<compile_context>
chip_gen: v5e
topology: v5e:2x2
jax: 0.10.0
libtpu: 0.0.40
codegen_flags: <defaults>
</compile_context>

<pallas_src>
import functools

import jax
import jax.numpy as jnp
from jax.experimental import pallas as pl
from jax.experimental.pallas import tpu as pltpu


# ---------------------------------------------------------------------------
# Fused kernel: one grid step per conv layer (layer l = pl.program_id(0))
# ---------------------------------------------------------------------------
def _recon_kernel(alpha_ref, x_ref, w_ref, o_ref, act_hi, act_lo, res_ref, *, W):
    l = pl.program_id(0)
    Hp, NW, C = act_hi.shape          # H-padded rows, N*W fused minor row dim
    H = Hp - 2
    NHW = H * NW

    # ---- layer 0: load input, zero ONLY the two H-padding rows -------------
    @pl.when(l == 0)
    def _():
        x = x_ref[...]                                    # (NHW, C) f32
        x_hi = x.astype(jnp.bfloat16)
        x_lo = (x - x_hi.astype(jnp.float32)).astype(jnp.bfloat16)
        zrow = jnp.zeros((1, NW, C), jnp.bfloat16)
        act_hi[0:1] = zrow
        act_hi[Hp - 1:Hp] = zrow
        act_lo[0:1] = zrow
        act_lo[Hp - 1:Hp] = zrow
        act_hi[1:H + 1] = x_hi.reshape(H, NW, C)
        act_lo[1:H + 1] = x_lo.reshape(H, NW, C)
        res_ref[...] = x                                  # res1 = x (f32)

    # ---- W-direction shifts: done ONCE per layer per hi/lo component -------
    a_hi = act_hi[...]                                    # (Hp, NW, C) bf16
    a_lo = act_lo[...]
    col = jax.lax.broadcasted_iota(jnp.int32, (Hp, NW, C), 1) % W

    def shift_minus(v):   # out[.., r, :] = v[.., r-1, :], zero at x == 0
        s = jnp.concatenate(
            [jnp.zeros((Hp, 1, C), v.dtype), v[:, :NW - 1, :]], axis=1)
        return jnp.where(col == 0, jnp.zeros_like(s), s)

    def shift_plus(v):    # out[.., r, :] = v[.., r+1, :], zero at x == W-1
        s = jnp.concatenate(
            [v[:, 1:, :], jnp.zeros((Hp, 1, C), v.dtype)], axis=1)
        return jnp.where(col == W - 1, jnp.zeros_like(s), s)

    sh_hi = (shift_minus(a_hi), a_hi, shift_plus(a_hi))   # indexed by kx
    sh_lo = (shift_minus(a_lo), a_lo, shift_plus(a_lo))

    # ---- 3x3 "same" conv as ONE im2col contraction over K = 9*C ------------
    # Tap (ky, kx) of output pixel (y, x) = stored_act[h = y+ky, x+kx-1], i.e.
    # an aligned slab slice [ky:ky+H] of the kx-shifted activation.
    cols_hi, cols_lo = [], []
    for ky in range(3):
        for kx in range(3):
            cols_hi.append(sh_hi[kx][ky:ky + H].reshape(NHW, C))
            cols_lo.append(sh_lo[kx][ky:ky + H].reshape(NHW, C))
    p_hi = jnp.concatenate(cols_hi, axis=1)               # (NHW, 9*C) bf16
    p_lo = jnp.concatenate(cols_lo, axis=1)

    wmat = w_ref[0]                                       # (9*C, C) bf16
    y = jnp.dot(p_hi, wmat, preferred_element_type=jnp.float32)
    y = y + jnp.dot(p_lo, wmat, preferred_element_type=jnp.float32)

    # PReLU (alpha[8] == 1.0 -> identity for the final conv17 layer).
    a = alpha_ref[l]
    y = jnp.where(y >= 0, y, a * y)

    def store_act(z):
        z_hi = z.astype(jnp.bfloat16)
        z_lo = (z - z_hi.astype(jnp.float32)).astype(jnp.bfloat16)
        act_hi[1:H + 1] = z_hi.reshape(H, NW, C)
        act_lo[1:H + 1] = z_lo.reshape(H, NW, C)

    # conv1 / conv5 / conv9 / conv13: carry the activation forward.
    @pl.when(jnp.logical_and(l < 8, (l % 2) == 0))
    def _():
        store_act(y)

    # conv3 / conv7 / conv11 / conv15: add running residual, then update it.
    @pl.when(jnp.logical_and(l < 8, (l % 2) == 1))
    def _():
        z = y + res_ref[...]
        store_act(z)
        res_ref[...] = z

    # conv17: add res1 (= the block input) and emit the output.
    @pl.when(l == 8)
    def _():
        o_ref[...] = (y + x_ref[...]).astype(o_ref.dtype)


# ---------------------------------------------------------------------------
# Wrapper: one fused pallas_call for the whole Recon_Block
# ---------------------------------------------------------------------------
def recon_block(x_nchw, weights9, alphas):
    """x_nchw: (N, 256, H, W) f32.
    weights9: list of 9 arrays (9, Cin, Cout), tap-major (ky*3+kx, cin, cout).
    alphas:   list of 8 PReLU slopes (scalars / shape-(1,))."""
    N, C, H, W = x_nchw.shape
    NW, Hp, NHW = N * W, H + 2, H * N * W

    # (N, C, H, W) -> (H, N, W, C) -> (H*N*W, C): row = h*(N*W) + n*W + w.
    x = jnp.transpose(x_nchw, (2, 0, 3, 1)).reshape(NHW, C)

    # Stack per-layer im2col weight matrices: (layer, 9*Cin, Cout), bf16.
    w_stack = jnp.stack([w.reshape(9 * C, C) for w in weights9]).astype(jnp.bfloat16)
    # 8 PReLU slopes + identity slope (1.0) for the final conv (no PReLU).
    alpha_vec = jnp.concatenate(
        [jnp.ravel(jnp.asarray(a, jnp.float32))[:1] for a in alphas]
        + [jnp.ones((1,), jnp.float32)])

    kernel = functools.partial(_recon_kernel, W=W)

    out = pl.pallas_call(
        kernel,
        out_shape=jax.ShapeDtypeStruct((NHW, C), x.dtype),
        grid=(9,),                                        # one step per conv layer
        in_specs=[
            pl.BlockSpec(memory_space=pltpu.MemorySpace.SMEM),   # PReLU alphas
            pl.BlockSpec((NHW, C), lambda l: (0, 0)),            # x (VMEM-resident)
            pl.BlockSpec((1, 9 * C, C), lambda l: (l, 0, 0)),    # layer-l weights
        ],
        out_specs=pl.BlockSpec((NHW, C), lambda l: (0, 0)),
        scratch_shapes=[
            pltpu.VMEM((Hp, NW, C), jnp.bfloat16),        # activation (hi part)
            pltpu.VMEM((Hp, NW, C), jnp.bfloat16),        # activation (lo part)
            pltpu.VMEM((NHW, C), jnp.float32),            # running residual (f32)
        ],
        compiler_params=pltpu.CompilerParams(
            dimension_semantics=("arbitrary",),           # layers are sequential
            vmem_limit_bytes=20 * 1024 * 1024),           # right-sized (~7 MiB used)
    )(alpha_vec, x, w_stack)

    out = out.reshape(H, N, W, C)
    return jnp.transpose(out, (1, 3, 0, 2))               # (H,N,W,C) -> (N,C,H,W)


# ---------------------------------------------------------------------------
# Pure-JAX reference (full-precision conv on the same bf16-rounded weights)
# ---------------------------------------------------------------------------
def _conv_ref(x, w_pt):
    return jax.lax.conv_general_dilated(
        x, jnp.transpose(w_pt, (2, 3, 1, 0)), (1, 1), 'SAME',
        dimension_numbers=('NHWC', 'HWIO', 'NHWC'),
        precision=jax.lax.Precision.HIGHEST)


def recon_block_ref(x_nchw, weights_pt, alphas):
    prelu = lambda v, a: jnp.where(v >= 0, v, a * v)
    x = jnp.transpose(x_nchw, (0, 2, 3, 1))
    res1 = x
    out = prelu(_conv_ref(x, weights_pt[0]), alphas[0][0])
    out = prelu(_conv_ref(out, weights_pt[1]), alphas[1][0]) + res1
    res2 = out
    out = prelu(_conv_ref(out, weights_pt[2]), alphas[2][0])
    out = prelu(_conv_ref(out, weights_pt[3]), alphas[3][0]) + res2
    res3 = out
    out = prelu(_conv_ref(out, weights_pt[4]), alphas[4][0])
    out = prelu(_conv_ref(out, weights_pt[5]), alphas[5][0]) + res3
    res4 = out
    out = prelu(_conv_ref(out, weights_pt[6]), alphas[6][0])
    out = prelu(_conv_ref(out, weights_pt[7]), alphas[7][0]) + res4
    out = _conv_ref(out, weights_pt[8]) + res1
    return jnp.transpose(out, (0, 3, 1, 2))


# ---------------------------------------------------------------------------
if __name__ == "__main__":
    C = 256                    # fixed by the module (conv in/out channels)
    N, H, W = 2, 8, 8          # small batch / spatial extents
    key = jax.random.PRNGKey(0)
    keys = jax.random.split(key, 10)

    # PyTorch conv weight layout: (Cout, Cin, 3, 3); PReLU default alpha = 0.25.
    weights_pt = [0.02 * jax.random.normal(keys[i], (C, C, 3, 3), jnp.float32)
                  for i in range(9)]
    alphas = [jnp.full((1,), 0.25, jnp.float32) for _ in range(8)]

    # Weight policy: bf16 weights (halves the dominant HBM traffic).  The
    # reference uses the SAME bf16-rounded weights at full conv precision, so
    # the check isolates kernel-implementation error from the intentional
    # weight quantization.
    weights_q_pt = [w.astype(jnp.bfloat16).astype(jnp.float32) for w in weights_pt]
    # Kernel-friendly layout: (ky*3+kx, Cin, Cout)
    weights9 = [jnp.transpose(w, (2, 3, 1, 0)).reshape(9, C, C) for w in weights_q_pt]

    x = jax.random.normal(keys[9], (N, C, H, W), jnp.float32)

    out = jax.block_until_ready(recon_block(x, weights9, alphas))

    ref = recon_block_ref(x, weights_q_pt, alphas)
    assert out.shape == (N, C, H, W)
    err = float(jnp.max(jnp.abs(out - ref)))
    assert jnp.allclose(out, ref, atol=2e-3, rtol=2e-3), err

    print("KERNEL_OK")
</pallas_src>

<mosaic_0001>
module attributes {stable_mosaic.version = 11 : i64} {
  func.func @_recon_kernel(%arg0: i32, %arg1: memref<9xf32, #tpu.memory_space<smem>>, %arg2: memref<128x256xf32, #tpu.memory_space<vmem>>, %arg3: memref<1x2304x256xbf16, #tpu.memory_space<vmem>>, %arg4: memref<128x256xf32, #tpu.memory_space<vmem>>, %arg5: memref<10x16x256xbf16, #tpu.memory_space<vmem>>, %arg6: memref<10x16x256xbf16, #tpu.memory_space<vmem>>, %arg7: memref<128x256xf32, #tpu.memory_space<vmem>>) attributes {dimension_semantics = [#tpu.dimension_semantics<arbitrary>], iteration_bounds = array<i64: 9>, scalar_prefetch = 0 : i64, scratch_operands = 3 : i64, tpu.core_type = #tpu.core_type<tc>, window_params = [{transform_indices = @transform_0, window_bounds = array<i64: 9>}, {pipeline_mode = #tpu.pipeline_mode<synchronous>, transform_indices = @transform_1, window_bounds = array<i64: 128, 256>}, {transform_indices = @transform_2, window_bounds = array<i64: 1, 2304, 256>}, {pipeline_mode = #tpu.pipeline_mode<synchronous>, transform_indices = @transform_3, window_bounds = array<i64: 128, 256>}]} {
    %c0_i32 = arith.constant 0 : i32
    %0 = arith.cmpi eq, %arg0, %c0_i32 : i32
    %1 = arith.extui %0 : i1 to i32
    %c0_i32_0 = arith.constant 0 : i32
    %2 = arith.cmpi ne, %1, %c0_i32_0 : i32
    scf.if %2 {
      %c0_45 = arith.constant 0 : index
      %c0_46 = arith.constant 0 : index
      %133 = vector.load %arg2[%c0_45, %c0_46] : memref<128x256xf32, #tpu.memory_space<vmem>>, vector<128x256xf32>
      %134 = arith.truncf %133 : vector<128x256xf32> to vector<128x256xbf16>
      %135 = arith.extf %134 : vector<128x256xbf16> to vector<128x256xf32>
      %136 = arith.subf %133, %135 : vector<128x256xf32>
      %137 = arith.truncf %136 : vector<128x256xf32> to vector<128x256xbf16>
      %cst_47 = arith.constant 0.000000e+00 : bf16
      %138 = vector.broadcast %cst_47 : bf16 to vector<1x16x256xbf16>
      %c0_48 = arith.constant 0 : index
      %c0_49 = arith.constant 0 : index
      %c0_50 = arith.constant 0 : index
      %139 = vector.load %arg5[%c0_48, %c0_49, %c0_50] : memref<10x16x256xbf16, #tpu.memory_space<vmem>>, vector<1x16x256xbf16>
      tpu.vector_store %arg5[%c0_48, %c0_49, %c0_50], %138 {strides = array<i32>} : memref<10x16x256xbf16, #tpu.memory_space<vmem>>, vector<1x16x256xbf16>,
      %c9 = arith.constant 9 : index
      %c0_51 = arith.constant 0 : index
      %c0_52 = arith.constant 0 : index
      %140 = vector.load %arg5[%c9, %c0_51, %c0_52] : memref<10x16x256xbf16, #tpu.memory_space<vmem>>, vector<1x16x256xbf16>
      tpu.vector_store %arg5[%c9, %c0_51, %c0_52], %138 {strides = array<i32>} : memref<10x16x256xbf16, #tpu.memory_space<vmem>>, vector<1x16x256xbf16>,
      %c0_53 = arith.constant 0 : index
      %c0_54 = arith.constant 0 : index
      %c0_55 = arith.constant 0 : index
      %141 = vector.load %arg6[%c0_53, %c0_54, %c0_55] : memref<10x16x256xbf16, #tpu.memory_space<vmem>>, vector<1x16x256xbf16>
      tpu.vector_store %arg6[%c0_53, %c0_54, %c0_55], %138 {strides = array<i32>} : memref<10x16x256xbf16, #tpu.memory_space<vmem>>, vector<1x16x256xbf16>,
      %c9_56 = arith.constant 9 : index
      %c0_57 = arith.constant 0 : index
      %c0_58 = arith.constant 0 : index
      %142 = vector.load %arg6[%c9_56, %c0_57, %c0_58] : memref<10x16x256xbf16, #tpu.memory_space<vmem>>, vector<1x16x256xbf16>
      tpu.vector_store %arg6[%c9_56, %c0_57, %c0_58], %138 {strides = array<i32>} : memref<10x16x256xbf16, #tpu.memory_space<vmem>>, vector<1x16x256xbf16>,
      %143 = vector.shape_cast %134 : vector<128x256xbf16> to vector<8x16x256xbf16>
      %c1 = arith.constant 1 : index
      %c0_59 = arith.constant 0 : index
      %c0_60 = arith.constant 0 : index
      %144 = vector.load %arg5[%c1, %c0_59, %c0_60] : memref<10x16x256xbf16, #tpu.memory_space<vmem>>, vector<8x16x256xbf16>
      tpu.vector_store %arg5[%c1, %c0_59, %c0_60], %143 {strides = array<i32>} : memref<10x16x256xbf16, #tpu.memory_space<vmem>>, vector<8x16x256xbf16>,
      %145 = vector.shape_cast %137 : vector<128x256xbf16> to vector<8x16x256xbf16>
      %c1_61 = arith.constant 1 : index
      %c0_62 = arith.constant 0 : index
      %c0_63 = arith.constant 0 : index
      %146 = vector.load %arg6[%c1_61, %c0_62, %c0_63] : memref<10x16x256xbf16, #tpu.memory_space<vmem>>, vector<8x16x256xbf16>
      tpu.vector_store %arg6[%c1_61, %c0_62, %c0_63], %145 {strides = array<i32>} : memref<10x16x256xbf16, #tpu.memory_space<vmem>>, vector<8x16x256xbf16>,
      %c0_64 = arith.constant 0 : index
      %c0_65 = arith.constant 0 : index
      %147 = vector.load %arg7[%c0_64, %c0_65] : memref<128x256xf32, #tpu.memory_space<vmem>>, vector<128x256xf32>
      tpu.vector_store %arg7[%c0_64, %c0_65], %133 {strides = array<i32>} : memref<128x256xf32, #tpu.memory_space<vmem>>, vector<128x256xf32>,
    } else {
    }
    %c0 = arith.constant 0 : index
    %c0_1 = arith.constant 0 : index
    %c0_2 = arith.constant 0 : index
    %3 = vector.load %arg5[%c0, %c0_1, %c0_2] : memref<10x16x256xbf16, #tpu.memory_space<vmem>>, vector<10x16x256xbf16>
    %c0_3 = arith.constant 0 : index
    %c0_4 = arith.constant 0 : index
    %c0_5 = arith.constant 0 : index
    %4 = vector.load %arg6[%c0_3, %c0_4, %c0_5] : memref<10x16x256xbf16, #tpu.memory_space<vmem>>, vector<10x16x256xbf16>
    %5 = tpu.iota {dimensions = array<i32: 1>} : vector<10x16x256xi32>
    %c8_i32 = arith.constant 8 : i32
    %c0_i32_6 = arith.constant 0 : i32
    %6 = arith.cmpi eq, %c8_i32, %c0_i32_6 : i32
    %c1_i32 = arith.constant 1 : i32
    %7 = arith.select %6, %c1_i32, %c8_i32 : i32
    %8 = vector.broadcast %7 : i32 to vector<10x16x256xi32>
    %9 = arith.remsi %5, %8 : vector<10x16x256xi32>
    %c0_i32_7 = arith.constant 0 : i32
    %10 = vector.broadcast %c0_i32_7 : i32 to vector<10x16x256xi32>
    %11 = arith.cmpi ne, %9, %10 : vector<10x16x256xi32>
    %c0_i32_8 = arith.constant 0 : i32
    %12 = vector.broadcast %c0_i32_8 : i32 to vector<10x16x256xi32>
    %13 = arith.cmpi slt, %9, %12 : vector<10x16x256xi32>
    %c0_i32_9 = arith.constant 0 : i32
    %14 = arith.cmpi slt, %7, %c0_i32_9 : i32
    %15 = vector.broadcast %14 : i1 to vector<10x16x256xi1>
    %16 = vector.broadcast %15 : vector<10x16x256xi1> to vector<10x16x256xi1>
    %17 = arith.xori %13, %16 : vector<10x16x256xi1>
    %18 = arith.andi %17, %11 : vector<10x16x256xi1>
    %19 = vector.broadcast %7 : i32 to vector<10x16x256xi32>
    %20 = arith.addi %9, %19 : vector<10x16x256xi32>
    %21 = arith.select %18, %20, %9 : vector<10x16x256xi1>, vector<10x16x256xi32>
    %cst = arith.constant 0.000000e+00 : bf16
    %22 = vector.broadcast %cst : bf16 to vector<10x1x256xbf16>
    %23 = vector.extract_strided_slice %3 {offsets = [0, 0, 0], sizes = [10, 15, 256], strides = [1, 1, 1]} : vector<10x16x256xbf16> to vector<10x15x256xbf16>
    %24 = tpu.concatenate %22, %23 in 1 : vector<10x1x256xbf16>, vector<10x15x256xbf16> -> vector<10x16x256xbf16>
    %c0_i32_10 = arith.constant 0 : i32
    %25 = vector.broadcast %c0_i32_10 : i32 to vector<10x16x256xi32>
    %26 = arith.cmpi eq, %21, %25 : vector<10x16x256xi32>
    %cst_11 = arith.constant 0.000000e+00 : bf16
    %27 = vector.broadcast %cst_11 : bf16 to vector<10x16x256xbf16>
    %28 = arith.select %26, %27, %24 : vector<10x16x256xi1>, vector<10x16x256xbf16>
    %29 = vector.extract_strided_slice %3 {offsets = [0, 1, 0], sizes = [10, 15, 256], strides = [1, 1, 1]} : vector<10x16x256xbf16> to vector<10x15x256xbf16>
    %cst_12 = arith.constant 0.000000e+00 : bf16
    %30 = vector.broadcast %cst_12 : bf16 to vector<10x1x256xbf16>
    %31 = tpu.concatenate %29, %30 in 1 : vector<10x15x256xbf16>, vector<10x1x256xbf16> -> vector<10x16x256xbf16>
    %c7_i32 = arith.constant 7 : i32
    %32 = vector.broadcast %c7_i32 : i32 to vector<10x16x256xi32>
    %33 = arith.cmpi eq, %21, %32 : vector<10x16x256xi32>
    %cst_13 = arith.constant 0.000000e+00 : bf16
    %34 = vector.broadcast %cst_13 : bf16 to vector<10x16x256xbf16>
    %35 = arith.select %33, %34, %31 : vector<10x16x256xi1>, vector<10x16x256xbf16>
    %cst_14 = arith.constant 0.000000e+00 : bf16
    %36 = vector.broadcast %cst_14 : bf16 to vector<10x1x256xbf16>
    %37 = vector.extract_strided_slice %4 {offsets = [0, 0, 0], sizes = [10, 15, 256], strides = [1, 1, 1]} : vector<10x16x256xbf16> to vector<10x15x256xbf16>
    %38 = tpu.concatenate %36, %37 in 1 : vector<10x1x256xbf16>, vector<10x15x256xbf16> -> vector<10x16x256xbf16>
    %c0_i32_15 = arith.constant 0 : i32
    %39 = vector.broadcast %c0_i32_15 : i32 to vector<10x16x256xi32>
    %40 = arith.cmpi eq, %21, %39 : vector<10x16x256xi32>
    %cst_16 = arith.constant 0.000000e+00 : bf16
    %41 = vector.broadcast %cst_16 : bf16 to vector<10x16x256xbf16>
    %42 = arith.select %40, %41, %38 : vector<10x16x256xi1>, vector<10x16x256xbf16>
    %43 = vector.extract_strided_slice %4 {offsets = [0, 1, 0], sizes = [10, 15, 256], strides = [1, 1, 1]} : vector<10x16x256xbf16> to vector<10x15x256xbf16>
    %cst_17 = arith.constant 0.000000e+00 : bf16
    %44 = vector.broadcast %cst_17 : bf16 to vector<10x1x256xbf16>
    %45 = tpu.concatenate %43, %44 in 1 : vector<10x15x256xbf16>, vector<10x1x256xbf16> -> vector<10x16x256xbf16>
    %c7_i32_18 = arith.constant 7 : i32
    %46 = vector.broadcast %c7_i32_18 : i32 to vector<10x16x256xi32>
    %47 = arith.cmpi eq, %21, %46 : vector<10x16x256xi32>
    %cst_19 = arith.constant 0.000000e+00 : bf16
    %48 = vector.broadcast %cst_19 : bf16 to vector<10x16x256xbf16>
    %49 = arith.select %47, %48, %45 : vector<10x16x256xi1>, vector<10x16x256xbf16>
    %50 = vector.extract_strided_slice %28 {offsets = [0, 0, 0], sizes = [8, 16, 256], strides = [1, 1, 1]} : vector<10x16x256xbf16> to vector<8x16x256xbf16>
    %51 = vector.shape_cast %50 : vector<8x16x256xbf16> to vector<128x256xbf16>
    %52 = vector.extract_strided_slice %42 {offsets = [0, 0, 0], sizes = [8, 16, 256], strides = [1, 1, 1]} : vector<10x16x256xbf16> to vector<8x16x256xbf16>
    %53 = vector.shape_cast %52 : vector<8x16x256xbf16> to vector<128x256xbf16>
    %54 = vector.extract_strided_slice %3 {offsets = [0, 0, 0], sizes = [8, 16, 256], strides = [1, 1, 1]} : vector<10x16x256xbf16> to vector<8x16x256xbf16>
    %55 = vector.shape_cast %54 : vector<8x16x256xbf16> to vector<128x256xbf16>
    %56 = vector.extract_strided_slice %4 {offsets = [0, 0, 0], sizes = [8, 16, 256], strides = [1, 1, 1]} : vector<10x16x256xbf16> to vector<8x16x256xbf16>
    %57 = vector.shape_cast %56 : vector<8x16x256xbf16> to vector<128x256xbf16>
    %58 = vector.extract_strided_slice %35 {offsets = [0, 0, 0], sizes = [8, 16, 256], strides = [1, 1, 1]} : vector<10x16x256xbf16> to vector<8x16x256xbf16>
    %59 = vector.shape_cast %58 : vector<8x16x256xbf16> to vector<128x256xbf16>
    %60 = vector.extract_strided_slice %49 {offsets = [0, 0, 0], sizes = [8, 16, 256], strides = [1, 1, 1]} : vector<10x16x256xbf16> to vector<8x16x256xbf16>
    %61 = vector.shape_cast %60 : vector<8x16x256xbf16> to vector<128x256xbf16>
    %62 = vector.extract_strided_slice %28 {offsets = [1, 0, 0], sizes = [8, 16, 256], strides = [1, 1, 1]} : vector<10x16x256xbf16> to vector<8x16x256xbf16>
    %63 = vector.shape_cast %62 : vector<8x16x256xbf16> to vector<128x256xbf16>
    %64 = vector.extract_strided_slice %42 {offsets = [1, 0, 0], sizes = [8, 16, 256], strides = [1, 1, 1]} : vector<10x16x256xbf16> to vector<8x16x256xbf16>
    %65 = vector.shape_cast %64 : vector<8x16x256xbf16> to vector<128x256xbf16>
    %66 = vector.extract_strided_slice %3 {offsets = [1, 0, 0], sizes = [8, 16, 256], strides = [1, 1, 1]} : vector<10x16x256xbf16> to vector<8x16x256xbf16>
    %67 = vector.shape_cast %66 : vector<8x16x256xbf16> to vector<128x256xbf16>
    %68 = vector.extract_strided_slice %4 {offsets = [1, 0, 0], sizes = [8, 16, 256], strides = [1, 1, 1]} : vector<10x16x256xbf16> to vector<8x16x256xbf16>
    %69 = vector.shape_cast %68 : vector<8x16x256xbf16> to vector<128x256xbf16>
    %70 = vector.extract_strided_slice %35 {offsets = [1, 0, 0], sizes = [8, 16, 256], strides = [1, 1, 1]} : vector<10x16x256xbf16> to vector<8x16x256xbf16>
    %71 = vector.shape_cast %70 : vector<8x16x256xbf16> to vector<128x256xbf16>
    %72 = vector.extract_strided_slice %49 {offsets = [1, 0, 0], sizes = [8, 16, 256], strides = [1, 1, 1]} : vector<10x16x256xbf16> to vector<8x16x256xbf16>
    %73 = vector.shape_cast %72 : vector<8x16x256xbf16> to vector<128x256xbf16>
    %74 = vector.extract_strided_slice %28 {offsets = [2, 0, 0], sizes = [8, 16, 256], strides = [1, 1, 1]} : vector<10x16x256xbf16> to vector<8x16x256xbf16>
    %75 = vector.shape_cast %74 : vector<8x16x256xbf16> to vector<128x256xbf16>
    %76 = vector.extract_strided_slice %42 {offsets = [2, 0, 0], sizes = [8, 16, 256], strides = [1, 1, 1]} : vector<10x16x256xbf16> to vector<8x16x256xbf16>
    %77 = vector.shape_cast %76 : vector<8x16x256xbf16> to vector<128x256xbf16>
    %78 = vector.extract_strided_slice %3 {offsets = [2, 0, 0], sizes = [8, 16, 256], strides = [1, 1, 1]} : vector<10x16x256xbf16> to vector<8x16x256xbf16>
    %79 = vector.shape_cast %78 : vector<8x16x256xbf16> to vector<128x256xbf16>
    %80 = vector.extract_strided_slice %4 {offsets = [2, 0, 0], sizes = [8, 16, 256], strides = [1, 1, 1]} : vector<10x16x256xbf16> to vector<8x16x256xbf16>
    %81 = vector.shape_cast %80 : vector<8x16x256xbf16> to vector<128x256xbf16>
    %82 = vector.extract_strided_slice %35 {offsets = [2, 0, 0], sizes = [8, 16, 256], strides = [1, 1, 1]} : vector<10x16x256xbf16> to vector<8x16x256xbf16>
    %83 = vector.shape_cast %82 : vector<8x16x256xbf16> to vector<128x256xbf16>
    %84 = vector.extract_strided_slice %49 {offsets = [2, 0, 0], sizes = [8, 16, 256], strides = [1, 1, 1]} : vector<10x16x256xbf16> to vector<8x16x256xbf16>
    %85 = vector.shape_cast %84 : vector<8x16x256xbf16> to vector<128x256xbf16>
    %86 = tpu.concatenate %51, %55, %59, %63, %67, %71, %75, %79, %83 in 1 : vector<128x256xbf16>, vector<128x256xbf16>, vector<128x256xbf16>, vector<128x256xbf16>, vector<128x256xbf16>, vector<128x256xbf16>, vector<128x256xbf16>, vector<128x256xbf16>, vector<128x256xbf16> -> vector<128x2304xbf16>
    %87 = tpu.concatenate %53, %57, %61, %65, %69, %73, %77, %81, %85 in 1 : vector<128x256xbf16>, vector<128x256xbf16>, vector<128x256xbf16>, vector<128x256xbf16>, vector<128x256xbf16>, vector<128x256xbf16>, vector<128x256xbf16>, vector<128x256xbf16>, vector<128x256xbf16> -> vector<128x2304xbf16>
    %c0_20 = arith.constant 0 : index
    %c0_21 = arith.constant 0 : index
    %c0_22 = arith.constant 0 : index
    %88 = vector.load %arg3[%c0_20, %c0_21, %c0_22] : memref<1x2304x256xbf16, #tpu.memory_space<vmem>>, vector<1x2304x256xbf16>
    %89 = vector.shape_cast %88 : vector<1x2304x256xbf16> to vector<2304x256xbf16>
    %cst_23 = arith.constant dense<0.000000e+00> : vector<128x256xf32>
    %90 = tpu.matmul %86, %89, %cst_23 {dimension_numbers = #tpu.dot_dimension_numbers<[1], [0], [0], [1], [0, 0, 1, 1], [], []>} : vector<128x2304xbf16>, vector<2304x256xbf16>, vector<128x256xf32> -> vector<128x256xf32>
    %cst_24 = arith.constant dense<0.000000e+00> : vector<128x256xf32>
    %91 = tpu.matmul %87, %89, %cst_24 {dimension_numbers = #tpu.dot_dimension_numbers<[1], [0], [0], [1], [0, 0, 1, 1], [], []>} : vector<128x2304xbf16>, vector<2304x256xbf16>, vector<128x256xf32> -> vector<128x256xf32>
    %92 = arith.addf %90, %91 : vector<128x256xf32>
    %93 = arith.index_cast %arg0 : i32 to index
    %94 = memref.load %arg1[%93] : memref<9xf32, #tpu.memory_space<smem>>
    %cst_25 = arith.constant 0.000000e+00 : f32
    %95 = vector.broadcast %cst_25 : f32 to vector<128x256xf32>
    %96 = arith.cmpf oge, %92, %95 : vector<128x256xf32>
    %97 = vector.broadcast %94 : f32 to vector<128x256xf32>
    %98 = arith.mulf %97, %92 : vector<128x256xf32>
    %99 = arith.select %96, %92, %98 : vector<128x256xi1>, vector<128x256xf32>
    %c8_i32_26 = arith.constant 8 : i32
    %100 = arith.cmpi slt, %arg0, %c8_i32_26 : i32
    %c2_i32 = arith.constant 2 : i32
    %c0_i32_27 = arith.constant 0 : i32
    %101 = arith.cmpi eq, %c2_i32, %c0_i32_27 : i32
    %c1_i32_28 = arith.constant 1 : i32
    %102 = arith.select %101, %c1_i32_28, %c2_i32 : i32
    %103 = arith.remsi %arg0, %102 : i32
    %c0_i32_29 = arith.constant 0 : i32
    %104 = arith.cmpi ne, %103, %c0_i32_29 : i32
    %c0_i32_30 = arith.constant 0 : i32
    %105 = arith.cmpi slt, %103, %c0_i32_30 : i32
    %c0_i32_31 = arith.constant 0 : i32
    %106 = arith.cmpi slt, %102, %c0_i32_31 : i32
    %107 = arith.xori %105, %106 : i1
    %108 = arith.andi %107, %104 : i1
    %109 = arith.addi %103, %102 : i32
    %110 = arith.select %108, %109, %103 : i32
    %c0_i32_32 = arith.constant 0 : i32
    %111 = arith.cmpi eq, %110, %c0_i32_32 : i32
    %112 = arith.andi %100, %111 : i1
    %113 = arith.extui %112 : i1 to i32
    %c0_i32_33 = arith.constant 0 : i32
    %114 = arith.cmpi ne, %113, %c0_i32_33 : i32
    scf.if %114 {
      %133 = arith.truncf %99 : vector<128x256xf32> to vector<128x256xbf16>
      %134 = arith.extf %133 : vector<128x256xbf16> to vector<128x256xf32>
      %135 = arith.subf %99, %134 : vector<128x256xf32>
      %136 = arith.truncf %135 : vector<128x256xf32> to vector<128x256xbf16>
      %137 = vector.shape_cast %133 : vector<128x256xbf16> to vector<8x16x256xbf16>
      %c1 = arith.constant 1 : index
      %c0_45 = arith.constant 0 : index
      %c0_46 = arith.constant 0 : index
      %138 = vector.load %arg5[%c1, %c0_45, %c0_46] : memref<10x16x256xbf16, #tpu.memory_space<vmem>>, vector<8x16x256xbf16>
      tpu.vector_store %arg5[%c1, %c0_45, %c0_46], %137 {strides = array<i32>} : memref<10x16x256xbf16, #tpu.memory_space<vmem>>, vector<8x16x256xbf16>,
      %139 = vector.shape_cast %136 : vector<128x256xbf16> to vector<8x16x256xbf16>
      %c1_47 = arith.constant 1 : index
      %c0_48 = arith.constant 0 : index
      %c0_49 = arith.constant 0 : index
      %140 = vector.load %arg6[%c1_47, %c0_48, %c0_49] : memref<10x16x256xbf16, #tpu.memory_space<vmem>>, vector<8x16x256xbf16>
      tpu.vector_store %arg6[%c1_47, %c0_48, %c0_49], %139 {strides = array<i32>} : memref<10x16x256xbf16, #tpu.memory_space<vmem>>, vector<8x16x256xbf16>,
    } else {
    }
    %c8_i32_34 = arith.constant 8 : i32
    %115 = arith.cmpi slt, %arg0, %c8_i32_34 : i32
    %c2_i32_35 = arith.constant 2 : i32
    %c0_i32_36 = arith.constant 0 : i32
    %116 = arith.cmpi eq, %c2_i32_35, %c0_i32_36 : i32
    %c1_i32_37 = arith.constant 1 : i32
    %117 = arith.select %116, %c1_i32_37, %c2_i32_35 : i32
    %118 = arith.remsi %arg0, %117 : i32
    %c0_i32_38 = arith.constant 0 : i32
    %119 = arith.cmpi ne, %118, %c0_i32_38 : i32
    %c0_i32_39 = arith.constant 0 : i32
    %120 = arith.cmpi slt, %118, %c0_i32_39 : i32
    %c0_i32_40 = arith.constant 0 : i32
    %121 = arith.cmpi slt, %117, %c0_i32_40 : i32
    %122 = arith.xori %120, %121 : i1
    %123 = arith.andi %122, %119 : i1
    %124 = arith.addi %118, %117 : i32
    %125 = arith.select %123, %124, %118 : i32
    %c1_i32_41 = arith.constant 1 : i32
    %126 = arith.cmpi eq, %125, %c1_i32_41 : i32
    %127 = arith.andi %115, %126 : i1
    %128 = arith.extui %127 : i1 to i32
    %c0_i32_42 = arith.constant 0 : i32
    %129 = arith.cmpi ne, %128, %c0_i32_42 : i32
    scf.if %129 {
      %c0_45 = arith.constant 0 : index
      %c0_46 = arith.constant 0 : index
      %133 = vector.load %arg7[%c0_45, %c0_46] : memref<128x256xf32, #tpu.memory_space<vmem>>, vector<128x256xf32>
      %134 = arith.addf %99, %133 : vector<128x256xf32>
      %135 = arith.truncf %134 : vector<128x256xf32> to vector<128x256xbf16>
      %136 = arith.extf %135 : vector<128x256xbf16> to vector<128x256xf32>
      %137 = arith.subf %134, %136 : vector<128x256xf32>
      %138 = arith.truncf %137 : vector<128x256xf32> to vector<128x256xbf16>
      %139 = vector.shape_cast %135 : vector<128x256xbf16> to vector<8x16x256xbf16>
      %c1 = arith.constant 1 : index
      %c0_47 = arith.constant 0 : index
      %c0_48 = arith.constant 0 : index
      %140 = vector.load %arg5[%c1, %c0_47, %c0_48] : memref<10x16x256xbf16, #tpu.memory_space<vmem>>, vector<8x16x256xbf16>
      tpu.vector_store %arg5[%c1, %c0_47, %c0_48], %139 {strides = array<i32>} : memref<10x16x256xbf16, #tpu.memory_space<vmem>>, vector<8x16x256xbf16>,
      %141 = vector.shape_cast %138 : vector<128x256xbf16> to vector<8x16x256xbf16>
      %c1_49 = arith.constant 1 : index
      %c0_50 = arith.constant 0 : index
      %c0_51 = arith.constant 0 : index
      %142 = vector.load %arg6[%c1_49, %c0_50, %c0_51] : memref<10x16x256xbf16, #tpu.memory_space<vmem>>, vector<8x16x256xbf16>
      tpu.vector_store %arg6[%c1_49, %c0_50, %c0_51], %141 {strides = array<i32>} : memref<10x16x256xbf16, #tpu.memory_space<vmem>>, vector<8x16x256xbf16>,
      %c0_52 = arith.constant 0 : index
      %c0_53 = arith.constant 0 : index
      %143 = vector.load %arg7[%c0_52, %c0_53] : memref<128x256xf32, #tpu.memory_space<vmem>>, vector<128x256xf32>
      tpu.vector_store %arg7[%c0_52, %c0_53], %134 {strides = array<i32>} : memref<128x256xf32, #tpu.memory_space<vmem>>, vector<128x256xf32>,
    } else {
    }
    %c8_i32_43 = arith.constant 8 : i32
    %130 = arith.cmpi eq, %arg0, %c8_i32_43 : i32
    %131 = arith.extui %130 : i1 to i32
    %c0_i32_44 = arith.constant 0 : i32
    %132 = arith.cmpi ne, %131, %c0_i32_44 : i32
    scf.if %132 {
      %c0_45 = arith.constant 0 : index
      %c0_46 = arith.constant 0 : index
      %133 = vector.load %arg2[%c0_45, %c0_46] : memref<128x256xf32, #tpu.memory_space<vmem>>, vector<128x256xf32>
      %134 = arith.addf %99, %133 : vector<128x256xf32>
      %c0_47 = arith.constant 0 : index
      %c0_48 = arith.constant 0 : index
      %135 = vector.load %arg4[%c0_47, %c0_48] : memref<128x256xf32, #tpu.memory_space<vmem>>, vector<128x256xf32>
      tpu.vector_store %arg4[%c0_47, %c0_48], %134 {strides = array<i32>} : memref<128x256xf32, #tpu.memory_space<vmem>>, vector<128x256xf32>,
    } else {
    }
    return
  }
  func.func @transform_0(%arg0: i32) -> i32 {
    %c0_i32 = arith.constant 0 : i32
    %c0_i32_0 = arith.constant 0 : i32
    return %c0_i32 : i32
  }
  func.func @transform_1(%arg0: i32) -> (i32, i32) {
    %c0_i32 = arith.constant 0 : i32
    %c0_i32_0 = arith.constant 0 : i32
    %c0_i32_1 = arith.constant 0 : i32
    return %c0_i32, %c0_i32_0 : i32, i32
  }
  func.func @transform_2(%arg0: i32) -> (i32, i32, i32) {
    %c0_i32 = arith.constant 0 : i32
    %c0_i32_0 = arith.constant 0 : i32
    %c0_i32_1 = arith.constant 0 : i32
    return %arg0, %c0_i32, %c0_i32_0 : i32, i32, i32
  }
  func.func @transform_3(%arg0: i32) -> (i32, i32) {
    %c0_i32 = arith.constant 0 : i32
    %c0_i32_0 = arith.constant 0 : i32
    %c0_i32_1 = arith.constant 0 : i32
    return %c0_i32, %c0_i32_0 : i32, i32
  }
}

</mosaic_0001>

<bundles_post_ra>
// kernel: tpu_custom_call.1
= control target key start
LH: loop header
LB: loop body
LE: loop exit
PB: predicated region body
PF: predicated region fallthrough
CT: control target
= control target key end

     0   :  { %8 = vsyncpa [#allocation8], 0  ;;  %s14236_s0 = inlined_call_operand.hbm [shape: f32[9], index: 0, kind: input, shape index: {}]   ;;  %s14237_s1 = inlined_call_operand.hbm [shape: f32[128,256], index: 1, kind: input, shape index: {}]   ;;  %s14238_s2 = inlined_call_operand.hbm [shape: bf16[9,2304,256], index: 2, kind: input, shape index: {}]   ;;  %s14239_s3 = inlined_call_operand.hbm [shape: f32[128,256], index: 3, kind: output, shape index: {}]  }
   0x1   :  { %9 = vsyncpa [#allocation6], 0 }
   0x2   :  { %10 = vsyncpa [#allocation11], 0 }
   0x3   :  { %12 = vsyncpa [#allocation11 + $0x1], 0 }
   0x4   :  { %13 = vsyncpa [#allocation7], 0  ;;  %s9166_s12 = smov 0   ;;  %s9168_s13 = smov 0  }
   0x5   :  { %s9170_s14 = smov 0   ;;  %s9172_s15 = smov 0  }
   0x6 LB: > { %s9185_s16 = sadd.s32 4294967295, %s9133_s15   ;;  %s9188_s17 = sadd.s32 1, %s9133_s15   ;;  %s9133_s15 = sphi %s9172_s15, %s15939_s15   ;;  %s9129_s14 = sphi %s9170_s14, %s15938_s14   ;;  %s9125_s13 = sphi %s9168_s13, %s15937_s13   ;;  %s9121_s12 = sphi %s9166_s12, %s15936_s12  }
   0x7   : > { %s65_s18 = ssub.s32 %s9133_s15, %s9188_s17  ;;  %s68_s19 = sadd.s32 1, %s9129_s14 }
   0x8   : > { %p66_p0 = scmp.eq.s32.totalorder %s65_s18, 0  ;;  %p75_p1 = scmp.ne.s32.totalorder %s9129_s14, %s9125_s13 }
   0x9   : > { %p76_p2 = scmp.eq.s32.totalorder %s9133_s15, 0  ;;  %p81_p3 = scmp.ne.s32.totalorder %s9125_s13, %s9121_s12 }
   0xa   : > { %s9198_s20 = scalar_select %p66_p0, %s9129_s14, %s68_s19  }
   0xb   : > { %p9200_p4 = por %p76_p2, %p75_p1  ;;  %p82_p5 = scmp.eq.s32.totalorder %s9185_s16, 0 }
   0xc   : > { %p7245_p6 = scmp.ge.s32.totalorder %s9133_s15, 1  ;;  %p113_p7 = scmp.lt.s32.totalorder %s9133_s15, 10 }
   0xd   : > { %p9209_p8 = por %p82_p5, %p81_p3  ;;  %p7246_p9 = scmp.ne.s32.totalorder %s9185_s16, 0 }
   0xe   : > { %p9214_p10 = pnand %p7245_p6, %p113_p7  ;;  %s125_s26 = sshll.u32 %s14236_s0, 4  ;;  %s126_s26 = int_to_ptr.hbm [resolvable:$true] %s125_s26 }
   0xf   : > { %p8936_p12 = scmp.lt.s32.totalorder %s9133_s15, 9  ;;  %s134_s29 = sshll.u32 %s14237_s1, 4  ;;  %s135_s29 = int_to_ptr.hbm [resolvable:$true] %s134_s29 }
  0x10   : > { %p8923_p11 = pneg %p9214_p10  ;;  %s9135_s4 = smov [#allocation9]  }
  0x11   : > { %p9231_p0 = pnand %p8936_p12, %p9200_p4  ;;  %s136_s5 = sshll.u32 %s9135_s4, 4  ;;  %s137_s5 = int_to_ptr.vmem [resolvable:$true] %s136_s5 }
  0x12   : > { %p8924_p13 = pnand %p8923_p11, %p82_p5  ;;  %s9136_s6 = smov [#allocation5]  }
  0x13   : > { %s9137_s7 = smov 256   ;;  %s9138_s8 = smov 16  }
  0x14   : > { %8926 = dma.hbm_to_smem (!%p8924_p13), %s126_s26, 16, %s9136_s6, [#allocation8]  }
  0x15   : > { %8929 = dma.hbm_to_vmem [thread:$0]  (!%p8924_p13), %s135_s29, 4096, %s137_s5, [#allocation6], %s9137_s7, %s9137_s7, %s9138_s8  }
  0x16   : > { %s150_s9 = sand.u32 1, %s9129_s14   ;;  %s8907_s10 = smul.u32 2304, %s9133_s15 }
  0x17   : > { %s8906_s11 = smul.u32 2304, %s150_s9  ;;  %s151_s27 = scalar_lea.sflag [#allocation11], %s150_s9 }
  0x18   : > { %s159_s19 = scalar_lea.hbm %s14238_s2, %s8907_s10  ;;  %p9033_p2 = pneg %p9231_p0 }
  0x19   : > { %s160_s21 = sshll.u32 %s159_s19, 4  ;;  %s154_s24 = scalar_lea.vmem [#allocation10], %s8906_s11  ;;  %s161_s21 = int_to_ptr.hbm [resolvable:$true] %s160_s21 }
  0x1a   : > { %s162_s25 = sshll.u32 %s154_s24, 4  ;;  %s9029_s28 = sshra.s32 %s161_s21, 4  ;;  %s163_s25 = int_to_ptr.vmem [resolvable:$true] %s162_s25  ;;  %s9030_s28 = int_to_ptr.hbm [resolvable:$true] %s9029_s28 }
  0x1b   : > { %s9031_s26 = scalar_lea.hbm %s9030_s28, 2304  ;;  %s9036_s4 = scalar_lea.hbm %s14238_s2, 20736 }
  0x1c   : > { %p9032_p1 = scmp.ne.s32.totalorder %s9030_s28, %s9031_s26  ;;  %p9037_p6 = scmp.lt.s32.totalorder %s9030_s28, %s14238_s2 }
  0x1d   : > { %p9038_p7 = scmp.lt.s32.totalorder %s9036_s4, %s9031_s26 }
  0x1e   : > { %p9034_p3 = pnand %p9033_p2, %p9032_p1 }
  0x1f   : > { %p9039_p11 = por %p9038_p7, %p9037_p6 }
  0x20   : > { %p9035_p4 = pneg %p9034_p3 }
  0x22   : > { %p9040_p12 = pnand %p9039_p11, %p9035_p4 }
  0x24   : > { %9043 = shalt.err (!%p9040_p12)
}
  0x25   : > { %s9139_s7 = smov 128   ;;  %s9140_s8 = smov 8  }
  0x26   : > { %8933 = dma.hbm_to_vmem [thread:$0]  (!%p9231_p0), %s161_s21, 36864, %s163_s25, %s151_s27, %s9139_s7, %s9139_s7, %s9140_s8  }
  0x27   : > { %174 = sbr.rel (%p9214_p10) target bundleno = 2768 (0xad0), region = 32 }
  0x2c   : > { %9104 = dma.done.wait (%p82_p5), [#allocation8], 16  }
  0x2d   : > { %9106 = vsyncadd (%p82_p5), [#allocation8], 4294967280 }
  0x2e   : > { %9108 = dma.done.wait (%p82_p5), [#allocation6], 4096  }
  0x2f   : > { %9110 = vsyncadd (%p82_p5), [#allocation6], 4294963200  ;;  %s186_s9 = sand.u32 1, %s9125_s13  }
  0x30   : > { %s8908_s30 = smul.u32 2304, %s186_s9  ;;  %s187_s10 = scalar_lea.sflag [#allocation11], %s186_s9 }
  0x32   : > { %s9261_s11 = scalar_lea.vmem [#allocation10], %s8908_s30 }
  0x33   : > { %9112 = dma.done.wait (%p9209_p8), %s187_s10, 36864  }
  0x34   : > { %9114 = vsyncadd (%p9209_p8), %s187_s10, 4294930432 }
  0x35   : > { %196 = sfence }
  0x36   : > { %216 = sbr.rel (%p7246_p9) target bundleno = 132 (0x84), region = 48 }
  0x3b   : > { %v9141_v0 = vmov 0   ;;  %v9269_v1 = vld [vmem:[#allocation9] sm:$0xff]  ;;  %v9271_v2 = vld [vmem:[#allocation9 + $0x8] sm:$0xff]  ;;  %v9277_v4 = vld [vmem:[#allocation9 + $0x10] sm:$0xff] }
  0x3c   : > { %345 = vst [vmem:[#allocation2] sm:$0xff] %v9141_v0  ;;  %v9275_v3 = vpack.c.bf16 %v9271_v2, %v9269_v1  ;;  %v9279_v5 = vld [vmem:[#allocation9 + $0x18] sm:$0xff]  ;;  %v9287_v7 = vld [vmem:[#allocation9 + $0x20] sm:$0xff]  ;;  %v9289_v8 = vld [vmem:[#allocation9 + $0x28] sm:$0xff] }
  0x3d   : > { %346 = vst [vmem:[#allocation2 + $0x8] sm:$0xff] %v9141_v0  ;;  %v9285_v6 = vpack.c.bf16 %v9279_v5, %v9277_v4  ;;  %v9296_v9 = vpack.c.bf16 %v9289_v8, %v9287_v7  ;;  %v9298_v10 = vld [vmem:[#allocation9 + $0x30] sm:$0xff]  ;;  %v9300_v11 = vld [vmem:[#allocation9 + $0x38] sm:$0xff]  ;;  %v9309_v13 = vld [vmem:[#allocation9 + $0x40] sm:$0xff] }
  0x3e   : > { %348 = vst [vmem:[#allocation2 + $0x90] sm:$0xff] %v9141_v0  ;;  %v9307_v12 = vpack.c.bf16 %v9300_v11, %v9298_v10  ;;  %v9311_v14 = vld [vmem:[#allocation9 + $0x48] sm:$0xff]  ;;  %v9320_v16 = vld [vmem:[#allocation9 + $0x50] sm:$0xff]  ;;  %v9322_v17 = vld [vmem:[#allocation9 + $0x58] sm:$0xff]  ;;  %v265_v47 = vunpack.c.l.bf16 %v9275_v3  ;;  %v266_v48 = vunpack.c.h.bf16 %v9275_v3 }
  0x3f   : > { %349 = vst [vmem:[#allocation2 + $0x98] sm:$0xff] %v9141_v0  ;;  %v9318_v15 = vpack.c.bf16 %v9311_v14, %v9309_v13  ;;  %v9329_v18 = vpack.c.bf16 %v9322_v17, %v9320_v16  ;;  %v9331_v19 = vld [vmem:[#allocation9 + $0x60] sm:$0xff]  ;;  %v9333_v20 = vld [vmem:[#allocation9 + $0x68] sm:$0xff]  ;;  %v9342_v22 = vld [vmem:[#allocation9 + $0x70] sm:$0xff]  ;;  %v267_v51 = vunpack.c.l.bf16 %v9285_v6  ;;  %v268_v52 = vunpack.c.h.bf16 %v9285_v6 }
  0x40   : > { %350 = vst [vmem:[#allocation3] sm:$0xff] %v9141_v0  ;;  %v9340_v21 = vpack.c.bf16 %v9333_v20, %v9331_v19  ;;  %v9344_v23 = vld [vmem:[#allocation9 + $0x78] sm:$0xff]  ;;  %v9353_v25 = vld [vmem:[#allocation9 + $0x80] sm:$0xff]  ;;  %v9355_v26 = vld [vmem:[#allocation9 + $0x88] sm:$0xff]  ;;  %v269_v53 = vunpack.c.l.bf16 %v9296_v9  ;;  %v270_v54 = vunpack.c.h.bf16 %v9296_v9  ;;  %v271_v55 = vunpack.c.l.bf16 %v9307_v12 }
  0x41   : > { %351 = vst [vmem:[#allocation3 + $0x8] sm:$0xff] %v9141_v0  ;;  %v9351_v24 = vpack.c.bf16 %v9344_v23, %v9342_v22  ;;  %v9362_v27 = vpack.c.bf16 %v9355_v26, %v9353_v25  ;;  %v9364_v28 = vld [vmem:[#allocation9 + $0x90] sm:$0xff]  ;;  %v9366_v29 = vld [vmem:[#allocation9 + $0x98] sm:$0xff]  ;;  %v9375_v31 = vld [vmem:[#allocation9 + $0xa0] sm:$0xff]  ;;  %v272_v56 = vunpack.c.h.bf16 %v9307_v12  ;;  %v273_v57 = vunpack.c.l.bf16 %v9318_v15 }
  0x42   : > { %353 = vst [vmem:[#allocation3 + $0x90] sm:$0xff] %v9141_v0  ;;  %v9373_v30 = vpack.c.bf16 %v9366_v29, %v9364_v28  ;;  %v9377_v32 = vld [vmem:[#allocation9 + $0xa8] sm:$0xff]  ;;  %v9386_v34 = vld [vmem:[#allocation9 + $0xb0] sm:$0xff]  ;;  %v9388_v35 = vld [vmem:[#allocation9 + $0xb8] sm:$0xff]  ;;  %v274_v58 = vunpack.c.h.bf16 %v9318_v15  ;;  %v275_v59 = vunpack.c.l.bf16 %v9329_v18  ;;  %v276_v60 = vunpack.c.h.bf16 %v9329_v18 }
  0x43   : > { %354 = vst [vmem:[#allocation3 + $0x98] sm:$0xff] %v9141_v0  ;;  %v9384_v33 = vpack.c.bf16 %v9377_v32, %v9375_v31  ;;  %v9395_v36 = vpack.c.bf16 %v9388_v35, %v9386_v34  ;;  %v9397_v37 = vld [vmem:[#allocation9 + $0xc0] sm:$0xff]  ;;  %v9399_v38 = vld [vmem:[#allocation9 + $0xc8] sm:$0xff]  ;;  %v9402_v39 = vld [vmem:[#allocation9 + $0xd0] sm:$0xff]  ;;  %v297_v61 = vsub.f32 %v9269_v1, %v265_v47  ;;  %v298_v62 = vsub.f32 %v9271_v2, %v266_v48 }
  0x44   : > { %356 = vst [vmem:[#allocation2 + $0x10] sm:$0xff] %v9275_v3  ;;  %v9404_v40 = vld [vmem:[#allocation9 + $0xd8] sm:$0xff]  ;;  %v9406_v41 = vld [vmem:[#allocation9 + $0xe0] sm:$0xff]  ;;  %v9409_v42 = vld [vmem:[#allocation9 + $0xe8] sm:$0xff]  ;;  %v9418_v45 = vpack.c.bf16 %v9399_v38, %v9397_v37  ;;  %v277_v63 = vunpack.c.l.bf16 %v9340_v21  ;;  %v278_v0 = vunpack.c.h.bf16 %v9340_v21  ;;  %v299_v3 = vsub.f32 %v9277_v4, %v267_v51 }
  0x45   : > { %389 = vst [vmem:[#allocation4 + $0xb0] sm:$0xff] %v9269_v1  ;;  %v9411_v43 = vld [vmem:[#allocation9 + $0xf0] sm:$0xff]  ;;  %v9413_v44 = vld [vmem:[#allocation9 + $0xf8] sm:$0xff]  ;;  %v9423_v46 = vpack.c.bf16 %v9404_v40, %v9402_v39  ;;  %v9430_v49 = vpack.c.bf16 %v9409_v42, %v9406_v41  ;;  %v301_v1 = vsub.f32 %v9287_v7, %v269_v53  ;;  %v329_v47 = vpack.c.bf16 %v298_v62, %v297_v61 }
  0x46   : > { %390 = vst [vmem:[#allocation4] sm:$0xff] %v9271_v2  ;;  %v9434_v50 = vpack.c.bf16 %v9413_v44, %v9411_v43  ;;  %v302_v2 = vsub.f32 %v9289_v8, %v270_v54  ;;  %v283_v51 = vunpack.c.l.bf16 %v9373_v30  ;;  %v285_v53 = vunpack.c.l.bf16 %v9384_v33 }
  0x47   : > { %357 = vst [vmem:[#allocation2 + $0x18] sm:$0xff] %v9285_v6  ;;  %v300_v6 = vsub.f32 %v9279_v5, %v268_v52  ;;  %v287_v54 = vunpack.c.l.bf16 %v9395_v36  ;;  %v294_v62 = vunpack.c.h.bf16 %v9430_v49 }
  0x48   : > { %391 = vst [vmem:[#allocation4 + $0xd8] sm:$0xff] %v9277_v4  ;;  %v305_v4 = vsub.f32 %v9309_v13, %v273_v57  ;;  %v289_v57 = vunpack.c.l.bf16 %v9418_v45 }
  0x49   : > { %392 = vst [vmem:[#allocation4 + $0x18] sm:$0xff] %v9279_v5  ;;  %v306_v5 = vsub.f32 %v9311_v14, %v274_v58  ;;  %v290_v58 = vunpack.c.h.bf16 %v9418_v45 }
  0x4a   : > { %358 = vst [vmem:[#allocation2 + $0x20] sm:$0xff] %v9296_v9  ;;  %v279_v9 = vunpack.c.l.bf16 %v9351_v24 }
  0x4b   : > { %393 = vst [vmem:[#allocation4 + $0x50] sm:$0xff] %v9287_v7  ;;  %v309_v7 = vsub.f32 %v9331_v19, %v277_v63  ;;  %v296_v63 = vunpack.c.h.bf16 %v9434_v50 }
  0x4c   : > { %394 = vst [vmem:[#allocation4 + $0x68] sm:$0xff] %v9289_v8  ;;  %v310_v8 = vsub.f32 %v9333_v20, %v278_v0  ;;  %v321_v0 = vsub.f32 %v9397_v37, %v289_v57 }
  0x4d   : > { %359 = vst [vmem:[#allocation2 + $0x28] sm:$0xff] %v9307_v12  ;;  %v280_v12 = vunpack.c.h.bf16 %v9351_v24 }
  0x4e   : > { %395 = vst [vmem:[#allocation4 + $0x30] sm:$0xff] %v9298_v10 }
  0x4f   : > { %396 = vst [vmem:[#allocation4 + $0x48] sm:$0xff] %v9300_v11 }
  0x50   : > { %360 = vst [vmem:[#allocation2 + $0x30] sm:$0xff] %v9318_v15  ;;  %v303_v15 = vsub.f32 %v9298_v10, %v271_v55  ;;  %v281_v10 = vunpack.c.l.bf16 %v9362_v27  ;;  %v288_v55 = vunpack.c.h.bf16 %v9395_v36 }
  0x51   : > { %397 = vst [vmem:[#allocation4 + $0x80] sm:$0xff] %v9309_v13  ;;  %v311_v13 = vsub.f32 %v9342_v22, %v279_v9 }
  0x52   : > { %398 = vst [vmem:[#allocation4 + $0x88] sm:$0xff] %v9311_v14  ;;  %v312_v14 = vsub.f32 %v9344_v23, %v280_v12 }
  0x53   : > { %361 = vst [vmem:[#allocation2 + $0x38] sm:$0xff] %v9329_v18  ;;  %v304_v18 = vsub.f32 %v9300_v11, %v272_v56  ;;  %v330_v11 = vpack.c.bf16 %v300_v6, %v299_v3  ;;  %v326_v6 = vsub.f32 %v9409_v42, %v294_v62 }
  0x54   : > { %399 = vst [vmem:[#allocation4 + $0xe8] sm:$0xff] %v9320_v16  ;;  %v336_v56 = vpack.c.bf16 %v312_v14, %v311_v13 }
  0x55   : > { %400 = vst [vmem:[#allocation4 + $0xb8] sm:$0xff] %v9322_v17  ;;  %v332_v48 = vpack.c.bf16 %v304_v18, %v303_v15 }
  0x56   : > { %362 = vst [vmem:[#allocation2 + $0x40] sm:$0xff] %v9340_v21  ;;  %v307_v21 = vsub.f32 %v9320_v16, %v275_v59  ;;  %v282_v16 = vunpack.c.h.bf16 %v9362_v27 }
  0x57   : > { %401 = vst [vmem:[#allocation4 + $0x60] sm:$0xff] %v9331_v19  ;;  %v284_v19 = vunpack.c.h.bf16 %v9373_v30 }
  0x58   : > { %402 = vst [vmem:[#allocation4 + $0xf0] sm:$0xff] %v9333_v20  ;;  %v333_v20 = vpack.c.bf16 %v306_v5, %v305_v4 }
  0x59   : > { %363 = vst [vmem:[#allocation2 + $0x48] sm:$0xff] %v9351_v24  ;;  %v308_v24 = vsub.f32 %v9322_v17, %v276_v60  ;;  %v331_v17 = vpack.c.bf16 %v302_v2, %v301_v1  ;;  %v316_v59 = vsub.f32 %v9366_v29, %v284_v19  ;;  %v291_v60 = vunpack.c.l.bf16 %v9423_v46 }
  0x5a   : > { %403 = vst [vmem:[#allocation4 + $0x8] sm:$0xff] %v9342_v22  ;;  %v286_v22 = vunpack.c.h.bf16 %v9384_v33 }
  0x5b   : > { %404 = vst [vmem:[#allocation4 + $0x78] sm:$0xff] %v9344_v23  ;;  %v334_v52 = vpack.c.bf16 %v308_v24, %v307_v21  ;;  %v335_v23 = vpack.c.bf16 %v310_v8, %v309_v7  ;;  %v323_v3 = vsub.f32 %v9402_v39, %v291_v60 }
  0x5c   : > { %364 = vst [vmem:[#allocation2 + $0x50] sm:$0xff] %v9362_v27  ;;  %v313_v27 = vsub.f32 %v9353_v25, %v281_v10  ;;  %v318_v61 = vsub.f32 %v9377_v32, %v286_v22 }
  0x5d   : > { %405 = vst [vmem:[#allocation4 + $0x38] sm:$0xff] %v9353_v25  ;;  %v292_v25 = vunpack.c.h.bf16 %v9423_v46 }
  0x5e   : > { %406 = vst [vmem:[#allocation4 + $0x58] sm:$0xff] %v9355_v26 }
  0x5f   : > { %365 = vst [vmem:[#allocation2 + $0x58] sm:$0xff] %v9373_v30  ;;  %v314_v30 = vsub.f32 %v9355_v26, %v282_v16  ;;  %v293_v26 = vunpack.c.l.bf16 %v9430_v49 }
  0x60   : > { %407 = vst [vmem:[#allocation4 + $0x40] sm:$0xff] %v9364_v28 }
  0x61   : > { %408 = vst [vmem:[#allocation4 + $0xc8] sm:$0xff] %v9366_v29  ;;  %v295_v29 = vunpack.c.l.bf16 %v9434_v50 }
  0x62   : > { %366 = vst [vmem:[#allocation2 + $0x60] sm:$0xff] %v9384_v33  ;;  %v315_v33 = vsub.f32 %v9364_v28, %v283_v51  ;;  %v320_v28 = vsub.f32 %v9388_v35, %v288_v55 }
  0x63   : > { %409 = vst [vmem:[#allocation4 + $0xe0] sm:$0xff] %v9375_v31  ;;  %v327_v9 = vsub.f32 %v9411_v43, %v295_v29 }
  0x64   : > { %410 = vst [vmem:[#allocation4 + $0x90] sm:$0xff] %v9377_v32  ;;  %v338_v32 = vpack.c.bf16 %v316_v59, %v315_v33 }
  0x65   : > { %367 = vst [vmem:[#allocation2 + $0x68] sm:$0xff] %v9395_v36  ;;  %v317_v36 = vsub.f32 %v9375_v31, %v285_v53  ;;  %v322_v31 = vsub.f32 %v9399_v38, %v290_v58 }
  0x66   : > { %411 = vst [vmem:[#allocation4 + $0x70] sm:$0xff] %v9386_v34 }
  0x67   : > { %412 = vst [vmem:[#allocation4 + $0xc0] sm:$0xff] %v9388_v35  ;;  %v325_v35 = vsub.f32 %v9406_v41, %v293_v26 }
  0x68   : > { %368 = vst [vmem:[#allocation2 + $0x70] sm:$0xff] %v9418_v45  ;;  %v319_v45 = vsub.f32 %v9386_v34, %v287_v54  ;;  %v339_v34 = vpack.c.bf16 %v318_v61, %v317_v36 }
  0x69   : > { %413 = vst [vmem:[#allocation4 + $0xa8] sm:$0xff] %v9397_v37  ;;  %v328_v37 = vsub.f32 %v9413_v44, %v296_v63 }
  0x6a   : > { %414 = vst [vmem:[#allocation4 + $0xd0] sm:$0xff] %v9399_v38  ;;  %v341_v38 = vpack.c.bf16 %v322_v31, %v321_v0 }
  0x6b   : > { %369 = vst [vmem:[#allocation2 + $0x78] sm:$0xff] %v9423_v46  ;;  %v337_v46 = vpack.c.bf16 %v314_v30, %v313_v27 }
  0x6c   : > { %415 = vst [vmem:[#allocation4 + $0x10] sm:$0xff] %v9402_v39  ;;  %v343_v39 = vpack.c.bf16 %v326_v6, %v325_v35 }
  0x6d   : > { %416 = vst [vmem:[#allocation4 + $0x28] sm:$0xff] %v9404_v40 }
  0x6e   : > { %370 = vst [vmem:[#allocation2 + $0x80] sm:$0xff] %v9430_v49  ;;  %v324_v49 = vsub.f32 %v9404_v40, %v292_v25  ;;  %v344_v40 = vpack.c.bf16 %v328_v37, %v327_v9 }
  0x6f   : > { %417 = vst [vmem:[#allocation4 + $0xa0] sm:$0xff] %v9406_v41 }
  0x70   : > { %418 = vst [vmem:[#allocation4 + $0xf8] sm:$0xff] %v9409_v42  ;;  %v342_v12 = vpack.c.bf16 %v324_v49, %v323_v3 }
  0x71   : > { %371 = vst [vmem:[#allocation2 + $0x88] sm:$0xff] %v9434_v50  ;;  %v340_v50 = vpack.c.bf16 %v320_v28, %v319_v45 }
  0x72   : > { %419 = vst [vmem:[#allocation4 + $0x20] sm:$0xff] %v9411_v43 }
  0x73   : > { %420 = vst [vmem:[#allocation4 + $0x98] sm:$0xff] %v9413_v44 }
  0x74   : > { %373 = vst [vmem:[#allocation3 + $0x10] sm:$0xff] %v329_v47 }
  0x75   : > { %374 = vst [vmem:[#allocation3 + $0x18] sm:$0xff] %v330_v11 }
  0x76   : > { %375 = vst [vmem:[#allocation3 + $0x20] sm:$0xff] %v331_v17 }
  0x77   : > { %376 = vst [vmem:[#allocation3 + $0x28] sm:$0xff] %v332_v48 }
  0x78   : > { %377 = vst [vmem:[#allocation3 + $0x30] sm:$0xff] %v333_v20 }
  0x79   : > { %378 = vst [vmem:[#allocation3 + $0x38] sm:$0xff] %v334_v52 }
  0x7a   : > { %379 = vst [vmem:[#allocation3 + $0x40] sm:$0xff] %v335_v23 }
  0x7b   : > { %380 = vst [vmem:[#allocation3 + $0x48] sm:$0xff] %v336_v56 }
  0x7c   : > { %381 = vst [vmem:[#allocation3 + $0x50] sm:$0xff] %v337_v46 }
  0x7d   : > { %382 = vst [vmem:[#allocation3 + $0x58] sm:$0xff] %v338_v32 }
  0x7e   : > { %383 = vst [vmem:[#allocation3 + $0x60] sm:$0xff] %v339_v34 }
  0x7f   : > { %384 = vst [vmem:[#allocation3 + $0x68] sm:$0xff] %v340_v50 }
  0x80   : > { %385 = vst [vmem:[#allocation3 + $0x70] sm:$0xff] %v341_v38 }
  0x81   : > { %386 = vst [vmem:[#allocation3 + $0x78] sm:$0xff] %v342_v12 }
  0x82   : > { %387 = vst [vmem:[#allocation3 + $0x80] sm:$0xff] %v343_v39 }
  0x83   : > { %388 = vst [vmem:[#allocation3 + $0x88] sm:$0xff] %v344_v40 }
  0x84 PF: > { %v7476_v41 = vld [vmem:[%s9261_s11 + $0x70] sm:$0xf]  ;;  %v8633_v42 = vld [vmem:[%s9261_s11 + $0x74] sm:$0xf0]  ;;  %v7468_v24 = vld [vmem:[%s9261_s11 + $0x60] sm:$0xf] }
  0x85   : > { %v7540_v43 = vld [vmem:[%s9261_s11 + $0xf0] sm:$0xf]  ;;  %v9512_v44 = vor.u32 %v8633_v42, %v7476_v41  ;;  %v8649_v1 = vld [vmem:[%s9261_s11 + $0xf4] sm:$0xf0]  ;;  %v8631_v7 = vld [vmem:[%s9261_s11 + $0x64] sm:$0xf0] }
  0x86   : > { %v7604_v2 = vld [vmem:[%s9261_s11 + $0x170] sm:$0xf]  ;;  %v8665_v15 = vld [vmem:[%s9261_s11 + $0x174] sm:$0xf0]  ;;  %v9517_v18 = vor.u32 %v8649_v1, %v7540_v43  ;;  %v7532_v8 = vld [vmem:[%s9261_s11 + $0xe0] sm:$0xf]  ;;  %v9532_v11 = vor.u32 %v8631_v7, %v7468_v24  ;;  %v461_v24 = vlaneseq }
  0x87   : > { %14849 = vst [vmem:[#allocation17_spill] sm:$0xff] %v9512_v44  ;;  %v9519_v4 = vor.u32 %v8665_v15, %v7604_v2  ;;  %v7668_v5 = vld [vmem:[%s9261_s11 + $0x1f0] sm:$0xf]  ;;  %v8681_v21 = vld [vmem:[%s9261_s11 + $0x1f4] sm:$0xf0]  ;;  %3054 = vmatpush.bf16.msra.mxu0 %v9512_v44  ;;  %vm728_vm2 = vcmask 1040384  }
  0x88   : > { %14850 = vst [vmem:[#allocation18_spill] sm:$0xff] %v9517_v18  ;;  %v9525_v47 = vor.u32 %v8681_v21, %v7668_v5  ;;  %v8647_v10 = vld [vmem:[%s9261_s11 + $0xe4] sm:$0xf0]  ;;  %3103 = vmatpush.bf16.msra.mxu1 %v9517_v18  ;;  %v7596_v14 = vld [vmem:[%s9261_s11 + $0x160] sm:$0xf]  ;;  %vm847_vm14 = vcmask 1047552  }
  0x89   : > { %14851 = vst [vmem:[#allocation19_spill] sm:$0xff] %v9519_v4  ;;  %3152 = vmatpush.bf16.msra.mxu2 %v9519_v4  ;;  %v9534_v13 = vor.u32 %v8647_v10, %v7532_v8  ;;  %v8663_v16 = vld [vmem:[%s9261_s11 + $0x164] sm:$0xf0]  ;;  %v7660_v17 = vld [vmem:[%s9261_s11 + $0x1e0] sm:$0xf]  ;;  %s6582_s22 = sld [smem:[#allocation5 + %s9185_s16]] }
  0x8a   : > { %14852 = vst [vmem:[#allocation20_spill] sm:$0xff] %v9525_v47  ;;  %3201 = vmatpush.bf16.msra.mxu3 %v9525_v47  ;;  %v9540_v48 = vor.u32 %v8663_v16, %v7596_v14  ;;  %v8679_v51 = vld [vmem:[%s9261_s11 + $0x1e4] sm:$0xf0]  ;;  %v7460_v19 = vld [vmem:[%s9261_s11 + $0x50] sm:$0xf]  ;;  %s6682_s23 = ssub.s32 0, %s9185_s16 }
  0x8b   : > { %14853 = vst [vmem:[#allocation21_spill] sm:$0xff] %v9532_v11  ;;  %v8629_v20 = vld [vmem:[%s9261_s11 + $0x54] sm:$0xf0]  ;;  %v9545_v52 = vor.u32 %v8679_v51, %v7660_v17  ;;  %v7524_v53 = vld [vmem:[%s9261_s11 + $0xd0] sm:$0xf]  ;;  %3055 = vmatpush.bf16.msra.mxu0 %v9532_v11  ;;  %s8570_s12 = smin.u32 %s9185_s16, %s6682_s23  ;;  %p6681_p5 = scmp.lt.s32.totalorder %s9185_s16, 0 }
  0x8c   : > { %14854 = vst [vmem:[#allocation22_spill] sm:$0xff] %v9534_v13  ;;  %v8645_v22 = vld [vmem:[%s9261_s11 + $0xd4] sm:$0xf0]  ;;  %v7588_v23 = vld [vmem:[%s9261_s11 + $0x150] sm:$0xf]  ;;  %v9551_v27 = vor.u32 %v8629_v20, %v7460_v19  ;;  %3104 = vmatpush.bf16.msra.mxu1 %v9534_v13  ;;  %s6684_s18 = sand.u32 1, %s8570_s12  }
  0x8d   : > { %14855 = vst [vmem:[#allocation23_spill] sm:$0xff] %v9540_v48  ;;  %v8661_v54 = vld [vmem:[%s9261_s11 + $0x154] sm:$0xf0]  ;;  %v7652_v55 = vld [vmem:[%s9261_s11 + $0x1d0] sm:$0xf]  ;;  %3153 = vmatpush.bf16.msra.mxu2 %v9540_v48  ;;  %v9558_v30 = vor.u32 %v8645_v22, %v7524_v53  ;;  %s6685_s19 = ssub.s32 0, %s6684_s18 }
  0x8e   : > { %14856 = vst [vmem:[#allocation24_spill] sm:$0xff] %v9545_v52  ;;  %v8677_v56 = vld [vmem:[%s9261_s11 + $0x1d4] sm:$0xf0]  ;;  %v9560_v57 = vor.u32 %v8661_v54, %v7588_v23  ;;  %v7452_v58 = vld [vmem:[%s9261_s11 + $0x40] sm:$0xf]  ;;  %3202 = vmatpush.bf16.msra.mxu3 %v9545_v52  ;;  %s15941_s19 = smov (!%p6681_p5, %s6685_s19), %s6684_s18  ;;  %p6680_p9 = scmp.lt.s32.totalorder %s9185_s16, 8 }
  0x8f   : > { %14857 = vst [vmem:[#allocation25_spill] sm:$0xff] %v9551_v27  ;;  %v8627_v33 = vld [vmem:[%s9261_s11 + $0x44] sm:$0xf0]  ;;  %v7516_v59 = vld [vmem:[%s9261_s11 + $0xc0] sm:$0xf]  ;;  %v9566_v60 = vor.u32 %v8677_v56, %v7652_v55  ;;  %3056 = vmatpush.bf16.msra.mxu0 %v9551_v27  ;;  %p8572_p8 = scmp.lt.s32.totalorder %s15941_s19, 0 }
  0x90   : > { %14858 = vst [vmem:[#allocation26_spill] sm:$0xff] %v9558_v30  ;;  %v8643_v25 = vld [vmem:[%s9261_s11 + $0xc4] sm:$0xf0]  ;;  %v7580_v36 = vld [vmem:[%s9261_s11 + $0x140] sm:$0xf]  ;;  %v9574_v45 = vor.u32 %v8627_v33, %v7452_v58  ;;  %3105 = vmatpush.bf16.msra.mxu1 %v9558_v30  ;;  %s6691_s21 = sadd.s32 2, %s15941_s19 }
  0x91   : > { %14859 = vst [vmem:[#allocation27_spill] sm:$0xff] %v9560_v57  ;;  %v8659_v61 = vld [vmem:[%s9261_s11 + $0x144] sm:$0xf0]  ;;  %v7644_v26 = vld [vmem:[%s9261_s11 + $0x1c0] sm:$0xf]  ;;  %3154 = vmatpush.bf16.msra.mxu2 %v9560_v57  ;;  %v9578_v28 = vor.u32 %v8643_v25, %v7516_v59  ;;  %v9641_v59 = vshrl.u32 %v461_v24, 7  ;;  %s15943_s21 = smov (!%p8572_p8, %s6691_s21), %s15941_s19 }
  0x92   : > { %14860 = vst [vmem:[#allocation28_spill] sm:$0xff] %v9566_v60  ;;  %v8675_v62 = vld [vmem:[%s9261_s11 + $0x1c4] sm:$0xf0]  ;;  %v9580_v29 = vor.u32 %v8659_v61, %v7580_v36  ;;  %v7444_v63 = vld [vmem:[%s9261_s11 + $0x30] sm:$0xf]  ;;  %3203 = vmatpush.bf16.msra.mxu3 %v9566_v60  ;;  %p6693_p10 = scmp.eq.s32.totalorder %s15943_s21, 0 }
  0x93   : > { %14861 = vst [vmem:[#allocation29_spill] sm:$0xff] %v9574_v45  ;;  %v8625_v46 = vld [vmem:[%s9261_s11 + $0x34] sm:$0xf0]  ;;  %v7508_v0 = vld [vmem:[%s9261_s11 + $0xb0] sm:$0xf]  ;;  %v9586_v31 = vor.u32 %v8675_v62, %v7644_v26  ;;  %3057 = vmatpush.bf16.msra.mxu0 %v9574_v45 }
  0x94   : > { %14862 = vst [vmem:[#allocation30_spill] sm:$0xff] %v9578_v28  ;;  %v8641_v32 = vld [vmem:[%s9261_s11 + $0xb4] sm:$0xf0]  ;;  %v7572_v3 = vld [vmem:[%s9261_s11 + $0x130] sm:$0xf]  ;;  %v9594_v6 = vor.u32 %v8625_v46, %v7444_v63  ;;  %3106 = vmatpush.bf16.msra.mxu1 %v9578_v28  ;;  %p13738_p13 = pnand %p6693_p10, %p6680_p9 }
  0x95   : > { %14863 = vst [vmem:[#allocation31_spill] sm:$0xff] %v9580_v29  ;;  %v8657_v49 = vld [vmem:[%s9261_s11 + $0x134] sm:$0xf0]  ;;  %v7636_v34 = vld [vmem:[%s9261_s11 + $0x1b0] sm:$0xf]  ;;  %3155 = vmatpush.bf16.msra.mxu2 %v9580_v29  ;;  %v9601_v38 = vor.u32 %v8641_v32, %v7508_v0  ;;  %v9657_v32 = vadd.s32 8, %v9641_v59 }
  0x96   : > { %14864 = vst [vmem:[#allocation32_spill] sm:$0xff] %v9586_v31  ;;  %v8673_v35 = vld [vmem:[%s9261_s11 + $0x1b4] sm:$0xf0]  ;;  %v7436_v50 = vld [vmem:[%s9261_s11 + $0x20] sm:$0xf]  ;;  %v9603_v12 = vor.u32 %v8657_v49, %v7572_v3  ;;  %3204 = vmatpush.bf16.msra.mxu3 %v9586_v31  ;;  %v14242_v3 = vand.u32 7, %v9641_v59 }
  0x97   : > { %14865 = vst [vmem:[#allocation33_spill] sm:$0xff] %v9594_v6  ;;  %v8623_v9 = vld [vmem:[%s9261_s11 + $0x24] sm:$0xf0]  ;;  %v7500_v37 = vld [vmem:[%s9261_s11 + $0xa0] sm:$0xf]  ;;  %v9609_v42 = vor.u32 %v8673_v35, %v7636_v34  ;;  %3058 = vmatpush.bf16.msra.mxu0 %v9594_v6 }
  0x98   : > { %14866 = vst [vmem:[#allocation34_spill] sm:$0xff] %v9601_v38  ;;  %v8639_v39 = vld [vmem:[%s9261_s11 + $0xa4] sm:$0xf0]  ;;  %v7564_v40 = vld [vmem:[%s9261_s11 + $0x120] sm:$0xf]  ;;  %v9618_v7 = vor.u32 %v8623_v9, %v7436_v50  ;;  %3107 = vmatpush.bf16.msra.mxu1 %v9601_v38  ;;  %vm9679_vm1 = vcmp.eq.s32.totalorder %v14242_v3, 0 }
  0x99   : > { %14867 = vst [vmem:[#allocation35_spill] sm:$0xff] %v9603_v12  ;;  %v8655_v41 = vld [vmem:[%s9261_s11 + $0x124] sm:$0xf0]  ;;  %v7628_v43 = vld [vmem:[%s9261_s11 + $0x1a0] sm:$0xf]  ;;  %3156 = vmatpush.bf16.msra.mxu2 %v9603_v12  ;;  %v9625_v16 = vor.u32 %v8639_v39, %v7500_v37  ;;  %vm753_vm3 = vmpackc.low %vm9679_vm1, %vm9679_vm1 }
  0x9a   : > { %14868 = vst [vmem:[#allocation36_spill] sm:$0xff] %v9609_v42  ;;  %v8671_v1 = vld [vmem:[%s9261_s11 + $0x1a4] sm:$0xf0]  ;;  %v7428_v2 = vld [vmem:[%s9261_s11 + $0x10] sm:$0xf]  ;;  %v9627_v17 = vor.u32 %v8655_v41, %v7564_v40  ;;  %3205 = vmatpush.bf16.msra.mxu3 %v9609_v42 }
  0x9b   : > { %v8621_v15 = vld [vmem:[%s9261_s11 + $0x14] sm:$0xf0]  ;;  %v7492_v5 = vld [vmem:[%s9261_s11 + $0x90] sm:$0xf]  ;;  %14869 = vst [vmem:[#allocation37_spill] sm:$0xff] %v9618_v7  ;;  %v9633_v53 = vor.u32 %v8671_v1, %v7628_v43  ;;  %3059 = vmatpush.bf16.msra.mxu0 %v9618_v7 }
  0x9c   : > { %v8637_v21 = vld [vmem:[%s9261_s11 + $0x94] sm:$0xf0]  ;;  %v7556_v8 = vld [vmem:[%s9261_s11 + $0x110] sm:$0xf]  ;;  %14870 = vst [vmem:[#allocation38_spill] sm:$0xff] %v9625_v16  ;;  %v9638_v58 = vor.u32 %v8621_v15, %v7428_v2  ;;  %3108 = vmatpush.bf16.msra.mxu1 %v9625_v16  ;;  %v14241_v2 = vand.u32 7, %v9657_v32 }
  0x9d   : > { %v8653_v10 = vld [vmem:[%s9261_s11 + $0x114] sm:$0xf0]  ;;  %v7620_v14 = vld [vmem:[%s9261_s11 + $0x190] sm:$0xf]  ;;  %14871 = vst [vmem:[#allocation39_spill] sm:$0xff] %v9627_v17  ;;  %v9644_v36 = vor.u32 %v8637_v21, %v7492_v5  ;;  %3157 = vmatpush.bf16.msra.mxu2 %v9627_v17 }
  0x9e   : > { %v8669_v51 = vld [vmem:[%s9261_s11 + $0x194] sm:$0xf0]  ;;  %v7420_v19 = vld [vmem:[%s9261_s11] sm:$0xf]  ;;  %v8619_v20 = vld [vmem:[%s9261_s11 + $0x4] sm:$0xf0]  ;;  %v9652_v46 = vor.u32 %v8653_v10, %v7556_v8  ;;  %3206 = vmatpush.bf16.msra.mxu3 %v9633_v53 }
  0x9f   : > { %14872 = vst [vmem:[#allocation40_spill] sm:$0xff] %v9633_v53  ;;  %v7484_v22 = vld [vmem:[%s9261_s11 + $0x80] sm:$0xf]  ;;  %v8635_v23 = vld [vmem:[%s9261_s11 + $0x84] sm:$0xf0]  ;;  %v9654_v0 = vor.u32 %v8669_v51, %v7620_v14  ;;  %v9663_v35 = vor.u32 %v8619_v20, %v7420_v19  ;;  %3060 = vmatpush.bf16.msra.mxu0 %v9638_v58  ;;  %vm752_vm4 = vcmp.eq.s32.totalorder %v14241_v2, 0 }
  0xa0   : > { %v7548_v54 = vld [vmem:[%s9261_s11 + $0x100] sm:$0xf]  ;;  %v8599_v56 = vld [vmem:[#allocation3 + $0x4] sm:$0xf0]  ;;  %14873 = vst [vmem:[#allocation41_spill] sm:$0xff] %v9638_v58  ;;  %v9672_v43 = vor.u32 %v8635_v23, %v7484_v22  ;;  %3109 = vmatpush.bf16.msra.mxu1 %v9644_v36  ;;  %v14246_v19 = vmov 0   ;;  %vm754_vm5 = vmpackc.low %vm752_vm4, %vm752_vm4 }
  0xa1   : > { %v7340_v55 = vld [vmem:[#allocation3] sm:$0xf]  ;;  %v8651_v33 = vld [vmem:[%s9261_s11 + $0x104] sm:$0xf0]  ;;  %v8598_v25 = vld [vmem:[#allocation3 + $0x4] sm:$0xf]  ;;  %3158 = vmatpush.bf16.msra.mxu2 %v9652_v46  ;;  %v9702_v22 = vunpack.c.l.b16 %v14246_v19 }
  0xa2   : > { %14874 = vst [vmem:[#allocation42_spill] sm:$0xff] %v9644_v36  ;;  %v7612_v61 = vld [vmem:[%s9261_s11 + $0x180] sm:$0xf]  ;;  %v8667_v26 = vld [vmem:[%s9261_s11 + $0x184] sm:$0xf0]  ;;  %v9648_v62 = vor.u32 %v8599_v56, %v7340_v55  ;;  %v9674_v1 = vor.u32 %v8651_v33, %v7548_v54  ;;  %v755_v20 = vsel %vm753_vm3, 65537, %v14246_v19  ;;  %3207 = vmatpush.bf16.msra.mxu3 %v9654_v0  ;;  %v9706_v56 = vunpack.c.h.b16 %v14246_v19 }
  0xa3   : > { %vm729_vm0 = vsmask.f32 256  ;;  %v7342_v63 = vld [vmem:[#allocation3 + $0x8] sm:$0xf0]  ;;  %14876 = vst [vmem:[#allocation44_spill] sm:$0xff] %v9652_v46  ;;  %v9696_v51 = vor.u32 %v8667_v26, %v7612_v61  ;;  %v757_v55 = vunpack.c.l.b16 %v755_v20  ;;  %3061 = vmatpush.bf16.msra.mxu0 %v9663_v35 }
  0xa4   : > { %14875 = vst [vmem:[#allocation43_spill] sm:$0xff] %v9648_v62  ;;  %v7860_v49 = vld [vmem:[%s9261_s11 + $0x370] sm:$0xf]  ;;  %v8729_v34 = vld [vmem:[%s9261_s11 + $0x374] sm:$0xf0]  ;;  %v14240_v50 = vshrl.u32 %v9648_v62, 16  ;;  %v9667_v37 = vor.u32 %v8598_v25, %v7342_v63  ;;  %vm9724_vm6 = vmand %vm728_vm2, %vm729_vm0  ;;  %3110 = vmatpush.bf16.msra.mxu1 %v9672_v43 }
  0xa5   : > { %14877 = vst [vmem:[#allocation45_spill] sm:$0xff] %v9654_v0  ;;  %v14244_v9 = vshll.u32 %v9648_v62, 16  ;;  %v7732_v39 = vld [vmem:[%s9261_s11 + $0x270] sm:$0xf]  ;;  %v8697_v40 = vld [vmem:[%s9261_s11 + $0x274] sm:$0xf0]  ;;  %v9710_v25 = vor.u32 %v8729_v34, %v7860_v49  ;;  %3159 = vmatpush.bf16.msra.mxu2 %v9674_v1 }
  0xa6   : > { %14878 = vst [vmem:[#allocation46_spill] sm:$0xff] %v9663_v35  ;;  %v7924_v41 = vld [vmem:[%s9261_s11 + $0x3f0] sm:$0xf]  ;;  %v8745_v5 = vld [vmem:[%s9261_s11 + $0x3f4] sm:$0xf0]  ;;  %v989_v24 = vrot.slane %v14240_v50, 7  ;;  %v9715_v50 = vor.u32 %v8697_v40, %v7732_v39  ;;  %3208 = vmatpush.bf16.msra.mxu3 %v9696_v51 }
  0xa7   : > { %14879 = vst [vmem:[#allocation47_spill] sm:$0xff] %v9667_v37  ;;  %v7796_v21 = vld [vmem:[%s9261_s11 + $0x2f0] sm:$0xf]  ;;  %v14243_v8 = vshrl.u32 %v9667_v37, 16  ;;  %v14245_v10 = vshll.u32 %v9667_v37, 16  ;;  %v756_v63 = vsel %vm754_vm5, 65537, %v14246_v19  ;;  %v9717_v20 = vor.u32 %v8745_v5, %v7924_v41 }
  0xa8   : > { %14880 = vst [vmem:[#allocation48_spill] sm:$0xff] %v9672_v43  ;;  %v8713_v14 = vld [vmem:[%s9261_s11 + $0x2f4] sm:$0xf0]  ;;  %v7348_v23 = vld [vmem:[#allocation3 + $0x10] sm:$0xf]  ;;  %v992_v15 = vor.u32 %v14244_v9, %v989_v24  ;;  %v14888_v49 = vmov 0  ;;  %v758_v34 = vunpack.c.l.b16 %v756_v63  ;;  %3250 = vmatpush.bf16.msrb.mxu0 %v9715_v50  ;;  %3160 = vmatmul.bf16.vlgmr.msra.gmra.mxu2 %v9648_v62 }
  0xa9   : > { %14881 = vst [vmem:[#allocation49_spill] sm:$0xff] %v9674_v1  ;;  %v8601_v54 = vld [vmem:[#allocation3 + $0x14] sm:$0xf0]  ;;  %v996_v33 = vrot.slane %v14243_v8, 7  ;;  %v8600_v61 = vld [vmem:[#allocation3 + $0x14] sm:$0xf]  ;;  %v7334_v8 = vunpack.i.l.s16 %v757_v55  ;;  %v9730_v40 = vor.u32 %v8713_v14, %v7796_v21  ;;  %3348 = vmatpush.bf16.msrb.mxu2 %v9710_v25  ;;  %3209 = vmatmul.bf16.vlgmr.msra.gmra.mxu3 %v9667_v37 }
  0xaa   : > { %14884 = vst [vmem:[#allocation50_spill] sm:$0xff] %v9696_v51  ;;  %v7350_v26 = vld [vmem:[#allocation3 + $0x18] sm:$0xf0]  ;;  %v7852_v2 = vld [vmem:[%s9261_s11 + $0x360] sm:$0xf]  ;;  %v14889_v49 = vsel %vm9724_vm6, 4294967295, %v14888_v49  ;;  %v9734_v41 = vor.u32 %v8601_v54, %v7348_v23  ;;  %v7335_v55 = vunpack.i.l.s16 %v758_v34  ;;  %3397 = vmatpush.bf16.msrb.mxu3 %v9717_v20 }
  0xab   : > { %14885 = vst [vmem:[#allocation51_spill] sm:$0xff] %v9710_v25  ;;  %v8727_v3 = vld [vmem:[%s9261_s11 + $0x364] sm:$0xf0]  ;;  %v999_v39 = vor.u32 %v14245_v10, %v996_v33  ;;  %v9736_v5 = vor.u32 %v8600_v61, %v7350_v26  ;;  %v7724_v24 = vld [vmem:[%s9261_s11 + $0x260] sm:$0xf]  ;;  %vm764_vm7 = vcmp.ne.s32.totalorder %v7334_v8, %v9702_v22  ;;  %v1146_v23 = vsel %vm9724_vm6, 0, %v992_v15  ;;  %3299 = vmatpush.bf16.msrb.mxu1 %v9730_v40 }
  0xac   : > { %14886 = vst [vmem:[#allocation52_spill] sm:$0xff] %v9715_v50  ;;  %v8695_v9 = vld [vmem:[%s9261_s11 + $0x264] sm:$0xf0]  ;;  %v7916_v63 = vld [vmem:[%s9261_s11 + $0x3e0] sm:$0xf]  ;;  %v9744_v21 = vor.u32 %v8727_v3, %v7852_v2  ;;  %vm765_vm8 = vcmp.ne.s32.totalorder %v7335_v55, %v9706_v56  ;;  %v14897_v26 = vmov 0 }
  0xad   : > { %14887 = vst [vmem:[#allocation53_spill] sm:$0xff] %v9717_v20  ;;  %v8743_v14 = vld [vmem:[%s9261_s11 + $0x3e4] sm:$0xf0]  ;;  %v7788_v33 = vld [vmem:[%s9261_s11 + $0x2e0] sm:$0xf]  ;;  %v1147_v54 = vsel %vm9724_vm6, 0, %v999_v39  ;;  %v9758_v3 = vor.u32 %v8695_v9, %v7724_v24  ;;  %vm9764_vm9 = vmpackc.low %vm765_vm8, %vm764_vm7 }
  0xae   : > { %14890 = vst [vmem:[#allocation54_spill] sm:$0xff] %v14889_v49  ;;  %v8711_v61 = vld [vmem:[%s9261_s11 + $0x2e4] sm:$0xf0]  ;;  %v9760_v2 = vor.u32 %v8743_v14, %v7916_v63  ;;  %v14898_v26 = vsel %vm9764_vm9, 4294967295, %v14897_v26  ;;  %v14251_v15 = vshrl.u32 %v9734_v41, 16  ;;  %v14252_v34 = vshrl.u32 %v9736_v5, 16  ;;  %3349 = vmatpush.bf16.msrb.mxu2 %v9744_v21 }
  0xaf   : > { %14891 = vst [vmem:[#allocation55_spill] sm:$0xff] %v9730_v40  ;;  %v9771_v39 = vor.u32 %v8711_v61, %v7788_v33  ;;  %v9775_v9 = vsel %vm9764_vm9, 0, %v1146_v23  ;;  %v9779_v8 = vsel %vm9764_vm9, 0, %v1147_v54  ;;  %v7844_v24 = vld [vmem:[%s9261_s11 + $0x350] sm:$0xf]  ;;  %3251 = vmatpush.bf16.msrb.mxu0 %v9758_v3 }
  0xb0   : > { %14892 = vst [vmem:[#allocation56_spill] sm:$0xff] %v9734_v41  ;;  %3062 = vmatmul.bf16.vlgmr.msra.gmra.mxu0 %v9775_v9  ;;  %3111 = vmatmul.bf16.vlgmr.msra.gmra.mxu1 %v9779_v8  ;;  %v8725_v14 = vld [vmem:[%s9261_s11 + $0x354] sm:$0xf0]  ;;  %v1003_v33 = vrot.slane %v14251_v15, 7  ;;  %v1010_v23 = vrot.slane %v14252_v34, 7  ;;  %v14907_v34 = vshll.u32 %v9734_v41, 16 }
  0xb1   : > { %14893 = vst [vmem:[#allocation57_spill] sm:$0xff] %v9736_v5  ;;  %3398 = vmatpush.bf16.msrb.mxu3 %v9760_v2  ;;  %3300 = vmatpush.bf16.msrb.mxu1 %v9771_v39  ;;  %v9795_v54 = vor.u32 %v8725_v14, %v7844_v24  ;;  %v7716_v61 = vld [vmem:[%s9261_s11 + $0x250] sm:$0xf]  ;;  %v8693_v10 = vld [vmem:[%s9261_s11 + $0x254] sm:$0xf0]  ;;  %v14908_v14 = vshll.u32 %v9736_v5, 16 }
  0xb2   : > { %14894 = vst [vmem:[#allocation58_spill] sm:$0xff] %v9744_v21  ;;  %v9799_v19 = vor.u32 %v8693_v10, %v7716_v61  ;;  %v7908_v55 = vld [vmem:[%s9261_s11 + $0x3d0] sm:$0xf]  ;;  %v8741_v63 = vld [vmem:[%s9261_s11 + $0x3d4] sm:$0xf0]  ;;  %v1006_v24 = vor.u32 %v14907_v34, %v1003_v33 }
  0xb3   : > { %14895 = vst [vmem:[#allocation59_spill] sm:$0xff] %v9758_v3  ;;  %3350 = vmatpush.bf16.msrb.mxu2 %v9795_v54  ;;  %v9804_v3 = vor.u32 %v8741_v63, %v7908_v55  ;;  %v8709_v21 = vld [vmem:[%s9261_s11 + $0x2d4] sm:$0xf0]  ;;  %v7356_v10 = vld [vmem:[#allocation3 + $0x20] sm:$0xf] }
  0xb4   : > { %14896 = vst [vmem:[#allocation60_spill] sm:$0xff] %v9760_v2  ;;  %v7780_v2 = vld [vmem:[%s9261_s11 + $0x2d0] sm:$0xf]  ;;  %3252 = vmatpush.bf16.msrb.mxu0 %v9799_v19  ;;  %v8603_v61 = vld [vmem:[#allocation3 + $0x24] sm:$0xf0] }
  0xb5   : > { %14899 = vst [vmem:[#allocation61_spill] sm:$0xff] %v14898_v26  ;;  %v9809_v15 = vor.u32 %v8709_v21, %v7780_v2  ;;  %3399 = vmatpush.bf16.msrb.mxu3 %v9804_v3  ;;  %v8602_v40 = vld [vmem:[#allocation3 + $0x24] sm:$0xf]  ;;  %v1148_v21 = vsel %vm9724_vm6, 0, %v1006_v24  ;;  %v9821_v34 = vor.u32 %v8603_v61, %v7356_v10  ;;  %v7836_v24 = vld [vmem:[%s9261_s11 + $0x340] sm:$0xf] }
  0xb6   : > { %14900 = vst [vmem:[#allocation62_spill] sm:$0xff] %v9771_v39  ;;  %v1013_v39 = vor.u32 %v14908_v14, %v1010_v23  ;;  %v9827_v55 = vsel %vm9764_vm9, 0, %v1148_v21  ;;  %v8723_v14 = vld [vmem:[%s9261_s11 + $0x344] sm:$0xf0]  ;;  %v7708_v10 = vld [vmem:[%s9261_s11 + $0x240] sm:$0xf] }
  0xb7   : > { %14901 = vst [vmem:[#allocation63_spill] sm:$0xff] %v9775_v9  ;;  %3301 = vmatpush.bf16.msrb.mxu1 %v9809_v15  ;;  %v9844_v61 = vor.u32 %v8723_v14, %v7836_v24  ;;  %v8691_v21 = vld [vmem:[%s9261_s11 + $0x244] sm:$0xf0]  ;;  %v14914_v23 = vshrl.u32 %v9821_v34, 16  ;;  %v7772_v50 = vld [vmem:[%s9261_s11 + $0x2c0] sm:$0xf] }
  0xb8   : > { %14902 = vst [vmem:[#allocation64_spill] sm:$0xff] %v9779_v8  ;;  %v1149_v2 = vsel %vm9724_vm6, 0, %v1013_v39  ;;  %3165 = vmatmul.bf16.gmra.mxu2 %v9734_v41  ;;  %v8739_v39 = vld [vmem:[%s9261_s11 + $0x3c4] sm:$0xf0]  ;;  %v7364_v24 = vld [vmem:[#allocation3 + $0x30] sm:$0xf] }
  0xb9   : > { %14903 = vst [vmem:[#allocation65_spill] sm:$0xff] %v9795_v54  ;;  %v7358_v54 = vld [vmem:[#allocation3 + $0x28] sm:$0xf0]  ;;  %v9831_v33 = vsel %vm9764_vm9, 0, %v1149_v2  ;;  %3214 = vmatmul.bf16.gmra.mxu3 %v9736_v5  ;;  %v7900_v2 = vld [vmem:[%s9261_s11 + $0x3c0] sm:$0xf]  ;;  %3351 = vmatpush.bf16.msrb.mxu2 %v9844_v61 }
  0xba   : > { %14904 = vst [vmem:[#allocation66_spill] sm:$0xff] %v9799_v19  ;;  %v9823_v63 = vor.u32 %v8602_v40, %v7358_v54  ;;  %v9855_v54 = vor.u32 %v8739_v39, %v7900_v2  ;;  %v8707_v20 = vld [vmem:[%s9261_s11 + $0x2c4] sm:$0xf0]  ;;  %v8605_v14 = vld [vmem:[#allocation3 + $0x34] sm:$0xf0] }
  0xbb   : > { %14905 = vst [vmem:[#allocation67_spill] sm:$0xff] %v9804_v3  ;;  %v9853_v3 = vor.u32 %v8691_v21, %v7708_v10  ;;  %v9860_v25 = vor.u32 %v8707_v20, %v7772_v50  ;;  %v9869_v21 = vor.u32 %v8605_v14, %v7364_v24  ;;  %v8604_v2 = vld [vmem:[#allocation3 + $0x34] sm:$0xf]  ;;  %v7366_v50 = vld [vmem:[#allocation3 + $0x38] sm:$0xf0] }
  0xbc   : > { %14906 = vst [vmem:[#allocation68_spill] sm:$0xff] %v9809_v15  ;;  %v1017_v15 = vrot.slane %v14914_v23, 7  ;;  %v14915_v40 = vshrl.u32 %v9823_v63, 16  ;;  %3400 = vmatpush.bf16.msrb.mxu3 %v9855_v54  ;;  %v14919_v23 = vshll.u32 %v9821_v34, 16  ;;  %v14920_v39 = vshll.u32 %v9823_v63, 16 }
  0xbd   : > { %14909 = vst [vmem:[#allocation69_spill] sm:$0xff] %v9821_v34  ;;  %3253 = vmatpush.bf16.msrb.mxu0 %v9853_v3  ;;  %3302 = vmatpush.bf16.msrb.mxu1 %v9860_v25  ;;  %v7764_v51 = vld [vmem:[%s9261_s11 + $0x2b0] sm:$0xf]  ;;  %v8705_v35 = vld [vmem:[%s9261_s11 + $0x2b4] sm:$0xf0] }
  0xbe   : > { %14910 = vst [vmem:[#allocation70_spill] sm:$0xff] %v9823_v63  ;;  %v1024_v19 = vrot.slane %v14915_v40, 7  ;;  %v1020_v40 = vor.u32 %v14919_v23, %v1017_v15  ;;  %v14266_v15 = vshrl.u32 %v9869_v21, 16  ;;  %v9912_v1 = vor.u32 %v8705_v35, %v7764_v51  ;;  %v7374_v35 = vld [vmem:[#allocation3 + $0x48] sm:$0xf0] }
  0xbf   : > { %14911 = vst [vmem:[#allocation71_spill] sm:$0xff] %v9827_v55  ;;  %v7756_v0 = vld [vmem:[%s9261_s11 + $0x2a0] sm:$0xf]  ;;  %v8703_v58 = vld [vmem:[%s9261_s11 + $0x2a4] sm:$0xf0] }
  0xc0   : > { %14912 = vst [vmem:[#allocation72_spill] sm:$0xff] %v9831_v33  ;;  %3067 = vmatmul.bf16.gmra.mxu0 %v9827_v55  ;;  %3116 = vmatmul.bf16.gmra.mxu1 %v9831_v33  ;;  %v1027_v10 = vor.u32 %v14920_v39, %v1024_v19  ;;  %v1150_v20 = vsel %vm9724_vm6, 0, %v1020_v40  ;;  %v1031_v23 = vrot.slane %v14266_v15, 7  ;;  %v7828_v39 = vld [vmem:[%s9261_s11 + $0x330] sm:$0xf]  ;;  %v9964_v46 = vor.u32 %v8703_v58, %v7756_v0 }
  0xc1   : > { %14913 = vst [vmem:[#allocation73_spill] sm:$0xff] %v9844_v61  ;;  %v9880_v19 = vsel %vm9764_vm9, 0, %v1150_v20  ;;  %v7892_v20 = vld [vmem:[%s9261_s11 + $0x3b0] sm:$0xf]  ;;  %3303 = vmatpush.bf16.msrb.mxu1 %v9912_v1  ;;  %v7382_v58 = vld [vmem:[#allocation3 + $0x58] sm:$0xf0] }
  0xc2   : > { %14916 = vst [vmem:[#allocation74_spill] sm:$0xff] %v9853_v3  ;;  %v1151_v3 = vsel %vm9724_vm6, 0, %v1027_v10  ;;  %v7700_v10 = vld [vmem:[%s9261_s11 + $0x230] sm:$0xf]  ;;  %v8701_v17 = vld [vmem:[%s9261_s11 + $0x294] sm:$0xf0] }
  0xc3   : > { %14917 = vst [vmem:[#allocation75_spill] sm:$0xff] %v9855_v54  ;;  %v9884_v24 = vsel %vm9764_vm9, 0, %v1151_v3  ;;  %v8721_v3 = vld [vmem:[%s9261_s11 + $0x334] sm:$0xf0]  ;;  %v7748_v53 = vld [vmem:[%s9261_s11 + $0x290] sm:$0xf] }
  0xc4   : > { %14918 = vst [vmem:[#allocation76_spill] sm:$0xff] %v9860_v25  ;;  %v9875_v25 = vor.u32 %v8604_v2, %v7366_v50  ;;  %v9897_v2 = vor.u32 %v8721_v3, %v7828_v39  ;;  %v8689_v50 = vld [vmem:[%s9261_s11 + $0x234] sm:$0xf0]  ;;  %v7372_v39 = vld [vmem:[#allocation3 + $0x40] sm:$0xf]  ;;  %v10016_v7 = vor.u32 %v8701_v17, %v7748_v53 }
  0xc5   : > { %14921 = vst [vmem:[#allocation77_spill] sm:$0xff] %v9869_v21  ;;  %v8737_v54 = vld [vmem:[%s9261_s11 + $0x3b4] sm:$0xf0]  ;;  %v9905_v43 = vor.u32 %v8689_v50, %v7700_v10  ;;  %v8607_v3 = vld [vmem:[#allocation3 + $0x44] sm:$0xf0]  ;;  %3304 = vmatpush.bf16.msrb.mxu1 %v9964_v46 }
  0xc6   : > { %14922 = vst [vmem:[#allocation78_spill] sm:$0xff] %v9875_v25  ;;  %v14271_v14 = vshrl.u32 %v9875_v25, 16  ;;  %v14274_v15 = vshll.u32 %v9875_v25, 16  ;;  %v9907_v40 = vor.u32 %v8737_v54, %v7892_v20  ;;  %3352 = vmatpush.bf16.msrb.mxu2 %v9897_v2  ;;  %v9921_v50 = vor.u32 %v8607_v3, %v7372_v39  ;;  %v8606_v20 = vld [vmem:[#allocation3 + $0x44] sm:$0xf] }
  0xc7   : > { %14923 = vst [vmem:[#allocation79_spill] sm:$0xff] %v9880_v19  ;;  %3254 = vmatpush.bf16.msrb.mxu0 %v9905_v43  ;;  %v7390_v17 = vld [vmem:[#allocation3 + $0x68] sm:$0xf0]  ;;  %v7740_v42 = vld [vmem:[%s9261_s11 + $0x280] sm:$0xf] }
  0xc8   : > { %14924 = vst [vmem:[#allocation80_spill] sm:$0xff] %v9884_v24  ;;  %3170 = vmatmul.bf16.gmra.mxu2 %v9821_v34  ;;  %v1038_v61 = vrot.slane %v14271_v14, 7  ;;  %3401 = vmatpush.bf16.msrb.mxu3 %v9907_v40  ;;  %v14929_v14 = vshll.u32 %v9869_v21, 16  ;;  %v8699_v12 = vld [vmem:[%s9261_s11 + $0x284] sm:$0xf0] }
  0xc9   : > { %3219 = vmatmul.bf16.gmra.mxu3 %v9823_v63  ;;  %14925 = vst [vmem:[#allocation81_spill] sm:$0xff] %v9897_v2  ;;  %3305 = vmatpush.bf16.msrb.mxu1 %v10016_v7  ;;  %v10068_v6 = vor.u32 %v8699_v12, %v7740_v42  ;;  %v8809_v31 = vld [vmem:[%s9261_s11 + $0x5f4] sm:$0xf0]  ;;  %v8044_v60 = vld [vmem:[%s9261_s11 + $0x4e0] sm:$0xf] }
  0xca   : > { %14926 = vst [vmem:[#allocation82_spill] sm:$0xff] %v9905_v43  ;;  %v1034_v10 = vor.u32 %v14929_v14, %v1031_v23  ;;  %v1041_v54 = vor.u32 %v14274_v15, %v1038_v61  ;;  %v14277_v14 = vshrl.u32 %v9921_v50, 16  ;;  %v7884_v15 = vld [vmem:[%s9261_s11 + $0x3a0] sm:$0xf]  ;;  %vm848_vm15 = vsmask.f32 7424 }
  0xcb   : > { %14927 = vst [vmem:[#allocation83_spill] sm:$0xff] %v9907_v40  ;;  %v8735_v40 = vld [vmem:[%s9261_s11 + $0x3a4] sm:$0xf0]  ;;  %vm10179_vm0 = vmand %vm847_vm14, %vm848_vm15  ;;  %v8300_v26 = vld [vmem:[%s9261_s11 + $0x6e0] sm:$0xf] }
  0xcc   : > { %14928 = vst [vmem:[#allocation84_spill] sm:$0xff] %v9912_v1  ;;  %v1152_v51 = vsel %vm9724_vm6, 0, %v1034_v10  ;;  %v1153_v43 = vsel %vm9724_vm6, 0, %v1041_v54  ;;  %v9927_v1 = vor.u32 %v8606_v20, %v7374_v35  ;;  %v1045_v3 = vrot.slane %v14277_v14, 7  ;;  %v7820_v54 = vld [vmem:[%s9261_s11 + $0x320] sm:$0xf] }
  0xcd   : > { %14930 = vst [vmem:[#allocation85_spill] sm:$0xff] %v9921_v50  ;;  %v9932_v61 = vsel %vm9764_vm9, 0, %v1152_v51  ;;  %v9936_v23 = vsel %vm9764_vm9, 0, %v1153_v43  ;;  %v8719_v43 = vld [vmem:[%s9261_s11 + $0x324] sm:$0xf0]  ;;  %v9959_v10 = vor.u32 %v8735_v40, %v7884_v15  ;;  %3306 = vmatpush.bf16.msrb.mxu1 %v10068_v6 }
  0xce   : > { %14931 = vst [vmem:[#allocation86_spill] sm:$0xff] %v9927_v1  ;;  %v14282_v39 = vshrl.u32 %v9927_v1, 16  ;;  %v7692_v20 = vld [vmem:[%s9261_s11 + $0x220] sm:$0xf]  ;;  %v9949_v35 = vor.u32 %v8719_v43, %v7820_v54  ;;  %v8687_v51 = vld [vmem:[%s9261_s11 + $0x224] sm:$0xf0] }
  0xcf   : > { %14932 = vst [vmem:[#allocation87_spill] sm:$0xff] %v9932_v61  ;;  %v14285_v14 = vshll.u32 %v9927_v1, 16  ;;  %v9957_v36 = vor.u32 %v8687_v51, %v7692_v20  ;;  %v7380_v54 = vld [vmem:[#allocation3 + $0x50] sm:$0xf]  ;;  %v8609_v43 = vld [vmem:[#allocation3 + $0x54] sm:$0xf0]  ;;  %3402 = vmatpush.bf16.msrb.mxu3 %v9959_v10 }
  0xd0   : > { %3072 = vmatmul.bf16.gmra.mxu0 %v9880_v19  ;;  %3121 = vmatmul.bf16.gmra.mxu1 %v9884_v24  ;;  %14933 = vst [vmem:[#allocation88_spill] sm:$0xff] %v9936_v23  ;;  %v1052_v2 = vrot.slane %v14282_v39, 7  ;;  %v14938_v39 = vshll.u32 %v9921_v50, 16  ;;  %v9973_v40 = vor.u32 %v8609_v43, %v7380_v54  ;;  %v8608_v51 = vld [vmem:[#allocation3 + $0x54] sm:$0xf] }
  0xd1   : > { %14934 = vst [vmem:[#allocation89_spill] sm:$0xff] %v9949_v35  ;;  %3353 = vmatpush.bf16.msrb.mxu2 %v9949_v35  ;;  %3255 = vmatpush.bf16.msrb.mxu0 %v9957_v36 }
  0xd2   : > { %14935 = vst [vmem:[#allocation90_spill] sm:$0xff] %v9957_v36  ;;  %v1048_v20 = vor.u32 %v14938_v39, %v1045_v3  ;;  %v1055_v15 = vor.u32 %v14285_v14, %v1052_v2  ;;  %v14288_v39 = vshrl.u32 %v9973_v40, 16  ;;  %v7876_v14 = vld [vmem:[%s9261_s11 + $0x390] sm:$0xf] }
  0xd3   : > { %14936 = vst [vmem:[#allocation91_spill] sm:$0xff] %v9959_v10  ;;  %v8733_v10 = vld [vmem:[%s9261_s11 + $0x394] sm:$0xf0] }
  0xd4   : > { %14937 = vst [vmem:[#allocation92_spill] sm:$0xff] %v9964_v46  ;;  %v1154_v0 = vsel %vm9724_vm6, 0, %v1048_v20  ;;  %v1155_v36 = vsel %vm9724_vm6, 0, %v1055_v15  ;;  %v9979_v46 = vor.u32 %v8608_v51, %v7382_v58  ;;  %v1059_v43 = vrot.slane %v14288_v39, 7  ;;  %v7812_v15 = vld [vmem:[%s9261_s11 + $0x310] sm:$0xf] }
  0xd5   : > { %14939 = vst [vmem:[#allocation93_spill] sm:$0xff] %v9973_v40  ;;  %v9984_v2 = vsel %vm9764_vm9, 0, %v1154_v0  ;;  %v9988_v3 = vsel %vm9764_vm9, 0, %v1155_v36  ;;  %v8717_v36 = vld [vmem:[%s9261_s11 + $0x314] sm:$0xf0]  ;;  %v10011_v20 = vor.u32 %v8733_v10, %v7876_v14 }
  0xd6   : > { %14940 = vst [vmem:[#allocation94_spill] sm:$0xff] %v9979_v46  ;;  %v14293_v54 = vshrl.u32 %v9979_v46, 16  ;;  %v7684_v51 = vld [vmem:[%s9261_s11 + $0x210] sm:$0xf]  ;;  %v10001_v58 = vor.u32 %v8717_v36, %v7812_v15  ;;  %v8685_v0 = vld [vmem:[%s9261_s11 + $0x214] sm:$0xf0] }
  0xd7   : > { %14941 = vst [vmem:[#allocation95_spill] sm:$0xff] %v9984_v2  ;;  %v14296_v39 = vshll.u32 %v9979_v46, 16  ;;  %v10009_v16 = vor.u32 %v8685_v0, %v7684_v51  ;;  %v7388_v15 = vld [vmem:[#allocation3 + $0x60] sm:$0xf]  ;;  %v8611_v36 = vld [vmem:[#allocation3 + $0x64] sm:$0xf0]  ;;  %3403 = vmatpush.bf16.msrb.mxu3 %v10011_v20 }
  0xd8   : > { %3175 = vmatmul.bf16.gmra.mxu2 %v9869_v21  ;;  %14942 = vst [vmem:[#allocation96_spill] sm:$0xff] %v9988_v3  ;;  %v1066_v35 = vrot.slane %v14293_v54, 7  ;;  %v14947_v54 = vshll.u32 %v9973_v40, 16  ;;  %v10025_v10 = vor.u32 %v8611_v36, %v7388_v15  ;;  %v8610_v0 = vld [vmem:[#allocation3 + $0x64] sm:$0xf] }
  0xd9   : > { %3224 = vmatmul.bf16.gmra.mxu3 %v9875_v25  ;;  %14943 = vst [vmem:[#allocation97_spill] sm:$0xff] %v10001_v58  ;;  %3354 = vmatpush.bf16.msrb.mxu2 %v10001_v58 }
  0xda   : > { %14944 = vst [vmem:[#allocation98_spill] sm:$0xff] %v10009_v16  ;;  %3256 = vmatpush.bf16.msrb.mxu0 %v10009_v16  ;;  %v1062_v51 = vor.u32 %v14947_v54, %v1059_v43  ;;  %v1069_v14 = vor.u32 %v14296_v39, %v1066_v35  ;;  %v14299_v54 = vshrl.u32 %v10025_v10, 16  ;;  %v7868_v39 = vld [vmem:[%s9261_s11 + $0x380] sm:$0xf] }
  0xdb   : > { %14945 = vst [vmem:[#allocation99_spill] sm:$0xff] %v10011_v20  ;;  %v8731_v20 = vld [vmem:[%s9261_s11 + $0x384] sm:$0xf0] }
  0xdc   : > { %14946 = vst [vmem:[#allocation100_spill] sm:$0xff] %v10016_v7  ;;  %v1156_v53 = vsel %vm9724_vm6, 0, %v1062_v51  ;;  %v1157_v16 = vsel %vm9724_vm6, 0, %v1069_v14  ;;  %v10031_v7 = vor.u32 %v8610_v0, %v7390_v17  ;;  %v1073_v36 = vrot.slane %v14299_v54, 7  ;;  %v7804_v14 = vld [vmem:[%s9261_s11 + $0x300] sm:$0xf] }
  0xdd   : > { %14948 = vst [vmem:[#allocation101_spill] sm:$0xff] %v10025_v10  ;;  %v10036_v35 = vsel %vm9764_vm9, 0, %v1156_v53  ;;  %v10040_v43 = vsel %vm9764_vm9, 0, %v1157_v16  ;;  %v8715_v16 = vld [vmem:[%s9261_s11 + $0x304] sm:$0xf0]  ;;  %v10063_v51 = vor.u32 %v8731_v20, %v7868_v39 }
  0xde   : > { %14949 = vst [vmem:[#allocation102_spill] sm:$0xff] %v10031_v7  ;;  %v14304_v15 = vshrl.u32 %v10031_v7, 16  ;;  %v7676_v0 = vld [vmem:[%s9261_s11 + $0x200] sm:$0xf]  ;;  %v10053_v17 = vor.u32 %v8715_v16, %v7804_v14  ;;  %v8683_v53 = vld [vmem:[%s9261_s11 + $0x204] sm:$0xf0] }
  0xdf   : > { %14950 = vst [vmem:[#allocation103_spill] sm:$0xff] %v10036_v35  ;;  %v14306_v54 = vshll.u32 %v10031_v7, 16  ;;  %v10061_v38 = vor.u32 %v8683_v53, %v7676_v0  ;;  %3404 = vmatpush.bf16.msrb.mxu3 %v10063_v51  ;;  %v14956_v14 = vshll.u32 %v10025_v10, 16  ;;  %v7396_v39 = vld [vmem:[#allocation3 + $0x70] sm:$0xf] }
  0xe0   : > { %3077 = vmatmul.bf16.gmra.mxu0 %v9932_v61  ;;  %3126 = vmatmul.bf16.gmra.mxu1 %v9936_v23  ;;  %14951 = vst [vmem:[#allocation104_spill] sm:$0xff] %v10040_v43  ;;  %v1080_v58 = vrot.slane %v14304_v15, 7  ;;  %v8613_v20 = vld [vmem:[#allocation3 + $0x74] sm:$0xf0]  ;;  %v8612_v53 = vld [vmem:[#allocation3 + $0x74] sm:$0xf] }
  0xe1   : > { %14952 = vst [vmem:[#allocation105_spill] sm:$0xff] %v10053_v17  ;;  %3355 = vmatpush.bf16.msrb.mxu2 %v10053_v17  ;;  %3257 = vmatpush.bf16.msrb.mxu0 %v10061_v38  ;;  %v1076_v16 = vor.u32 %v14956_v14, %v1073_v36  ;;  %v7398_v15 = vld [vmem:[#allocation3 + $0x78] sm:$0xf0] }
  0xe2   : > { %14953 = vst [vmem:[#allocation106_spill] sm:$0xff] %v10061_v38  ;;  %v1083_v0 = vor.u32 %v14306_v54, %v1080_v58  ;;  %v10083_v36 = vor.u32 %v8612_v53, %v7398_v15  ;;  %v8180_v54 = vld [vmem:[%s9261_s11 + $0x5f0] sm:$0xf] }
  0xe3   : > { %14954 = vst [vmem:[#allocation107_spill] sm:$0xff] %v10063_v51  ;;  %v1158_v12 = vsel %vm9724_vm6, 0, %v1076_v16  ;;  %v10116_v15 = vor.u32 %v8809_v31, %v8180_v54  ;;  %v14967_v31 = vand.u32 7, %v9657_v32  ;;  %v14968_v54 = vmov 0  }
  0xe4   : > { %14955 = vst [vmem:[#allocation108_spill] sm:$0xff] %v10068_v6  ;;  %v1159_v42 = vsel %vm9724_vm6, 0, %v1083_v0  ;;  %v10081_v6 = vor.u32 %v8613_v20, %v7396_v39  ;;  %v10087_v58 = vsel %vm9764_vm9, 0, %v1158_v12  ;;  %v14314_v0 = vshrl.u32 %v10083_v36, 16  ;;  %v8116_v39 = vld [vmem:[%s9261_s11 + $0x570] sm:$0xf] }
  0xe5   : > { %14958 = vst [vmem:[#allocation110_spill] sm:$0xff] %v10083_v36  ;;  %v10091_v14 = vsel %vm9764_vm9, 0, %v1159_v42  ;;  %v8793_v20 = vld [vmem:[%s9261_s11 + $0x574] sm:$0xf0]  ;;  %v7988_v12 = vld [vmem:[%s9261_s11 + $0x470] sm:$0xf]  ;;  %3593 = vmatpush.bf16.msra.mxu3 %v10116_v15 }
  0xe6   : > { %14957 = vst [vmem:[#allocation109_spill] sm:$0xff] %v10081_v6  ;;  %v14313_v16 = vshrl.u32 %v10081_v6, 16  ;;  %v10102_v53 = vor.u32 %v8793_v20, %v8116_v39  ;;  %v8761_v42 = vld [vmem:[%s9261_s11 + $0x474] sm:$0xf0]  ;;  %v1094_v51 = vrot.slane %v14314_v0, 7  ;;  %v14315_v17 = vshll.u32 %v10083_v36, 16 }
  0xe7   : > { %14959 = vst [vmem:[#allocation111_spill] sm:$0xff] %v10087_v58  ;;  %v10112_v28 = vor.u32 %v8761_v42, %v7988_v12  ;;  %v8052_v39 = vld [vmem:[%s9261_s11 + $0x4f0] sm:$0xf]  ;;  %v8777_v20 = vld [vmem:[%s9261_s11 + $0x4f4] sm:$0xf0]  ;;  %v14966_v0 = vshll.u32 %v10081_v6, 16 }
  0xe8   : > { %3180 = vmatmul.bf16.gmra.mxu2 %v9921_v50  ;;  %14960 = vst [vmem:[#allocation112_spill] sm:$0xff] %v10091_v14  ;;  %v1087_v38 = vrot.slane %v14313_v16, 7  ;;  %v10121_v29 = vor.u32 %v8777_v20, %v8052_v39  ;;  %v14965_v16 = vand.u32 7, %v9641_v59  ;;  %v1097_v42 = vor.u32 %v14315_v17, %v1094_v51  ;;  %v8807_v17 = vld [vmem:[%s9261_s11 + $0x5e4] sm:$0xf0] }
  0xe9   : > { %3229 = vmatmul.bf16.gmra.mxu3 %v9927_v1  ;;  %14961 = vst [vmem:[#allocation113_spill] sm:$0xff] %v10102_v53  ;;  %3544 = vmatpush.bf16.msra.mxu2 %v10102_v53  ;;  %vm871_vm11 = vcmp.eq.s32.totalorder %v14967_v31, 7  ;;  %v7980_v31 = vld [vmem:[%s9261_s11 + $0x460] sm:$0xf] }
  0xea   : > { %14962 = vst [vmem:[#allocation114_spill] sm:$0xff] %v10112_v28  ;;  %3446 = vmatpush.bf16.msra.mxu0 %v10112_v28  ;;  %vm870_vm10 = vcmp.eq.s32.totalorder %v14965_v16, 7  ;;  %v1090_v12 = vor.u32 %v14966_v0, %v1087_v38  ;;  %3495 = vmatpush.bf16.msra.mxu1 %v10121_v29  ;;  %vm873_vm13 = vmpackc.low %vm871_vm11, %vm871_vm11  ;;  %v1161_v38 = vsel %vm9724_vm6, 0, %v1097_v42  ;;  %v8791_v42 = vld [vmem:[%s9261_s11 + $0x564] sm:$0xf0] }
  0xeb   : > { %14963 = vst [vmem:[#allocation115_spill] sm:$0xff] %v10116_v15  ;;  %vm872_vm12 = vmpackc.low %vm870_vm10, %vm870_vm10  ;;  %v875_v32 = vsel %vm873_vm13, 65537, %v14968_v54  ;;  %v10145_v0 = vsel %vm9764_vm9, 0, %v1161_v38  ;;  %v8172_v38 = vld [vmem:[%s9261_s11 + $0x5e0] sm:$0xf] }
  0xec   : > { %14964 = vst [vmem:[#allocation116_spill] sm:$0xff] %v10121_v29  ;;  %v1160_v59 = vsel %vm9724_vm6, 0, %v1090_v12  ;;  %v874_v51 = vsel %vm872_vm12, 65537, %v14968_v54  ;;  %v877_v20 = vunpack.c.l.b16 %v875_v32  ;;  %v8108_v12 = vld [vmem:[%s9261_s11 + $0x560] sm:$0xf]  ;;  %v14972_v29 = vshll.u32 %v9648_v62, 16 }
  0xed   : > { %v10141_v16 = vsel %vm9764_vm9, 0, %v1160_v59  ;;  %14970 = vst [vmem:[#allocation118_spill] sm:$0xff] %v10145_v0  ;;  %v876_v39 = vunpack.c.l.b16 %v874_v51  ;;  %v10154_v59 = vor.u32 %v8791_v42, %v8108_v12  ;;  %v8759_v54 = vld [vmem:[%s9261_s11 + $0x464] sm:$0xf0]  ;;  %v14973_v51 = vshll.u32 %v9667_v37, 16 }
  0xee   : > { %14969 = vst [vmem:[#allocation117_spill] sm:$0xff] %v10141_v16  ;;  %v1186_v28 = vrot.slane %v14972_v29, 1  ;;  %v10163_v15 = vor.u32 %v8759_v54, %v7980_v31  ;;  %v10165_v53 = vor.u32 %v8807_v17, %v8172_v38  ;;  %v7337_v30 = vunpack.i.l.s16 %v877_v20  ;;  %v8775_v12 = vld [vmem:[%s9261_s11 + $0x4e4] sm:$0xf0] }
  0xef   : > { %14971 = vst [vmem:[#allocation119_spill] sm:$0xff] %v10154_v59  ;;  %v1188_v32 = vrot.slane %v14973_v51, 1  ;;  %v7336_v45 = vunpack.i.l.s16 %v876_v39  ;;  %3545 = vmatpush.bf16.msra.mxu2 %v10154_v59  ;;  %v10172_v29 = vor.u32 %v8775_v12, %v8044_v60  ;;  %v14977_v42 = vshrl.u32 %v9648_v62, 16  ;;  %v8789_v12 = vld [vmem:[%s9261_s11 + $0x554] sm:$0xf0] }
  0xf0   : > { %3082 = vmatmul.bf16.gmra.mxu0 %v9984_v2  ;;  %3131 = vmatmul.bf16.gmra.mxu1 %v9988_v3  ;;  %14974 = vst [vmem:[#allocation120_spill] sm:$0xff] %v10163_v15  ;;  %v14978_v17 = vshrl.u32 %v9667_v37, 16  ;;  %v14979_v39 = vmov 0  ;;  %vm884_vm2 = vcmp.ne.s32.totalorder %v7337_v30, %v9706_v56  ;;  %v14982_v60 = vmov 0 }
  0xf1   : > { %14975 = vst [vmem:[#allocation121_spill] sm:$0xff] %v10165_v53  ;;  %3447 = vmatpush.bf16.msra.mxu0 %v10163_v15  ;;  %3594 = vmatpush.bf16.msra.mxu3 %v10165_v53  ;;  %v1187_v31 = vor.u32 %v1186_v28, %v14977_v42  ;;  %v14980_v39 = vsel %vm10179_vm0, 4294967295, %v14979_v39  ;;  %vm883_vm1 = vcmp.ne.s32.totalorder %v7336_v45, %v9702_v22  ;;  %v7972_v42 = vld [vmem:[%s9261_s11 + $0x450] sm:$0xf]  ;;  %v14989_v15 = vshll.u32 %v9736_v5, 16 }
  0xf2   : > { %14976 = vst [vmem:[#allocation122_spill] sm:$0xff] %v10172_v29  ;;  %v1189_v54 = vor.u32 %v1188_v32, %v14978_v17  ;;  %3496 = vmatpush.bf16.msra.mxu1 %v10172_v29  ;;  %vm10185_vm3 = vmpackc.low %vm884_vm2, %vm883_vm1  ;;  %v8100_v32 = vld [vmem:[%s9261_s11 + $0x550] sm:$0xf]  ;;  %v8805_v29 = vld [vmem:[%s9261_s11 + $0x5d4] sm:$0xf0] }
  0xf3   : > { %14981 = vst [vmem:[#allocation123_spill] sm:$0xff] %v14980_v39  ;;  %v14983_v60 = vsel %vm10185_vm3, 4294967295, %v14982_v60  ;;  %v1246_v28 = vsel %vm10179_vm0, %v1187_v31, 0  ;;  %v1192_v53 = vrot.slane %v14989_v15, 1  ;;  %v14993_v15 = vshrl.u32 %v9734_v41, 16 }
  0xf4   : > { %14984 = vst [vmem:[#allocation124_spill] sm:$0xff] %v14983_v60  ;;  %v1247_v20 = vsel %vm10179_vm0, %v1189_v54, 0  ;;  %v10195_v45 = vsel %vm10185_vm3, 0, %v1246_v28  ;;  %v10208_v54 = vor.u32 %v8789_v12, %v8100_v32  ;;  %v8757_v28 = vld [vmem:[%s9261_s11 + $0x454] sm:$0xf0] }
  0xf5   : > { %14985 = vst [vmem:[#allocation125_spill] sm:$0xff] %v10195_v45  ;;  %v10199_v30 = vsel %vm10185_vm3, 0, %v1247_v20  ;;  %v8164_v20 = vld [vmem:[%s9261_s11 + $0x5d0] sm:$0xf]  ;;  %v10217_v59 = vor.u32 %v8757_v28, %v7972_v42 }
  0xf6   : > { %14986 = vst [vmem:[#allocation126_spill] sm:$0xff] %v10199_v30  ;;  %v10219_v57 = vor.u32 %v8805_v29, %v8164_v20  ;;  %3546 = vmatpush.bf16.msra.mxu2 %v10208_v54  ;;  %v14994_v29 = vshrl.u32 %v9736_v5, 16 }
  0xf7   : > { %14987 = vst [vmem:[#allocation127_spill] sm:$0xff] %v10208_v54  ;;  %3448 = vmatpush.bf16.msra.mxu0 %v10217_v59 }
  0xf8   : > { %3185 = vmatmul.bf16.gmra.mxu2 %v9973_v40  ;;  %14990 = vst [vmem:[#allocation128_spill] sm:$0xff] %v10217_v59  ;;  %3595 = vmatpush.bf16.msra.mxu3 %v10219_v57  ;;  %v8803_v59 = vld [vmem:[%s9261_s11 + $0x5c4] sm:$0xf0] }
  0xf9   : > { %3234 = vmatmul.bf16.gmra.mxu3 %v9979_v46  ;;  %14991 = vst [vmem:[#allocation129_spill] sm:$0xff] %v10219_v57  ;;  %v14999_v57 = vshll.u32 %v9823_v63, 16 }
  0xfb   : > { %v1196_v54 = vrot.slane %v14999_v57, 1  ;;  %v15003_v57 = vshrl.u32 %v9821_v34, 16 }
 0x100   : > { %3087 = vmatmul.bf16.gmra.mxu0 %v10036_v35  ;;  %3136 = vmatmul.bf16.gmra.mxu1 %v10040_v43 }
 0x108   : > { %3190 = vmatmul.bf16.gmra.mxu2 %v10025_v10 }
 0x109   : > { %3239 = vmatmul.bf16.gmra.mxu3 %v10031_v7 }
 0x110   : > { %3092 = vmatmul.bf16.gmra.mxu0 %v10087_v58  ;;  %3141 = vmatmul.bf16.gmra.mxu1 %v10091_v14 }
 0x118   : > { %3195 = vmatmul.bf16.gmra.mxu2 %v10081_v6 }
 0x119   : > { %3244 = vmatmul.bf16.gmra.mxu3 %v10083_v36 }
 0x120   : > { %3097 = vmatmul.bf16.gmra.mxu0 %v10141_v16  ;;  %3146 = vmatmul.bf16.gmra.mxu1 %v10145_v0 }
 0x128   : > { %3356 = vmatmul.bf16.vlgmr.msrb.gmra.mxu2 %v9827_v55 }
 0x129   : > { %3405 = vmatmul.bf16.vlgmr.msrb.gmra.mxu3 %v9831_v33 }
 0x12b   : > { %v3161_v56 = vpop.f32.mrf.mxu2 }
 0x12c   : > { %v3210_v17 = vpop.f32.mrf.mxu3 }
 0x12d   : > { %v3063_v38 = vpop.f32.mrf.mxu0  ;;  %v3112_v51 = vpop.f32.mrf.mxu1 }
 0x12e   : > { %v3113_v22 = vadd.f32 %v3112_v51, %v3063_v38  ;;  %v14988_v38 = vshll.u32 %v9734_v41, 16 }
 0x130   : > { %3258 = vmatmul.bf16.vlgmr.msrb.gmra.mxu0 %v10195_v45  ;;  %3307 = vmatmul.bf16.vlgmr.msrb.gmra.mxu1 %v10199_v30  ;;  %v3162_v31 = vadd.f32 %v3161_v56, %v3113_v22  ;;  %v1190_v51 = vrot.slane %v14988_v38, 1  ;;  %v8036_v22 = vld [vmem:[%s9261_s11 + $0x4d0] sm:$0xf]  ;;  %v8773_v56 = vld [vmem:[%s9261_s11 + $0x4d4] sm:$0xf0] }
 0x131   : > { %v10228_v32 = vor.u32 %v8773_v56, %v8036_v22 }
 0x132   : > { %v10221_v27 = vadd.f32 %v3210_v17, %v3162_v31  ;;  %v1191_v42 = vor.u32 %v1190_v51, %v14993_v15  ;;  %v1193_v31 = vor.u32 %v1192_v53, %v14994_v29  ;;  %v8092_v29 = vld [vmem:[%s9261_s11 + $0x540] sm:$0xf] }
 0x133   : > { %14992 = vst [vmem:[#allocation130_spill] sm:$0xff] %v10228_v32  ;;  %3497 = vmatpush.bf16.msra.mxu1 %v10228_v32  ;;  %v3163_v17 = vpop.f32.mrf.mxu2  ;;  %v8156_v32 = vld [vmem:[%s9261_s11 + $0x5c0] sm:$0xf] }
 0x134   : > { %v3212_v20 = vpop.f32.mrf.mxu3  ;;  %v1248_v22 = vsel %vm10179_vm0, %v1191_v42, 0  ;;  %v1249_v56 = vsel %vm10179_vm0, %v1193_v31, 0  ;;  %v8787_v31 = vld [vmem:[%s9261_s11 + $0x544] sm:$0xf0]  ;;  %v10267_v11 = vor.u32 %v8803_v59, %v8156_v32  ;;  %v15004_v59 = vshrl.u32 %v9823_v63, 16 }
 0x135   : > { %v3065_v12 = vpop.f32.mrf.mxu0  ;;  %v3114_v38 = vpop.f32.mrf.mxu1  ;;  %v10243_v53 = vsel %vm10185_vm3, 0, %v1248_v22  ;;  %v10256_v22 = vor.u32 %v8787_v31, %v8092_v29 }
 0x136   : > { %v3115_v13 = vadd.f32 %v3114_v38, %v3065_v12  ;;  %14995 = vst [vmem:[#allocation131_spill] sm:$0xff] %v10243_v53  ;;  %3596 = vmatpush.bf16.msra.mxu3 %v10267_v11  ;;  %v1197_v32 = vor.u32 %v1196_v54, %v15004_v59  ;;  %v8084_v59 = vld [vmem:[%s9261_s11 + $0x530] sm:$0xf] }
 0x137   : > { %14997 = vst [vmem:[#allocation133_spill] sm:$0xff] %v10256_v22  ;;  %3547 = vmatpush.bf16.msra.mxu2 %v10256_v22 }
 0x138   : > { %v3164_v28 = vadd.f32 %v3163_v17, %v3115_v13  ;;  %v10247_v13 = vsel %vm10185_vm3, 0, %v1249_v56  ;;  %3361 = vmatmul.bf16.gmra.mxu2 %v9880_v19  ;;  %v7964_v17 = vld [vmem:[%s9261_s11 + $0x440] sm:$0xf]  ;;  %v8755_v56 = vld [vmem:[%s9261_s11 + $0x444] sm:$0xf0]  ;;  %15001 = vst [vmem:[#allocation135_spill] sm:$0xff] %v10267_v11 }
 0x139   : > { %14996 = vst [vmem:[#allocation132_spill] sm:$0xff] %v10247_v13  ;;  %3410 = vmatmul.bf16.gmra.mxu3 %v9884_v24  ;;  %v10265_v52 = vor.u32 %v8755_v56, %v7964_v17  ;;  %v15007_v11 = vshll.u32 %v9875_v25, 16 }
 0x13a   : > { %v10239_v12 = vadd.f32 %v3212_v20, %v3164_v28 }
 0x13b   : > { %v3166_v42 = vpop.f32.mrf.mxu2  ;;  %15000 = vst [vmem:[#allocation134_spill] sm:$0xff] %v10265_v52  ;;  %3449 = vmatpush.bf16.msra.mxu0 %v10265_v52  ;;  %v8801_v52 = vld [vmem:[%s9261_s11 + $0x5b4] sm:$0xf0]  ;;  %v1200_v22 = vrot.slane %v15007_v11, 1  ;;  %v15011_v11 = vshrl.u32 %v9869_v21, 16 }
 0x13c   : > { %v3215_v20 = vpop.f32.mrf.mxu3 }
 0x13d   : > { %v3068_v51 = vpop.f32.mrf.mxu0  ;;  %v3117_v38 = vpop.f32.mrf.mxu1 }
 0x13e   : > { %v3118_v15 = vadd.f32 %v3117_v38, %v3068_v51  ;;  %v14998_v51 = vshll.u32 %v9821_v34, 16 }
 0x140   : > { %3263 = vmatmul.bf16.gmra.mxu0 %v10243_v53  ;;  %3312 = vmatmul.bf16.gmra.mxu1 %v10247_v13  ;;  %v3167_v28 = vadd.f32 %v3166_v42, %v3118_v15  ;;  %v1194_v38 = vrot.slane %v14998_v51, 1  ;;  %v8028_v15 = vld [vmem:[%s9261_s11 + $0x4c0] sm:$0xf]  ;;  %v8771_v42 = vld [vmem:[%s9261_s11 + $0x4c4] sm:$0xf0] }
 0x141   : > { %v10276_v29 = vor.u32 %v8771_v42, %v8028_v15  ;;  %v1251_v42 = vsel %vm10179_vm0, %v1197_v32, 0  ;;  %v8785_v32 = vld [vmem:[%s9261_s11 + $0x534] sm:$0xf0] }
 0x142   : > { %v10269_v48 = vadd.f32 %v3215_v20, %v3167_v28  ;;  %v1195_v17 = vor.u32 %v1194_v38, %v15003_v57 }
 0x143   : > { %15002 = vst [vmem:[#allocation136_spill] sm:$0xff] %v10276_v29  ;;  %3498 = vmatpush.bf16.msra.mxu1 %v10276_v29  ;;  %v3168_v28 = vpop.f32.mrf.mxu2  ;;  %v8148_v29 = vld [vmem:[%s9261_s11 + $0x5b0] sm:$0xf] }
 0x144   : > { %v3217_v56 = vpop.f32.mrf.mxu3  ;;  %v1250_v15 = vsel %vm10179_vm0, %v1195_v17, 0  ;;  %v10315_v44 = vor.u32 %v8801_v52, %v8148_v29  ;;  %v15012_v52 = vshrl.u32 %v9875_v25, 16 }
 0x145   : > { %v3070_v31 = vpop.f32.mrf.mxu0  ;;  %v3119_v51 = vpop.f32.mrf.mxu1  ;;  %v10291_v54 = vsel %vm10185_vm3, 0, %v1250_v15  ;;  %v10304_v15 = vor.u32 %v8785_v32, %v8084_v59 }
 0x146   : > { %v3120_v18 = vadd.f32 %v3119_v51, %v3070_v31  ;;  %15009 = vst [vmem:[#allocation139_spill] sm:$0xff] %v10315_v44  ;;  %3597 = vmatpush.bf16.msra.mxu3 %v10315_v44  ;;  %v1201_v29 = vor.u32 %v1200_v22, %v15012_v52  ;;  %v8076_v52 = vld [vmem:[%s9261_s11 + $0x520] sm:$0xf]  ;;  %v15015_v44 = vshll.u32 %v9927_v1, 16 }
 0x147   : > { %15005 = vst [vmem:[#allocation137_spill] sm:$0xff] %v10304_v15  ;;  %3548 = vmatpush.bf16.msra.mxu2 %v10304_v15 }
 0x148   : > { %v3169_v20 = vadd.f32 %v3168_v28, %v3120_v18  ;;  %v10295_v18 = vsel %vm10185_vm3, 0, %v1251_v42  ;;  %3366 = vmatmul.bf16.gmra.mxu2 %v9932_v61  ;;  %v7956_v28 = vld [vmem:[%s9261_s11 + $0x430] sm:$0xf]  ;;  %v8753_v42 = vld [vmem:[%s9261_s11 + $0x434] sm:$0xf0]  ;;  %v1204_v15 = vrot.slane %v15015_v44, 1 }
 0x149   : > { %3415 = vmatmul.bf16.gmra.mxu3 %v9936_v23  ;;  %v10313_v47 = vor.u32 %v8753_v42, %v7956_v28  ;;  %v15019_v44 = vshrl.u32 %v9921_v50, 16 }
 0x14a   : > { %v10287_v31 = vadd.f32 %v3217_v56, %v3169_v20 }
 0x14b   : > { %v3171_v17 = vpop.f32.mrf.mxu2  ;;  %15008 = vst [vmem:[#allocation138_spill] sm:$0xff] %v10313_v47  ;;  %3450 = vmatpush.bf16.msra.mxu0 %v10313_v47  ;;  %v8799_v47 = vld [vmem:[%s9261_s11 + $0x5a4] sm:$0xf0] }
 0x14c   : > { %v3220_v56 = vpop.f32.mrf.mxu3 }
 0x14d   : > { %v3073_v38 = vpop.f32.mrf.mxu0  ;;  %v3122_v51 = vpop.f32.mrf.mxu1 }
 0x14e   : > { %v3123_v57 = vadd.f32 %v3122_v51, %v3073_v38  ;;  %v15006_v38 = vshll.u32 %v9869_v21, 16 }
 0x150   : > { %3268 = vmatmul.bf16.gmra.mxu0 %v10291_v54  ;;  %3317 = vmatmul.bf16.gmra.mxu1 %v10295_v18  ;;  %v3172_v20 = vadd.f32 %v3171_v17, %v3123_v57  ;;  %v1198_v51 = vrot.slane %v15006_v38, 1  ;;  %v8020_v57 = vld [vmem:[%s9261_s11 + $0x4b0] sm:$0xf]  ;;  %v8769_v17 = vld [vmem:[%s9261_s11 + $0x4b4] sm:$0xf0] }
 0x151   : > { %v10324_v59 = vor.u32 %v8769_v17, %v8020_v57  ;;  %v1253_v17 = vsel %vm10179_vm0, %v1201_v29, 0  ;;  %v8783_v29 = vld [vmem:[%s9261_s11 + $0x524] sm:$0xf0] }
 0x152   : > { %v10317_v4 = vadd.f32 %v3220_v56, %v3172_v20  ;;  %v1199_v28 = vor.u32 %v1198_v51, %v15011_v11 }
 0x153   : > { %15010 = vst [vmem:[#allocation140_spill] sm:$0xff] %v10324_v59  ;;  %3499 = vmatpush.bf16.msra.mxu1 %v10324_v59  ;;  %v3173_v20 = vpop.f32.mrf.mxu2  ;;  %v8140_v59 = vld [vmem:[%s9261_s11 + $0x5a0] sm:$0xf] }
 0x154   : > { %v3222_v42 = vpop.f32.mrf.mxu3  ;;  %v1252_v57 = vsel %vm10179_vm0, %v1199_v28, 0  ;;  %v10363_v30 = vor.u32 %v8799_v47, %v8140_v59  ;;  %v15020_v47 = vshrl.u32 %v9927_v1, 16 }
 0x155   : > { %v3075_v32 = vpop.f32.mrf.mxu0  ;;  %v3124_v38 = vpop.f32.mrf.mxu1  ;;  %v10339_v22 = vsel %vm10185_vm3, 0, %v1252_v57  ;;  %v10352_v57 = vor.u32 %v8783_v29, %v8076_v52 }
 0x156   : > { %v3125_v37 = vadd.f32 %v3124_v38, %v3075_v32  ;;  %15017 = vst [vmem:[#allocation143_spill] sm:$0xff] %v10363_v30  ;;  %3598 = vmatpush.bf16.msra.mxu3 %v10363_v30  ;;  %v1205_v59 = vor.u32 %v1204_v15, %v15020_v47  ;;  %v8068_v47 = vld [vmem:[%s9261_s11 + $0x510] sm:$0xf]  ;;  %v15025_v30 = vshll.u32 %v9979_v46, 16 }
 0x157   : > { %15013 = vst [vmem:[#allocation141_spill] sm:$0xff] %v10352_v57  ;;  %3549 = vmatpush.bf16.msra.mxu2 %v10352_v57 }
 0x158   : > { %v3174_v56 = vadd.f32 %v3173_v20, %v3125_v37  ;;  %v10343_v37 = vsel %vm10185_vm3, 0, %v1253_v17  ;;  %3371 = vmatmul.bf16.gmra.mxu2 %v9984_v2  ;;  %v7948_v20 = vld [vmem:[%s9261_s11 + $0x420] sm:$0xf]  ;;  %v8751_v17 = vld [vmem:[%s9261_s11 + $0x424] sm:$0xf0]  ;;  %v1208_v57 = vrot.slane %v15025_v30, 1 }
 0x159   : > { %3420 = vmatmul.bf16.gmra.mxu3 %v9988_v3  ;;  %v10361_v62 = vor.u32 %v8751_v17, %v7948_v20  ;;  %v15029_v30 = vshrl.u32 %v9973_v40, 16  ;;  %v8614_v3 = vld [vmem:[#allocation3 + $0x84] sm:$0xf]  ;;  %v7406_v2 = vld [vmem:[#allocation3 + $0x88] sm:$0xf0] }
 0x15a   : > { %v10335_v32 = vadd.f32 %v3222_v42, %v3174_v56  ;;  %v10477_v23 = vor.u32 %v8614_v3, %v7406_v2 }
 0x15b   : > { %v3176_v28 = vpop.f32.mrf.mxu2  ;;  %15016 = vst [vmem:[#allocation142_spill] sm:$0xff] %v10361_v62  ;;  %3451 = vmatpush.bf16.msra.mxu0 %v10361_v62  ;;  %v8797_v62 = vld [vmem:[%s9261_s11 + $0x594] sm:$0xf0] }
 0x15c   : > { %v3225_v42 = vpop.f32.mrf.mxu3  ;;  %15042 = vst [vmem:[#allocation158_spill] sm:$0xff] %v10477_v23 }
 0x15d   : > { %v3078_v51 = vpop.f32.mrf.mxu0  ;;  %v3127_v38 = vpop.f32.mrf.mxu1 }
 0x15e   : > { %v3128_v11 = vadd.f32 %v3127_v38, %v3078_v51  ;;  %v15014_v51 = vshll.u32 %v9921_v50, 16 }
 0x160   : > { %3273 = vmatmul.bf16.gmra.mxu0 %v10339_v22  ;;  %3322 = vmatmul.bf16.gmra.mxu1 %v10343_v37  ;;  %v3177_v56 = vadd.f32 %v3176_v28, %v3128_v11  ;;  %v1202_v38 = vrot.slane %v15014_v51, 1  ;;  %v8012_v11 = vld [vmem:[%s9261_s11 + $0x4a0] sm:$0xf]  ;;  %v8767_v28 = vld [vmem:[%s9261_s11 + $0x4a4] sm:$0xf0] }
 0x161   : > { %v10372_v52 = vor.u32 %v8767_v28, %v8012_v11  ;;  %v1255_v28 = vsel %vm10179_vm0, %v1205_v59, 0  ;;  %v8781_v59 = vld [vmem:[%s9261_s11 + $0x514] sm:$0xf0] }
 0x162   : > { %v10365_v45 = vadd.f32 %v3225_v42, %v3177_v56  ;;  %v1203_v20 = vor.u32 %v1202_v38, %v15019_v44 }
 0x163   : > { %15018 = vst [vmem:[#allocation144_spill] sm:$0xff] %v10372_v52  ;;  %3500 = vmatpush.bf16.msra.mxu1 %v10372_v52  ;;  %v3178_v56 = vpop.f32.mrf.mxu2  ;;  %v8132_v52 = vld [vmem:[%s9261_s11 + $0x590] sm:$0xf] }
 0x164   : > { %v3227_v17 = vpop.f32.mrf.mxu3  ;;  %v1254_v11 = vsel %vm10179_vm0, %v1203_v20, 0  ;;  %v10411_v8 = vor.u32 %v8797_v62, %v8132_v52  ;;  %v15030_v62 = vshrl.u32 %v9979_v46, 16 }
 0x165   : > { %v3080_v29 = vpop.f32.mrf.mxu0  ;;  %v3129_v51 = vpop.f32.mrf.mxu1  ;;  %v10387_v15 = vsel %vm10185_vm3, 0, %v1254_v11  ;;  %v10400_v11 = vor.u32 %v8781_v59, %v8068_v47 }
 0x166   : > { %v3130_v33 = vadd.f32 %v3129_v51, %v3080_v29  ;;  %15021 = vst [vmem:[#allocation145_spill] sm:$0xff] %v10387_v15  ;;  %3599 = vmatpush.bf16.msra.mxu3 %v10411_v8  ;;  %v1209_v52 = vor.u32 %v1208_v57, %v15030_v62  ;;  %v8060_v62 = vld [vmem:[%s9261_s11 + $0x500] sm:$0xf] }
 0x167   : > { %15023 = vst [vmem:[#allocation147_spill] sm:$0xff] %v10400_v11  ;;  %3550 = vmatpush.bf16.msra.mxu2 %v10400_v11 }
 0x168   : > { %v3179_v42 = vadd.f32 %v3178_v56, %v3130_v33  ;;  %v10391_v33 = vsel %vm10185_vm3, 0, %v1255_v28  ;;  %3376 = vmatmul.bf16.gmra.mxu2 %v10036_v35  ;;  %v7940_v56 = vld [vmem:[%s9261_s11 + $0x410] sm:$0xf]  ;;  %v8749_v28 = vld [vmem:[%s9261_s11 + $0x414] sm:$0xf0]  ;;  %15027 = vst [vmem:[#allocation149_spill] sm:$0xff] %v10411_v8 }
 0x169   : > { %15022 = vst [vmem:[#allocation146_spill] sm:$0xff] %v10391_v33  ;;  %3425 = vmatmul.bf16.gmra.mxu3 %v10040_v43  ;;  %v10409_v55 = vor.u32 %v8749_v28, %v7940_v56  ;;  %v7404_v35 = vld [vmem:[#allocation3 + $0x80] sm:$0xf] }
 0x16a   : > { %v10383_v29 = vadd.f32 %v3227_v17, %v3179_v42 }
 0x16b   : > { %v3181_v20 = vpop.f32.mrf.mxu2  ;;  %15026 = vst [vmem:[#allocation148_spill] sm:$0xff] %v10409_v55  ;;  %3452 = vmatpush.bf16.msra.mxu0 %v10409_v55  ;;  %v15035_v55 = vshll.u32 %v10031_v7, 16 }
 0x16c   : > { %v3230_v17 = vpop.f32.mrf.mxu3 }
 0x16d   : > { %v3083_v38 = vpop.f32.mrf.mxu0  ;;  %v3132_v51 = vpop.f32.mrf.mxu1  ;;  %v1212_v8 = vrot.slane %v15035_v55, 1 }
 0x16e   : > { %v3133_v44 = vadd.f32 %v3132_v51, %v3083_v38  ;;  %v15024_v38 = vshll.u32 %v9973_v40, 16 }
 0x170   : > { %3278 = vmatmul.bf16.gmra.mxu0 %v10387_v15  ;;  %3327 = vmatmul.bf16.gmra.mxu1 %v10391_v33  ;;  %v3182_v42 = vadd.f32 %v3181_v20, %v3133_v44  ;;  %v1206_v51 = vrot.slane %v15024_v38, 1  ;;  %v8004_v44 = vld [vmem:[%s9261_s11 + $0x490] sm:$0xf]  ;;  %v8765_v20 = vld [vmem:[%s9261_s11 + $0x494] sm:$0xf0] }
 0x171   : > { %v10420_v47 = vor.u32 %v8765_v20, %v8004_v44  ;;  %v1257_v20 = vsel %vm10179_vm0, %v1209_v52, 0  ;;  %v8779_v52 = vld [vmem:[%s9261_s11 + $0x504] sm:$0xf0] }
 0x172   : > { %v10413_v9 = vadd.f32 %v3230_v17, %v3182_v42  ;;  %v1207_v56 = vor.u32 %v1206_v51, %v15029_v30 }
 0x173   : > { %15028 = vst [vmem:[#allocation150_spill] sm:$0xff] %v10420_v47  ;;  %3501 = vmatpush.bf16.msra.mxu1 %v10420_v47  ;;  %v3183_v42 = vpop.f32.mrf.mxu2  ;;  %v8124_v47 = vld [vmem:[%s9261_s11 + $0x580] sm:$0xf] }
 0x174   : > { %v3232_v28 = vpop.f32.mrf.mxu3  ;;  %v1256_v44 = vsel %vm10179_vm0, %v1207_v56, 0 }
 0x175   : > { %v3085_v59 = vpop.f32.mrf.mxu0  ;;  %v3134_v38 = vpop.f32.mrf.mxu1  ;;  %v10435_v57 = vsel %vm10185_vm3, 0, %v1256_v44  ;;  %v7932_v44 = vld [vmem:[%s9261_s11 + $0x400] sm:$0xf] }
 0x176   : > { %v3135_v43 = vadd.f32 %v3134_v38, %v3085_v59  ;;  %15031 = vst [vmem:[#allocation151_spill] sm:$0xff] %v10435_v57 }
 0x178   : > { %v3184_v17 = vadd.f32 %v3183_v42, %v3135_v43  ;;  %v10439_v43 = vsel %vm10185_vm3, 0, %v1257_v20  ;;  %3381 = vmatmul.bf16.gmra.mxu2 %v10087_v58  ;;  %v8747_v20 = vld [vmem:[%s9261_s11 + $0x404] sm:$0xf0] }
 0x179   : > { %15032 = vst [vmem:[#allocation152_spill] sm:$0xff] %v10439_v43  ;;  %3430 = vmatmul.bf16.gmra.mxu3 %v10091_v14  ;;  %v10456_v11 = vor.u32 %v8747_v20, %v7932_v44  ;;  %v8795_v14 = vld [vmem:[%s9261_s11 + $0x584] sm:$0xf0] }
 0x17a   : > { %v10431_v59 = vadd.f32 %v3232_v28, %v3184_v17  ;;  %v10447_v28 = vor.u32 %v8779_v52, %v8060_v62  ;;  %v8763_v62 = vld [vmem:[%s9261_s11 + $0x484] sm:$0xf0] }
 0x17b   : > { %v3186_v56 = vpop.f32.mrf.mxu2  ;;  %15036 = vst [vmem:[#allocation154_spill] sm:$0xff] %v10456_v11  ;;  %v8615_v52 = vld [vmem:[#allocation3 + $0x84] sm:$0xf0]  ;;  %3453 = vmatpush.bf16.msra.mxu0 %v10456_v11 }
 0x17c   : > { %v3235_v17 = vpop.f32.mrf.mxu3  ;;  %15033 = vst [vmem:[#allocation153_spill] sm:$0xff] %v10447_v28  ;;  %3551 = vmatpush.bf16.msra.mxu2 %v10447_v28  ;;  %v10475_v28 = vor.u32 %v8615_v52, %v7404_v35 }
 0x17d   : > { %v3088_v51 = vpop.f32.mrf.mxu0  ;;  %v3137_v38 = vpop.f32.mrf.mxu1 }
 0x17e   : > { %v3138_v30 = vadd.f32 %v3137_v38, %v3088_v51  ;;  %v15034_v51 = vshll.u32 %v10025_v10, 16  ;;  %15041 = vst [vmem:[#allocation157_spill] sm:$0xff] %v10475_v28 }
 0x180   : > { %3283 = vmatmul.bf16.gmra.mxu0 %v10435_v57  ;;  %3332 = vmatmul.bf16.gmra.mxu1 %v10439_v43  ;;  %v3187_v42 = vadd.f32 %v3186_v56, %v3138_v30  ;;  %v1210_v38 = vrot.slane %v15034_v51, 1  ;;  %v10462_v30 = vor.u32 %v8795_v14, %v8124_v47  ;;  %v7996_v56 = vld [vmem:[%s9261_s11 + $0x480] sm:$0xf]  ;;  %v15040_v14 = vshrl.u32 %v10031_v7, 16 }
 0x181   : > { %v10467_v51 = vor.u32 %v8763_v62, %v7996_v56 }
 0x182   : > { %v10459_v58 = vadd.f32 %v3235_v17, %v3187_v42  ;;  %15037 = vst [vmem:[#allocation155_spill] sm:$0xff] %v10462_v30  ;;  %3600 = vmatpush.bf16.msra.mxu3 %v10462_v30  ;;  %v15039_v17 = vshrl.u32 %v10025_v10, 16  ;;  %v1213_v47 = vor.u32 %v1212_v8, %v15040_v14  ;;  %v14387_v8 = vshrl.u32 %v10477_v23, 16 }
 0x183   : > { %15038 = vst [vmem:[#allocation156_spill] sm:$0xff] %v10467_v51  ;;  %3502 = vmatpush.bf16.msra.mxu1 %v10467_v51  ;;  %v3188_v11 = vpop.f32.mrf.mxu2  ;;  %v8873_v51 = vld [vmem:[%s9261_s11 + $0x7f4] sm:$0xf0]  ;;  %v15047_v30 = vshll.u32 %v10083_v36, 16 }
 0x184   : > { %v1211_v20 = vor.u32 %v1210_v38, %v15039_v17  ;;  %v3237_v62 = vpop.f32.mrf.mxu3  ;;  %v14385_v38 = vshrl.u32 %v10475_v28, 16  ;;  %v8436_v17 = vld [vmem:[%s9261_s11 + $0x7f0] sm:$0xf] }
 0x185   : > { %v3090_v55 = vpop.f32.mrf.mxu0  ;;  %v3139_v44 = vpop.f32.mrf.mxu1  ;;  %v10519_v24 = vor.u32 %v8873_v51, %v8436_v17 }
 0x186   : > { %v3140_v42 = vadd.f32 %v3139_v44, %v3090_v55  ;;  %v1258_v61 = vsel %vm10179_vm0, %v1211_v20, 0  ;;  %v1259_v55 = vsel %vm10179_vm0, %v1213_v47, 0  ;;  %v8372_v47 = vld [vmem:[%s9261_s11 + $0x770] sm:$0xf] }
 0x187   : > { %v10489_v3 = vsel %vm10185_vm3, 0, %v1258_v61  ;;  %v1108_v61 = vrot.slane %v14387_v8, 7  ;;  %v15046_v8 = vshll.u32 %v10081_v6, 16  ;;  %15049 = vst [vmem:[#allocation163_spill] sm:$0xff] %v10519_v24  ;;  %3789 = vmatpush.bf16.msrb.mxu3 %v10519_v24 }
 0x188   : > { %v3189_v56 = vadd.f32 %v3188_v11, %v3140_v42  ;;  %15043 = vst [vmem:[#allocation159_spill] sm:$0xff] %v10489_v3  ;;  %v10493_v11 = vsel %vm10185_vm3, 0, %v1259_v55  ;;  %3386 = vmatmul.bf16.gmra.mxu2 %v10141_v16  ;;  %v1101_v42 = vrot.slane %v14385_v38, 7  ;;  %v8825_v38 = vld [vmem:[%s9261_s11 + $0x674] sm:$0xf0] }
 0x189   : > { %15044 = vst [vmem:[#allocation160_spill] sm:$0xff] %v10493_v11  ;;  %3435 = vmatmul.bf16.gmra.mxu3 %v10145_v0  ;;  %v1214_v20 = vrot.slane %v15046_v8, 1  ;;  %v1216_v0 = vrot.slane %v15047_v30, 1  ;;  %v8308_v8 = vld [vmem:[%s9261_s11 + $0x6f0] sm:$0xf] }
 0x18a   : > { %v10483_v44 = vadd.f32 %v3237_v62, %v3189_v56  ;;  %v8857_v56 = vld [vmem:[%s9261_s11 + $0x774] sm:$0xf0]  ;;  %v8244_v62 = vld [vmem:[%s9261_s11 + $0x670] sm:$0xf] }
 0x18b   : > { %v3191_v14 = vpop.f32.mrf.mxu2  ;;  %v10517_v16 = vor.u32 %v8825_v38, %v8244_v62  ;;  %v8841_v30 = vld [vmem:[%s9261_s11 + $0x6f4] sm:$0xf0] }
 0x18c   : > { %v10532_v51 = vor.u32 %v8841_v30, %v8308_v8 }
 0x18d   : > { %v3093_v35 = vpop.f32.mrf.mxu0  ;;  %v3142_v2 = vpop.f32.mrf.mxu1  ;;  %15048 = vst [vmem:[#allocation162_spill] sm:$0xff] %v10517_v16  ;;  %3642 = vmatpush.bf16.msrb.mxu0 %v10517_v16 }
 0x18e   : > { %v3143_v52 = vadd.f32 %v3142_v2, %v3093_v35  ;;  %v3240_v35 = vpop.f32.mrf.mxu3  ;;  %v10508_v2 = vor.u32 %v8857_v56, %v8372_v47  ;;  %v15051_v47 = vshll.u32 %v10477_v23, 16  ;;  %15052 = vst [vmem:[#allocation164_spill] sm:$0xff] %v10532_v51  ;;  %3691 = vmatpush.bf16.msrb.mxu1 %v10532_v51 }
 0x190   : > { %3288 = vmatmul.bf16.gmra.mxu0 %v10489_v3  ;;  %3337 = vmatmul.bf16.gmra.mxu1 %v10493_v11  ;;  %v3192_v55 = vadd.f32 %v3191_v14, %v3143_v52  ;;  %15045 = vst [vmem:[#allocation161_spill] sm:$0xff] %v10508_v2  ;;  %v15050_v52 = vshll.u32 %v10475_v28, 16  ;;  %v1111_v56 = vor.u32 %v15051_v47, %v1108_v61 }
 0x191   : > { %3740 = vmatpush.bf16.msrb.mxu2 %v10508_v2 }
 0x192   : > { %v10521_v19 = vadd.f32 %v3240_v35, %v3192_v55  ;;  %v1104_v14 = vor.u32 %v15050_v52, %v1101_v42  ;;  %v15053_v55 = vshrl.u32 %v10081_v6, 16  ;;  %v15054_v42 = vshrl.u32 %v10083_v36, 16 }
 0x193   : > { %v3193_v47 = vpop.f32.mrf.mxu2  ;;  %v1163_v16 = vsel %vm9724_vm6, 0, %v1111_v56 }
 0x194   : > { %v1215_v35 = vor.u32 %v1214_v20, %v15053_v55  ;;  %v1217_v52 = vor.u32 %v1216_v0, %v15054_v42  ;;  %v1162_v61 = vsel %vm9724_vm6, 0, %v1104_v14  ;;  %v10555_v56 = vsel %vm9764_vm9, 0, %v1163_v16  ;;  %v8855_v55 = vld [vmem:[%s9261_s11 + $0x764] sm:$0xf0] }
 0x195   : > { %v3095_v38 = vpop.f32.mrf.mxu0  ;;  %v3144_v62 = vpop.f32.mrf.mxu1  ;;  %v10549_v0 = vsel %vm9764_vm9, 0, %v1162_v61  ;;  %15056 = vst [vmem:[#allocation166_spill] sm:$0xff] %v10555_v56 }
 0x196   : > { %v3145_v17 = vadd.f32 %v3144_v62, %v3095_v38  ;;  %v3242_v2 = vpop.f32.mrf.mxu3  ;;  %v1260_v8 = vsel %vm10179_vm0, %v1215_v35, 0  ;;  %v1261_v20 = vsel %vm10179_vm0, %v1217_v52, 0  ;;  %15055 = vst [vmem:[#allocation165_spill] sm:$0xff] %v10549_v0  ;;  %v8236_v35 = vld [vmem:[%s9261_s11 + $0x660] sm:$0xf] }
 0x197   : > { %v10559_v62 = vsel %vm10185_vm3, 0, %v1260_v8  ;;  %v8428_v8 = vld [vmem:[%s9261_s11 + $0x7e0] sm:$0xf] }
 0x198   : > { %v3194_v24 = vadd.f32 %v3193_v47, %v3145_v17  ;;  %15057 = vst [vmem:[#allocation167_spill] sm:$0xff] %v10559_v62  ;;  %v10563_v17 = vsel %vm10185_vm3, 0, %v1261_v20  ;;  %3391 = vmatmul.bf16.gmra.mxu2 %v10549_v0  ;;  %v8823_v47 = vld [vmem:[%s9261_s11 + $0x664] sm:$0xf0] }
 0x199   : > { %15058 = vst [vmem:[#allocation168_spill] sm:$0xff] %v10563_v17  ;;  %3440 = vmatmul.bf16.gmra.mxu3 %v10555_v56  ;;  %v8871_v20 = vld [vmem:[%s9261_s11 + $0x7e4] sm:$0xf0] }
 0x19a   : > { %v10551_v14 = vadd.f32 %v3242_v2, %v3194_v24  ;;  %v8364_v2 = vld [vmem:[%s9261_s11 + $0x760] sm:$0xf] }
 0x19b   : > { %v3196_v16 = vpop.f32.mrf.mxu2  ;;  %v10572_v61 = vor.u32 %v8855_v55, %v8364_v2 }
 0x19d   : > { %v3098_v30 = vpop.f32.mrf.mxu0  ;;  %v3147_v38 = vpop.f32.mrf.mxu1  ;;  %15059 = vst [vmem:[#allocation169_spill] sm:$0xff] %v10572_v61  ;;  %3741 = vmatpush.bf16.msrb.mxu2 %v10572_v61  ;;  %v8292_v61 = vld [vmem:[%s9261_s11 + $0x6d0] sm:$0xf] }
 0x19e   : > { %v3148_v24 = vadd.f32 %v3147_v38, %v3098_v30  ;;  %v3245_v52 = vpop.f32.mrf.mxu3  ;;  %v10577_v30 = vor.u32 %v8823_v47, %v8236_v35  ;;  %v10579_v38 = vor.u32 %v8871_v20, %v8428_v8 }
 0x1a0   : > { %3293 = vmatmul.bf16.gmra.mxu0 %v10559_v62  ;;  %3342 = vmatmul.bf16.gmra.mxu1 %v10563_v17  ;;  %v3197_v42 = vadd.f32 %v3196_v16, %v3148_v24  ;;  %15060 = vst [vmem:[#allocation170_spill] sm:$0xff] %v10577_v30  ;;  %v8839_v24 = vld [vmem:[%s9261_s11 + $0x6e4] sm:$0xf0] }
 0x1a1   : > { %15061 = vst [vmem:[#allocation171_spill] sm:$0xff] %v10579_v38  ;;  %3643 = vmatpush.bf16.msrb.mxu0 %v10577_v30  ;;  %3790 = vmatpush.bf16.msrb.mxu3 %v10579_v38  ;;  %v10588_v55 = vor.u32 %v8839_v24, %v8300_v26  ;;  %v8420_v30 = vld [vmem:[%s9261_s11 + $0x7d0] sm:$0xf]  ;;  %v8869_v38 = vld [vmem:[%s9261_s11 + $0x7d4] sm:$0xf0] }
 0x1a2   : > { %v10581_v51 = vadd.f32 %v3245_v52, %v3197_v42 }
 0x1a3   : > { %15062 = vst [vmem:[#allocation172_spill] sm:$0xff] %v10588_v55  ;;  %3692 = vmatpush.bf16.msrb.mxu1 %v10588_v55  ;;  %v3198_v35 = vpop.f32.mrf.mxu2  ;;  %v8821_v55 = vld [vmem:[%s9261_s11 + $0x654] sm:$0xf0] }
 0x1a5   : > { %v3100_v16 = vpop.f32.mrf.mxu0  ;;  %v3149_v2 = vpop.f32.mrf.mxu1 }
 0x1a6   : > { %v3150_v49 = vadd.f32 %v3149_v2, %v3100_v16  ;;  %v3247_v52 = vpop.f32.mrf.mxu3  ;;  %v8356_v16 = vld [vmem:[%s9261_s11 + $0x750] sm:$0xf]  ;;  %v8853_v2 = vld [vmem:[%s9261_s11 + $0x754] sm:$0xf0] }
 0x1a8   : > { %v3199_v42 = vadd.f32 %v3198_v35, %v3150_v49  ;;  %3552 = vmatmul.bf16.vlgmr.msra.gmra.mxu2 %v10243_v53  ;;  %v8228_v35 = vld [vmem:[%s9261_s11 + $0x650] sm:$0xf]  ;;  %v15093_v53 = vshrl.u32 %v10477_v23, 16 }
 0x1a9   : > { %3601 = vmatmul.bf16.vlgmr.msra.gmra.mxu3 %v10247_v13 }
 0x1aa   : > { %v10591_v47 = vadd.f32 %v3247_v52, %v3199_v42  ;;  %v10601_v52 = vor.u32 %v8853_v2, %v8356_v16 }
 0x1ab   : > { %v3357_v49 = vpop.f32.mrf.mxu2 }
 0x1ac   : > { %15063 = vst [vmem:[#allocation173_spill] sm:$0xff] %v10601_v52  ;;  %3742 = vmatpush.bf16.msrb.mxu2 %v10601_v52 }
 0x1ad   : > { %v3259_v8 = vpop.f32.mrf.mxu0  ;;  %v3308_v20 = vpop.f32.mrf.mxu1 }
 0x1ae   : > { %v3260_v26 = vadd.f32 %v3259_v8, %v10221_v27  ;;  %v3406_v42 = vpop.f32.mrf.mxu3  ;;  %v10606_v8 = vor.u32 %v8821_v55, %v8228_v35 }
 0x1b0   : > { %v3309_v24 = vadd.f32 %v3308_v20, %v3260_v26  ;;  %3454 = vmatmul.bf16.vlgmr.msra.gmra.mxu0 %v9734_v41  ;;  %3503 = vmatmul.bf16.vlgmr.msra.gmra.mxu1 %v9736_v5  ;;  %15064 = vst [vmem:[#allocation174_spill] sm:$0xff] %v10606_v8  ;;  %v10608_v20 = vor.u32 %v8869_v38, %v8420_v30  ;;  %v8837_v5 = vld [vmem:[%s9261_s11 + $0x6d4] sm:$0xf0] }
 0x1b1   : > { %3644 = vmatpush.bf16.msrb.mxu0 %v10606_v8  ;;  %v10617_v41 = vor.u32 %v8837_v5, %v8292_v61  ;;  %v8284_v8 = vld [vmem:[%s9261_s11 + $0x6c0] sm:$0xf] }
 0x1b2   : > { %v3358_v27 = vadd.f32 %v3357_v49, %v3309_v24  ;;  %15065 = vst [vmem:[#allocation175_spill] sm:$0xff] %v10608_v20  ;;  %3791 = vmatpush.bf16.msrb.mxu3 %v10608_v20  ;;  %v8835_v20 = vld [vmem:[%s9261_s11 + $0x6c4] sm:$0xf0] }
 0x1b3   : > { %15066 = vst [vmem:[#allocation176_spill] sm:$0xff] %v10617_v41  ;;  %3693 = vmatpush.bf16.msrb.mxu1 %v10617_v41  ;;  %v3359_v38 = vpop.f32.mrf.mxu2  ;;  %v8867_v41 = vld [vmem:[%s9261_s11 + $0x7c4] sm:$0xf0]  ;;  %v10647_v52 = vor.u32 %v8835_v20, %v8284_v8 }
 0x1b4   : > { %v10611_v26 = vadd.f32 %v3406_v42, %v3358_v27 }
 0x1b5   : > { %v3261_v16 = vpop.f32.mrf.mxu0  ;;  %v3310_v2 = vpop.f32.mrf.mxu1  ;;  %15070 = vst [vmem:[#allocation180_spill] sm:$0xff] %v10647_v52 }
 0x1b6   : > { %v3262_v24 = vadd.f32 %v3261_v16, %v10239_v12  ;;  %v3408_v55 = vpop.f32.mrf.mxu3  ;;  %v8348_v16 = vld [vmem:[%s9261_s11 + $0x740] sm:$0xf] }
 0x1b7   : > { %3694 = vmatpush.bf16.msrb.mxu1 %v10647_v52  ;;  %v8865_v52 = vld [vmem:[%s9261_s11 + $0x7b4] sm:$0xf0] }
 0x1b8   : > { %v3311_v30 = vadd.f32 %v3310_v2, %v3262_v24  ;;  %3557 = vmatmul.bf16.gmra.mxu2 %v10291_v54  ;;  %v8851_v2 = vld [vmem:[%s9261_s11 + $0x744] sm:$0xf0]  ;;  %v8220_v24 = vld [vmem:[%s9261_s11 + $0x640] sm:$0xf] }
 0x1b9   : > { %3606 = vmatmul.bf16.gmra.mxu3 %v10295_v18 }
 0x1ba   : > { %v3360_v49 = vadd.f32 %v3359_v38, %v3311_v30  ;;  %v10631_v38 = vor.u32 %v8851_v2, %v8348_v16 }
 0x1bb   : > { %v3362_v61 = vpop.f32.mrf.mxu2 }
 0x1bc   : > { %v10621_v35 = vadd.f32 %v3408_v55, %v3360_v49  ;;  %15067 = vst [vmem:[#allocation177_spill] sm:$0xff] %v10631_v38  ;;  %v8819_v55 = vld [vmem:[%s9261_s11 + $0x644] sm:$0xf0]  ;;  %v8412_v49 = vld [vmem:[%s9261_s11 + $0x7c0] sm:$0xf]  ;;  %3743 = vmatpush.bf16.msrb.mxu2 %v10631_v38 }
 0x1bd   : > { %v3264_v42 = vpop.f32.mrf.mxu0  ;;  %v3313_v27 = vpop.f32.mrf.mxu1 }
 0x1be   : > { %v3265_v5 = vadd.f32 %v3264_v42, %v10269_v48  ;;  %v3411_v30 = vpop.f32.mrf.mxu3  ;;  %v10636_v42 = vor.u32 %v8819_v55, %v8220_v24 }
 0x1c0   : > { %v3314_v12 = vadd.f32 %v3313_v27, %v3265_v5  ;;  %3459 = vmatmul.bf16.gmra.mxu0 %v9821_v34  ;;  %3508 = vmatmul.bf16.gmra.mxu1 %v9823_v63  ;;  %15068 = vst [vmem:[#allocation178_spill] sm:$0xff] %v10636_v42  ;;  %v10638_v27 = vor.u32 %v8867_v41, %v8412_v49 }
 0x1c1   : > { %3645 = vmatpush.bf16.msrb.mxu0 %v10636_v42  ;;  %v8276_v42 = vld [vmem:[%s9261_s11 + $0x6b0] sm:$0xf] }
 0x1c2   : > { %v3363_v48 = vadd.f32 %v3362_v61, %v3314_v12  ;;  %15069 = vst [vmem:[#allocation179_spill] sm:$0xff] %v10638_v27  ;;  %3792 = vmatpush.bf16.msrb.mxu3 %v10638_v27  ;;  %v8833_v27 = vld [vmem:[%s9261_s11 + $0x6b4] sm:$0xf0] }
 0x1c3   : > { %v3364_v61 = vpop.f32.mrf.mxu2  ;;  %v10677_v38 = vor.u32 %v8833_v27, %v8276_v42 }
 0x1c4   : > { %v10641_v5 = vadd.f32 %v3411_v30, %v3363_v48 }
 0x1c5   : > { %v3266_v16 = vpop.f32.mrf.mxu0  ;;  %v3315_v2 = vpop.f32.mrf.mxu1  ;;  %15074 = vst [vmem:[#allocation184_spill] sm:$0xff] %v10677_v38  ;;  %3695 = vmatpush.bf16.msrb.mxu1 %v10677_v38  ;;  %v8863_v38 = vld [vmem:[%s9261_s11 + $0x7a4] sm:$0xf0] }
 0x1c6   : > { %v3267_v12 = vadd.f32 %v3266_v16, %v10287_v31  ;;  %v3413_v24 = vpop.f32.mrf.mxu3  ;;  %v8340_v16 = vld [vmem:[%s9261_s11 + $0x730] sm:$0xf] }
 0x1c8   : > { %v3316_v41 = vadd.f32 %v3315_v2, %v3267_v12  ;;  %3562 = vmatmul.bf16.gmra.mxu2 %v10339_v22  ;;  %v8849_v2 = vld [vmem:[%s9261_s11 + $0x734] sm:$0xf0]  ;;  %v8212_v12 = vld [vmem:[%s9261_s11 + $0x630] sm:$0xf] }
 0x1c9   : > { %3611 = vmatmul.bf16.gmra.mxu3 %v10343_v37 }
 0x1ca   : > { %v3365_v30 = vadd.f32 %v3364_v61, %v3316_v41  ;;  %v10661_v61 = vor.u32 %v8849_v2, %v8340_v16 }
 0x1cb   : > { %v3367_v20 = vpop.f32.mrf.mxu2 }
 0x1cc   : > { %v10651_v55 = vadd.f32 %v3413_v24, %v3365_v30  ;;  %15071 = vst [vmem:[#allocation181_spill] sm:$0xff] %v10661_v61  ;;  %v8817_v24 = vld [vmem:[%s9261_s11 + $0x634] sm:$0xf0]  ;;  %v8404_v30 = vld [vmem:[%s9261_s11 + $0x7b0] sm:$0xf]  ;;  %3744 = vmatpush.bf16.msrb.mxu2 %v10661_v61 }
 0x1cd   : > { %v3269_v49 = vpop.f32.mrf.mxu0  ;;  %v3318_v48 = vpop.f32.mrf.mxu1 }
 0x1ce   : > { %v3270_v31 = vadd.f32 %v3269_v49, %v10317_v4  ;;  %v3416_v41 = vpop.f32.mrf.mxu3  ;;  %v10666_v49 = vor.u32 %v8817_v24, %v8212_v12 }
 0x1d0   : > { %v3319_v8 = vadd.f32 %v3318_v48, %v3270_v31  ;;  %3464 = vmatmul.bf16.gmra.mxu0 %v9869_v21  ;;  %3513 = vmatmul.bf16.gmra.mxu1 %v9875_v25  ;;  %15072 = vst [vmem:[#allocation182_spill] sm:$0xff] %v10666_v49  ;;  %v10668_v48 = vor.u32 %v8865_v52, %v8404_v30 }
 0x1d1   : > { %3646 = vmatpush.bf16.msrb.mxu0 %v10666_v49  ;;  %v8268_v49 = vld [vmem:[%s9261_s11 + $0x6a0] sm:$0xf] }
 0x1d2   : > { %v3368_v4 = vadd.f32 %v3367_v20, %v3319_v8  ;;  %15073 = vst [vmem:[#allocation183_spill] sm:$0xff] %v10668_v48  ;;  %3793 = vmatpush.bf16.msrb.mxu3 %v10668_v48  ;;  %v8831_v48 = vld [vmem:[%s9261_s11 + $0x6a4] sm:$0xf0] }
 0x1d3   : > { %v3369_v20 = vpop.f32.mrf.mxu2  ;;  %v10707_v61 = vor.u32 %v8831_v48, %v8268_v49 }
 0x1d4   : > { %v10671_v31 = vadd.f32 %v3416_v41, %v3368_v4 }
 0x1d5   : > { %v3271_v16 = vpop.f32.mrf.mxu0  ;;  %v3320_v2 = vpop.f32.mrf.mxu1  ;;  %15078 = vst [vmem:[#allocation188_spill] sm:$0xff] %v10707_v61  ;;  %3696 = vmatpush.bf16.msrb.mxu1 %v10707_v61  ;;  %v8861_v61 = vld [vmem:[%s9261_s11 + $0x794] sm:$0xf0] }
 0x1d6   : > { %v3272_v8 = vadd.f32 %v3271_v16, %v10335_v32  ;;  %v3418_v12 = vpop.f32.mrf.mxu3  ;;  %v8332_v16 = vld [vmem:[%s9261_s11 + $0x720] sm:$0xf] }
 0x1d8   : > { %v3321_v52 = vadd.f32 %v3320_v2, %v3272_v8  ;;  %3567 = vmatmul.bf16.gmra.mxu2 %v10387_v15  ;;  %v8847_v2 = vld [vmem:[%s9261_s11 + $0x724] sm:$0xf0]  ;;  %v8204_v8 = vld [vmem:[%s9261_s11 + $0x620] sm:$0xf] }
 0x1d9   : > { %3616 = vmatmul.bf16.gmra.mxu3 %v10391_v33 }
 0x1da   : > { %v3370_v41 = vadd.f32 %v3369_v20, %v3321_v52  ;;  %v10691_v20 = vor.u32 %v8847_v2, %v8332_v16 }
 0x1db   : > { %v3372_v27 = vpop.f32.mrf.mxu2 }
 0x1dc   : > { %v10681_v24 = vadd.f32 %v3418_v12, %v3370_v41  ;;  %15075 = vst [vmem:[#allocation185_spill] sm:$0xff] %v10691_v20  ;;  %v8815_v12 = vld [vmem:[%s9261_s11 + $0x624] sm:$0xf0]  ;;  %v8396_v41 = vld [vmem:[%s9261_s11 + $0x7a0] sm:$0xf]  ;;  %3745 = vmatpush.bf16.msrb.mxu2 %v10691_v20 }
 0x1dd   : > { %v3274_v30 = vpop.f32.mrf.mxu0  ;;  %v3323_v4 = vpop.f32.mrf.mxu1 }
 0x1de   : > { %v3275_v32 = vadd.f32 %v3274_v30, %v10365_v45  ;;  %v3421_v52 = vpop.f32.mrf.mxu3  ;;  %v10696_v30 = vor.u32 %v8815_v12, %v8204_v8 }
 0x1e0   : > { %v3324_v42 = vadd.f32 %v3323_v4, %v3275_v32  ;;  %3469 = vmatmul.bf16.gmra.mxu0 %v9921_v50  ;;  %3518 = vmatmul.bf16.gmra.mxu1 %v9927_v1  ;;  %15076 = vst [vmem:[#allocation186_spill] sm:$0xff] %v10696_v30  ;;  %v10698_v4 = vor.u32 %v8863_v38, %v8396_v41 }
 0x1e1   : > { %3647 = vmatpush.bf16.msrb.mxu0 %v10696_v30  ;;  %v8260_v30 = vld [vmem:[%s9261_s11 + $0x690] sm:$0xf] }
 0x1e2   : > { %v3373_v45 = vadd.f32 %v3372_v27, %v3324_v42  ;;  %15077 = vst [vmem:[#allocation187_spill] sm:$0xff] %v10698_v4  ;;  %3794 = vmatpush.bf16.msrb.mxu3 %v10698_v4  ;;  %v8829_v4 = vld [vmem:[%s9261_s11 + $0x694] sm:$0xf0] }
 0x1e3   : > { %v3374_v27 = vpop.f32.mrf.mxu2  ;;  %v10737_v20 = vor.u32 %v8829_v4, %v8260_v30 }
 0x1e4   : > { %v10701_v32 = vadd.f32 %v3421_v52, %v3373_v45 }
 0x1e5   : > { %v3276_v16 = vpop.f32.mrf.mxu0  ;;  %v3325_v2 = vpop.f32.mrf.mxu1  ;;  %15082 = vst [vmem:[#allocation192_spill] sm:$0xff] %v10737_v20  ;;  %3697 = vmatpush.bf16.msrb.mxu1 %v10737_v20  ;;  %v8859_v20 = vld [vmem:[%s9261_s11 + $0x784] sm:$0xf0] }
 0x1e6   : > { %v3277_v42 = vadd.f32 %v3276_v16, %v10383_v29  ;;  %v3423_v8 = vpop.f32.mrf.mxu3  ;;  %v8324_v16 = vld [vmem:[%s9261_s11 + $0x710] sm:$0xf] }
 0x1e8   : > { %v3326_v38 = vadd.f32 %v3325_v2, %v3277_v42  ;;  %3572 = vmatmul.bf16.gmra.mxu2 %v10435_v57  ;;  %v8845_v2 = vld [vmem:[%s9261_s11 + $0x714] sm:$0xf0]  ;;  %v8196_v42 = vld [vmem:[%s9261_s11 + $0x610] sm:$0xf] }
 0x1e9   : > { %3621 = vmatmul.bf16.gmra.mxu3 %v10439_v43 }
 0x1ea   : > { %v3375_v52 = vadd.f32 %v3374_v27, %v3326_v38  ;;  %v10721_v27 = vor.u32 %v8845_v2, %v8324_v16 }
 0x1eb   : > { %v3377_v48 = vpop.f32.mrf.mxu2 }
 0x1ec   : > { %v10711_v12 = vadd.f32 %v3423_v8, %v3375_v52  ;;  %15079 = vst [vmem:[#allocation189_spill] sm:$0xff] %v10721_v27  ;;  %v8813_v8 = vld [vmem:[%s9261_s11 + $0x614] sm:$0xf0]  ;;  %v8388_v52 = vld [vmem:[%s9261_s11 + $0x790] sm:$0xf]  ;;  %3746 = vmatpush.bf16.msrb.mxu2 %v10721_v27 }
 0x1ed   : > { %v3279_v41 = vpop.f32.mrf.mxu0  ;;  %v3328_v45 = vpop.f32.mrf.mxu1 }
 0x1ee   : > { %v3280_v29 = vadd.f32 %v3279_v41, %v10413_v9  ;;  %v3426_v38 = vpop.f32.mrf.mxu3  ;;  %v10726_v41 = vor.u32 %v8813_v8, %v8196_v42 }
 0x1f0   : > { %v3329_v49 = vadd.f32 %v3328_v45, %v3280_v29  ;;  %3474 = vmatmul.bf16.gmra.mxu0 %v9973_v40  ;;  %3523 = vmatmul.bf16.gmra.mxu1 %v9979_v46  ;;  %15080 = vst [vmem:[#allocation190_spill] sm:$0xff] %v10726_v41  ;;  %v10728_v45 = vor.u32 %v8861_v61, %v8388_v52 }
 0x1f1   : > { %3648 = vmatpush.bf16.msrb.mxu0 %v10726_v41  ;;  %v8252_v41 = vld [vmem:[%s9261_s11 + $0x680] sm:$0xf] }
 0x1f2   : > { %v3378_v9 = vadd.f32 %v3377_v48, %v3329_v49  ;;  %15081 = vst [vmem:[#allocation191_spill] sm:$0xff] %v10728_v45  ;;  %3795 = vmatpush.bf16.msrb.mxu3 %v10728_v45  ;;  %v8827_v45 = vld [vmem:[%s9261_s11 + $0x684] sm:$0xf0] }
 0x1f3   : > { %v3379_v48 = vpop.f32.mrf.mxu2  ;;  %v10767_v27 = vor.u32 %v8827_v45, %v8252_v41  ;;  %v15087_v41 = vshll.u32 %v10475_v28, 16 }
 0x1f4   : > { %v10731_v29 = vadd.f32 %v3426_v38, %v3378_v9 }
 0x1f5   : > { %v3281_v16 = vpop.f32.mrf.mxu0  ;;  %v3330_v2 = vpop.f32.mrf.mxu1  ;;  %15086 = vst [vmem:[#allocation196_spill] sm:$0xff] %v10767_v27  ;;  %3698 = vmatpush.bf16.msrb.mxu1 %v10767_v27  ;;  %v1218_v45 = vrot.slane %v15087_v41, 1  ;;  %v8889_v27 = vld [vmem:[%s9261_s11 + $0x874] sm:$0xf0]  ;;  %v7542_v41 = vld [vmem:[%s9261_s11 + $0xf8] sm:$0xf0] }
 0x1f6   : > { %v3282_v49 = vadd.f32 %v3281_v16, %v10431_v59  ;;  %v3428_v42 = vpop.f32.mrf.mxu3  ;;  %v8316_v16 = vld [vmem:[%s9261_s11 + $0x700] sm:$0xf] }
 0x1f8   : > { %v3331_v61 = vadd.f32 %v3330_v2, %v3282_v49  ;;  %3577 = vmatmul.bf16.gmra.mxu2 %v10489_v3  ;;  %v8843_v2 = vld [vmem:[%s9261_s11 + $0x704] sm:$0xf0]  ;;  %v8188_v49 = vld [vmem:[%s9261_s11 + $0x600] sm:$0xf] }
 0x1f9   : > { %3626 = vmatmul.bf16.gmra.mxu3 %v10493_v11 }
 0x1fa   : > { %v3380_v38 = vadd.f32 %v3379_v48, %v3331_v61  ;;  %v10751_v48 = vor.u32 %v8843_v2, %v8316_v16 }
 0x1fb   : > { %v3382_v4 = vpop.f32.mrf.mxu2 }
 0x1fc   : > { %v10741_v8 = vadd.f32 %v3428_v42, %v3380_v38  ;;  %15083 = vst [vmem:[#allocation193_spill] sm:$0xff] %v10751_v48  ;;  %v8811_v42 = vld [vmem:[%s9261_s11 + $0x604] sm:$0xf0]  ;;  %v8380_v38 = vld [vmem:[%s9261_s11 + $0x780] sm:$0xf]  ;;  %3747 = vmatpush.bf16.msrb.mxu2 %v10751_v48 }
 0x1fd   : > { %v3284_v52 = vpop.f32.mrf.mxu0  ;;  %v3333_v9 = vpop.f32.mrf.mxu1 }
 0x1fe   : > { %v3285_v59 = vadd.f32 %v3284_v52, %v10459_v58  ;;  %v3431_v61 = vpop.f32.mrf.mxu3  ;;  %v10756_v52 = vor.u32 %v8811_v42, %v8188_v49 }
 0x200   : > { %v3334_v30 = vadd.f32 %v3333_v9, %v3285_v59  ;;  %3479 = vmatmul.bf16.gmra.mxu0 %v10025_v10  ;;  %3528 = vmatmul.bf16.gmra.mxu1 %v10031_v7  ;;  %15084 = vst [vmem:[#allocation194_spill] sm:$0xff] %v10756_v52  ;;  %v10758_v9 = vor.u32 %v8859_v20, %v8380_v38 }
 0x201   : > { %3649 = vmatpush.bf16.msrb.mxu0 %v10756_v52  ;;  %v8648_v52 = vld [vmem:[%s9261_s11 + $0xf4] sm:$0xf] }
 0x202   : > { %v3383_v58 = vadd.f32 %v3382_v4, %v3334_v30  ;;  %15085 = vst [vmem:[#allocation195_spill] sm:$0xff] %v10758_v9  ;;  %3796 = vmatpush.bf16.msrb.mxu3 %v10758_v9 }
 0x203   : > { %v3384_v4 = vpop.f32.mrf.mxu2 }
 0x204   : > { %v10761_v59 = vadd.f32 %v3431_v61, %v3383_v58 }
 0x205   : > { %v3286_v16 = vpop.f32.mrf.mxu0  ;;  %v3335_v2 = vpop.f32.mrf.mxu1 }
 0x206   : > { %v3287_v30 = vadd.f32 %v3286_v16, %v10483_v44  ;;  %v3433_v49 = vpop.f32.mrf.mxu3  ;;  %v15088_v16 = vshll.u32 %v10477_v23, 16 }
 0x208   : > { %v3336_v20 = vadd.f32 %v3335_v2, %v3287_v30  ;;  %3582 = vmatmul.bf16.gmra.mxu2 %v10559_v62  ;;  %v1220_v2 = vrot.slane %v15088_v16, 1 }
 0x209   : > { %3631 = vmatmul.bf16.gmra.mxu3 %v10563_v17 }
 0x20a   : > { %v3385_v61 = vadd.f32 %v3384_v4, %v3336_v20  ;;  %v8632_v4 = vld [vmem:[%s9261_s11 + $0x74] sm:$0xf]  ;;  %v1221_v17 = vor.u32 %v1220_v2, %v15093_v53 }
 0x20b   : > { %v3387_v20 = vpop.f32.mrf.mxu2 }
 0x20c   : > { %v10771_v42 = vadd.f32 %v3433_v49, %v3385_v61  ;;  %v7478_v49 = vld [vmem:[%s9261_s11 + $0x78] sm:$0xf0]  ;;  %v8500_v61 = vld [vmem:[%s9261_s11 + $0x870] sm:$0xf]  ;;  %v1263_v53 = vsel %vm10179_vm0, %v1221_v17, 0 }
 0x20d   : > { %v3289_v38 = vpop.f32.mrf.mxu0  ;;  %v3338_v58 = vpop.f32.mrf.mxu1  ;;  %v10790_v48 = vor.u32 %v8889_v27, %v8500_v61 }
 0x20e   : > { %v3290_v44 = vadd.f32 %v3289_v38, %v10521_v19  ;;  %v3436_v19 = vpop.f32.mrf.mxu3  ;;  %v10785_v38 = vor.u32 %v8632_v4, %v7478_v49  ;;  %v8564_v4 = vld [vmem:[%s9261_s11 + $0x8f0] sm:$0xf] }
 0x20f   : > { %15090 = vst [vmem:[#allocation198_spill] sm:$0xff] %v10790_v48  ;;  %3838 = vmatpush.bf16.msra.mxu0 %v10790_v48  ;;  %v8903_v48 = vld [vmem:[%s9261_s11 + $0x8e4] sm:$0xf0] }
 0x210   : > { %v3339_v30 = vadd.f32 %v3338_v58, %v3290_v44  ;;  %3484 = vmatmul.bf16.gmra.mxu0 %v10081_v6  ;;  %3533 = vmatmul.bf16.gmra.mxu1 %v10083_v36  ;;  %15089 = vst [vmem:[#allocation197_spill] sm:$0xff] %v10785_v38  ;;  %v10792_v58 = vor.u32 %v8648_v52, %v7542_v41  ;;  %v15092_v44 = vshrl.u32 %v10475_v28, 16 }
 0x211   : > { %3936 = vmatpush.bf16.msra.mxu2 %v10785_v38  ;;  %v8901_v38 = vld [vmem:[%s9261_s11 + $0x8d4] sm:$0xf0] }
 0x212   : > { %v3388_v9 = vadd.f32 %v3387_v20, %v3339_v30  ;;  %15091 = vst [vmem:[#allocation199_spill] sm:$0xff] %v10792_v58  ;;  %v1219_v16 = vor.u32 %v1218_v45, %v15092_v44  ;;  %3985 = vmatpush.bf16.msra.mxu3 %v10792_v58  ;;  %v8905_v30 = vld [vmem:[%s9261_s11 + $0x8f4] sm:$0xf0] }
 0x213   : > { %v10805_v52 = vor.u32 %v8905_v30, %v8564_v4  ;;  %v3389_v61 = vpop.f32.mrf.mxu2 }
 0x214   : > { %v10797_v13 = vadd.f32 %v3436_v19, %v3388_v9  ;;  %v1262_v45 = vsel %vm10179_vm0, %v1219_v16, 0 }
 0x215   : > { %v3291_v27 = vpop.f32.mrf.mxu0  ;;  %v3340_v20 = vpop.f32.mrf.mxu1  ;;  %15094 = vst [vmem:[#allocation200_spill] sm:$0xff] %v10805_v52  ;;  %3887 = vmatpush.bf16.msra.mxu1 %v10805_v52  ;;  %v10815_v41 = vsel %vm10185_vm3, 0, %v1262_v45  ;;  %v8492_v45 = vld [vmem:[%s9261_s11 + $0x860] sm:$0xf] }
 0x216   : > { %v3292_v49 = vadd.f32 %v3291_v27, %v10551_v14  ;;  %v3438_v2 = vpop.f32.mrf.mxu3  ;;  %15095 = vst [vmem:[#allocation201_spill] sm:$0xff] %v10815_v41  ;;  %v10819_v14 = vsel %vm10185_vm3, 0, %v1263_v53  ;;  %v8887_v53 = vld [vmem:[%s9261_s11 + $0x864] sm:$0xf0]  ;;  %v8556_v52 = vld [vmem:[%s9261_s11 + $0x8e0] sm:$0xf] }
 0x217   : > { %15096 = vst [vmem:[#allocation202_spill] sm:$0xff] %v10819_v14  ;;  %v10847_v58 = vor.u32 %v8903_v48, %v8556_v52  ;;  %v15101_v52 = vld [vmem:[#allocation79_spill] sm:$0xff] }
 0x218   : > { %v3341_v9 = vadd.f32 %v3340_v20, %v3292_v49  ;;  %3587 = vmatmul.bf16.gmra.mxu2 %v10815_v41  ;;  %v8630_v20 = vld [vmem:[%s9261_s11 + $0x64] sm:$0xf]  ;;  %v7470_v49 = vld [vmem:[%s9261_s11 + $0x68] sm:$0xf0] }
 0x219   : > { %3636 = vmatmul.bf16.gmra.mxu3 %v10819_v14  ;;  %15100 = vst [vmem:[#allocation206_spill] sm:$0xff] %v10847_v58  ;;  %3888 = vmatpush.bf16.msra.mxu1 %v10847_v58  ;;  %v8885_v58 = vld [vmem:[%s9261_s11 + $0x854] sm:$0xf0] }
 0x21a   : > { %v3390_v19 = vadd.f32 %v3389_v61, %v3341_v9  ;;  %v10831_v61 = vor.u32 %v8630_v20, %v7470_v49 }
 0x21b   : > { %v3392_v27 = vpop.f32.mrf.mxu2 }
 0x21c   : > { %v10821_v44 = vadd.f32 %v3438_v2, %v3390_v19  ;;  %15097 = vst [vmem:[#allocation203_spill] sm:$0xff] %v10831_v61  ;;  %v8646_v2 = vld [vmem:[%s9261_s11 + $0xe4] sm:$0xf]  ;;  %v7534_v19 = vld [vmem:[%s9261_s11 + $0xe8] sm:$0xf0]  ;;  %3937 = vmatpush.bf16.msra.mxu2 %v10831_v61 }
 0x21d   : > { %v3294_v16 = vpop.f32.mrf.mxu0  ;;  %v3343_v4 = vpop.f32.mrf.mxu1  ;;  %v8548_v61 = vld [vmem:[%s9261_s11 + $0x8d0] sm:$0xf] }
 0x21e   : > { %v3295_v17 = vadd.f32 %v3294_v16, %v10581_v51  ;;  %v3441_v9 = vpop.f32.mrf.mxu3  ;;  %v10836_v16 = vor.u32 %v8887_v53, %v8492_v45 }
 0x220   : > { %v3344_v30 = vadd.f32 %v3343_v4, %v3295_v17  ;;  %3489 = vmatmul.bf16.gmra.mxu0 %v10475_v28  ;;  %3538 = vmatmul.bf16.gmra.mxu1 %v10477_v23  ;;  %15098 = vst [vmem:[#allocation204_spill] sm:$0xff] %v10836_v16  ;;  %v10838_v4 = vor.u32 %v8646_v2, %v7534_v19 }
 0x221   : > { %3839 = vmatpush.bf16.msra.mxu0 %v10836_v16  ;;  %v8644_v16 = vld [vmem:[%s9261_s11 + $0xd4] sm:$0xf] }
 0x222   : > { %v3393_v51 = vadd.f32 %v3392_v27, %v3344_v30  ;;  %15099 = vst [vmem:[#allocation205_spill] sm:$0xff] %v10838_v4  ;;  %3986 = vmatpush.bf16.msra.mxu3 %v10838_v4  ;;  %v7526_v4 = vld [vmem:[%s9261_s11 + $0xd8] sm:$0xf0] }
 0x223   : > { %v3394_v45 = vpop.f32.mrf.mxu2 }
 0x224   : > { %v10841_v17 = vadd.f32 %v3441_v9, %v3393_v51 }
 0x225   : > { %v3296_v20 = vpop.f32.mrf.mxu0  ;;  %v3345_v49 = vpop.f32.mrf.mxu1 }
 0x226   : > { %v3297_v30 = vadd.f32 %v3296_v20, %v10591_v47  ;;  %v3443_v9 = vpop.f32.mrf.mxu3  ;;  %v15102_v20 = vld [vmem:[#allocation80_spill] sm:$0xff] }
 0x228   : > { %v3346_v27 = vadd.f32 %v3345_v49, %v3297_v30  ;;  %3748 = vmatmul.bf16.vlgmr.msrb.gmra.mxu2 %v9821_v34  ;;  %v8628_v30 = vld [vmem:[%s9261_s11 + $0x54] sm:$0xf] }
 0x229   : > { %3797 = vmatmul.bf16.vlgmr.msrb.gmra.mxu3 %v9823_v63  ;;  %v10877_v63 = vor.u32 %v8901_v38, %v8548_v61  ;;  %v15107_v61 = vld [vmem:[#allocation87_spill] sm:$0xff] }
 0x22a   : > { %v3395_v53 = vadd.f32 %v3394_v45, %v3346_v27  ;;  %v7462_v27 = vld [vmem:[%s9261_s11 + $0x58] sm:$0xf0]  ;;  %v8484_v45 = vld [vmem:[%s9261_s11 + $0x850] sm:$0xf] }
 0x22b   : > { %v3553_v49 = vpop.f32.mrf.mxu2  ;;  %15106 = vst [vmem:[#allocation208_spill] sm:$0xff] %v10877_v63  ;;  %3889 = vmatpush.bf16.msra.mxu1 %v10877_v63  ;;  %v8883_v63 = vld [vmem:[%s9261_s11 + $0x844] sm:$0xf0] }
 0x22c   : > { %v10851_v2 = vadd.f32 %v3443_v9, %v3395_v53  ;;  %v10861_v53 = vor.u32 %v8628_v30, %v7462_v27 }
 0x22d   : > { %v3455_v19 = vpop.f32.mrf.mxu0  ;;  %v3504_v51 = vpop.f32.mrf.mxu1 }
 0x22e   : > { %v3456_v47 = vadd.f32 %v3455_v19, %v10611_v26  ;;  %v3602_v9 = vpop.f32.mrf.mxu3  ;;  %15103 = vst [vmem:[#allocation79_spill] sm:$0xff] %v10861_v53  ;;  %v10866_v19 = vor.u32 %v8885_v58, %v8484_v45  ;;  %3938 = vmatpush.bf16.msra.mxu2 %v10861_v53  ;;  %v8540_v53 = vld [vmem:[%s9261_s11 + $0x8c0] sm:$0xf] }
 0x230   : > { %v3505_v48 = vadd.f32 %v3504_v51, %v3456_v47  ;;  %3650 = vmatmul.bf16.vlgmr.msrb.gmra.mxu0 %v15101_v52  ;;  %3699 = vmatmul.bf16.vlgmr.msrb.gmra.mxu1 %v15102_v20  ;;  %15104 = vst [vmem:[#allocation80_spill] sm:$0xff] %v10866_v19  ;;  %v10868_v51 = vor.u32 %v8644_v16, %v7526_v4 }
 0x231   : > { %3840 = vmatpush.bf16.msra.mxu0 %v10866_v19  ;;  %v8642_v19 = vld [vmem:[%s9261_s11 + $0xc4] sm:$0xf] }
 0x232   : > { %v3554_v26 = vadd.f32 %v3553_v49, %v3505_v48  ;;  %15105 = vst [vmem:[#allocation207_spill] sm:$0xff] %v10868_v51  ;;  %3987 = vmatpush.bf16.msra.mxu3 %v10868_v51  ;;  %v7518_v51 = vld [vmem:[%s9261_s11 + $0xc8] sm:$0xf0] }
 0x233   : > { %v3555_v16 = vpop.f32.mrf.mxu2 }
 0x234   : > { %v10871_v47 = vadd.f32 %v3602_v9, %v3554_v26 }
 0x235   : > { %v3457_v30 = vpop.f32.mrf.mxu0  ;;  %v3506_v27 = vpop.f32.mrf.mxu1 }
 0x236   : > { %v3458_v48 = vadd.f32 %v3457_v30, %v10621_v35  ;;  %v3604_v4 = vpop.f32.mrf.mxu3  ;;  %v15108_v30 = vld [vmem:[#allocation88_spill] sm:$0xff] }
 0x238   : > { %v3507_v58 = vadd.f32 %v3506_v27, %v3458_v48  ;;  %3753 = vmatmul.bf16.gmra.mxu2 %v9869_v21  ;;  %v8626_v48 = vld [vmem:[%s9261_s11 + $0x44] sm:$0xf] }
 0x239   : > { %3802 = vmatmul.bf16.gmra.mxu3 %v9875_v25  ;;  %v8899_v25 = vld [vmem:[%s9261_s11 + $0x8c4] sm:$0xf0] }
 0x23a   : > { %v3556_v49 = vadd.f32 %v3555_v16, %v3507_v58  ;;  %v7454_v58 = vld [vmem:[%s9261_s11 + $0x48] sm:$0xf0]  ;;  %v8476_v16 = vld [vmem:[%s9261_s11 + $0x840] sm:$0xf]  ;;  %v10907_v21 = vor.u32 %v8899_v25, %v8540_v53  ;;  %v15113_v53 = vld [vmem:[#allocation95_spill] sm:$0xff] }
 0x23b   : > { %v3558_v27 = vpop.f32.mrf.mxu2 }
 0x23c   : > { %v10881_v45 = vadd.f32 %v3604_v4, %v3556_v49  ;;  %v10891_v49 = vor.u32 %v8626_v48, %v7454_v58  ;;  %15112 = vst [vmem:[#allocation210_spill] sm:$0xff] %v10907_v21  ;;  %3890 = vmatpush.bf16.msra.mxu1 %v10907_v21  ;;  %v8881_v21 = vld [vmem:[%s9261_s11 + $0x834] sm:$0xf0] }
 0x23d   : > { %v3460_v9 = vpop.f32.mrf.mxu0  ;;  %v3509_v26 = vpop.f32.mrf.mxu1 }
 0x23e   : > { %v3461_v35 = vadd.f32 %v3460_v9, %v10641_v5  ;;  %v3607_v4 = vpop.f32.mrf.mxu3  ;;  %15109 = vst [vmem:[#allocation87_spill] sm:$0xff] %v10891_v49  ;;  %v10896_v9 = vor.u32 %v8883_v63, %v8476_v16  ;;  %3939 = vmatpush.bf16.msra.mxu2 %v10891_v49  ;;  %v8532_v49 = vld [vmem:[%s9261_s11 + $0x8b0] sm:$0xf] }
 0x240   : > { %v3510_v38 = vadd.f32 %v3509_v26, %v3461_v35  ;;  %3655 = vmatmul.bf16.gmra.mxu0 %v15107_v61  ;;  %3704 = vmatmul.bf16.gmra.mxu1 %v15108_v30  ;;  %15110 = vst [vmem:[#allocation88_spill] sm:$0xff] %v10896_v9  ;;  %v10898_v26 = vor.u32 %v8642_v19, %v7518_v51 }
 0x241   : > { %3841 = vmatpush.bf16.msra.mxu0 %v10896_v9  ;;  %v8640_v9 = vld [vmem:[%s9261_s11 + $0xb4] sm:$0xf] }
 0x242   : > { %v3559_v5 = vadd.f32 %v3558_v27, %v3510_v38  ;;  %15111 = vst [vmem:[#allocation209_spill] sm:$0xff] %v10898_v26  ;;  %3988 = vmatpush.bf16.msra.mxu3 %v10898_v26  ;;  %v7510_v26 = vld [vmem:[%s9261_s11 + $0xb8] sm:$0xf0] }
 0x243   : > { %v3560_v19 = vpop.f32.mrf.mxu2 }
 0x244   : > { %v10901_v35 = vadd.f32 %v3607_v4, %v3559_v5 }
 0x245   : > { %v3462_v48 = vpop.f32.mrf.mxu0  ;;  %v3511_v58 = vpop.f32.mrf.mxu1 }
 0x246   : > { %v3463_v38 = vadd.f32 %v3462_v48, %v10651_v55  ;;  %v3609_v51 = vpop.f32.mrf.mxu3  ;;  %v15114_v48 = vld [vmem:[#allocation96_spill] sm:$0xff] }
 0x248   : > { %v3512_v63 = vadd.f32 %v3511_v58, %v3463_v38  ;;  %3758 = vmatmul.bf16.gmra.mxu2 %v9921_v50  ;;  %v8624_v38 = vld [vmem:[%s9261_s11 + $0x34] sm:$0xf] }
 0x249   : > { %3807 = vmatmul.bf16.gmra.mxu3 %v9927_v1  ;;  %v8897_v1 = vld [vmem:[%s9261_s11 + $0x8b4] sm:$0xf0] }
 0x24a   : > { %v3561_v27 = vadd.f32 %v3560_v19, %v3512_v63  ;;  %v7446_v63 = vld [vmem:[%s9261_s11 + $0x38] sm:$0xf0]  ;;  %v8468_v19 = vld [vmem:[%s9261_s11 + $0x830] sm:$0xf]  ;;  %v10937_v50 = vor.u32 %v8897_v1, %v8532_v49 }
 0x24b   : > { %v3563_v58 = vpop.f32.mrf.mxu2  ;;  %v15119_v49 = vld [vmem:[#allocation103_spill] sm:$0xff] }
 0x24c   : > { %v10911_v16 = vadd.f32 %v3609_v51, %v3561_v27  ;;  %v10921_v27 = vor.u32 %v8624_v38, %v7446_v63  ;;  %15118 = vst [vmem:[#allocation212_spill] sm:$0xff] %v10937_v50  ;;  %3891 = vmatpush.bf16.msra.mxu1 %v10937_v50  ;;  %v8879_v50 = vld [vmem:[%s9261_s11 + $0x824] sm:$0xf0] }
 0x24d   : > { %v3465_v4 = vpop.f32.mrf.mxu0  ;;  %v3514_v5 = vpop.f32.mrf.mxu1 }
 0x24e   : > { %v3466_v25 = vadd.f32 %v3465_v4, %v10671_v31  ;;  %v3612_v51 = vpop.f32.mrf.mxu3  ;;  %15115 = vst [vmem:[#allocation95_spill] sm:$0xff] %v10921_v27  ;;  %v10926_v4 = vor.u32 %v8881_v21, %v8468_v19  ;;  %3940 = vmatpush.bf16.msra.mxu2 %v10921_v27  ;;  %v8524_v27 = vld [vmem:[%s9261_s11 + $0x8a0] sm:$0xf] }
 0x250   : > { %v3515_v55 = vadd.f32 %v3514_v5, %v3466_v25  ;;  %3660 = vmatmul.bf16.gmra.mxu0 %v15113_v53  ;;  %3709 = vmatmul.bf16.gmra.mxu1 %v15114_v48  ;;  %15116 = vst [vmem:[#allocation96_spill] sm:$0xff] %v10926_v4  ;;  %v10928_v5 = vor.u32 %v8640_v9, %v7510_v26 }
 0x251   : > { %3842 = vmatpush.bf16.msra.mxu0 %v10926_v4  ;;  %v8638_v4 = vld [vmem:[%s9261_s11 + $0xa4] sm:$0xf] }
 0x252   : > { %v3564_v31 = vadd.f32 %v3563_v58, %v3515_v55  ;;  %15117 = vst [vmem:[#allocation211_spill] sm:$0xff] %v10928_v5  ;;  %3989 = vmatpush.bf16.msra.mxu3 %v10928_v5  ;;  %v7502_v5 = vld [vmem:[%s9261_s11 + $0xa8] sm:$0xf0] }
 0x253   : > { %v3565_v9 = vpop.f32.mrf.mxu2 }
 0x254   : > { %v10931_v25 = vadd.f32 %v3612_v51, %v3564_v31 }
 0x255   : > { %v3467_v38 = vpop.f32.mrf.mxu0  ;;  %v3516_v63 = vpop.f32.mrf.mxu1 }
 0x256   : > { %v3468_v55 = vadd.f32 %v3467_v38, %v10681_v24  ;;  %v3614_v26 = vpop.f32.mrf.mxu3  ;;  %v15120_v38 = vld [vmem:[#allocation104_spill] sm:$0xff] }
 0x258   : > { %v3517_v21 = vadd.f32 %v3516_v63, %v3468_v55  ;;  %3763 = vmatmul.bf16.gmra.mxu2 %v9973_v40  ;;  %v8622_v55 = vld [vmem:[%s9261_s11 + $0x24] sm:$0xf] }
 0x259   : > { %3812 = vmatmul.bf16.gmra.mxu3 %v9979_v46  ;;  %v8895_v46 = vld [vmem:[%s9261_s11 + $0x8a4] sm:$0xf0] }
 0x25a   : > { %v3566_v58 = vadd.f32 %v3565_v9, %v3517_v21  ;;  %v7438_v21 = vld [vmem:[%s9261_s11 + $0x28] sm:$0xf0]  ;;  %v8460_v9 = vld [vmem:[%s9261_s11 + $0x820] sm:$0xf]  ;;  %v10967_v40 = vor.u32 %v8895_v46, %v8524_v27  ;;  %v15125_v27 = vld [vmem:[#allocation111_spill] sm:$0xff] }
 0x25b   : > { %v3568_v63 = vpop.f32.mrf.mxu2 }
 0x25c   : > { %v10941_v19 = vadd.f32 %v3614_v26, %v3566_v58  ;;  %v10951_v58 = vor.u32 %v8622_v55, %v7438_v21  ;;  %15124 = vst [vmem:[#allocation214_spill] sm:$0xff] %v10967_v40  ;;  %3892 = vmatpush.bf16.msra.mxu1 %v10967_v40  ;;  %v8877_v40 = vld [vmem:[%s9261_s11 + $0x814] sm:$0xf0] }
 0x25d   : > { %v3470_v51 = vpop.f32.mrf.mxu0  ;;  %v3519_v31 = vpop.f32.mrf.mxu1 }
 0x25e   : > { %v3471_v1 = vadd.f32 %v3470_v51, %v10701_v32  ;;  %v3617_v26 = vpop.f32.mrf.mxu3  ;;  %15121 = vst [vmem:[#allocation103_spill] sm:$0xff] %v10951_v58  ;;  %v10956_v51 = vor.u32 %v8879_v50, %v8460_v9  ;;  %3941 = vmatpush.bf16.msra.mxu2 %v10951_v58  ;;  %v8516_v58 = vld [vmem:[%s9261_s11 + $0x890] sm:$0xf] }
 0x260   : > { %v3520_v24 = vadd.f32 %v3519_v31, %v3471_v1  ;;  %3665 = vmatmul.bf16.gmra.mxu0 %v15119_v49  ;;  %3714 = vmatmul.bf16.gmra.mxu1 %v15120_v38  ;;  %15122 = vst [vmem:[#allocation104_spill] sm:$0xff] %v10956_v51  ;;  %v10958_v31 = vor.u32 %v8638_v4, %v7502_v5 }
 0x261   : > { %3843 = vmatpush.bf16.msra.mxu0 %v10956_v51  ;;  %v8636_v51 = vld [vmem:[%s9261_s11 + $0x94] sm:$0xf] }
 0x262   : > { %v3569_v32 = vadd.f32 %v3568_v63, %v3520_v24  ;;  %15123 = vst [vmem:[#allocation213_spill] sm:$0xff] %v10958_v31  ;;  %3990 = vmatpush.bf16.msra.mxu3 %v10958_v31  ;;  %v7494_v31 = vld [vmem:[%s9261_s11 + $0x98] sm:$0xf0] }
 0x263   : > { %v3570_v4 = vpop.f32.mrf.mxu2 }
 0x264   : > { %v10961_v1 = vadd.f32 %v3617_v26, %v3569_v32 }
 0x265   : > { %v3472_v55 = vpop.f32.mrf.mxu0  ;;  %v3521_v21 = vpop.f32.mrf.mxu1 }
 0x266   : > { %v3473_v24 = vadd.f32 %v3472_v55, %v10711_v12  ;;  %v3619_v5 = vpop.f32.mrf.mxu3  ;;  %v15126_v55 = vld [vmem:[#allocation112_spill] sm:$0xff] }
 0x268   : > { %v3522_v50 = vadd.f32 %v3521_v21, %v3473_v24  ;;  %3768 = vmatmul.bf16.gmra.mxu2 %v10025_v10  ;;  %v8620_v24 = vld [vmem:[%s9261_s11 + $0x14] sm:$0xf] }
 0x269   : > { %3817 = vmatmul.bf16.gmra.mxu3 %v10031_v7  ;;  %v8893_v7 = vld [vmem:[%s9261_s11 + $0x894] sm:$0xf0] }
 0x26a   : > { %v3571_v63 = vadd.f32 %v3570_v4, %v3522_v50  ;;  %v7430_v50 = vld [vmem:[%s9261_s11 + $0x18] sm:$0xf0]  ;;  %v8452_v4 = vld [vmem:[%s9261_s11 + $0x810] sm:$0xf]  ;;  %v10997_v10 = vor.u32 %v8893_v7, %v8516_v58  ;;  %v15131_v58 = vld [vmem:[#allocation117_spill] sm:$0xff] }
 0x26b   : > { %v3573_v21 = vpop.f32.mrf.mxu2 }
 0x26c   : > { %v10971_v9 = vadd.f32 %v3619_v5, %v3571_v63  ;;  %v10981_v63 = vor.u32 %v8620_v24, %v7430_v50  ;;  %15130 = vst [vmem:[#allocation216_spill] sm:$0xff] %v10997_v10  ;;  %3893 = vmatpush.bf16.msra.mxu1 %v10997_v10  ;;  %v8875_v10 = vld [vmem:[%s9261_s11 + $0x804] sm:$0xf0] }
 0x26d   : > { %v3475_v26 = vpop.f32.mrf.mxu0  ;;  %v3524_v32 = vpop.f32.mrf.mxu1 }
 0x26e   : > { %v3476_v46 = vadd.f32 %v3475_v26, %v10731_v29  ;;  %v3622_v5 = vpop.f32.mrf.mxu3  ;;  %15127 = vst [vmem:[#allocation111_spill] sm:$0xff] %v10981_v63  ;;  %v10986_v26 = vor.u32 %v8877_v40, %v8452_v4  ;;  %3942 = vmatpush.bf16.msra.mxu2 %v10981_v63 }
 0x270   : > { %v3525_v12 = vadd.f32 %v3524_v32, %v3476_v46  ;;  %3670 = vmatmul.bf16.gmra.mxu0 %v15125_v27  ;;  %3719 = vmatmul.bf16.gmra.mxu1 %v15126_v55  ;;  %15128 = vst [vmem:[#allocation112_spill] sm:$0xff] %v10986_v26  ;;  %v10988_v32 = vor.u32 %v8636_v51, %v7494_v31 }
 0x271   : > { %3844 = vmatpush.bf16.msra.mxu0 %v10986_v26  ;;  %v8634_v26 = vld [vmem:[%s9261_s11 + $0x84] sm:$0xf] }
 0x272   : > { %v3574_v29 = vadd.f32 %v3573_v21, %v3525_v12  ;;  %15129 = vst [vmem:[#allocation215_spill] sm:$0xff] %v10988_v32  ;;  %3991 = vmatpush.bf16.msra.mxu3 %v10988_v32 }
 0x273   : > { %v3575_v51 = vpop.f32.mrf.mxu2 }
 0x274   : > { %v10991_v46 = vadd.f32 %v3622_v5, %v3574_v29 }
 0x275   : > { %v3477_v24 = vpop.f32.mrf.mxu0  ;;  %v3526_v50 = vpop.f32.mrf.mxu1 }
 0x276   : > { %v3478_v12 = vadd.f32 %v3477_v24, %v10741_v8  ;;  %v3624_v31 = vpop.f32.mrf.mxu3  ;;  %v15132_v24 = vld [vmem:[#allocation118_spill] sm:$0xff] }
 0x278   : > { %v3527_v40 = vadd.f32 %v3526_v50, %v3478_v12  ;;  %3773 = vmatmul.bf16.gmra.mxu2 %v10081_v6  ;;  %v8618_v12 = vld [vmem:[%s9261_s11 + $0x4] sm:$0xf]  ;;  %v8508_v6 = vld [vmem:[%s9261_s11 + $0x880] sm:$0xf] }
 0x279   : > { %3822 = vmatmul.bf16.gmra.mxu3 %v10083_v36  ;;  %v8617_v36 = vld [vmem:[#allocation3 + $0x94] sm:$0xf0] }
 0x27a   : > { %v3576_v21 = vadd.f32 %v3575_v51, %v3527_v40  ;;  %v7422_v40 = vld [vmem:[%s9261_s11 + $0x8] sm:$0xf0] }
 0x27b   : > { %v3578_v50 = vpop.f32.mrf.mxu2 }
 0x27c   : > { %v11001_v4 = vadd.f32 %v3624_v31, %v3576_v21  ;;  %v11010_v31 = vor.u32 %v8618_v12, %v7422_v40  ;;  %v8444_v21 = vld [vmem:[%s9261_s11 + $0x800] sm:$0xf]  ;;  %v8891_v12 = vld [vmem:[%s9261_s11 + $0x884] sm:$0xf0] }
 0x27d   : > { %v3480_v5 = vpop.f32.mrf.mxu0  ;;  %v3529_v29 = vpop.f32.mrf.mxu1 }
 0x27e   : > { %v3481_v7 = vadd.f32 %v3480_v5, %v10761_v59  ;;  %v3627_v51 = vpop.f32.mrf.mxu3  ;;  %15133 = vst [vmem:[#allocation117_spill] sm:$0xff] %v11010_v31  ;;  %v11015_v59 = vor.u32 %v8875_v10, %v8444_v21  ;;  %v7486_v5 = vld [vmem:[%s9261_s11 + $0x88] sm:$0xf0]  ;;  %3943 = vmatpush.bf16.msra.mxu2 %v11010_v31  ;;  %v8616_v21 = vld [vmem:[#allocation3 + $0x94] sm:$0xf] }
 0x280   : > { %v3530_v8 = vadd.f32 %v3529_v29, %v3481_v7  ;;  %3675 = vmatmul.bf16.gmra.mxu0 %v15131_v58  ;;  %3724 = vmatmul.bf16.gmra.mxu1 %v15132_v24  ;;  %15134 = vst [vmem:[#allocation217_spill] sm:$0xff] %v11015_v59  ;;  %v7412_v29 = vld [vmem:[#allocation3 + $0x90] sm:$0xf]  ;;  %v11019_v7 = vor.u32 %v8634_v26, %v7486_v5  ;;  %v7414_v26 = vld [vmem:[#allocation3 + $0x98] sm:$0xf0] }
 0x281   : > { %3845 = vmatpush.bf16.msra.mxu0 %v11015_v59  ;;  %v11033_v31 = vor.u32 %v8616_v21, %v7414_v26  ;;  %v7734_v26 = vld [vmem:[%s9261_s11 + $0x278] sm:$0xf0] }
 0x282   : > { %v3579_v32 = vadd.f32 %v3578_v50, %v3530_v8  ;;  %15135 = vst [vmem:[#allocation218_spill] sm:$0xff] %v11019_v7  ;;  %3992 = vmatpush.bf16.msra.mxu3 %v11019_v7  ;;  %v11027_v8 = vor.u32 %v8891_v12, %v8508_v6  ;;  %v11030_v50 = vor.u32 %v8617_v36, %v7412_v29 }
 0x283   : > { %15138 = vst [vmem:[#allocation221_spill] sm:$0xff] %v11033_v31 }
 0x284   : > { %v11021_v63 = vadd.f32 %v3627_v51, %v3579_v32  ;;  %15136 = vst [vmem:[#allocation219_spill] sm:$0xff] %v11027_v8  ;;  %3894 = vmatpush.bf16.msra.mxu1 %v11027_v8  ;;  %v3580_v51 = vpop.f32.mrf.mxu2  ;;  %v14497_v24 = vshrl.u32 %v11030_v50, 16 }
 0x285   : > { %v3482_v40 = vpop.f32.mrf.mxu0  ;;  %v3531_v34 = vpop.f32.mrf.mxu1  ;;  %15137 = vst [vmem:[#allocation220_spill] sm:$0xff] %v11030_v50 }
 0x286   : > { %v3483_v10 = vadd.f32 %v3482_v40, %v10771_v42  ;;  %v3629_v5 = vpop.f32.mrf.mxu3  ;;  %v1115_v12 = vrot.slane %v14497_v24, 7  ;;  %v8712_v24 = vld [vmem:[%s9261_s11 + $0x2f4] sm:$0xf]  ;;  %v15140_v40 = vshrl.u32 %v11033_v31, 16 }
 0x288   : > { %v3532_v32 = vadd.f32 %v3531_v34, %v3483_v10  ;;  %3778 = vmatmul.bf16.gmra.mxu2 %v10475_v28  ;;  %v7798_v34 = vld [vmem:[%s9261_s11 + $0x2f8] sm:$0xf0] }
 0x289   : > { %3827 = vmatmul.bf16.gmra.mxu3 %v10477_v23  ;;  %v11060_v8 = vor.u32 %v8712_v24, %v7798_v34  ;;  %v15145_v34 = vshll.u32 %v11033_v31, 16 }
 0x28a   : > { %v3581_v59 = vadd.f32 %v3580_v51, %v3532_v32  ;;  %v8664_v32 = vld [vmem:[%s9261_s11 + $0x174] sm:$0xf] }
 0x28b   : > { %15142 = vst [vmem:[#allocation224_spill] sm:$0xff] %v11060_v8  ;;  %4181 = vmatpush.bf16.msrb.mxu3 %v11060_v8 }
 0x28c   : > { %v11036_v6 = vadd.f32 %v3629_v5, %v3581_v59  ;;  %v3583_v21 = vpop.f32.mrf.mxu2 }
 0x28d   : > { %v3485_v42 = vpop.f32.mrf.mxu0  ;;  %v3534_v36 = vpop.f32.mrf.mxu1 }
 0x28e   : > { %v3486_v29 = vadd.f32 %v3485_v42, %v10797_v13  ;;  %v8696_v13 = vld [vmem:[%s9261_s11 + $0x274] sm:$0xf]  ;;  %v3632_v51 = vpop.f32.mrf.mxu3  ;;  %v7606_v42 = vld [vmem:[%s9261_s11 + $0x178] sm:$0xf0] }
 0x28f   : > { %v11051_v5 = vor.u32 %v8696_v13, %v7734_v26  ;;  %v8680_v13 = vld [vmem:[%s9261_s11 + $0x1f4] sm:$0xf]  ;;  %v7670_v26 = vld [vmem:[%s9261_s11 + $0x1f8] sm:$0xf0] }
 0x290   : > { %v3535_v10 = vadd.f32 %v3534_v36, %v3486_v29  ;;  %3680 = vmatmul.bf16.gmra.mxu0 %v10549_v0  ;;  %3729 = vmatmul.bf16.gmra.mxu1 %v10555_v56  ;;  %v1122_v36 = vrot.slane %v15140_v40, 7  ;;  %v11058_v29 = vor.u32 %v8664_v32, %v7606_v42 }
 0x291   : > { %15139 = vst [vmem:[#allocation222_spill] sm:$0xff] %v11051_v5  ;;  %4132 = vmatpush.bf16.msrb.mxu2 %v11051_v5  ;;  %v8678_v5 = vld [vmem:[%s9261_s11 + $0x1e4] sm:$0xf] }
 0x292   : > { %v3584_v59 = vadd.f32 %v3583_v21, %v3535_v10  ;;  %15141 = vst [vmem:[#allocation223_spill] sm:$0xff] %v11058_v29  ;;  %4034 = vmatpush.bf16.msrb.mxu0 %v11058_v29  ;;  %v11069_v10 = vor.u32 %v8680_v13, %v7670_v26  ;;  %v15144_v21 = vshll.u32 %v11030_v50, 16  ;;  %v1125_v32 = vor.u32 %v15145_v34, %v1122_v36  ;;  %v8694_v34 = vld [vmem:[%s9261_s11 + $0x264] sm:$0xf]  ;;  %v7662_v26 = vld [vmem:[%s9261_s11 + $0x1e8] sm:$0xf0] }
 0x293   : > { %v11115_v8 = vor.u32 %v8678_v5, %v7662_v26  ;;  %v15154_v5 = vld [vmem:[#allocation63_spill] sm:$0xff]  ;;  %v15155_v26 = vld [vmem:[#allocation64_spill] sm:$0xff] }
 0x294   : > { %v11063_v7 = vadd.f32 %v3632_v51, %v3584_v59  ;;  %15143 = vst [vmem:[#allocation225_spill] sm:$0xff] %v11069_v10  ;;  %v1118_v24 = vor.u32 %v15144_v21, %v1115_v12  ;;  %4083 = vmatpush.bf16.msrb.mxu1 %v11069_v10  ;;  %v3585_v51 = vpop.f32.mrf.mxu2  ;;  %v7790_v10 = vld [vmem:[%s9261_s11 + $0x2e8] sm:$0xf0] }
 0x295   : > { %v3487_v56 = vpop.f32.mrf.mxu0  ;;  %v3536_v0 = vpop.f32.mrf.mxu1  ;;  %15153 = vst [vmem:[#allocation231_spill] sm:$0xff] %v11115_v8 }
 0x296   : > { %v3488_v40 = vadd.f32 %v3487_v56, %v10821_v44  ;;  %v3634_v42 = vpop.f32.mrf.mxu3  ;;  %v1164_v13 = vsel %vm9724_vm6, 0, %v1118_v24  ;;  %v1165_v56 = vsel %vm9724_vm6, 0, %v1125_v32  ;;  %v7726_v32 = vld [vmem:[%s9261_s11 + $0x268] sm:$0xf0] }
 0x298   : > { %v3537_v59 = vadd.f32 %v3536_v0, %v3488_v40  ;;  %v11085_v0 = vsel %vm9764_vm9, 0, %v1164_v13  ;;  %v11089_v40 = vsel %vm9764_vm9, 0, %v1165_v56  ;;  %3783 = vmatmul.bf16.gmra.mxu2 %v11030_v50  ;;  %v7598_v13 = vld [vmem:[%s9261_s11 + $0x168] sm:$0xf0]  ;;  %v8710_v56 = vld [vmem:[%s9261_s11 + $0x2e4] sm:$0xf]  ;;  %4084 = vmatpush.bf16.msrb.mxu1 %v11115_v8 }
 0x299   : > { %15148 = vst [vmem:[#allocation226_spill] sm:$0xff] %v11085_v0  ;;  %3832 = vmatmul.bf16.gmra.mxu3 %v11033_v31  ;;  %v7590_v8 = vld [vmem:[%s9261_s11 + $0x158] sm:$0xf0] }
 0x29a   : > { %v3586_v29 = vadd.f32 %v3585_v51, %v3537_v59  ;;  %15149 = vst [vmem:[#allocation227_spill] sm:$0xff] %v11089_v40  ;;  %v8662_v59 = vld [vmem:[%s9261_s11 + $0x164] sm:$0xf] }
 0x29c   : > { %v11081_v44 = vadd.f32 %v3634_v42, %v3586_v29  ;;  %v3588_v24 = vpop.f32.mrf.mxu2  ;;  %v11099_v42 = vor.u32 %v8694_v34, %v7726_v32 }
 0x29d   : > { %v3490_v12 = vpop.f32.mrf.mxu0  ;;  %v3539_v36 = vpop.f32.mrf.mxu1 }
 0x29e   : > { %v3491_v21 = vadd.f32 %v3490_v12, %v10841_v17  ;;  %v3637_v51 = vpop.f32.mrf.mxu3  ;;  %15150 = vst [vmem:[#allocation228_spill] sm:$0xff] %v11099_v42  ;;  %v11104_v12 = vor.u32 %v8662_v59, %v7598_v13  ;;  %4133 = vmatpush.bf16.msrb.mxu2 %v11099_v42 }
 0x2a0   : > { %v3540_v29 = vadd.f32 %v3539_v36, %v3491_v21  ;;  %3685 = vmatmul.bf16.gmra.mxu0 %v11085_v0  ;;  %3734 = vmatmul.bf16.gmra.mxu1 %v11089_v40  ;;  %15151 = vst [vmem:[#allocation229_spill] sm:$0xff] %v11104_v12  ;;  %v11106_v36 = vor.u32 %v8710_v56, %v7790_v10  ;;  %v7646_v40 = vld [vmem:[%s9261_s11 + $0x1c8] sm:$0xf0] }
 0x2a1   : > { %4035 = vmatpush.bf16.msrb.mxu0 %v11104_v12  ;;  %v7782_v12 = vld [vmem:[%s9261_s11 + $0x2d8] sm:$0xf0] }
 0x2a2   : > { %v3589_v17 = vadd.f32 %v3588_v24, %v3540_v29  ;;  %15152 = vst [vmem:[#allocation230_spill] sm:$0xff] %v11106_v36  ;;  %4182 = vmatpush.bf16.msrb.mxu3 %v11106_v36  ;;  %v7654_v36 = vld [vmem:[%s9261_s11 + $0x1d8] sm:$0xf0] }
 0x2a4   : > { %v11109_v21 = vadd.f32 %v3637_v51, %v3589_v17  ;;  %v3590_v24 = vpop.f32.mrf.mxu2 }
 0x2a5   : > { %v3492_v34 = vpop.f32.mrf.mxu0  ;;  %v3541_v32 = vpop.f32.mrf.mxu1 }
 0x2a6   : > { %v3493_v29 = vadd.f32 %v3492_v34, %v10851_v2  ;;  %v3639_v59 = vpop.f32.mrf.mxu3 }
 0x2a8   : > { %v3542_v10 = vadd.f32 %v3541_v32, %v3493_v29  ;;  %3944 = vmatmul.bf16.vlgmr.msra.gmra.mxu2 %v15154_v5  ;;  %v8692_v29 = vld [vmem:[%s9261_s11 + $0x254] sm:$0xf] }
 0x2a9   : > { %3993 = vmatmul.bf16.vlgmr.msra.gmra.mxu3 %v15155_v26  ;;  %v8708_v5 = vld [vmem:[%s9261_s11 + $0x2d4] sm:$0xf] }
 0x2aa   : > { %v3591_v51 = vadd.f32 %v3590_v24, %v3542_v10  ;;  %v7718_v10 = vld [vmem:[%s9261_s11 + $0x258] sm:$0xf0]  ;;  %v8660_v24 = vld [vmem:[%s9261_s11 + $0x154] sm:$0xf] }
 0x2ab   : > { %v8676_v26 = vld [vmem:[%s9261_s11 + $0x1d4] sm:$0xf] }
 0x2ac   : > { %v11119_v13 = vadd.f32 %v3639_v59, %v3591_v51  ;;  %v3749_v32 = vpop.f32.mrf.mxu2  ;;  %v11129_v51 = vor.u32 %v8692_v29, %v7718_v10  ;;  %v11145_v42 = vor.u32 %v8676_v26, %v7654_v36  ;;  %v15160_v36 = vld [vmem:[#allocation71_spill] sm:$0xff]  ;;  %v15161_v26 = vld [vmem:[#allocation72_spill] sm:$0xff] }
 0x2ad   : > { %v3651_v56 = vpop.f32.mrf.mxu0  ;;  %v3700_v17 = vpop.f32.mrf.mxu1 }
 0x2ae   : > { %v3652_v2 = vadd.f32 %v3651_v56, %v10871_v47  ;;  %v3798_v59 = vpop.f32.mrf.mxu3  ;;  %15156 = vst [vmem:[#allocation63_spill] sm:$0xff] %v11129_v51  ;;  %v11134_v56 = vor.u32 %v8660_v24, %v7590_v8  ;;  %4134 = vmatpush.bf16.msrb.mxu2 %v11129_v51  ;;  %4085 = vmatpush.bf16.msrb.mxu1 %v11145_v42  ;;  %v8674_v51 = vld [vmem:[%s9261_s11 + $0x1c4] sm:$0xf] }
 0x2af   : > { %15159 = vst [vmem:[#allocation233_spill] sm:$0xff] %v11145_v42  ;;  %v7582_v42 = vld [vmem:[%s9261_s11 + $0x148] sm:$0xf0]  ;;  %v11175_v0 = vor.u32 %v8674_v51, %v7646_v40 }
 0x2b0   : > { %v3701_v34 = vadd.f32 %v3700_v17, %v3652_v2  ;;  %3846 = vmatmul.bf16.vlgmr.msra.gmra.mxu0 %v10291_v54  ;;  %3895 = vmatmul.bf16.vlgmr.msra.gmra.mxu1 %v10295_v18  ;;  %15157 = vst [vmem:[#allocation64_spill] sm:$0xff] %v11134_v56  ;;  %v11136_v17 = vor.u32 %v8708_v5, %v7782_v12 }
 0x2b1   : > { %4036 = vmatpush.bf16.msrb.mxu0 %v11134_v56  ;;  %v8706_v56 = vld [vmem:[%s9261_s11 + $0x2c4] sm:$0xf]  ;;  %15165 = vst [vmem:[#allocation235_spill] sm:$0xff] %v11175_v0 }
 0x2b2   : > { %v3750_v47 = vadd.f32 %v3749_v32, %v3701_v34  ;;  %15158 = vst [vmem:[#allocation232_spill] sm:$0xff] %v11136_v17  ;;  %4183 = vmatpush.bf16.msrb.mxu3 %v11136_v17  ;;  %v7774_v17 = vld [vmem:[%s9261_s11 + $0x2c8] sm:$0xf0]  ;;  %4086 = vmatpush.bf16.msrb.mxu1 %v11175_v0  ;;  %v7766_v0 = vld [vmem:[%s9261_s11 + $0x2b8] sm:$0xf0] }
 0x2b4   : > { %v11139_v2 = vadd.f32 %v3798_v59, %v3750_v47  ;;  %v3751_v12 = vpop.f32.mrf.mxu2 }
 0x2b5   : > { %v3653_v29 = vpop.f32.mrf.mxu0  ;;  %v3702_v10 = vpop.f32.mrf.mxu1 }
 0x2b6   : > { %v3654_v34 = vadd.f32 %v3653_v29, %v10881_v45  ;;  %v3800_v32 = vpop.f32.mrf.mxu3 }
 0x2b8   : > { %v3703_v8 = vadd.f32 %v3702_v10, %v3654_v34  ;;  %3949 = vmatmul.bf16.gmra.mxu2 %v15160_v36  ;;  %v8690_v34 = vld [vmem:[%s9261_s11 + $0x244] sm:$0xf] }
 0x2b9   : > { %3998 = vmatmul.bf16.gmra.mxu3 %v15161_v26 }
 0x2ba   : > { %v3752_v24 = vadd.f32 %v3751_v12, %v3703_v8  ;;  %v7710_v8 = vld [vmem:[%s9261_s11 + $0x248] sm:$0xf0]  ;;  %v8658_v12 = vld [vmem:[%s9261_s11 + $0x144] sm:$0xf] }
 0x2bc   : > { %v11149_v59 = vadd.f32 %v3800_v32, %v3752_v24  ;;  %v3754_v10 = vpop.f32.mrf.mxu2  ;;  %v11159_v24 = vor.u32 %v8690_v34, %v7710_v8 }
 0x2bd   : > { %v3656_v5 = vpop.f32.mrf.mxu0  ;;  %v3705_v47 = vpop.f32.mrf.mxu1 }
 0x2be   : > { %v3657_v45 = vadd.f32 %v3656_v5, %v10901_v35  ;;  %v3803_v32 = vpop.f32.mrf.mxu3  ;;  %15162 = vst [vmem:[#allocation71_spill] sm:$0xff] %v11159_v24  ;;  %v11164_v5 = vor.u32 %v8658_v12, %v7582_v42  ;;  %4135 = vmatpush.bf16.msrb.mxu2 %v11159_v24 }
 0x2c0   : > { %v3706_v29 = vadd.f32 %v3705_v47, %v3657_v45  ;;  %3851 = vmatmul.bf16.gmra.mxu0 %v10339_v22  ;;  %3900 = vmatmul.bf16.gmra.mxu1 %v10343_v37  ;;  %15163 = vst [vmem:[#allocation72_spill] sm:$0xff] %v11164_v5  ;;  %v11166_v47 = vor.u32 %v8706_v56, %v7774_v17 }
 0x2c1   : > { %4037 = vmatpush.bf16.msrb.mxu0 %v11164_v5  ;;  %v8672_v5 = vld [vmem:[%s9261_s11 + $0x1b4] sm:$0xf] }
 0x2c2   : > { %v3755_v35 = vadd.f32 %v3754_v10, %v3706_v29  ;;  %15164 = vst [vmem:[#allocation234_spill] sm:$0xff] %v11166_v47  ;;  %4184 = vmatpush.bf16.msrb.mxu3 %v11166_v47  ;;  %v7638_v47 = vld [vmem:[%s9261_s11 + $0x1b8] sm:$0xf0] }
 0x2c3   : > { %v11205_v24 = vor.u32 %v8672_v5, %v7638_v47 }
 0x2c4   : > { %v11169_v45 = vadd.f32 %v3803_v32, %v3755_v35  ;;  %v3756_v56 = vpop.f32.mrf.mxu2 }
 0x2c5   : > { %v3658_v34 = vpop.f32.mrf.mxu0  ;;  %v3707_v8 = vpop.f32.mrf.mxu1  ;;  %15169 = vst [vmem:[#allocation239_spill] sm:$0xff] %v11205_v24  ;;  %4087 = vmatpush.bf16.msrb.mxu1 %v11205_v24  ;;  %v7758_v24 = vld [vmem:[%s9261_s11 + $0x2a8] sm:$0xf0] }
 0x2c6   : > { %v3659_v29 = vadd.f32 %v3658_v34, %v10911_v16  ;;  %v3805_v17 = vpop.f32.mrf.mxu3  ;;  %v8688_v34 = vld [vmem:[%s9261_s11 + $0x234] sm:$0xf] }
 0x2c8   : > { %v3708_v42 = vadd.f32 %v3707_v8, %v3659_v29  ;;  %3954 = vmatmul.bf16.gmra.mxu2 %v15101_v52  ;;  %v7702_v8 = vld [vmem:[%s9261_s11 + $0x238] sm:$0xf0]  ;;  %v8656_v29 = vld [vmem:[%s9261_s11 + $0x134] sm:$0xf] }
 0x2c9   : > { %4003 = vmatmul.bf16.gmra.mxu3 %v15102_v20 }
 0x2ca   : > { %v3757_v10 = vadd.f32 %v3756_v56, %v3708_v42  ;;  %v11189_v56 = vor.u32 %v8688_v34, %v7702_v8 }
 0x2cc   : > { %v11179_v12 = vadd.f32 %v3805_v17, %v3757_v10  ;;  %v3759_v51 = vpop.f32.mrf.mxu2  ;;  %15166 = vst [vmem:[#allocation236_spill] sm:$0xff] %v11189_v56  ;;  %v7574_v17 = vld [vmem:[%s9261_s11 + $0x138] sm:$0xf0]  ;;  %v8704_v10 = vld [vmem:[%s9261_s11 + $0x2b4] sm:$0xf]  ;;  %4136 = vmatpush.bf16.msrb.mxu2 %v11189_v56 }
 0x2cd   : > { %v3661_v32 = vpop.f32.mrf.mxu0  ;;  %v3710_v35 = vpop.f32.mrf.mxu1 }
 0x2ce   : > { %v3662_v16 = vadd.f32 %v3661_v32, %v10931_v25  ;;  %v3808_v42 = vpop.f32.mrf.mxu3  ;;  %v11194_v32 = vor.u32 %v8656_v29, %v7574_v17 }
 0x2d0   : > { %v3711_v40 = vadd.f32 %v3710_v35, %v3662_v16  ;;  %3856 = vmatmul.bf16.gmra.mxu0 %v10387_v15  ;;  %3905 = vmatmul.bf16.gmra.mxu1 %v10391_v33  ;;  %15167 = vst [vmem:[#allocation237_spill] sm:$0xff] %v11194_v32  ;;  %v11196_v35 = vor.u32 %v8704_v10, %v7766_v0 }
 0x2d1   : > { %4038 = vmatpush.bf16.msrb.mxu0 %v11194_v32  ;;  %v8670_v32 = vld [vmem:[%s9261_s11 + $0x1a4] sm:$0xf] }
 0x2d2   : > { %v3760_v25 = vadd.f32 %v3759_v51, %v3711_v40  ;;  %15168 = vst [vmem:[#allocation238_spill] sm:$0xff] %v11196_v35  ;;  %4185 = vmatpush.bf16.msrb.mxu3 %v11196_v35  ;;  %v7630_v35 = vld [vmem:[%s9261_s11 + $0x1a8] sm:$0xf0] }
 0x2d3   : > { %v11235_v56 = vor.u32 %v8670_v32, %v7630_v35 }
 0x2d4   : > { %v11199_v16 = vadd.f32 %v3808_v42, %v3760_v25  ;;  %v3761_v51 = vpop.f32.mrf.mxu2 }
 0x2d5   : > { %v3663_v34 = vpop.f32.mrf.mxu0  ;;  %v3712_v8 = vpop.f32.mrf.mxu1  ;;  %15173 = vst [vmem:[#allocation243_spill] sm:$0xff] %v11235_v56  ;;  %4088 = vmatpush.bf16.msrb.mxu1 %v11235_v56  ;;  %v7750_v56 = vld [vmem:[%s9261_s11 + $0x298] sm:$0xf0] }
 0x2d6   : > { %v3664_v40 = vadd.f32 %v3663_v34, %v10941_v19  ;;  %v3810_v29 = vpop.f32.mrf.mxu3  ;;  %v8686_v34 = vld [vmem:[%s9261_s11 + $0x224] sm:$0xf] }
 0x2d8   : > { %v3713_v0 = vadd.f32 %v3712_v8, %v3664_v40  ;;  %3959 = vmatmul.bf16.gmra.mxu2 %v15107_v61  ;;  %v7694_v8 = vld [vmem:[%s9261_s11 + $0x228] sm:$0xf0]  ;;  %v8654_v40 = vld [vmem:[%s9261_s11 + $0x124] sm:$0xf] }
 0x2d9   : > { %4008 = vmatmul.bf16.gmra.mxu3 %v15108_v30 }
 0x2da   : > { %v3762_v42 = vadd.f32 %v3761_v51, %v3713_v0  ;;  %v11219_v51 = vor.u32 %v8686_v34, %v7694_v8 }
 0x2dc   : > { %v11209_v17 = vadd.f32 %v3810_v29, %v3762_v42  ;;  %v3764_v47 = vpop.f32.mrf.mxu2  ;;  %15170 = vst [vmem:[#allocation240_spill] sm:$0xff] %v11219_v51  ;;  %v7566_v29 = vld [vmem:[%s9261_s11 + $0x128] sm:$0xf0]  ;;  %v8702_v42 = vld [vmem:[%s9261_s11 + $0x2a4] sm:$0xf]  ;;  %4137 = vmatpush.bf16.msrb.mxu2 %v11219_v51 }
 0x2dd   : > { %v3666_v10 = vpop.f32.mrf.mxu0  ;;  %v3715_v25 = vpop.f32.mrf.mxu1 }
 0x2de   : > { %v3667_v19 = vadd.f32 %v3666_v10, %v10961_v1  ;;  %v3813_v0 = vpop.f32.mrf.mxu3  ;;  %v11224_v10 = vor.u32 %v8654_v40, %v7566_v29 }
 0x2e0   : > { %v3716_v5 = vadd.f32 %v3715_v25, %v3667_v19  ;;  %3861 = vmatmul.bf16.gmra.mxu0 %v10435_v57  ;;  %3910 = vmatmul.bf16.gmra.mxu1 %v10439_v43  ;;  %15171 = vst [vmem:[#allocation241_spill] sm:$0xff] %v11224_v10  ;;  %v11226_v25 = vor.u32 %v8702_v42, %v7758_v24 }
 0x2e1   : > { %4039 = vmatpush.bf16.msrb.mxu0 %v11224_v10  ;;  %v8668_v10 = vld [vmem:[%s9261_s11 + $0x194] sm:$0xf] }
 0x2e2   : > { %v3765_v1 = vadd.f32 %v3764_v47, %v3716_v5  ;;  %15172 = vst [vmem:[#allocation242_spill] sm:$0xff] %v11226_v25  ;;  %4186 = vmatpush.bf16.msrb.mxu3 %v11226_v25  ;;  %v7622_v25 = vld [vmem:[%s9261_s11 + $0x198] sm:$0xf0] }
 0x2e3   : > { %v11265_v51 = vor.u32 %v8668_v10, %v7622_v25  ;;  %v15178_v25 = vld [vmem:[#allocation168_spill] sm:$0xff] }
 0x2e4   : > { %v11229_v19 = vadd.f32 %v3813_v0, %v3765_v1  ;;  %v3766_v47 = vpop.f32.mrf.mxu2 }
 0x2e5   : > { %v3668_v34 = vpop.f32.mrf.mxu0  ;;  %v3717_v8 = vpop.f32.mrf.mxu1  ;;  %15177 = vst [vmem:[#allocation247_spill] sm:$0xff] %v11265_v51  ;;  %4089 = vmatpush.bf16.msrb.mxu1 %v11265_v51  ;;  %v8698_v51 = vld [vmem:[%s9261_s11 + $0x284] sm:$0xf] }
 0x2e6   : > { %v3669_v5 = vadd.f32 %v3668_v34, %v10971_v9  ;;  %v3815_v40 = vpop.f32.mrf.mxu3  ;;  %v8684_v34 = vld [vmem:[%s9261_s11 + $0x214] sm:$0xf] }
 0x2e8   : > { %v3718_v24 = vadd.f32 %v3717_v8, %v3669_v5  ;;  %3964 = vmatmul.bf16.gmra.mxu2 %v15113_v53  ;;  %v7686_v8 = vld [vmem:[%s9261_s11 + $0x218] sm:$0xf0]  ;;  %v8652_v5 = vld [vmem:[%s9261_s11 + $0x114] sm:$0xf] }
 0x2e9   : > { %4013 = vmatmul.bf16.gmra.mxu3 %v15114_v48 }
 0x2ea   : > { %v3767_v0 = vadd.f32 %v3766_v47, %v3718_v24  ;;  %v11249_v47 = vor.u32 %v8684_v34, %v7686_v8 }
 0x2ec   : > { %v11239_v29 = vadd.f32 %v3815_v40, %v3767_v0  ;;  %v3769_v35 = vpop.f32.mrf.mxu2  ;;  %15174 = vst [vmem:[#allocation244_spill] sm:$0xff] %v11249_v47  ;;  %v7558_v40 = vld [vmem:[%s9261_s11 + $0x118] sm:$0xf0]  ;;  %v8700_v0 = vld [vmem:[%s9261_s11 + $0x294] sm:$0xf]  ;;  %4138 = vmatpush.bf16.msrb.mxu2 %v11249_v47 }
 0x2ed   : > { %v3671_v42 = vpop.f32.mrf.mxu0  ;;  %v3720_v1 = vpop.f32.mrf.mxu1  ;;  %v7614_v47 = vld [vmem:[%s9261_s11 + $0x188] sm:$0xf0] }
 0x2ee   : > { %v3672_v9 = vadd.f32 %v3671_v42, %v10991_v46  ;;  %v3818_v24 = vpop.f32.mrf.mxu3  ;;  %v11254_v42 = vor.u32 %v8652_v5, %v7558_v40 }
 0x2f0   : > { %v3721_v32 = vadd.f32 %v3720_v1, %v3672_v9  ;;  %3866 = vmatmul.bf16.gmra.mxu0 %v10489_v3  ;;  %3915 = vmatmul.bf16.gmra.mxu1 %v10493_v11  ;;  %15175 = vst [vmem:[#allocation245_spill] sm:$0xff] %v11254_v42  ;;  %v11256_v1 = vor.u32 %v8700_v0, %v7750_v56 }
 0x2f1   : > { %4040 = vmatpush.bf16.msrb.mxu0 %v11254_v42  ;;  %v7742_v42 = vld [vmem:[%s9261_s11 + $0x288] sm:$0xf0] }
 0x2f2   : > { %v3770_v46 = vadd.f32 %v3769_v35, %v3721_v32  ;;  %15176 = vst [vmem:[#allocation246_spill] sm:$0xff] %v11256_v1  ;;  %4187 = vmatpush.bf16.msrb.mxu3 %v11256_v1  ;;  %v8666_v1 = vld [vmem:[%s9261_s11 + $0x184] sm:$0xf] }
 0x2f3   : > { %v11295_v23 = vor.u32 %v8666_v1, %v7614_v47  ;;  %v15183_v47 = vshll.u32 %v11030_v50, 16 }
 0x2f4   : > { %v11259_v9 = vadd.f32 %v3818_v24, %v3770_v46  ;;  %v3771_v35 = vpop.f32.mrf.mxu2 }
 0x2f5   : > { %v3673_v34 = vpop.f32.mrf.mxu0  ;;  %v3722_v8 = vpop.f32.mrf.mxu1  ;;  %15182 = vst [vmem:[#allocation251_spill] sm:$0xff] %v11295_v23  ;;  %4090 = vmatpush.bf16.msrb.mxu1 %v11295_v23  ;;  %v1222_v1 = vrot.slane %v15183_v47, 1  ;;  %v8054_v23 = vld [vmem:[%s9261_s11 + $0x4f8] sm:$0xf0]  ;;  %v15185_v47 = vshll.u32 %v11033_v31, 16 }
 0x2f6   : > { %v3674_v32 = vadd.f32 %v3673_v34, %v11001_v4  ;;  %v3820_v5 = vpop.f32.mrf.mxu3 }
 0x2f8   : > { %v3723_v56 = vadd.f32 %v3722_v8, %v3674_v32  ;;  %3969 = vmatmul.bf16.gmra.mxu2 %v15119_v49  ;;  %v8682_v8 = vld [vmem:[%s9261_s11 + $0x204] sm:$0xf]  ;;  %v7678_v32 = vld [vmem:[%s9261_s11 + $0x208] sm:$0xf0] }
 0x2f9   : > { %4018 = vmatmul.bf16.gmra.mxu3 %v15120_v38 }
 0x2fa   : > { %v3772_v24 = vadd.f32 %v3771_v35, %v3723_v56  ;;  %v8650_v56 = vld [vmem:[%s9261_s11 + $0x104] sm:$0xf] }
 0x2fc   : > { %v11269_v40 = vadd.f32 %v3820_v5, %v3772_v24  ;;  %v3774_v34 = vpop.f32.mrf.mxu2  ;;  %v11279_v5 = vor.u32 %v8682_v8, %v7678_v32  ;;  %v7550_v24 = vld [vmem:[%s9261_s11 + $0x108] sm:$0xf0] }
 0x2fd   : > { %v3676_v0 = vpop.f32.mrf.mxu0  ;;  %v3725_v46 = vpop.f32.mrf.mxu1 }
 0x2fe   : > { %v3677_v4 = vadd.f32 %v3676_v0, %v11021_v63  ;;  %v3823_v35 = vpop.f32.mrf.mxu3  ;;  %15179 = vst [vmem:[#allocation248_spill] sm:$0xff] %v11279_v5  ;;  %v11284_v0 = vor.u32 %v8650_v56, %v7550_v24  ;;  %4139 = vmatpush.bf16.msrb.mxu2 %v11279_v5  ;;  %v8744_v5 = vld [vmem:[%s9261_s11 + $0x3f4] sm:$0xf] }
 0x300   : > { %v3726_v10 = vadd.f32 %v3725_v46, %v3677_v4  ;;  %3871 = vmatmul.bf16.gmra.mxu0 %v10559_v62  ;;  %3920 = vmatmul.bf16.gmra.mxu1 %v15178_v25  ;;  %15180 = vst [vmem:[#allocation249_spill] sm:$0xff] %v11284_v0  ;;  %v11286_v46 = vor.u32 %v8698_v51, %v7742_v42 }
 0x301   : > { %4041 = vmatpush.bf16.msrb.mxu0 %v11284_v0 }
 0x302   : > { %v3775_v63 = vadd.f32 %v3774_v34, %v3726_v10  ;;  %15181 = vst [vmem:[#allocation250_spill] sm:$0xff] %v11286_v46  ;;  %4188 = vmatpush.bf16.msrb.mxu3 %v11286_v46 }
 0x304   : > { %v11289_v4 = vadd.f32 %v3823_v35, %v3775_v63  ;;  %v3776_v42 = vpop.f32.mrf.mxu2 }
 0x305   : > { %v3678_v8 = vpop.f32.mrf.mxu0  ;;  %v3727_v32 = vpop.f32.mrf.mxu1 }
 0x306   : > { %v3679_v10 = vadd.f32 %v3678_v8, %v11036_v6  ;;  %v3825_v34 = vpop.f32.mrf.mxu3 }
 0x308   : > { %v3728_v51 = vadd.f32 %v3727_v32, %v3679_v10  ;;  %3974 = vmatmul.bf16.gmra.mxu2 %v15125_v27  ;;  %v8760_v10 = vld [vmem:[%s9261_s11 + $0x474] sm:$0xf] }
 0x309   : > { %4023 = vmatmul.bf16.gmra.mxu3 %v15126_v55 }
 0x30a   : > { %v3777_v56 = vadd.f32 %v3776_v42, %v3728_v51  ;;  %v7990_v51 = vld [vmem:[%s9261_s11 + $0x478] sm:$0xf0]  ;;  %v8728_v42 = vld [vmem:[%s9261_s11 + $0x374] sm:$0xf] }
 0x30c   : > { %v11299_v35 = vadd.f32 %v3825_v34, %v3777_v56  ;;  %v3779_v32 = vpop.f32.mrf.mxu2  ;;  %v11311_v56 = vor.u32 %v8760_v10, %v7990_v51 }
 0x30d   : > { %v3681_v24 = vpop.f32.mrf.mxu0  ;;  %v3730_v63 = vpop.f32.mrf.mxu1 }
 0x30e   : > { %v3682_v6 = vadd.f32 %v3681_v24, %v11063_v7  ;;  %v3828_v34 = vpop.f32.mrf.mxu3  ;;  %15184 = vst [vmem:[#allocation252_spill] sm:$0xff] %v11311_v56  ;;  %v7862_v7 = vld [vmem:[%s9261_s11 + $0x378] sm:$0xf0]  ;;  %v8776_v24 = vld [vmem:[%s9261_s11 + $0x4f4] sm:$0xf]  ;;  %4328 = vmatpush.bf16.msra.mxu2 %v11311_v56 }
 0x30f   : > { %v11320_v46 = vor.u32 %v8776_v24, %v8054_v23  ;;  %v15189_v23 = vshrl.u32 %v11030_v50, 16 }
 0x310   : > { %v3731_v8 = vadd.f32 %v3730_v63, %v3682_v6  ;;  %3876 = vmatmul.bf16.gmra.mxu0 %v10815_v41  ;;  %3925 = vmatmul.bf16.gmra.mxu1 %v10819_v14  ;;  %v1224_v63 = vrot.slane %v15185_v47, 1  ;;  %v11318_v6 = vor.u32 %v8728_v42, %v7862_v7  ;;  %v7926_v14 = vld [vmem:[%s9261_s11 + $0x3f8] sm:$0xf0]  ;;  %v15190_v42 = vshrl.u32 %v11033_v31, 16 }
 0x311   : > { %15187 = vst [vmem:[#allocation254_spill] sm:$0xff] %v11320_v46  ;;  %v11325_v41 = vor.u32 %v8744_v5, %v7926_v14  ;;  %4377 = vmatpush.bf16.msra.mxu3 %v11320_v46  ;;  %v1223_v51 = vor.u32 %v1222_v1, %v15189_v23  ;;  %v15193_v23 = vld [vmem:[#allocation118_spill] sm:$0xff] }
 0x312   : > { %v3780_v0 = vadd.f32 %v3779_v32, %v3731_v8  ;;  %15186 = vst [vmem:[#allocation253_spill] sm:$0xff] %v11318_v6  ;;  %4230 = vmatpush.bf16.msra.mxu0 %v11318_v6  ;;  %v1225_v7 = vor.u32 %v1224_v63, %v15190_v42 }
 0x313   : > { %15188 = vst [vmem:[#allocation255_spill] sm:$0xff] %v11325_v41  ;;  %4279 = vmatpush.bf16.msra.mxu1 %v11325_v41  ;;  %v1264_v24 = vsel %vm10179_vm0, %v1223_v51, 0  ;;  %v8046_v41 = vld [vmem:[%s9261_s11 + $0x4e8] sm:$0xf0] }
 0x314   : > { %v11327_v28 = vadd.f32 %v3828_v34, %v3780_v0  ;;  %v3781_v5 = vpop.f32.mrf.mxu2  ;;  %v1265_v47 = vsel %vm10179_vm0, %v1225_v7, 0  ;;  %v11345_v63 = vsel %vm10185_vm3, 0, %v1264_v24  ;;  %v8758_v7 = vld [vmem:[%s9261_s11 + $0x464] sm:$0xf]  ;;  %v7854_v24 = vld [vmem:[%s9261_s11 + $0x368] sm:$0xf0] }
 0x315   : > { %v3683_v8 = vpop.f32.mrf.mxu0  ;;  %v3732_v32 = vpop.f32.mrf.mxu1  ;;  %15191 = vst [vmem:[#allocation256_spill] sm:$0xff] %v11345_v63 }
 0x316   : > { %v3684_v10 = vadd.f32 %v3683_v8, %v11081_v44  ;;  %v3830_v0 = vpop.f32.mrf.mxu3 }
 0x318   : > { %v3733_v14 = vadd.f32 %v3732_v32, %v3684_v10  ;;  %v11349_v32 = vsel %vm10185_vm3, 0, %v1265_v47  ;;  %3979 = vmatmul.bf16.gmra.mxu2 %v15131_v58  ;;  %v8774_v47 = vld [vmem:[%s9261_s11 + $0x4e4] sm:$0xf] }
 0x319   : > { %15192 = vst [vmem:[#allocation257_spill] sm:$0xff] %v11349_v32  ;;  %4028 = vmatmul.bf16.gmra.mxu3 %v15193_v23  ;;  %v11366_v6 = vor.u32 %v8774_v47, %v8046_v41 }
 0x31a   : > { %v3782_v34 = vadd.f32 %v3781_v5, %v3733_v14  ;;  %v7982_v14 = vld [vmem:[%s9261_s11 + $0x468] sm:$0xf0]  ;;  %v8726_v5 = vld [vmem:[%s9261_s11 + $0x364] sm:$0xf] }
 0x31b   : > { %15196 = vst [vmem:[#allocation259_spill] sm:$0xff] %v11366_v6  ;;  %4378 = vmatpush.bf16.msra.mxu3 %v11366_v6  ;;  %v8772_v6 = vld [vmem:[%s9261_s11 + $0x4d4] sm:$0xf] }
 0x31c   : > { %v11341_v44 = vadd.f32 %v3830_v0, %v3782_v34  ;;  %v3784_v42 = vpop.f32.mrf.mxu2  ;;  %v11359_v34 = vor.u32 %v8758_v7, %v7982_v14 }
 0x31d   : > { %v3686_v8 = vpop.f32.mrf.mxu0  ;;  %v3735_v1 = vpop.f32.mrf.mxu1 }
 0x31e   : > { %v3687_v10 = vadd.f32 %v3686_v8, %v11109_v21  ;;  %v3833_v0 = vpop.f32.mrf.mxu3  ;;  %15194 = vst [vmem:[#allocation118_spill] sm:$0xff] %v11359_v34  ;;  %v11364_v8 = vor.u32 %v8726_v5, %v7854_v24  ;;  %4329 = vmatpush.bf16.msra.mxu2 %v11359_v34 }
 0x320   : > { %v3736_v51 = vadd.f32 %v3735_v1, %v3687_v10  ;;  %3881 = vmatmul.bf16.gmra.mxu0 %v11345_v63  ;;  %3930 = vmatmul.bf16.gmra.mxu1 %v11349_v32  ;;  %15195 = vst [vmem:[#allocation258_spill] sm:$0xff] %v11364_v8  ;;  %v8742_v1 = vld [vmem:[%s9261_s11 + $0x3e4] sm:$0xf]  ;;  %v7918_v10 = vld [vmem:[%s9261_s11 + $0x3e8] sm:$0xf0] }
 0x321   : > { %v11371_v46 = vor.u32 %v8742_v1, %v7918_v10  ;;  %4231 = vmatpush.bf16.msra.mxu0 %v11364_v8  ;;  %v15198_v1 = vld [vmem:[#allocation125_spill] sm:$0xff] }
 0x322   : > { %v3785_v21 = vadd.f32 %v3784_v42, %v3736_v51 }
 0x323   : > { %15197 = vst [vmem:[#allocation260_spill] sm:$0xff] %v11371_v46  ;;  %4280 = vmatpush.bf16.msra.mxu1 %v11371_v46  ;;  %v15199_v46 = vld [vmem:[#allocation126_spill] sm:$0xff] }
 0x324   : > { %v11373_v56 = vadd.f32 %v3833_v0, %v3785_v21  ;;  %v3786_v42 = vpop.f32.mrf.mxu2 }
 0x325   : > { %v3688_v7 = vpop.f32.mrf.mxu0  ;;  %v3737_v14 = vpop.f32.mrf.mxu1 }
 0x326   : > { %v3689_v41 = vadd.f32 %v3688_v7, %v11119_v13  ;;  %v3835_v5 = vpop.f32.mrf.mxu3  ;;  %v15201_v7 = vld [vmem:[#allocation43_spill] sm:$0xff] }
 0x328   : > { %v3738_v51 = vadd.f32 %v3737_v14, %v3689_v41  ;;  %4140 = vmatmul.bf16.vlgmr.msrb.gmra.mxu2 %v15198_v1  ;;  %v15202_v14 = vld [vmem:[#allocation47_spill] sm:$0xff]  ;;  %v7846_v1 = vld [vmem:[%s9261_s11 + $0x358] sm:$0xf0] }
 0x329   : > { %4189 = vmatmul.bf16.vlgmr.msrb.gmra.mxu3 %v15199_v46 }
 0x32a   : > { %v3787_v24 = vadd.f32 %v3786_v42, %v3738_v51  ;;  %v8756_v51 = vld [vmem:[%s9261_s11 + $0x454] sm:$0xf]  ;;  %v7974_v42 = vld [vmem:[%s9261_s11 + $0x458] sm:$0xf0] }
 0x32b   : > { %v11391_v8 = vor.u32 %v8756_v51, %v7974_v42 }
 0x32c   : > { %v11379_v0 = vadd.f32 %v3835_v5, %v3787_v24  ;;  %v3945_v41 = vpop.f32.mrf.mxu2  ;;  %v8724_v5 = vld [vmem:[%s9261_s11 + $0x354] sm:$0xf] }
 0x32d   : > { %v3847_v47 = vpop.f32.mrf.mxu0  ;;  %v3896_v21 = vpop.f32.mrf.mxu1  ;;  %15203 = vst [vmem:[#allocation126_spill] sm:$0xff] %v11391_v8  ;;  %v11398_v46 = vor.u32 %v8724_v5, %v7846_v1  ;;  %4330 = vmatpush.bf16.msra.mxu2 %v11391_v8 }
 0x32e   : > { %v3848_v10 = vadd.f32 %v3847_v47, %v11139_v2  ;;  %v3994_v24 = vpop.f32.mrf.mxu3  ;;  %v8038_v2 = vld [vmem:[%s9261_s11 + $0x4d8] sm:$0xf0] }
 0x32f   : > { %v11396_v47 = vadd.f32 %v3994_v24, %v3945_v41  ;;  %15204 = vst [vmem:[#allocation43_spill] sm:$0xff] %v11398_v46  ;;  %4232 = vmatpush.bf16.msra.mxu0 %v11398_v46 }
 0x330   : > { %v11384_v13 = vadd.f32 %v3896_v21, %v3848_v10  ;;  %4042 = vmatmul.bf16.vlgmr.msrb.gmra.mxu0 %v15201_v7  ;;  %4091 = vmatmul.bf16.vlgmr.msrb.gmra.mxu1 %v15202_v14  ;;  %v11400_v21 = vor.u32 %v8772_v6, %v8038_v2  ;;  %v8740_v10 = vld [vmem:[%s9261_s11 + $0x3d4] sm:$0xf]  ;;  %v7910_v7 = vld [vmem:[%s9261_s11 + $0x3d8] sm:$0xf0] }
 0x331   : > { %v11405_v14 = vor.u32 %v8740_v10, %v7910_v7  ;;  %v15208_v7 = vld [vmem:[#allocation131_spill] sm:$0xff] }
 0x332   : > { %15200 = vst [vmem:[#allocation125_spill] sm:$0xff] %v11384_v13  ;;  %4379 = vmatpush.bf16.msra.mxu3 %v11400_v21  ;;  %v8770_v13 = vld [vmem:[%s9261_s11 + $0x4c4] sm:$0xf] }
 0x333   : > { %15205 = vst [vmem:[#allocation47_spill] sm:$0xff] %v11400_v21  ;;  %4281 = vmatpush.bf16.msra.mxu1 %v11405_v14  ;;  %v8722_v21 = vld [vmem:[%s9261_s11 + $0x344] sm:$0xf] }
 0x334   : > { %15206 = vst [vmem:[#allocation261_spill] sm:$0xff] %v11405_v14  ;;  %v3947_v5 = vpop.f32.mrf.mxu2  ;;  %v15209_v14 = vld [vmem:[#allocation132_spill] sm:$0xff] }
 0x335   : > { %v3849_v51 = vpop.f32.mrf.mxu0  ;;  %v3898_v42 = vpop.f32.mrf.mxu1 }
 0x336   : > { %v3850_v41 = vadd.f32 %v3849_v51, %v11149_v59  ;;  %v3996_v24 = vpop.f32.mrf.mxu3  ;;  %v15211_v51 = vld [vmem:[#allocation56_spill] sm:$0xff] }
 0x337   : > { %v11413_v1 = vadd.f32 %v3996_v24, %v3947_v5  ;;  %v8754_v5 = vld [vmem:[%s9261_s11 + $0x444] sm:$0xf]  ;;  %v7966_v24 = vld [vmem:[%s9261_s11 + $0x448] sm:$0xf0] }
 0x338   : > { %v11411_v6 = vadd.f32 %v3898_v42, %v3850_v41  ;;  %4145 = vmatmul.bf16.gmra.mxu2 %v15208_v7  ;;  %v15212_v42 = vld [vmem:[#allocation57_spill] sm:$0xff]  ;;  %v11425_v34 = vor.u32 %v8754_v5, %v7966_v24 }
 0x339   : > { %4194 = vmatmul.bf16.gmra.mxu3 %v15209_v14 }
 0x33a   : > { %15207 = vst [vmem:[#allocation262_spill] sm:$0xff] %v11411_v6  ;;  %v7838_v6 = vld [vmem:[%s9261_s11 + $0x348] sm:$0xf0]  ;;  %4331 = vmatpush.bf16.msra.mxu2 %v11425_v34 }
 0x33b   : > { %15213 = vst [vmem:[#allocation132_spill] sm:$0xff] %v11425_v34  ;;  %v11432_v60 = vor.u32 %v8722_v21, %v7838_v6  ;;  %v7830_v34 = vld [vmem:[%s9261_s11 + $0x338] sm:$0xf0] }
 0x33c   : > { %v3950_v41 = vpop.f32.mrf.mxu2 }
 0x33d   : > { %v3852_v2 = vpop.f32.mrf.mxu0  ;;  %v3901_v10 = vpop.f32.mrf.mxu1  ;;  %15214 = vst [vmem:[#allocation56_spill] sm:$0xff] %v11432_v60  ;;  %4233 = vmatpush.bf16.msra.mxu0 %v11432_v60 }
 0x33e   : > { %v3853_v46 = vadd.f32 %v3852_v2, %v11169_v45  ;;  %v3999_v8 = vpop.f32.mrf.mxu3  ;;  %v8030_v45 = vld [vmem:[%s9261_s11 + $0x4c8] sm:$0xf0] }
 0x33f   : > { %v11430_v2 = vadd.f32 %v3999_v8, %v3950_v41 }
 0x340   : > { %v11418_v59 = vadd.f32 %v3901_v10, %v3853_v46  ;;  %4047 = vmatmul.bf16.gmra.mxu0 %v15211_v51  ;;  %4096 = vmatmul.bf16.gmra.mxu1 %v15212_v42  ;;  %v11434_v46 = vor.u32 %v8770_v13, %v8030_v45  ;;  %v8738_v10 = vld [vmem:[%s9261_s11 + $0x3c4] sm:$0xf] }
 0x342   : > { %15210 = vst [vmem:[#allocation131_spill] sm:$0xff] %v11418_v59  ;;  %v7902_v59 = vld [vmem:[%s9261_s11 + $0x3c8] sm:$0xf0]  ;;  %4380 = vmatpush.bf16.msra.mxu3 %v11434_v46 }
 0x343   : > { %15215 = vst [vmem:[#allocation57_spill] sm:$0xff] %v11434_v46  ;;  %v11439_v39 = vor.u32 %v8738_v10, %v7902_v59 }
 0x344   : > { %v3952_v21 = vpop.f32.mrf.mxu2 }
 0x345   : > { %15216 = vst [vmem:[#allocation263_spill] sm:$0xff] %v11439_v39  ;;  %v3854_v5 = vpop.f32.mrf.mxu0  ;;  %v3903_v24 = vpop.f32.mrf.mxu1  ;;  %4282 = vmatpush.bf16.msra.mxu1 %v11439_v39  ;;  %v8720_v39 = vld [vmem:[%s9261_s11 + $0x334] sm:$0xf] }
 0x346   : > { %v3855_v8 = vadd.f32 %v3854_v5, %v11179_v12  ;;  %v4001_v6 = vpop.f32.mrf.mxu3  ;;  %v15219_v5 = vld [vmem:[#allocation69_spill] sm:$0xff]  ;;  %v11466_v31 = vor.u32 %v8720_v39, %v7830_v34 }
 0x347   : > { %v11447_v59 = vadd.f32 %v4001_v6, %v3952_v21  ;;  %v8752_v21 = vld [vmem:[%s9261_s11 + $0x434] sm:$0xf]  ;;  %v7958_v6 = vld [vmem:[%s9261_s11 + $0x438] sm:$0xf0] }
 0x348   : > { %v11445_v13 = vadd.f32 %v3903_v24, %v3855_v8  ;;  %4150 = vmatmul.bf16.gmra.mxu2 %v10291_v54  ;;  %v15220_v24 = vld [vmem:[#allocation70_spill] sm:$0xff]  ;;  %v11459_v46 = vor.u32 %v8752_v21, %v7958_v6  ;;  %4234 = vmatpush.bf16.msra.mxu0 %v11466_v31 }
 0x349   : > { %4199 = vmatmul.bf16.gmra.mxu3 %v10295_v18  ;;  %15222 = vst [vmem:[#allocation70_spill] sm:$0xff] %v11466_v31 }
 0x34a   : > { %15217 = vst [vmem:[#allocation264_spill] sm:$0xff] %v11445_v13  ;;  %v8768_v13 = vld [vmem:[%s9261_s11 + $0x4b4] sm:$0xf]  ;;  %4332 = vmatpush.bf16.msra.mxu2 %v11459_v46 }
 0x34b   : > { %15221 = vst [vmem:[#allocation69_spill] sm:$0xff] %v11459_v46  ;;  %v7822_v46 = vld [vmem:[%s9261_s11 + $0x328] sm:$0xf0] }
 0x34c   : > { %v3955_v8 = vpop.f32.mrf.mxu2 }
 0x34d   : > { %v3857_v41 = vpop.f32.mrf.mxu0  ;;  %v3906_v45 = vpop.f32.mrf.mxu1 }
 0x34e   : > { %v3858_v10 = vadd.f32 %v3857_v41, %v11199_v16  ;;  %v4004_v60 = vpop.f32.mrf.mxu3  ;;  %v8022_v16 = vld [vmem:[%s9261_s11 + $0x4b8] sm:$0xf0] }
 0x34f   : > { %v11464_v41 = vadd.f32 %v4004_v60, %v3955_v8 }
 0x350   : > { %v11452_v12 = vadd.f32 %v3906_v45, %v3858_v10  ;;  %4052 = vmatmul.bf16.gmra.mxu0 %v15219_v5  ;;  %4101 = vmatmul.bf16.gmra.mxu1 %v15220_v24  ;;  %v11468_v45 = vor.u32 %v8768_v13, %v8022_v16  ;;  %v8736_v10 = vld [vmem:[%s9261_s11 + $0x3b4] sm:$0xf] }
 0x352   : > { %15218 = vst [vmem:[#allocation265_spill] sm:$0xff] %v11452_v12  ;;  %v7894_v12 = vld [vmem:[%s9261_s11 + $0x3b8] sm:$0xf0]  ;;  %4381 = vmatpush.bf16.msra.mxu3 %v11468_v45 }
 0x353   : > { %15223 = vst [vmem:[#allocation266_spill] sm:$0xff] %v11468_v45  ;;  %v11473_v50 = vor.u32 %v8736_v10, %v7894_v12 }
 0x354   : > { %v3957_v34 = vpop.f32.mrf.mxu2 }
 0x355   : > { %15224 = vst [vmem:[#allocation267_spill] sm:$0xff] %v11473_v50  ;;  %v3859_v21 = vpop.f32.mrf.mxu0  ;;  %v3908_v6 = vpop.f32.mrf.mxu1  ;;  %4283 = vmatpush.bf16.msra.mxu1 %v11473_v50  ;;  %v8718_v50 = vld [vmem:[%s9261_s11 + $0x324] sm:$0xf] }
 0x356   : > { %v3860_v39 = vadd.f32 %v3859_v21, %v11209_v17  ;;  %v4006_v13 = vpop.f32.mrf.mxu3  ;;  %v15227_v21 = vld [vmem:[#allocation77_spill] sm:$0xff]  ;;  %v11500_v32 = vor.u32 %v8718_v50, %v7822_v46 }
 0x357   : > { %v11481_v12 = vadd.f32 %v4006_v13, %v3957_v34  ;;  %v8750_v34 = vld [vmem:[%s9261_s11 + $0x424] sm:$0xf]  ;;  %v7950_v13 = vld [vmem:[%s9261_s11 + $0x428] sm:$0xf0] }
 0x358   : > { %v11479_v60 = vadd.f32 %v3908_v6, %v3860_v39  ;;  %4155 = vmatmul.bf16.gmra.mxu2 %v10339_v22  ;;  %v15228_v6 = vld [vmem:[#allocation78_spill] sm:$0xff]  ;;  %v11493_v45 = vor.u32 %v8750_v34, %v7950_v13  ;;  %4235 = vmatpush.bf16.msra.mxu0 %v11500_v32 }
 0x359   : > { %4204 = vmatmul.bf16.gmra.mxu3 %v10343_v37  ;;  %15230 = vst [vmem:[#allocation78_spill] sm:$0xff] %v11500_v32 }
 0x35a   : > { %15225 = vst [vmem:[#allocation268_spill] sm:$0xff] %v11479_v60  ;;  %v8766_v60 = vld [vmem:[%s9261_s11 + $0x4a4] sm:$0xf]  ;;  %4333 = vmatpush.bf16.msra.mxu2 %v11493_v45 }
 0x35b   : > { %15229 = vst [vmem:[#allocation77_spill] sm:$0xff] %v11493_v45  ;;  %v7814_v45 = vld [vmem:[%s9261_s11 + $0x318] sm:$0xf0] }
 0x35c   : > { %v3960_v39 = vpop.f32.mrf.mxu2 }
 0x35d   : > { %v3862_v8 = vpop.f32.mrf.mxu0  ;;  %v3911_v16 = vpop.f32.mrf.mxu1 }
 0x35e   : > { %v3863_v10 = vadd.f32 %v3862_v8, %v11229_v19  ;;  %v4009_v31 = vpop.f32.mrf.mxu3  ;;  %v8014_v19 = vld [vmem:[%s9261_s11 + $0x4a8] sm:$0xf0] }
 0x35f   : > { %v11498_v8 = vadd.f32 %v4009_v31, %v3960_v39 }
 0x360   : > { %v11486_v17 = vadd.f32 %v3911_v16, %v3863_v10  ;;  %4057 = vmatmul.bf16.gmra.mxu0 %v15227_v21  ;;  %4106 = vmatmul.bf16.gmra.mxu1 %v15228_v6  ;;  %v11502_v16 = vor.u32 %v8766_v60, %v8014_v19  ;;  %v8734_v10 = vld [vmem:[%s9261_s11 + $0x3a4] sm:$0xf] }
 0x362   : > { %15226 = vst [vmem:[#allocation269_spill] sm:$0xff] %v11486_v17  ;;  %v7886_v17 = vld [vmem:[%s9261_s11 + $0x3a8] sm:$0xf0]  ;;  %4382 = vmatpush.bf16.msra.mxu3 %v11502_v16 }
 0x363   : > { %15231 = vst [vmem:[#allocation270_spill] sm:$0xff] %v11502_v16  ;;  %v11507_v63 = vor.u32 %v8734_v10, %v7886_v17 }
 0x364   : > { %v3962_v46 = vpop.f32.mrf.mxu2 }
 0x365   : > { %15232 = vst [vmem:[#allocation271_spill] sm:$0xff] %v11507_v63  ;;  %v3864_v34 = vpop.f32.mrf.mxu0  ;;  %v3913_v13 = vpop.f32.mrf.mxu1  ;;  %4284 = vmatpush.bf16.msra.mxu1 %v11507_v63  ;;  %v8716_v63 = vld [vmem:[%s9261_s11 + $0x314] sm:$0xf] }
 0x366   : > { %v3865_v31 = vadd.f32 %v3864_v34, %v11239_v29  ;;  %v4011_v60 = vpop.f32.mrf.mxu3  ;;  %v15235_v34 = vld [vmem:[#allocation85_spill] sm:$0xff] }
 0x367   : > { %v11515_v17 = vadd.f32 %v4011_v60, %v3962_v46  ;;  %v8748_v46 = vld [vmem:[%s9261_s11 + $0x414] sm:$0xf]  ;;  %v7942_v60 = vld [vmem:[%s9261_s11 + $0x418] sm:$0xf0] }
 0x368   : > { %v11513_v50 = vadd.f32 %v3913_v13, %v3865_v31  ;;  %4160 = vmatmul.bf16.gmra.mxu2 %v10387_v15  ;;  %v15236_v13 = vld [vmem:[#allocation86_spill] sm:$0xff]  ;;  %v11527_v16 = vor.u32 %v8748_v46, %v7942_v60 }
 0x369   : > { %4209 = vmatmul.bf16.gmra.mxu3 %v10391_v33  ;;  %v11534_v33 = vor.u32 %v8716_v63, %v7814_v45 }
 0x36a   : > { %15233 = vst [vmem:[#allocation272_spill] sm:$0xff] %v11513_v50  ;;  %v8764_v50 = vld [vmem:[%s9261_s11 + $0x494] sm:$0xf]  ;;  %4334 = vmatpush.bf16.msra.mxu2 %v11527_v16 }
 0x36b   : > { %15237 = vst [vmem:[#allocation85_spill] sm:$0xff] %v11527_v16  ;;  %4236 = vmatpush.bf16.msra.mxu0 %v11534_v33  ;;  %v7806_v16 = vld [vmem:[%s9261_s11 + $0x308] sm:$0xf0] }
 0x36c   : > { %v3965_v31 = vpop.f32.mrf.mxu2  ;;  %15238 = vst [vmem:[#allocation86_spill] sm:$0xff] %v11534_v33 }
 0x36d   : > { %v3867_v39 = vpop.f32.mrf.mxu0  ;;  %v3916_v19 = vpop.f32.mrf.mxu1 }
 0x36e   : > { %v3868_v10 = vadd.f32 %v3867_v39, %v11259_v9  ;;  %v4014_v32 = vpop.f32.mrf.mxu3  ;;  %v8006_v9 = vld [vmem:[%s9261_s11 + $0x498] sm:$0xf0] }
 0x36f   : > { %v11532_v39 = vadd.f32 %v4014_v32, %v3965_v31 }
 0x370   : > { %v11520_v29 = vadd.f32 %v3916_v19, %v3868_v10  ;;  %4062 = vmatmul.bf16.gmra.mxu0 %v15235_v34  ;;  %4111 = vmatmul.bf16.gmra.mxu1 %v15236_v13  ;;  %v11536_v19 = vor.u32 %v8764_v50, %v8006_v9  ;;  %v8732_v10 = vld [vmem:[%s9261_s11 + $0x394] sm:$0xf] }
 0x372   : > { %15234 = vst [vmem:[#allocation273_spill] sm:$0xff] %v11520_v29  ;;  %v7878_v29 = vld [vmem:[%s9261_s11 + $0x398] sm:$0xf0]  ;;  %4383 = vmatpush.bf16.msra.mxu3 %v11536_v19 }
 0x373   : > { %15239 = vst [vmem:[#allocation274_spill] sm:$0xff] %v11536_v19  ;;  %v11541_v15 = vor.u32 %v8732_v10, %v7878_v29 }
 0x374   : > { %v3967_v45 = vpop.f32.mrf.mxu2 }
 0x375   : > { %15240 = vst [vmem:[#allocation275_spill] sm:$0xff] %v11541_v15  ;;  %v3869_v46 = vpop.f32.mrf.mxu0  ;;  %v3918_v60 = vpop.f32.mrf.mxu1  ;;  %4285 = vmatpush.bf16.msra.mxu1 %v11541_v15  ;;  %v8714_v15 = vld [vmem:[%s9261_s11 + $0x304] sm:$0xf] }
 0x376   : > { %v3870_v63 = vadd.f32 %v3869_v46, %v11269_v40  ;;  %v4016_v50 = vpop.f32.mrf.mxu3  ;;  %v15243_v46 = vld [vmem:[#allocation93_spill] sm:$0xff] }
 0x377   : > { %v11549_v29 = vadd.f32 %v4016_v50, %v3967_v45  ;;  %v8746_v45 = vld [vmem:[%s9261_s11 + $0x404] sm:$0xf]  ;;  %v7934_v50 = vld [vmem:[%s9261_s11 + $0x408] sm:$0xf0] }
 0x378   : > { %v11547_v32 = vadd.f32 %v3918_v60, %v3870_v63  ;;  %4165 = vmatmul.bf16.gmra.mxu2 %v10435_v57  ;;  %v15244_v60 = vld [vmem:[#allocation94_spill] sm:$0xff]  ;;  %v11561_v19 = vor.u32 %v8746_v45, %v7934_v50 }
 0x379   : > { %4214 = vmatmul.bf16.gmra.mxu3 %v10439_v43  ;;  %v11568_v43 = vor.u32 %v8714_v15, %v7806_v16 }
 0x37a   : > { %15241 = vst [vmem:[#allocation276_spill] sm:$0xff] %v11547_v32  ;;  %v8762_v32 = vld [vmem:[%s9261_s11 + $0x484] sm:$0xf]  ;;  %4335 = vmatpush.bf16.msra.mxu2 %v11561_v19 }
 0x37b   : > { %15245 = vst [vmem:[#allocation93_spill] sm:$0xff] %v11561_v19  ;;  %4237 = vmatpush.bf16.msra.mxu0 %v11568_v43  ;;  %v8118_v19 = vld [vmem:[%s9261_s11 + $0x578] sm:$0xf0] }
 0x37c   : > { %v3970_v63 = vpop.f32.mrf.mxu2  ;;  %15246 = vst [vmem:[#allocation94_spill] sm:$0xff] %v11568_v43 }
 0x37d   : > { %v3872_v31 = vpop.f32.mrf.mxu0  ;;  %v3921_v9 = vpop.f32.mrf.mxu1 }
 0x37e   : > { %v3873_v10 = vadd.f32 %v3872_v31, %v11289_v4  ;;  %v4019_v33 = vpop.f32.mrf.mxu3  ;;  %v7998_v4 = vld [vmem:[%s9261_s11 + $0x488] sm:$0xf0] }
 0x37f   : > { %v11566_v31 = vadd.f32 %v4019_v33, %v3970_v63 }
 0x380   : > { %v11554_v40 = vadd.f32 %v3921_v9, %v3873_v10  ;;  %4067 = vmatmul.bf16.gmra.mxu0 %v15243_v46  ;;  %4116 = vmatmul.bf16.gmra.mxu1 %v15244_v60  ;;  %v11570_v9 = vor.u32 %v8762_v32, %v7998_v4  ;;  %v8730_v10 = vld [vmem:[%s9261_s11 + $0x384] sm:$0xf] }
 0x382   : > { %15242 = vst [vmem:[#allocation277_spill] sm:$0xff] %v11554_v40  ;;  %v7870_v40 = vld [vmem:[%s9261_s11 + $0x388] sm:$0xf0]  ;;  %4384 = vmatpush.bf16.msra.mxu3 %v11570_v9 }
 0x383   : > { %15247 = vst [vmem:[#allocation278_spill] sm:$0xff] %v11570_v9  ;;  %v11575_v57 = vor.u32 %v8730_v10, %v7870_v40 }
 0x384   : > { %v3972_v16 = vpop.f32.mrf.mxu2 }
 0x385   : > { %15248 = vst [vmem:[#allocation279_spill] sm:$0xff] %v11575_v57  ;;  %v3874_v45 = vpop.f32.mrf.mxu0  ;;  %v3923_v50 = vpop.f32.mrf.mxu1  ;;  %4286 = vmatpush.bf16.msra.mxu1 %v11575_v57 }
 0x386   : > { %v3875_v15 = vadd.f32 %v3874_v45, %v11299_v35  ;;  %v4021_v32 = vpop.f32.mrf.mxu3  ;;  %v15251_v35 = vld [vmem:[#allocation101_spill] sm:$0xff]  ;;  %v15252_v45 = vld [vmem:[#allocation102_spill] sm:$0xff] }
 0x387   : > { %v11583_v40 = vadd.f32 %v4021_v32, %v3972_v16  ;;  %v8246_v16 = vld [vmem:[%s9261_s11 + $0x678] sm:$0xf0]  ;;  %v8792_v32 = vld [vmem:[%s9261_s11 + $0x574] sm:$0xf] }
 0x388   : > { %v11581_v33 = vadd.f32 %v3923_v50, %v3875_v15  ;;  %4170 = vmatmul.bf16.gmra.mxu2 %v10489_v3  ;;  %v8824_v15 = vld [vmem:[%s9261_s11 + $0x674] sm:$0xf] }
 0x389   : > { %4219 = vmatmul.bf16.gmra.mxu3 %v10493_v11  ;;  %v11595_v9 = vor.u32 %v8824_v15, %v8246_v16  ;;  %v8182_v11 = vld [vmem:[%s9261_s11 + $0x5f8] sm:$0xf0] }
 0x38a   : > { %15249 = vst [vmem:[#allocation280_spill] sm:$0xff] %v11581_v33  ;;  %v8840_v33 = vld [vmem:[%s9261_s11 + $0x6f4] sm:$0xf] }
 0x38b   : > { %15253 = vst [vmem:[#allocation101_spill] sm:$0xff] %v11595_v9  ;;  %4524 = vmatpush.bf16.msrb.mxu2 %v11595_v9  ;;  %v8110_v9 = vld [vmem:[%s9261_s11 + $0x568] sm:$0xf0] }
 0x38c   : > { %v3975_v50 = vpop.f32.mrf.mxu2 }
 0x38d   : > { %v3877_v63 = vpop.f32.mrf.mxu0  ;;  %v3926_v4 = vpop.f32.mrf.mxu1 }
 0x38e   : > { %v3878_v10 = vadd.f32 %v3877_v63, %v11327_v28  ;;  %v4024_v43 = vpop.f32.mrf.mxu3  ;;  %v8310_v28 = vld [vmem:[%s9261_s11 + $0x6f8] sm:$0xf0] }
 0x38f   : > { %v11600_v63 = vadd.f32 %v4024_v43, %v3975_v50 }
 0x390   : > { %v11588_v57 = vadd.f32 %v3926_v4, %v3878_v10  ;;  %4072 = vmatmul.bf16.gmra.mxu0 %v15251_v35  ;;  %4121 = vmatmul.bf16.gmra.mxu1 %v15252_v45  ;;  %v11602_v4 = vor.u32 %v8792_v32, %v8118_v19  ;;  %v11604_v10 = vor.u32 %v8840_v33, %v8310_v28 }
 0x392   : > { %15250 = vst [vmem:[#allocation281_spill] sm:$0xff] %v11588_v57  ;;  %4426 = vmatpush.bf16.msrb.mxu0 %v11602_v4  ;;  %4573 = vmatpush.bf16.msrb.mxu3 %v11604_v10  ;;  %v8808_v57 = vld [vmem:[%s9261_s11 + $0x5f4] sm:$0xf] }
 0x393   : > { %15254 = vst [vmem:[#allocation102_spill] sm:$0xff] %v11602_v4  ;;  %v11611_v16 = vor.u32 %v8808_v57, %v8182_v11  ;;  %v15259_v11 = vld [vmem:[#allocation109_spill] sm:$0xff] }
 0x394   : > { %15255 = vst [vmem:[#allocation282_spill] sm:$0xff] %v11604_v10  ;;  %v3977_v33 = vpop.f32.mrf.mxu2 }
 0x395   : > { %v3879_v3 = vpop.f32.mrf.mxu0  ;;  %v3928_v15 = vpop.f32.mrf.mxu1  ;;  %15256 = vst [vmem:[#allocation283_spill] sm:$0xff] %v11611_v16  ;;  %4475 = vmatpush.bf16.msrb.mxu1 %v11611_v16 }
 0x396   : > { %v3880_v43 = vadd.f32 %v3879_v3, %v11341_v44  ;;  %v4026_v50 = vpop.f32.mrf.mxu3  ;;  %v15260_v44 = vld [vmem:[#allocation110_spill] sm:$0xff] }
 0x397   : > { %v11617_v32 = vadd.f32 %v4026_v50, %v3977_v33  ;;  %v8238_v33 = vld [vmem:[%s9261_s11 + $0x668] sm:$0xf0]  ;;  %v8790_v50 = vld [vmem:[%s9261_s11 + $0x564] sm:$0xf] }
 0x398   : > { %v11615_v19 = vadd.f32 %v3928_v15, %v3880_v43  ;;  %4175 = vmatmul.bf16.gmra.mxu2 %v10559_v62  ;;  %v8822_v43 = vld [vmem:[%s9261_s11 + $0x664] sm:$0xf] }
 0x399   : > { %4224 = vmatmul.bf16.gmra.mxu3 %v15178_v25  ;;  %v11629_v10 = vor.u32 %v8822_v43, %v8238_v33  ;;  %v8174_v25 = vld [vmem:[%s9261_s11 + $0x5e8] sm:$0xf0] }
 0x39a   : > { %15257 = vst [vmem:[#allocation284_spill] sm:$0xff] %v11615_v19  ;;  %v8838_v19 = vld [vmem:[%s9261_s11 + $0x6e4] sm:$0xf] }
 0x39b   : > { %15261 = vst [vmem:[#allocation109_spill] sm:$0xff] %v11629_v10  ;;  %4525 = vmatpush.bf16.msrb.mxu2 %v11629_v10  ;;  %v8558_v10 = vld [vmem:[%s9261_s11 + $0x8e8] sm:$0xf0] }
 0x39c   : > { %v3980_v15 = vpop.f32.mrf.mxu2 }
 0x39d   : > { %v3882_v28 = vpop.f32.mrf.mxu0  ;;  %v3931_v4 = vpop.f32.mrf.mxu1 }
 0x39e   : > { %v3883_v57 = vadd.f32 %v3882_v28, %v11373_v56  ;;  %v4029_v16 = vpop.f32.mrf.mxu3  ;;  %v8302_v56 = vld [vmem:[%s9261_s11 + $0x6e8] sm:$0xf0] }
 0x39f   : > { %v11634_v28 = vadd.f32 %v4029_v16, %v3980_v15 }
 0x3a0   : > { %v11622_v3 = vadd.f32 %v3931_v4, %v3883_v57  ;;  %4077 = vmatmul.bf16.gmra.mxu0 %v15259_v11  ;;  %4126 = vmatmul.bf16.gmra.mxu1 %v15260_v44  ;;  %v11636_v4 = vor.u32 %v8790_v50, %v8110_v9  ;;  %v11638_v57 = vor.u32 %v8838_v19, %v8302_v56 }
 0x3a2   : > { %15258 = vst [vmem:[#allocation285_spill] sm:$0xff] %v11622_v3  ;;  %4427 = vmatpush.bf16.msrb.mxu0 %v11636_v4  ;;  %4574 = vmatpush.bf16.msrb.mxu3 %v11638_v57  ;;  %v8806_v3 = vld [vmem:[%s9261_s11 + $0x5e4] sm:$0xf] }
 0x3a3   : > { %15262 = vst [vmem:[#allocation110_spill] sm:$0xff] %v11636_v4  ;;  %v11645_v33 = vor.u32 %v8806_v3, %v8174_v25  ;;  %v8820_v3 = vld [vmem:[%s9261_s11 + $0x654] sm:$0xf] }
 0x3a4   : > { %15263 = vst [vmem:[#allocation286_spill] sm:$0xff] %v11638_v57  ;;  %v3982_v19 = vpop.f32.mrf.mxu2  ;;  %v8294_v57 = vld [vmem:[%s9261_s11 + $0x6d8] sm:$0xf0] }
 0x3a5   : > { %v3884_v62 = vpop.f32.mrf.mxu0  ;;  %v3933_v43 = vpop.f32.mrf.mxu1  ;;  %15264 = vst [vmem:[#allocation287_spill] sm:$0xff] %v11645_v33  ;;  %4476 = vmatpush.bf16.msrb.mxu1 %v11645_v33  ;;  %v8102_v33 = vld [vmem:[%s9261_s11 + $0x558] sm:$0xf0] }
 0x3a6   : > { %v3885_v16 = vadd.f32 %v3884_v62, %v11379_v0  ;;  %v4031_v15 = vpop.f32.mrf.mxu3 }
 0x3a7   : > { %v11651_v50 = vadd.f32 %v4031_v15, %v3982_v19 }
 0x3a8   : > { %v11649_v9 = vadd.f32 %v3933_v43, %v3885_v16  ;;  %4336 = vmatmul.bf16.vlgmr.msra.gmra.mxu2 %v15211_v51  ;;  %v8230_v43 = vld [vmem:[%s9261_s11 + $0x658] sm:$0xf0]  ;;  %v8788_v16 = vld [vmem:[%s9261_s11 + $0x554] sm:$0xf] }
 0x3a9   : > { %4385 = vmatmul.bf16.vlgmr.msra.gmra.mxu3 %v15212_v42  ;;  %v11661_v15 = vor.u32 %v8820_v3, %v8230_v43  ;;  %v8836_v51 = vld [vmem:[%s9261_s11 + $0x6d4] sm:$0xf] }
 0x3aa   : > { %15265 = vst [vmem:[#allocation288_spill] sm:$0xff] %v11649_v9  ;;  %v11668_v42 = vor.u32 %v8836_v51, %v8294_v57  ;;  %v8870_v9 = vld [vmem:[%s9261_s11 + $0x7e4] sm:$0xf] }
 0x3ab   : > { %15266 = vst [vmem:[#allocation289_spill] sm:$0xff] %v11661_v15  ;;  %4526 = vmatpush.bf16.msrb.mxu2 %v11661_v15 }
 0x3ac   : > { %v4141_v0 = vpop.f32.mrf.mxu2  ;;  %15268 = vst [vmem:[#allocation291_spill] sm:$0xff] %v11668_v42  ;;  %4575 = vmatpush.bf16.msrb.mxu3 %v11668_v42  ;;  %v8158_v42 = vld [vmem:[%s9261_s11 + $0x5c8] sm:$0xf0] }
 0x3ad   : > { %v4043_v56 = vpop.f32.mrf.mxu0  ;;  %v4092_v4 = vpop.f32.mrf.mxu1 }
 0x3ae   : > { %v4044_v25 = vadd.f32 %v4043_v56, %v11396_v47  ;;  %v4190_v19 = vpop.f32.mrf.mxu3  ;;  %v11666_v56 = vor.u32 %v8788_v16, %v8102_v33 }
 0x3b0   : > { %v4093_v62 = vadd.f32 %v4092_v4, %v4044_v25  ;;  %4238 = vmatmul.bf16.vlgmr.msra.gmra.mxu0 %v15160_v36  ;;  %4287 = vmatmul.bf16.vlgmr.msra.gmra.mxu1 %v15161_v26  ;;  %15267 = vst [vmem:[#allocation290_spill] sm:$0xff] %v11666_v56  ;;  %v8804_v26 = vld [vmem:[%s9261_s11 + $0x5d4] sm:$0xf]  ;;  %v8166_v4 = vld [vmem:[%s9261_s11 + $0x5d8] sm:$0xf0] }
 0x3b1   : > { %4428 = vmatpush.bf16.msrb.mxu0 %v11666_v56  ;;  %v11677_v43 = vor.u32 %v8804_v26, %v8166_v4  ;;  %v8802_v56 = vld [vmem:[%s9261_s11 + $0x5c4] sm:$0xf] }
 0x3b2   : > { %v4142_v47 = vadd.f32 %v4141_v0, %v4093_v62  ;;  %v11707_v15 = vor.u32 %v8802_v56, %v8158_v42 }
 0x3b3   : > { %15269 = vst [vmem:[#allocation292_spill] sm:$0xff] %v11677_v43  ;;  %4477 = vmatpush.bf16.msrb.mxu1 %v11677_v43  ;;  %v8286_v43 = vld [vmem:[%s9261_s11 + $0x6c8] sm:$0xf0] }
 0x3b4   : > { %v11671_v36 = vadd.f32 %v4190_v19, %v4142_v47  ;;  %v4143_v33 = vpop.f32.mrf.mxu2  ;;  %15273 = vst [vmem:[#allocation296_spill] sm:$0xff] %v11707_v15 }
 0x3b5   : > { %v4045_v25 = vpop.f32.mrf.mxu0  ;;  %v4094_v3 = vpop.f32.mrf.mxu1 }
 0x3b6   : > { %v4046_v62 = vadd.f32 %v4045_v25, %v11413_v1  ;;  %v4192_v0 = vpop.f32.mrf.mxu3  ;;  %v8818_v25 = vld [vmem:[%s9261_s11 + $0x644] sm:$0xf] }
 0x3b7   : > { %4478 = vmatpush.bf16.msrb.mxu1 %v11707_v15  ;;  %v8278_v15 = vld [vmem:[%s9261_s11 + $0x6b8] sm:$0xf0] }
 0x3b8   : > { %v4095_v57 = vadd.f32 %v4094_v3, %v4046_v62  ;;  %4341 = vmatmul.bf16.gmra.mxu2 %v15219_v5  ;;  %v8222_v3 = vld [vmem:[%s9261_s11 + $0x648] sm:$0xf0]  ;;  %v8786_v62 = vld [vmem:[%s9261_s11 + $0x544] sm:$0xf] }
 0x3b9   : > { %4390 = vmatmul.bf16.gmra.mxu3 %v15220_v24 }
 0x3ba   : > { %v4144_v16 = vadd.f32 %v4143_v33, %v4095_v57  ;;  %v11691_v33 = vor.u32 %v8818_v25, %v8222_v3 }
 0x3bc   : > { %v11681_v19 = vadd.f32 %v4192_v0, %v4144_v16  ;;  %v4146_v4 = vpop.f32.mrf.mxu2  ;;  %15270 = vst [vmem:[#allocation293_spill] sm:$0xff] %v11691_v33  ;;  %v8094_v0 = vld [vmem:[%s9261_s11 + $0x548] sm:$0xf0]  ;;  %v8834_v16 = vld [vmem:[%s9261_s11 + $0x6c4] sm:$0xf]  ;;  %4527 = vmatpush.bf16.msrb.mxu2 %v11691_v33 }
 0x3bd   : > { %v4048_v51 = vpop.f32.mrf.mxu0  ;;  %v4097_v47 = vpop.f32.mrf.mxu1 }
 0x3be   : > { %v4049_v1 = vadd.f32 %v4048_v51, %v11430_v2  ;;  %v4195_v57 = vpop.f32.mrf.mxu3  ;;  %v11696_v51 = vor.u32 %v8786_v62, %v8094_v0 }
 0x3c0   : > { %v4098_v26 = vadd.f32 %v4097_v47, %v4049_v1  ;;  %4243 = vmatmul.bf16.gmra.mxu0 %v15101_v52  ;;  %4292 = vmatmul.bf16.gmra.mxu1 %v15102_v20  ;;  %15271 = vst [vmem:[#allocation294_spill] sm:$0xff] %v11696_v51  ;;  %v11698_v47 = vor.u32 %v8834_v16, %v8286_v43 }
 0x3c1   : > { %4429 = vmatpush.bf16.msrb.mxu0 %v11696_v51  ;;  %v8800_v51 = vld [vmem:[%s9261_s11 + $0x5b4] sm:$0xf] }
 0x3c2   : > { %v4147_v2 = vadd.f32 %v4146_v4, %v4098_v26  ;;  %15272 = vst [vmem:[#allocation295_spill] sm:$0xff] %v11698_v47  ;;  %4576 = vmatpush.bf16.msrb.mxu3 %v11698_v47  ;;  %v8150_v47 = vld [vmem:[%s9261_s11 + $0x5b8] sm:$0xf0] }
 0x3c3   : > { %v11737_v33 = vor.u32 %v8800_v51, %v8150_v47 }
 0x3c4   : > { %v11701_v1 = vadd.f32 %v4195_v57, %v4147_v2  ;;  %v4148_v4 = vpop.f32.mrf.mxu2 }
 0x3c5   : > { %v4050_v25 = vpop.f32.mrf.mxu0  ;;  %v4099_v3 = vpop.f32.mrf.mxu1  ;;  %15277 = vst [vmem:[#allocation300_spill] sm:$0xff] %v11737_v33  ;;  %4479 = vmatpush.bf16.msrb.mxu1 %v11737_v33  ;;  %v8270_v33 = vld [vmem:[%s9261_s11 + $0x6a8] sm:$0xf0] }
 0x3c6   : > { %v4051_v26 = vadd.f32 %v4050_v25, %v11447_v59  ;;  %v4197_v62 = vpop.f32.mrf.mxu3  ;;  %v8816_v25 = vld [vmem:[%s9261_s11 + $0x634] sm:$0xf] }
 0x3c8   : > { %v4100_v43 = vadd.f32 %v4099_v3, %v4051_v26  ;;  %4346 = vmatmul.bf16.gmra.mxu2 %v15227_v21  ;;  %v8214_v3 = vld [vmem:[%s9261_s11 + $0x638] sm:$0xf0]  ;;  %v8784_v26 = vld [vmem:[%s9261_s11 + $0x534] sm:$0xf] }
 0x3c9   : > { %4395 = vmatmul.bf16.gmra.mxu3 %v15228_v6 }
 0x3ca   : > { %v4149_v57 = vadd.f32 %v4148_v4, %v4100_v43  ;;  %v11721_v4 = vor.u32 %v8816_v25, %v8214_v3 }
 0x3cc   : > { %v11711_v0 = vadd.f32 %v4197_v62, %v4149_v57  ;;  %v4151_v42 = vpop.f32.mrf.mxu2  ;;  %15274 = vst [vmem:[#allocation297_spill] sm:$0xff] %v11721_v4  ;;  %v8086_v62 = vld [vmem:[%s9261_s11 + $0x538] sm:$0xf0]  ;;  %v8832_v57 = vld [vmem:[%s9261_s11 + $0x6b4] sm:$0xf]  ;;  %4528 = vmatpush.bf16.msrb.mxu2 %v11721_v4 }
 0x3cd   : > { %v4053_v16 = vpop.f32.mrf.mxu0  ;;  %v4102_v2 = vpop.f32.mrf.mxu1 }
 0x3ce   : > { %v4054_v59 = vadd.f32 %v4053_v16, %v11464_v41  ;;  %v4200_v43 = vpop.f32.mrf.mxu3  ;;  %v11726_v16 = vor.u32 %v8784_v26, %v8086_v62 }
 0x3d0   : > { %v4103_v56 = vadd.f32 %v4102_v2, %v4054_v59  ;;  %4248 = vmatmul.bf16.gmra.mxu0 %v15107_v61  ;;  %4297 = vmatmul.bf16.gmra.mxu1 %v15108_v30  ;;  %15275 = vst [vmem:[#allocation298_spill] sm:$0xff] %v11726_v16  ;;  %v11728_v2 = vor.u32 %v8832_v57, %v8278_v15 }
 0x3d1   : > { %4430 = vmatpush.bf16.msrb.mxu0 %v11726_v16  ;;  %v8798_v16 = vld [vmem:[%s9261_s11 + $0x5a4] sm:$0xf] }
 0x3d2   : > { %v4152_v41 = vadd.f32 %v4151_v42, %v4103_v56  ;;  %15276 = vst [vmem:[#allocation299_spill] sm:$0xff] %v11728_v2  ;;  %4577 = vmatpush.bf16.msrb.mxu3 %v11728_v2  ;;  %v8142_v2 = vld [vmem:[%s9261_s11 + $0x5a8] sm:$0xf0] }
 0x3d3   : > { %v11767_v4 = vor.u32 %v8798_v16, %v8142_v2 }
 0x3d4   : > { %v11731_v59 = vadd.f32 %v4200_v43, %v4152_v41  ;;  %v4153_v42 = vpop.f32.mrf.mxu2 }
 0x3d5   : > { %v4055_v25 = vpop.f32.mrf.mxu0  ;;  %v4104_v3 = vpop.f32.mrf.mxu1  ;;  %15281 = vst [vmem:[#allocation304_spill] sm:$0xff] %v11767_v4  ;;  %4480 = vmatpush.bf16.msrb.mxu1 %v11767_v4  ;;  %v8262_v4 = vld [vmem:[%s9261_s11 + $0x698] sm:$0xf0] }
 0x3d6   : > { %v4056_v56 = vadd.f32 %v4055_v25, %v11481_v12  ;;  %v4202_v26 = vpop.f32.mrf.mxu3  ;;  %v8814_v25 = vld [vmem:[%s9261_s11 + $0x624] sm:$0xf] }
 0x3d8   : > { %v4105_v15 = vadd.f32 %v4104_v3, %v4056_v56  ;;  %4351 = vmatmul.bf16.gmra.mxu2 %v15235_v34  ;;  %v8206_v3 = vld [vmem:[%s9261_s11 + $0x628] sm:$0xf0]  ;;  %v8782_v56 = vld [vmem:[%s9261_s11 + $0x524] sm:$0xf] }
 0x3d9   : > { %4400 = vmatmul.bf16.gmra.mxu3 %v15236_v13 }
 0x3da   : > { %v4154_v43 = vadd.f32 %v4153_v42, %v4105_v15  ;;  %v11751_v42 = vor.u32 %v8814_v25, %v8206_v3 }
 0x3dc   : > { %v11741_v62 = vadd.f32 %v4202_v26, %v4154_v43  ;;  %v4156_v47 = vpop.f32.mrf.mxu2  ;;  %15278 = vst [vmem:[#allocation301_spill] sm:$0xff] %v11751_v42  ;;  %v8078_v26 = vld [vmem:[%s9261_s11 + $0x528] sm:$0xf0]  ;;  %v8830_v43 = vld [vmem:[%s9261_s11 + $0x6a4] sm:$0xf]  ;;  %4529 = vmatpush.bf16.msrb.mxu2 %v11751_v42 }
 0x3dd   : > { %v4058_v57 = vpop.f32.mrf.mxu0  ;;  %v4107_v41 = vpop.f32.mrf.mxu1 }
 0x3de   : > { %v4059_v12 = vadd.f32 %v4058_v57, %v11498_v8  ;;  %v4205_v15 = vpop.f32.mrf.mxu3  ;;  %v11756_v57 = vor.u32 %v8782_v56, %v8078_v26 }
 0x3e0   : > { %v4108_v51 = vadd.f32 %v4107_v41, %v4059_v12  ;;  %4253 = vmatmul.bf16.gmra.mxu0 %v15113_v53  ;;  %4302 = vmatmul.bf16.gmra.mxu1 %v15114_v48  ;;  %15279 = vst [vmem:[#allocation302_spill] sm:$0xff] %v11756_v57  ;;  %v11758_v41 = vor.u32 %v8830_v43, %v8270_v33 }
 0x3e1   : > { %4431 = vmatpush.bf16.msrb.mxu0 %v11756_v57  ;;  %v8796_v57 = vld [vmem:[%s9261_s11 + $0x594] sm:$0xf] }
 0x3e2   : > { %v4157_v8 = vadd.f32 %v4156_v47, %v4108_v51  ;;  %15280 = vst [vmem:[#allocation303_spill] sm:$0xff] %v11758_v41  ;;  %4578 = vmatpush.bf16.msrb.mxu3 %v11758_v41  ;;  %v8134_v41 = vld [vmem:[%s9261_s11 + $0x598] sm:$0xf0] }
 0x3e3   : > { %v11797_v42 = vor.u32 %v8796_v57, %v8134_v41 }
 0x3e4   : > { %v11761_v12 = vadd.f32 %v4205_v15, %v4157_v8  ;;  %v4158_v47 = vpop.f32.mrf.mxu2 }
 0x3e5   : > { %v4060_v25 = vpop.f32.mrf.mxu0  ;;  %v4109_v3 = vpop.f32.mrf.mxu1  ;;  %15285 = vst [vmem:[#allocation308_spill] sm:$0xff] %v11797_v42  ;;  %4481 = vmatpush.bf16.msrb.mxu1 %v11797_v42  ;;  %v8254_v42 = vld [vmem:[%s9261_s11 + $0x688] sm:$0xf0] }
 0x3e6   : > { %v4061_v51 = vadd.f32 %v4060_v25, %v11515_v17  ;;  %v4207_v56 = vpop.f32.mrf.mxu3  ;;  %v8812_v25 = vld [vmem:[%s9261_s11 + $0x614] sm:$0xf] }
 0x3e8   : > { %v4110_v33 = vadd.f32 %v4109_v3, %v4061_v51  ;;  %4356 = vmatmul.bf16.gmra.mxu2 %v15243_v46  ;;  %v8198_v3 = vld [vmem:[%s9261_s11 + $0x618] sm:$0xf0]  ;;  %v8780_v51 = vld [vmem:[%s9261_s11 + $0x514] sm:$0xf] }
 0x3e9   : > { %4405 = vmatmul.bf16.gmra.mxu3 %v15244_v60 }
 0x3ea   : > { %v4159_v15 = vadd.f32 %v4158_v47, %v4110_v33  ;;  %v11781_v47 = vor.u32 %v8812_v25, %v8198_v3 }
 0x3ec   : > { %v11771_v26 = vadd.f32 %v4207_v56, %v4159_v15  ;;  %v4161_v2 = vpop.f32.mrf.mxu2  ;;  %15282 = vst [vmem:[#allocation305_spill] sm:$0xff] %v11781_v47  ;;  %v8070_v56 = vld [vmem:[%s9261_s11 + $0x518] sm:$0xf0]  ;;  %v8828_v15 = vld [vmem:[%s9261_s11 + $0x694] sm:$0xf]  ;;  %4530 = vmatpush.bf16.msrb.mxu2 %v11781_v47 }
 0x3ed   : > { %v4063_v43 = vpop.f32.mrf.mxu0  ;;  %v4112_v8 = vpop.f32.mrf.mxu1 }
 0x3ee   : > { %v4064_v17 = vadd.f32 %v4063_v43, %v11532_v39  ;;  %v4210_v33 = vpop.f32.mrf.mxu3  ;;  %v11786_v43 = vor.u32 %v8780_v51, %v8070_v56 }
 0x3f0   : > { %v4113_v16 = vadd.f32 %v4112_v8, %v4064_v17  ;;  %4258 = vmatmul.bf16.gmra.mxu0 %v15119_v49  ;;  %4307 = vmatmul.bf16.gmra.mxu1 %v15120_v38  ;;  %15283 = vst [vmem:[#allocation306_spill] sm:$0xff] %v11786_v43  ;;  %v11788_v8 = vor.u32 %v8828_v15, %v8262_v4 }
 0x3f1   : > { %4432 = vmatpush.bf16.msrb.mxu0 %v11786_v43  ;;  %v8794_v43 = vld [vmem:[%s9261_s11 + $0x584] sm:$0xf] }
 0x3f2   : > { %v4162_v39 = vadd.f32 %v4161_v2, %v4113_v16  ;;  %15284 = vst [vmem:[#allocation307_spill] sm:$0xff] %v11788_v8  ;;  %4579 = vmatpush.bf16.msrb.mxu3 %v11788_v8  ;;  %v8126_v8 = vld [vmem:[%s9261_s11 + $0x588] sm:$0xf0] }
 0x3f3   : > { %v11827_v47 = vor.u32 %v8794_v43, %v8126_v8 }
 0x3f4   : > { %v11791_v17 = vadd.f32 %v4210_v33, %v4162_v39  ;;  %v4163_v2 = vpop.f32.mrf.mxu2 }
 0x3f5   : > { %v4065_v25 = vpop.f32.mrf.mxu0  ;;  %v4114_v3 = vpop.f32.mrf.mxu1  ;;  %15289 = vst [vmem:[#allocation312_spill] sm:$0xff] %v11827_v47  ;;  %4482 = vmatpush.bf16.msrb.mxu1 %v11827_v47  ;;  %v8566_v47 = vld [vmem:[%s9261_s11 + $0x8f8] sm:$0xf0] }
 0x3f6   : > { %v4066_v16 = vadd.f32 %v4065_v25, %v11549_v29  ;;  %v4212_v51 = vpop.f32.mrf.mxu3  ;;  %v8810_v25 = vld [vmem:[%s9261_s11 + $0x604] sm:$0xf] }
 0x3f8   : > { %v4115_v4 = vadd.f32 %v4114_v3, %v4066_v16  ;;  %4361 = vmatmul.bf16.gmra.mxu2 %v15251_v35  ;;  %v8190_v3 = vld [vmem:[%s9261_s11 + $0x608] sm:$0xf0]  ;;  %v8778_v16 = vld [vmem:[%s9261_s11 + $0x504] sm:$0xf] }
 0x3f9   : > { %4410 = vmatmul.bf16.gmra.mxu3 %v15252_v45 }
 0x3fa   : > { %v4164_v33 = vadd.f32 %v4163_v2, %v4115_v4  ;;  %v11811_v2 = vor.u32 %v8810_v25, %v8190_v3 }
 0x3fc   : > { %v11801_v56 = vadd.f32 %v4212_v51, %v4164_v33  ;;  %v4166_v41 = vpop.f32.mrf.mxu2  ;;  %15286 = vst [vmem:[#allocation309_spill] sm:$0xff] %v11811_v2  ;;  %v8062_v51 = vld [vmem:[%s9261_s11 + $0x508] sm:$0xf0]  ;;  %v8826_v33 = vld [vmem:[%s9261_s11 + $0x684] sm:$0xf]  ;;  %4531 = vmatpush.bf16.msrb.mxu2 %v11811_v2 }
 0x3fd   : > { %v4068_v15 = vpop.f32.mrf.mxu0  ;;  %v4117_v39 = vpop.f32.mrf.mxu1 }
 0x3fe   : > { %v4069_v29 = vadd.f32 %v4068_v15, %v11566_v31  ;;  %v4215_v4 = vpop.f32.mrf.mxu3  ;;  %v11816_v15 = vor.u32 %v8778_v16, %v8062_v51 }
 0x400   : > { %v4118_v57 = vadd.f32 %v4117_v39, %v4069_v29  ;;  %4263 = vmatmul.bf16.gmra.mxu0 %v15125_v27  ;;  %4312 = vmatmul.bf16.gmra.mxu1 %v15126_v55  ;;  %15287 = vst [vmem:[#allocation310_spill] sm:$0xff] %v11816_v15  ;;  %v11818_v39 = vor.u32 %v8826_v33, %v8254_v42 }
 0x401   : > { %4433 = vmatpush.bf16.msrb.mxu0 %v11816_v15  ;;  %v8872_v15 = vld [vmem:[%s9261_s11 + $0x7f4] sm:$0xf] }
 0x402   : > { %v4167_v31 = vadd.f32 %v4166_v41, %v4118_v57  ;;  %15288 = vst [vmem:[#allocation311_spill] sm:$0xff] %v11818_v39  ;;  %4580 = vmatpush.bf16.msrb.mxu3 %v11818_v39  ;;  %v8438_v39 = vld [vmem:[%s9261_s11 + $0x7f8] sm:$0xf0] }
 0x403   : > { %v11857_v2 = vor.u32 %v8872_v15, %v8438_v39  ;;  %v15294_v15 = vld [vmem:[#allocation157_spill] sm:$0xff]  ;;  %v15295_v39 = vld [vmem:[#allocation158_spill] sm:$0xff] }
 0x404   : > { %v11821_v29 = vadd.f32 %v4215_v4, %v4167_v31  ;;  %v4168_v41 = vpop.f32.mrf.mxu2 }
 0x405   : > { %v4070_v25 = vpop.f32.mrf.mxu0  ;;  %v4119_v3 = vpop.f32.mrf.mxu1  ;;  %15293 = vst [vmem:[#allocation316_spill] sm:$0xff] %v11857_v2  ;;  %4671 = vmatpush.bf16.msra.mxu1 %v11857_v2  ;;  %v15296_v2 = vld [vmem:[#allocation165_spill] sm:$0xff] }
 0x406   : > { %v4071_v57 = vadd.f32 %v4070_v25, %v11583_v40  ;;  %v4217_v16 = vpop.f32.mrf.mxu3  ;;  %v8888_v25 = vld [vmem:[%s9261_s11 + $0x874] sm:$0xf] }
 0x408   : > { %v4120_v42 = vadd.f32 %v4119_v3, %v4071_v57  ;;  %4366 = vmatmul.bf16.gmra.mxu2 %v15259_v11  ;;  %v8502_v3 = vld [vmem:[%s9261_s11 + $0x878] sm:$0xf0]  ;;  %v8856_v57 = vld [vmem:[%s9261_s11 + $0x774] sm:$0xf] }
 0x409   : > { %4415 = vmatmul.bf16.gmra.mxu3 %v15260_v44 }
 0x40a   : > { %v4169_v4 = vadd.f32 %v4168_v41, %v4120_v42  ;;  %v11841_v41 = vor.u32 %v8888_v25, %v8502_v3 }
 0x40c   : > { %v11831_v51 = vadd.f32 %v4217_v16, %v4169_v4  ;;  %v4171_v8 = vpop.f32.mrf.mxu2  ;;  %15290 = vst [vmem:[#allocation313_spill] sm:$0xff] %v11841_v41  ;;  %v8374_v16 = vld [vmem:[%s9261_s11 + $0x778] sm:$0xf0]  ;;  %v8904_v4 = vld [vmem:[%s9261_s11 + $0x8f4] sm:$0xf]  ;;  %4720 = vmatpush.bf16.msra.mxu2 %v11841_v41 }
 0x40d   : > { %v4073_v33 = vpop.f32.mrf.mxu0  ;;  %v4122_v31 = vpop.f32.mrf.mxu1  ;;  %v8902_v41 = vld [vmem:[%s9261_s11 + $0x8e4] sm:$0xf] }
 0x40e   : > { %v4074_v40 = vadd.f32 %v4073_v33, %v11600_v63  ;;  %v4220_v42 = vpop.f32.mrf.mxu3  ;;  %v11846_v33 = vor.u32 %v8856_v57, %v8374_v16 }
 0x410   : > { %v4123_v43 = vadd.f32 %v4122_v31, %v4074_v40  ;;  %4268 = vmatmul.bf16.gmra.mxu0 %v15131_v58  ;;  %4317 = vmatmul.bf16.gmra.mxu1 %v15193_v23  ;;  %15291 = vst [vmem:[#allocation314_spill] sm:$0xff] %v11846_v33  ;;  %v11848_v31 = vor.u32 %v8904_v4, %v8566_v47 }
 0x411   : > { %4622 = vmatpush.bf16.msra.mxu0 %v11846_v33 }
 0x412   : > { %v4172_v63 = vadd.f32 %v4171_v8, %v4123_v43  ;;  %15292 = vst [vmem:[#allocation315_spill] sm:$0xff] %v11848_v31  ;;  %4769 = vmatpush.bf16.msra.mxu3 %v11848_v31  ;;  %v8366_v31 = vld [vmem:[%s9261_s11 + $0x768] sm:$0xf0] }
 0x414   : > { %v11851_v40 = vadd.f32 %v4220_v42, %v4172_v63  ;;  %v4173_v8 = vpop.f32.mrf.mxu2 }
 0x415   : > { %v4075_v25 = vpop.f32.mrf.mxu0  ;;  %v4124_v3 = vpop.f32.mrf.mxu1 }
 0x416   : > { %v4076_v43 = vadd.f32 %v4075_v25, %v11617_v32  ;;  %v4222_v57 = vpop.f32.mrf.mxu3 }
 0x418   : > { %v4125_v47 = vadd.f32 %v4124_v3, %v4076_v43  ;;  %4371 = vmatmul.bf16.gmra.mxu2 %v15294_v15  ;;  %v15297_v3 = vld [vmem:[#allocation166_spill] sm:$0xff] }
 0x419   : > { %4420 = vmatmul.bf16.gmra.mxu3 %v15295_v39  ;;  %v8430_v39 = vld [vmem:[%s9261_s11 + $0x7e8] sm:$0xf0] }
 0x41a   : > { %v4174_v42 = vadd.f32 %v4173_v8, %v4125_v47  ;;  %v8886_v47 = vld [vmem:[%s9261_s11 + $0x864] sm:$0xf]  ;;  %v8494_v8 = vld [vmem:[%s9261_s11 + $0x868] sm:$0xf0]  ;;  %v11887_v15 = vor.u32 %v8870_v9, %v8430_v39 }
 0x41b   : > { %v11871_v33 = vor.u32 %v8886_v47, %v8494_v8 }
 0x41c   : > { %v11861_v16 = vadd.f32 %v4222_v57, %v4174_v42  ;;  %v4176_v43 = vpop.f32.mrf.mxu2  ;;  %v8854_v57 = vld [vmem:[%s9261_s11 + $0x764] sm:$0xf]  ;;  %15301 = vst [vmem:[#allocation318_spill] sm:$0xff] %v11887_v15  ;;  %4672 = vmatpush.bf16.msra.mxu1 %v11887_v15 }
 0x41d   : > { %v4078_v4 = vpop.f32.mrf.mxu0  ;;  %v4127_v63 = vpop.f32.mrf.mxu1  ;;  %15298 = vst [vmem:[#allocation165_spill] sm:$0xff] %v11871_v33  ;;  %4721 = vmatpush.bf16.msra.mxu2 %v11871_v33 }
 0x41e   : > { %v4079_v32 = vadd.f32 %v4078_v4, %v11634_v28  ;;  %v4225_v42 = vpop.f32.mrf.mxu3  ;;  %v11876_v4 = vor.u32 %v8854_v57, %v8366_v31 }
 0x420   : > { %v4128_v25 = vadd.f32 %v4127_v63, %v4079_v32  ;;  %4273 = vmatmul.bf16.gmra.mxu0 %v15296_v2  ;;  %4322 = vmatmul.bf16.gmra.mxu1 %v15297_v3  ;;  %15299 = vst [vmem:[#allocation166_spill] sm:$0xff] %v11876_v4  ;;  %v11878_v63 = vor.u32 %v8902_v41, %v8558_v10 }
 0x421   : > { %4623 = vmatpush.bf16.msra.mxu0 %v11876_v4 }
 0x422   : > { %v4177_v28 = vadd.f32 %v4176_v43, %v4128_v25  ;;  %15300 = vst [vmem:[#allocation317_spill] sm:$0xff] %v11878_v63  ;;  %4770 = vmatpush.bf16.msra.mxu3 %v11878_v63 }
 0x424   : > { %v11881_v32 = vadd.f32 %v4225_v42, %v4177_v28  ;;  %v4178_v41 = vpop.f32.mrf.mxu2 }
 0x425   : > { %v4080_v47 = vpop.f32.mrf.mxu0  ;;  %v4129_v8 = vpop.f32.mrf.mxu1 }
 0x426   : > { %v4081_v25 = vadd.f32 %v4080_v47, %v11651_v50  ;;  %v4227_v31 = vpop.f32.mrf.mxu3  ;;  %v8884_v47 = vld [vmem:[%s9261_s11 + $0x854] sm:$0xf] }
 0x428   : > { %v4130_v10 = vadd.f32 %v4129_v8, %v4081_v25  ;;  %4532 = vmatmul.bf16.vlgmr.msrb.gmra.mxu2 %v15101_v52  ;;  %v8486_v8 = vld [vmem:[%s9261_s11 + $0x858] sm:$0xf0]  ;;  %v8852_v25 = vld [vmem:[%s9261_s11 + $0x754] sm:$0xf] }
 0x429   : > { %4581 = vmatmul.bf16.vlgmr.msrb.gmra.mxu3 %v15102_v20  ;;  %v8900_v52 = vld [vmem:[%s9261_s11 + $0x8d4] sm:$0xf] }
 0x42a   : > { %v4179_v43 = vadd.f32 %v4178_v41, %v4130_v10  ;;  %v11901_v41 = vor.u32 %v8884_v47, %v8486_v8 }
 0x42c   : > { %v11891_v57 = vadd.f32 %v4227_v31, %v4179_v43  ;;  %v4337_v39 = vpop.f32.mrf.mxu2  ;;  %15302 = vst [vmem:[#allocation319_spill] sm:$0xff] %v11901_v41  ;;  %v8358_v31 = vld [vmem:[%s9261_s11 + $0x758] sm:$0xf0]  ;;  %4722 = vmatpush.bf16.msra.mxu2 %v11901_v41 }
 0x42d   : > { %v4239_v42 = vpop.f32.mrf.mxu0  ;;  %v4288_v28 = vpop.f32.mrf.mxu1  ;;  %v8550_v43 = vld [vmem:[%s9261_s11 + $0x8d8] sm:$0xf0] }
 0x42e   : > { %v4240_v9 = vadd.f32 %v4239_v42, %v11671_v36  ;;  %v4386_v10 = vpop.f32.mrf.mxu3  ;;  %v11906_v42 = vor.u32 %v8852_v25, %v8358_v31  ;;  %v11908_v20 = vor.u32 %v8900_v52, %v8550_v43  ;;  %v7314_v41 = vld [vmem:[#allocation2 + $0x78] sm:$0xf0] }
 0x430   : > { %v4289_v50 = vadd.f32 %v4288_v28, %v4240_v9  ;;  %4434 = vmatmul.bf16.vlgmr.msrb.gmra.mxu0 %v15208_v7  ;;  %4483 = vmatmul.bf16.vlgmr.msrb.gmra.mxu1 %v15209_v14  ;;  %15303 = vst [vmem:[#allocation320_spill] sm:$0xff] %v11906_v42  ;;  %v8868_v7 = vld [vmem:[%s9261_s11 + $0x7d4] sm:$0xf]  ;;  %v8422_v28 = vld [vmem:[%s9261_s11 + $0x7d8] sm:$0xf0] }
 0x431   : > { %15304 = vst [vmem:[#allocation321_spill] sm:$0xff] %v11908_v20  ;;  %4624 = vmatpush.bf16.msra.mxu0 %v11906_v42  ;;  %4771 = vmatpush.bf16.msra.mxu3 %v11908_v20  ;;  %v11917_v8 = vor.u32 %v8868_v7, %v8422_v28 }
 0x432   : > { %v4338_v36 = vadd.f32 %v4337_v39, %v4289_v50 }
 0x433   : > { %15305 = vst [vmem:[#allocation322_spill] sm:$0xff] %v11917_v8  ;;  %4673 = vmatpush.bf16.msra.mxu1 %v11917_v8  ;;  %v8414_v8 = vld [vmem:[%s9261_s11 + $0x7c8] sm:$0xf0] }
 0x434   : > { %v11911_v14 = vadd.f32 %v4386_v10, %v4338_v36  ;;  %v4339_v25 = vpop.f32.mrf.mxu2 }
 0x435   : > { %v4241_v9 = vpop.f32.mrf.mxu0  ;;  %v4290_v47 = vpop.f32.mrf.mxu1 }
 0x436   : > { %v4242_v50 = vadd.f32 %v4241_v9, %v11681_v19  ;;  %v4388_v10 = vpop.f32.mrf.mxu3  ;;  %v8882_v9 = vld [vmem:[%s9261_s11 + $0x844] sm:$0xf] }
 0x438   : > { %v4291_v39 = vadd.f32 %v4290_v47, %v4242_v50  ;;  %4537 = vmatmul.bf16.gmra.mxu2 %v15107_v61  ;;  %v8478_v47 = vld [vmem:[%s9261_s11 + $0x848] sm:$0xf0]  ;;  %v8850_v50 = vld [vmem:[%s9261_s11 + $0x744] sm:$0xf] }
 0x439   : > { %4586 = vmatmul.bf16.gmra.mxu3 %v15108_v30  ;;  %v8898_v61 = vld [vmem:[%s9261_s11 + $0x8c4] sm:$0xf] }
 0x43a   : > { %v4340_v31 = vadd.f32 %v4339_v25, %v4291_v39  ;;  %v11931_v25 = vor.u32 %v8882_v9, %v8478_v47 }
 0x43c   : > { %v11921_v52 = vadd.f32 %v4388_v10, %v4340_v31  ;;  %v4342_v28 = vpop.f32.mrf.mxu2  ;;  %15306 = vst [vmem:[#allocation323_spill] sm:$0xff] %v11931_v25  ;;  %v8350_v10 = vld [vmem:[%s9261_s11 + $0x748] sm:$0xf0]  ;;  %4723 = vmatpush.bf16.msra.mxu2 %v11931_v25 }
 0x43d   : > { %v4244_v43 = vpop.f32.mrf.mxu0  ;;  %v4293_v36 = vpop.f32.mrf.mxu1  ;;  %v8542_v31 = vld [vmem:[%s9261_s11 + $0x8c8] sm:$0xf0] }
 0x43e   : > { %v4245_v19 = vadd.f32 %v4244_v43, %v11701_v1  ;;  %v4391_v39 = vpop.f32.mrf.mxu3  ;;  %v11936_v43 = vor.u32 %v8850_v50, %v8350_v10  ;;  %v11938_v30 = vor.u32 %v8898_v61, %v8542_v31 }
 0x440   : > { %v4294_v7 = vadd.f32 %v4293_v36, %v4245_v19  ;;  %4439 = vmatmul.bf16.gmra.mxu0 %v10291_v54  ;;  %4488 = vmatmul.bf16.gmra.mxu1 %v10295_v18  ;;  %15307 = vst [vmem:[#allocation324_spill] sm:$0xff] %v11936_v43  ;;  %v8866_v19 = vld [vmem:[%s9261_s11 + $0x7c4] sm:$0xf] }
 0x441   : > { %15308 = vst [vmem:[#allocation325_spill] sm:$0xff] %v11938_v30  ;;  %4625 = vmatpush.bf16.msra.mxu0 %v11936_v43  ;;  %4772 = vmatpush.bf16.msra.mxu3 %v11938_v30  ;;  %v11947_v42 = vor.u32 %v8866_v19, %v8414_v8  ;;  %v15332_v30 = vld [vmem:[#allocation19_spill] sm:$0xff] }
 0x442   : > { %v4343_v1 = vadd.f32 %v4342_v28, %v4294_v7 }
 0x443   : > { %15309 = vst [vmem:[#allocation326_spill] sm:$0xff] %v11947_v42  ;;  %4674 = vmatpush.bf16.msra.mxu1 %v11947_v42  ;;  %v8406_v42 = vld [vmem:[%s9261_s11 + $0x7b8] sm:$0xf0] }
 0x444   : > { %v11941_v36 = vadd.f32 %v4391_v39, %v4343_v1  ;;  %v4344_v50 = vpop.f32.mrf.mxu2 }
 0x445   : > { %v4246_v9 = vpop.f32.mrf.mxu0  ;;  %v4295_v47 = vpop.f32.mrf.mxu1 }
 0x446   : > { %v4247_v7 = vadd.f32 %v4246_v9, %v11711_v0  ;;  %v4393_v39 = vpop.f32.mrf.mxu3  ;;  %v8880_v9 = vld [vmem:[%s9261_s11 + $0x834] sm:$0xf] }
 0x448   : > { %v4296_v28 = vadd.f32 %v4295_v47, %v4247_v7  ;;  %4542 = vmatmul.bf16.gmra.mxu2 %v15113_v53  ;;  %v8470_v47 = vld [vmem:[%s9261_s11 + $0x838] sm:$0xf0]  ;;  %v8848_v7 = vld [vmem:[%s9261_s11 + $0x734] sm:$0xf] }
 0x449   : > { %4591 = vmatmul.bf16.gmra.mxu3 %v15114_v48  ;;  %v8896_v53 = vld [vmem:[%s9261_s11 + $0x8b4] sm:$0xf] }
 0x44a   : > { %v4345_v10 = vadd.f32 %v4344_v50, %v4296_v28  ;;  %v11961_v50 = vor.u32 %v8880_v9, %v8470_v47 }
 0x44c   : > { %v11951_v61 = vadd.f32 %v4393_v39, %v4345_v10  ;;  %v4347_v19 = vpop.f32.mrf.mxu2  ;;  %15310 = vst [vmem:[#allocation327_spill] sm:$0xff] %v11961_v50  ;;  %v8342_v39 = vld [vmem:[%s9261_s11 + $0x738] sm:$0xf0]  ;;  %4724 = vmatpush.bf16.msra.mxu2 %v11961_v50 }
 0x44d   : > { %v4249_v31 = vpop.f32.mrf.mxu0  ;;  %v4298_v1 = vpop.f32.mrf.mxu1  ;;  %v8534_v10 = vld [vmem:[%s9261_s11 + $0x8b8] sm:$0xf0] }
 0x44e   : > { %v4250_v0 = vadd.f32 %v4249_v31, %v11731_v59  ;;  %v4396_v28 = vpop.f32.mrf.mxu3  ;;  %v11966_v31 = vor.u32 %v8848_v7, %v8342_v39  ;;  %v11968_v48 = vor.u32 %v8896_v53, %v8534_v10 }
 0x450   : > { %v4299_v8 = vadd.f32 %v4298_v1, %v4250_v0  ;;  %4444 = vmatmul.bf16.gmra.mxu0 %v10339_v22  ;;  %4493 = vmatmul.bf16.gmra.mxu1 %v10343_v37  ;;  %15311 = vst [vmem:[#allocation328_spill] sm:$0xff] %v11966_v31  ;;  %v8864_v0 = vld [vmem:[%s9261_s11 + $0x7b4] sm:$0xf] }
 0x451   : > { %15312 = vst [vmem:[#allocation329_spill] sm:$0xff] %v11968_v48  ;;  %4626 = vmatpush.bf16.msra.mxu0 %v11966_v31  ;;  %4773 = vmatpush.bf16.msra.mxu3 %v11968_v48  ;;  %v11977_v43 = vor.u32 %v8864_v0, %v8406_v42  ;;  %v15314_v0 = vld [vmem:[#allocation145_spill] sm:$0xff]  ;;  %v8526_v31 = vld [vmem:[%s9261_s11 + $0x8a8] sm:$0xf0] }
 0x452   : > { %v4348_v59 = vadd.f32 %v4347_v19, %v4299_v8  ;;  %v8398_v48 = vld [vmem:[%s9261_s11 + $0x7a8] sm:$0xf0] }
 0x453   : > { %15313 = vst [vmem:[#allocation330_spill] sm:$0xff] %v11977_v43  ;;  %4675 = vmatpush.bf16.msra.mxu1 %v11977_v43  ;;  %v8334_v43 = vld [vmem:[%s9261_s11 + $0x728] sm:$0xf0] }
 0x454   : > { %v11971_v1 = vadd.f32 %v4396_v28, %v4348_v59  ;;  %v4349_v7 = vpop.f32.mrf.mxu2 }
 0x455   : > { %v4251_v9 = vpop.f32.mrf.mxu0  ;;  %v4300_v47 = vpop.f32.mrf.mxu1 }
 0x456   : > { %v4252_v8 = vadd.f32 %v4251_v9, %v11741_v62  ;;  %v4398_v28 = vpop.f32.mrf.mxu3  ;;  %v15315_v9 = vld [vmem:[#allocation146_spill] sm:$0xff] }
 0x458   : > { %v4301_v19 = vadd.f32 %v4300_v47, %v4252_v8  ;;  %4547 = vmatmul.bf16.gmra.mxu2 %v15119_v49  ;;  %v8878_v8 = vld [vmem:[%s9261_s11 + $0x824] sm:$0xf] }
 0x459   : > { %4596 = vmatmul.bf16.gmra.mxu3 %v15120_v38  ;;  %v8894_v49 = vld [vmem:[%s9261_s11 + $0x8a4] sm:$0xf] }
 0x45a   : > { %v4350_v39 = vadd.f32 %v4349_v7, %v4301_v19  ;;  %v8462_v19 = vld [vmem:[%s9261_s11 + $0x828] sm:$0xf0]  ;;  %v8846_v7 = vld [vmem:[%s9261_s11 + $0x724] sm:$0xf]  ;;  %v11998_v38 = vor.u32 %v8894_v49, %v8526_v31 }
 0x45c   : > { %v11981_v53 = vadd.f32 %v4398_v28, %v4350_v39  ;;  %v4352_v47 = vpop.f32.mrf.mxu2  ;;  %v11991_v39 = vor.u32 %v8878_v8, %v8462_v19  ;;  %15318 = vst [vmem:[#allocation331_spill] sm:$0xff] %v11998_v38  ;;  %4774 = vmatpush.bf16.msra.mxu3 %v11998_v38  ;;  %v8390_v38 = vld [vmem:[%s9261_s11 + $0x798] sm:$0xf0] }
 0x45d   : > { %v4254_v10 = vpop.f32.mrf.mxu0  ;;  %v4303_v59 = vpop.f32.mrf.mxu1 }
 0x45e   : > { %v4255_v62 = vadd.f32 %v4254_v10, %v11761_v12  ;;  %v4401_v28 = vpop.f32.mrf.mxu3  ;;  %15316 = vst [vmem:[#allocation145_spill] sm:$0xff] %v11991_v39  ;;  %v11996_v10 = vor.u32 %v8846_v7, %v8334_v43  ;;  %4725 = vmatpush.bf16.msra.mxu2 %v11991_v39 }
 0x460   : > { %v4304_v42 = vadd.f32 %v4303_v59, %v4255_v62  ;;  %4449 = vmatmul.bf16.gmra.mxu0 %v15314_v0  ;;  %4498 = vmatmul.bf16.gmra.mxu1 %v15315_v9  ;;  %15317 = vst [vmem:[#allocation146_spill] sm:$0xff] %v11996_v10  ;;  %v8862_v62 = vld [vmem:[%s9261_s11 + $0x7a4] sm:$0xf] }
 0x461   : > { %4627 = vmatpush.bf16.msra.mxu0 %v11996_v10  ;;  %v12007_v50 = vor.u32 %v8862_v62, %v8398_v48  ;;  %v15320_v62 = vld [vmem:[#allocation151_spill] sm:$0xff]  ;;  %v8518_v10 = vld [vmem:[%s9261_s11 + $0x898] sm:$0xf0] }
 0x462   : > { %v4353_v12 = vadd.f32 %v4352_v47, %v4304_v42 }
 0x463   : > { %15319 = vst [vmem:[#allocation332_spill] sm:$0xff] %v12007_v50  ;;  %4676 = vmatpush.bf16.msra.mxu1 %v12007_v50  ;;  %v8326_v50 = vld [vmem:[%s9261_s11 + $0x718] sm:$0xf0] }
 0x464   : > { %v12001_v59 = vadd.f32 %v4401_v28, %v4353_v12  ;;  %v4354_v31 = vpop.f32.mrf.mxu2 }
 0x465   : > { %v4256_v8 = vpop.f32.mrf.mxu0  ;;  %v4305_v19 = vpop.f32.mrf.mxu1 }
 0x466   : > { %v4257_v42 = vadd.f32 %v4256_v8, %v11771_v26  ;;  %v4403_v47 = vpop.f32.mrf.mxu3  ;;  %v15321_v8 = vld [vmem:[#allocation152_spill] sm:$0xff] }
 0x468   : > { %v4306_v43 = vadd.f32 %v4305_v19, %v4257_v42  ;;  %4552 = vmatmul.bf16.gmra.mxu2 %v15125_v27  ;;  %v8876_v42 = vld [vmem:[%s9261_s11 + $0x814] sm:$0xf] }
 0x469   : > { %4601 = vmatmul.bf16.gmra.mxu3 %v15126_v55  ;;  %v8892_v27 = vld [vmem:[%s9261_s11 + $0x894] sm:$0xf] }
 0x46a   : > { %v4355_v7 = vadd.f32 %v4354_v31, %v4306_v43  ;;  %v8454_v43 = vld [vmem:[%s9261_s11 + $0x818] sm:$0xf0]  ;;  %v8844_v31 = vld [vmem:[%s9261_s11 + $0x714] sm:$0xf]  ;;  %v12028_v55 = vor.u32 %v8892_v27, %v8518_v10 }
 0x46c   : > { %v12011_v28 = vadd.f32 %v4403_v47, %v4355_v7  ;;  %v4357_v19 = vpop.f32.mrf.mxu2  ;;  %v12021_v7 = vor.u32 %v8876_v42, %v8454_v43  ;;  %15324 = vst [vmem:[#allocation333_spill] sm:$0xff] %v12028_v55  ;;  %4775 = vmatpush.bf16.msra.mxu3 %v12028_v55  ;;  %v8382_v55 = vld [vmem:[%s9261_s11 + $0x788] sm:$0xf0] }
 0x46d   : > { %v4259_v49 = vpop.f32.mrf.mxu0  ;;  %v4308_v12 = vpop.f32.mrf.mxu1 }
 0x46e   : > { %v4260_v26 = vadd.f32 %v4259_v49, %v11791_v17  ;;  %v4406_v47 = vpop.f32.mrf.mxu3  ;;  %15322 = vst [vmem:[#allocation151_spill] sm:$0xff] %v12021_v7  ;;  %v12026_v49 = vor.u32 %v8844_v31, %v8326_v50  ;;  %4726 = vmatpush.bf16.msra.mxu2 %v12021_v7 }
 0x470   : > { %v4309_v48 = vadd.f32 %v4308_v12, %v4260_v26  ;;  %4454 = vmatmul.bf16.gmra.mxu0 %v15320_v62  ;;  %4503 = vmatmul.bf16.gmra.mxu1 %v15321_v8  ;;  %15323 = vst [vmem:[#allocation152_spill] sm:$0xff] %v12026_v49  ;;  %v8860_v26 = vld [vmem:[%s9261_s11 + $0x794] sm:$0xf] }
 0x471   : > { %4628 = vmatpush.bf16.msra.mxu0 %v12026_v49  ;;  %v12037_v39 = vor.u32 %v8860_v26, %v8390_v38  ;;  %v15326_v26 = vld [vmem:[#allocation159_spill] sm:$0xff]  ;;  %v8510_v49 = vld [vmem:[%s9261_s11 + $0x888] sm:$0xf0] }
 0x472   : > { %v4358_v17 = vadd.f32 %v4357_v19, %v4309_v48 }
 0x473   : > { %15325 = vst [vmem:[#allocation334_spill] sm:$0xff] %v12037_v39  ;;  %4677 = vmatpush.bf16.msra.mxu1 %v12037_v39  ;;  %v8318_v39 = vld [vmem:[%s9261_s11 + $0x708] sm:$0xf0] }
 0x474   : > { %v12031_v12 = vadd.f32 %v4406_v47, %v4358_v17  ;;  %v4359_v10 = vpop.f32.mrf.mxu2 }
 0x475   : > { %v4261_v42 = vpop.f32.mrf.mxu0  ;;  %v4310_v43 = vpop.f32.mrf.mxu1 }
 0x476   : > { %v4262_v48 = vadd.f32 %v4261_v42, %v11801_v56  ;;  %v4408_v19 = vpop.f32.mrf.mxu3  ;;  %v15327_v42 = vld [vmem:[#allocation160_spill] sm:$0xff] }
 0x478   : > { %v4311_v50 = vadd.f32 %v4310_v43, %v4262_v48  ;;  %4557 = vmatmul.bf16.gmra.mxu2 %v15131_v58  ;;  %v8874_v48 = vld [vmem:[%s9261_s11 + $0x804] sm:$0xf] }
 0x479   : > { %4606 = vmatmul.bf16.gmra.mxu3 %v15193_v23  ;;  %v8890_v58 = vld [vmem:[%s9261_s11 + $0x884] sm:$0xf] }
 0x47a   : > { %v4360_v31 = vadd.f32 %v4359_v10, %v4311_v50  ;;  %v8446_v50 = vld [vmem:[%s9261_s11 + $0x808] sm:$0xf0]  ;;  %v8842_v10 = vld [vmem:[%s9261_s11 + $0x704] sm:$0xf]  ;;  %v12058_v23 = vor.u32 %v8890_v58, %v8510_v49 }
 0x47c   : > { %v12041_v47 = vadd.f32 %v4408_v19, %v4360_v31  ;;  %v4362_v43 = vpop.f32.mrf.mxu2  ;;  %v12051_v31 = vor.u32 %v8874_v48, %v8446_v50  ;;  %15330 = vst [vmem:[#allocation335_spill] sm:$0xff] %v12058_v23  ;;  %4776 = vmatpush.bf16.msra.mxu3 %v12058_v23 }
 0x47d   : > { %v4264_v27 = vpop.f32.mrf.mxu0  ;;  %v4313_v17 = vpop.f32.mrf.mxu1 }
 0x47e   : > { %v4265_v56 = vadd.f32 %v4264_v27, %v11821_v29  ;;  %v4411_v19 = vpop.f32.mrf.mxu3  ;;  %15328 = vst [vmem:[#allocation159_spill] sm:$0xff] %v12051_v31  ;;  %v12056_v27 = vor.u32 %v8842_v10, %v8318_v39  ;;  %4727 = vmatpush.bf16.msra.mxu2 %v12051_v31  ;;  %v15333_v39 = vld [vmem:[#allocation17_spill] sm:$0xff] }
 0x480   : > { %v4314_v38 = vadd.f32 %v4313_v17, %v4265_v56  ;;  %4459 = vmatmul.bf16.gmra.mxu0 %v15326_v26  ;;  %4508 = vmatmul.bf16.gmra.mxu1 %v15327_v42  ;;  %15329 = vst [vmem:[#allocation160_spill] sm:$0xff] %v12056_v27  ;;  %v8858_v56 = vld [vmem:[%s9261_s11 + $0x784] sm:$0xf] }
 0x481   : > { %4629 = vmatpush.bf16.msra.mxu0 %v12056_v27  ;;  %v12067_v7 = vor.u32 %v8858_v56, %v8382_v55  ;;  %v15337_v27 = vld [vmem:[#allocation21_spill] sm:$0xff]  ;;  %v15338_v56 = vld [vmem:[#allocation24_spill] sm:$0xff] }
 0x482   : > { %v4363_v29 = vadd.f32 %v4362_v43, %v4314_v38  ;;  %4916 = vmatpush.bf16.msrb.mxu2 %v15332_v30  ;;  %v15334_v38 = vld [vmem:[#allocation20_spill] sm:$0xff] }
 0x483   : > { %15331 = vst [vmem:[#allocation336_spill] sm:$0xff] %v12067_v7  ;;  %4965 = vmatpush.bf16.msrb.mxu3 %v15334_v38  ;;  %4678 = vmatpush.bf16.msra.mxu1 %v12067_v7  ;;  %v15341_v38 = vld [vmem:[#allocation27_spill] sm:$0xff]  ;;  %v15356_v7 = vld [vmem:[#allocation40_spill] sm:$0xff] }
 0x484   : > { %v12061_v17 = vadd.f32 %v4411_v19, %v4363_v29  ;;  %v4364_v10 = vpop.f32.mrf.mxu2  ;;  %v15335_v19 = vld [vmem:[#allocation18_spill] sm:$0xff]  ;;  %v15336_v29 = vld [vmem:[#allocation23_spill] sm:$0xff] }
 0x485   : > { %v4266_v48 = vpop.f32.mrf.mxu0  ;;  %v4315_v50 = vpop.f32.mrf.mxu1  ;;  %4818 = vmatpush.bf16.msrb.mxu0 %v15333_v39  ;;  %v15339_v39 = vld [vmem:[#allocation22_spill] sm:$0xff] }
 0x486   : > { %v4267_v49 = vadd.f32 %v4266_v48, %v11831_v51  ;;  %v4413_v58 = vpop.f32.mrf.mxu3  ;;  %4917 = vmatpush.bf16.msrb.mxu2 %v15336_v29 }
 0x487   : > { %4867 = vmatpush.bf16.msrb.mxu1 %v15335_v19  ;;  %4966 = vmatpush.bf16.msrb.mxu3 %v15338_v56  ;;  %v15344_v19 = vld [vmem:[#allocation168_spill] sm:$0xff] }
 0x488   : > { %v4316_v43 = vadd.f32 %v4315_v50, %v4267_v49  ;;  %4562 = vmatmul.bf16.gmra.mxu2 %v15296_v2  ;;  %v15340_v50 = vld [vmem:[#allocation25_spill] sm:$0xff] }
 0x489   : > { %4819 = vmatpush.bf16.msrb.mxu0 %v15337_v27  ;;  %4611 = vmatmul.bf16.gmra.mxu3 %v15297_v3  ;;  %v15342_v27 = vld [vmem:[#allocation28_spill] sm:$0xff]  ;;  %v15346_v2 = vld [vmem:[#allocation29_spill] sm:$0xff] }
 0x48a   : > { %v4365_v55 = vadd.f32 %v4364_v10, %v4316_v43  ;;  %4918 = vmatpush.bf16.msrb.mxu2 %v15341_v38  ;;  %v15343_v10 = vld [vmem:[#allocation167_spill] sm:$0xff] }
 0x48b   : > { %4868 = vmatpush.bf16.msrb.mxu1 %v15339_v39  ;;  %4967 = vmatpush.bf16.msrb.mxu3 %v15342_v27  ;;  %v15347_v39 = vld [vmem:[#allocation31_spill] sm:$0xff] }
 0x48c   : > { %v12078_v30 = vadd.f32 %v4413_v58, %v4365_v55  ;;  %v4367_v58 = vpop.f32.mrf.mxu2  ;;  %v15345_v55 = vld [vmem:[#allocation26_spill] sm:$0xff]  ;;  %v15351_v27 = vld [vmem:[#allocation35_spill] sm:$0xff] }
 0x48d   : > { %v4269_v51 = vpop.f32.mrf.mxu0  ;;  %v4318_v48 = vpop.f32.mrf.mxu1  ;;  %4820 = vmatpush.bf16.msrb.mxu0 %v15340_v50 }
 0x48e   : > { %v4270_v49 = vadd.f32 %v4269_v51, %v11851_v40  ;;  %v4416_v29 = vpop.f32.mrf.mxu3  ;;  %4919 = vmatpush.bf16.msrb.mxu2 %v15347_v39  ;;  %v15348_v40 = vld [vmem:[#allocation32_spill] sm:$0xff]  ;;  %v15353_v39 = vld [vmem:[#allocation34_spill] sm:$0xff] }
 0x48f   : > { %4869 = vmatpush.bf16.msrb.mxu1 %v15345_v55  ;;  %4968 = vmatpush.bf16.msrb.mxu3 %v15348_v40  ;;  %v15352_v55 = vld [vmem:[#allocation36_spill] sm:$0xff]  ;;  %v15354_v40 = vld [vmem:[#allocation37_spill] sm:$0xff] }
 0x490   : > { %v4319_v43 = vadd.f32 %v4318_v48, %v4270_v49  ;;  %4464 = vmatmul.bf16.gmra.mxu0 %v15343_v10  ;;  %4513 = vmatmul.bf16.gmra.mxu1 %v15344_v19  ;;  %v15349_v48 = vld [vmem:[#allocation30_spill] sm:$0xff]  ;;  %v15350_v49 = vld [vmem:[#allocation33_spill] sm:$0xff] }
 0x491   : > { %4821 = vmatpush.bf16.msrb.mxu0 %v15346_v2 }
 0x492   : > { %v4368_v56 = vadd.f32 %v4367_v58, %v4319_v43  ;;  %4920 = vmatpush.bf16.msrb.mxu2 %v15351_v27  ;;  %v15358_v27 = vld [vmem:[#allocation38_spill] sm:$0xff] }
 0x493   : > { %4870 = vmatpush.bf16.msrb.mxu1 %v15349_v48  ;;  %4969 = vmatpush.bf16.msrb.mxu3 %v15352_v55  ;;  %v15360_v55 = vld [vmem:[#allocation44_spill] sm:$0xff] }
 0x494   : > { %v12093_v3 = vadd.f32 %v4416_v29, %v4368_v56  ;;  %v4369_v43 = vpop.f32.mrf.mxu2  ;;  %v15355_v56 = vld [vmem:[#allocation39_spill] sm:$0xff] }
 0x495   : > { %v4271_v51 = vpop.f32.mrf.mxu0  ;;  %v4320_v50 = vpop.f32.mrf.mxu1  ;;  %4822 = vmatpush.bf16.msrb.mxu0 %v15350_v49 }
 0x496   : > { %v4272_v38 = vadd.f32 %v4271_v51, %v11861_v16  ;;  %v4418_v58 = vpop.f32.mrf.mxu3  ;;  %4921 = vmatpush.bf16.msrb.mxu2 %v15355_v56  ;;  %v15357_v51 = vld [vmem:[#allocation226_spill] sm:$0xff] }
 0x497   : > { %4871 = vmatpush.bf16.msrb.mxu1 %v15353_v39  ;;  %4970 = vmatpush.bf16.msrb.mxu3 %v15356_v7  ;;  %v15361_v39 = vld [vmem:[#allocation41_spill] sm:$0xff]  ;;  %v15365_v56 = vld [vmem:[#allocation42_spill] sm:$0xff] }
 0x498   : > { %v4321_v2 = vadd.f32 %v4320_v50, %v4272_v38  ;;  %4567 = vmatmul.bf16.gmra.mxu2 %v15357_v51  ;;  %v15359_v38 = vld [vmem:[#allocation227_spill] sm:$0xff]  ;;  %v15363_v7 = vld [vmem:[#allocation201_spill] sm:$0xff] }
 0x499   : > { %4823 = vmatpush.bf16.msrb.mxu0 %v15354_v40  ;;  %4616 = vmatmul.bf16.gmra.mxu3 %v15359_v38 }
 0x49a   : > { %v4370_v29 = vadd.f32 %v4369_v43, %v4321_v2  ;;  %4922 = vmatpush.bf16.msrb.mxu2 %v15360_v55  ;;  %v15362_v2 = vld [vmem:[#allocation45_spill] sm:$0xff] }
 0x49b   : > { %4872 = vmatpush.bf16.msrb.mxu1 %v15358_v27  ;;  %4971 = vmatpush.bf16.msrb.mxu3 %v15362_v2  ;;  %v15366_v27 = vld [vmem:[#allocation49_spill] sm:$0xff] }
 0x49c   : > { %v12104_v48 = vadd.f32 %v4418_v58, %v4370_v29  ;;  %v15364_v58 = vld [vmem:[#allocation202_spill] sm:$0xff]  ;;  %v4372_v40 = vpop.f32.mrf.mxu2 }
 0x49d   : > { %v4274_v49 = vpop.f32.mrf.mxu0  ;;  %v4323_v16 = vpop.f32.mrf.mxu1  ;;  %4824 = vmatpush.bf16.msrb.mxu0 %v15361_v39 }
 0x49e   : > { %v4275_v50 = vadd.f32 %v4274_v49, %v11881_v32  ;;  %v4421_v29 = vpop.f32.mrf.mxu3  ;;  %4923 = vmatpush.bf16.msrb.mxu2 %v15366_v27  ;;  %v15367_v32 = vld [vmem:[#allocation46_spill] sm:$0xff] }
 0x49f   : > { %4873 = vmatpush.bf16.msrb.mxu1 %v15365_v56  ;;  %v15368_v49 = vld [vmem:[#allocation50_spill] sm:$0xff] }
 0x4a0   : > { %v4324_v43 = vadd.f32 %v4323_v16, %v4275_v50  ;;  %4469 = vmatmul.bf16.gmra.mxu0 %v15363_v7  ;;  %4518 = vmatmul.bf16.gmra.mxu1 %v15364_v58  ;;  %v15369_v16 = vld [vmem:[#allocation48_spill] sm:$0xff] }
 0x4a1   : > { %4825 = vmatpush.bf16.msrb.mxu0 %v15367_v32  ;;  %4972 = vmatpush.bf16.msrb.mxu3 %v15368_v49  ;;  %v15374_v49 = vld [vmem:[#allocation58_spill] sm:$0xff] }
 0x4a2   : > { %v4373_v51 = vadd.f32 %v4372_v40, %v4324_v43 }
 0x4a3   : > { %4874 = vmatpush.bf16.msrb.mxu1 %v15369_v16  ;;  %v15376_v16 = vld [vmem:[#allocation59_spill] sm:$0xff] }
 0x4a4   : > { %v12119_v38 = vadd.f32 %v4421_v29, %v4373_v51  ;;  %v4374_v23 = vpop.f32.mrf.mxu2  ;;  %v15370_v29 = vld [vmem:[#allocation51_spill] sm:$0xff]  ;;  %v15371_v51 = vld [vmem:[#allocation53_spill] sm:$0xff] }
 0x4a5   : > { %v4276_v55 = vpop.f32.mrf.mxu0  ;;  %v4325_v39 = vpop.f32.mrf.mxu1 }
 0x4a6   : > { %v4277_v50 = vadd.f32 %v4276_v55, %v11891_v57  ;;  %v4423_v31 = vpop.f32.mrf.mxu3 }
 0x4a8   : > { %v4326_v2 = vadd.f32 %v4325_v39, %v4277_v50  ;;  %4728 = vmatmul.bf16.vlgmr.msra.gmra.mxu2 %v10291_v54  ;;  %v15378_v50 = vld [vmem:[#allocation65_spill] sm:$0xff] }
 0x4a9   : > { %4777 = vmatmul.bf16.vlgmr.msra.gmra.mxu3 %v10295_v18  ;;  %5112 = vmatpush.bf16.msra.mxu2 %v15370_v29  ;;  %v15380_v29 = vld [vmem:[#allocation66_spill] sm:$0xff] }
 0x4aa   : > { %v4375_v25 = vadd.f32 %v4374_v23, %v4326_v2  ;;  %5161 = vmatpush.bf16.msra.mxu3 %v15371_v51  ;;  %v15373_v23 = vld [vmem:[#allocation55_spill] sm:$0xff]  ;;  %v15381_v51 = vld [vmem:[#allocation68_spill] sm:$0xff] }
 0x4ab   : > { %v15379_v2 = vld [vmem:[#allocation67_spill] sm:$0xff] }
 0x4ac   : > { %v12123_v56 = vadd.f32 %v4423_v31, %v4375_v25  ;;  %v4533_v57 = vpop.f32.mrf.mxu2  ;;  %v15372_v31 = vld [vmem:[#allocation52_spill] sm:$0xff] }
 0x4ad   : > { %v4435_v43 = vpop.f32.mrf.mxu0  ;;  %v4484_v40 = vpop.f32.mrf.mxu1  ;;  %5113 = vmatpush.bf16.msra.mxu2 %v15374_v49 }
 0x4ae   : > { %v4436_v27 = vadd.f32 %v4435_v43, %v11911_v14  ;;  %v4582_v25 = vpop.f32.mrf.mxu3  ;;  %v15375_v14 = vld [vmem:[#allocation60_spill] sm:$0xff] }
 0x4af   : > { %5162 = vmatpush.bf16.msra.mxu3 %v15375_v14  ;;  %v15385_v14 = vld [vmem:[#allocation76_spill] sm:$0xff] }
 0x4b0   : > { %v4485_v32 = vadd.f32 %v4484_v40, %v4436_v27  ;;  %4630 = vmatmul.bf16.vlgmr.msra.gmra.mxu0 %v15219_v5  ;;  %4679 = vmatmul.bf16.vlgmr.msra.gmra.mxu1 %v15220_v24  ;;  %v15377_v5 = vld [vmem:[#allocation62_spill] sm:$0xff] }
 0x4b1   : > { %5014 = vmatpush.bf16.msra.mxu0 %v15372_v31  ;;  %5063 = vmatpush.bf16.msra.mxu1 %v15373_v23 }
 0x4b2   : > { %v4534_v54 = vadd.f32 %v4533_v57, %v4485_v32  ;;  %5114 = vmatpush.bf16.msra.mxu2 %v15378_v50  ;;  %v15382_v57 = vld [vmem:[#allocation73_spill] sm:$0xff] }
 0x4b3   : > { %5163 = vmatpush.bf16.msra.mxu3 %v15379_v2  ;;  %v15389_v2 = vld [vmem:[#allocation84_spill] sm:$0xff] }
 0x4b4   : > { %v12136_v18 = vadd.f32 %v4582_v25, %v4534_v54  ;;  %v4535_v40 = vpop.f32.mrf.mxu2  ;;  %v15383_v25 = vld [vmem:[#allocation75_spill] sm:$0xff]  ;;  %v15384_v54 = vld [vmem:[#allocation74_spill] sm:$0xff] }
 0x4b5   : > { %v4437_v55 = vpop.f32.mrf.mxu0  ;;  %v4486_v39 = vpop.f32.mrf.mxu1  ;;  %5015 = vmatpush.bf16.msra.mxu0 %v15376_v16  ;;  %5064 = vmatpush.bf16.msra.mxu1 %v15377_v5 }
 0x4b6   : > { %v4438_v24 = vadd.f32 %v4437_v55, %v11921_v52  ;;  %v4584_v27 = vpop.f32.mrf.mxu3  ;;  %5115 = vmatpush.bf16.msra.mxu2 %v15382_v57  ;;  %v15386_v55 = vld [vmem:[#allocation81_spill] sm:$0xff] }
 0x4b7   : > { %5164 = vmatpush.bf16.msra.mxu3 %v15383_v25 }
 0x4b8   : > { %v4487_v43 = vadd.f32 %v4486_v39, %v4438_v24  ;;  %4733 = vmatmul.bf16.gmra.mxu2 %v10339_v22  ;;  %v15387_v39 = vld [vmem:[#allocation83_spill] sm:$0xff]  ;;  %v15388_v22 = vld [vmem:[#allocation82_spill] sm:$0xff] }
 0x4b9   : > { %5016 = vmatpush.bf16.msra.mxu0 %v15380_v29  ;;  %5065 = vmatpush.bf16.msra.mxu1 %v15381_v51  ;;  %v15392_v29 = vld [vmem:[#allocation90_spill] sm:$0xff]  ;;  %v15394_v51 = vld [vmem:[#allocation97_spill] sm:$0xff] }
 0x4ba   : > { %v4536_v32 = vadd.f32 %v4535_v40, %v4487_v43  ;;  %4782 = vmatmul.bf16.gmra.mxu3 %v10343_v37  ;;  %5116 = vmatpush.bf16.msra.mxu2 %v15386_v55  ;;  %v15391_v37 = vld [vmem:[#allocation91_spill] sm:$0xff] }
 0x4bb   : > { %5165 = vmatpush.bf16.msra.mxu3 %v15387_v39  ;;  %v15399_v55 = vld [vmem:[#allocation107_spill] sm:$0xff] }
 0x4bc   : > { %v12147_v31 = vadd.f32 %v4584_v27, %v4536_v32  ;;  %v4538_v5 = vpop.f32.mrf.mxu2  ;;  %v15395_v32 = vld [vmem:[#allocation99_spill] sm:$0xff] }
 0x4bd   : > { %v4440_v23 = vpop.f32.mrf.mxu0  ;;  %v4489_v52 = vpop.f32.mrf.mxu1  ;;  %5017 = vmatpush.bf16.msra.mxu0 %v15384_v54  ;;  %5066 = vmatpush.bf16.msra.mxu1 %v15385_v14  ;;  %v15398_v14 = vld [vmem:[#allocation105_spill] sm:$0xff] }
 0x4be   : > { %v4441_v49 = vadd.f32 %v4440_v23, %v11941_v36  ;;  %v4587_v24 = vpop.f32.mrf.mxu3  ;;  %v15390_v36 = vld [vmem:[#allocation89_spill] sm:$0xff] }
 0x4bf   : > { %5117 = vmatpush.bf16.msra.mxu2 %v15390_v36  ;;  %5166 = vmatpush.bf16.msra.mxu3 %v15391_v37 }
 0x4c0   : > { %v4490_v16 = vadd.f32 %v4489_v52, %v4441_v49  ;;  %4635 = vmatmul.bf16.gmra.mxu0 %v15227_v21  ;;  %4684 = vmatmul.bf16.gmra.mxu1 %v15228_v6  ;;  %v15393_v6 = vld [vmem:[#allocation92_spill] sm:$0xff]  ;;  %v15396_v52 = vld [vmem:[#allocation98_spill] sm:$0xff] }
 0x4c1   : > { %5018 = vmatpush.bf16.msra.mxu0 %v15388_v22  ;;  %5067 = vmatpush.bf16.msra.mxu1 %v15389_v2  ;;  %v15397_v49 = vld [vmem:[#allocation100_spill] sm:$0xff] }
 0x4c2   : > { %v4539_v50 = vadd.f32 %v4538_v5, %v4490_v16  ;;  %v15400_v5 = vld [vmem:[#allocation106_spill] sm:$0xff]  ;;  %v15401_v22 = vld [vmem:[#allocation108_spill] sm:$0xff] }
 0x4c3   : > { %5118 = vmatpush.bf16.msra.mxu2 %v15394_v51  ;;  %5167 = vmatpush.bf16.msra.mxu3 %v15395_v32 }
 0x4c4   : > { %v12162_v43 = vadd.f32 %v4587_v24, %v4539_v50  ;;  %v4540_v25 = vpop.f32.mrf.mxu2 }
 0x4c5   : > { %v4442_v40 = vpop.f32.mrf.mxu0  ;;  %v4491_v27 = vpop.f32.mrf.mxu1  ;;  %5019 = vmatpush.bf16.msra.mxu0 %v15392_v29  ;;  %5068 = vmatpush.bf16.msra.mxu1 %v15393_v6 }
 0x4c6   : > { %v4443_v21 = vadd.f32 %v4442_v40, %v11951_v61  ;;  %v4589_v23 = vpop.f32.mrf.mxu3 }
 0x4c7   : > { %5119 = vmatpush.bf16.msra.mxu2 %v15398_v14  ;;  %5168 = vmatpush.bf16.msra.mxu3 %v15399_v55 }
 0x4c8   : > { %v4492_v57 = vadd.f32 %v4491_v27, %v4443_v21  ;;  %4738 = vmatmul.bf16.gmra.mxu2 %v15314_v0 }
 0x4c9   : > { %5020 = vmatpush.bf16.msra.mxu0 %v15396_v52  ;;  %5069 = vmatpush.bf16.msra.mxu1 %v15397_v49 }
 0x4ca   : > { %v4541_v54 = vadd.f32 %v4540_v25, %v4492_v57  ;;  %4787 = vmatmul.bf16.gmra.mxu3 %v15315_v9 }
 0x4cc   : > { %v12173_v39 = vadd.f32 %v4589_v23, %v4541_v54  ;;  %v4543_v2 = vpop.f32.mrf.mxu2 }
 0x4cd   : > { %v4445_v61 = vpop.f32.mrf.mxu0  ;;  %v4494_v16 = vpop.f32.mrf.mxu1  ;;  %5021 = vmatpush.bf16.msra.mxu0 %v15400_v5  ;;  %5070 = vmatpush.bf16.msra.mxu1 %v15401_v22 }
 0x4ce   : > { %v4446_v24 = vadd.f32 %v4445_v61, %v11971_v1  ;;  %v4592_v36 = vpop.f32.mrf.mxu3 }
 0x4d0   : > { %v4495_v50 = vadd.f32 %v4494_v16, %v4446_v24  ;;  %4640 = vmatmul.bf16.gmra.mxu0 %v15235_v34  ;;  %4689 = vmatmul.bf16.gmra.mxu1 %v15236_v13 }
 0x4d2   : > { %v4544_v37 = vadd.f32 %v4543_v2, %v4495_v50 }
 0x4d4   : > { %v12182_v40 = vadd.f32 %v4592_v36, %v4544_v37  ;;  %v4545_v1 = vpop.f32.mrf.mxu2 }
 0x4d5   : > { %v4447_v27 = vpop.f32.mrf.mxu0  ;;  %v4496_v0 = vpop.f32.mrf.mxu1 }
 0x4d6   : > { %v4448_v29 = vadd.f32 %v4447_v27, %v11981_v53  ;;  %v4594_v6 = vpop.f32.mrf.mxu3 }
 0x4d8   : > { %v4497_v21 = vadd.f32 %v4496_v0, %v4448_v29  ;;  %4743 = vmatmul.bf16.gmra.mxu2 %v15320_v62 }
 0x4da   : > { %v4546_v9 = vadd.f32 %v4545_v1, %v4497_v21  ;;  %4792 = vmatmul.bf16.gmra.mxu3 %v15321_v8 }
 0x4dc   : > { %v12185_v51 = vadd.f32 %v4594_v6, %v4546_v9  ;;  %v4548_v53 = vpop.f32.mrf.mxu2 }
 0x4dd   : > { %v4450_v32 = vpop.f32.mrf.mxu0  ;;  %v4499_v57 = vpop.f32.mrf.mxu1 }
 0x4de   : > { %v4451_v34 = vadd.f32 %v4450_v32, %v12001_v59  ;;  %v4597_v25 = vpop.f32.mrf.mxu3 }
 0x4e0   : > { %v4500_v13 = vadd.f32 %v4499_v57, %v4451_v34  ;;  %4645 = vmatmul.bf16.gmra.mxu0 %v15243_v46  ;;  %4694 = vmatmul.bf16.gmra.mxu1 %v15244_v60 }
 0x4e2   : > { %v4549_v23 = vadd.f32 %v4548_v53, %v4500_v13 }
 0x4e4   : > { %v12192_v52 = vadd.f32 %v4597_v25, %v4549_v23  ;;  %v4550_v62 = vpop.f32.mrf.mxu2 }
 0x4e5   : > { %v4452_v54 = vpop.f32.mrf.mxu0  ;;  %v4501_v49 = vpop.f32.mrf.mxu1 }
 0x4e6   : > { %v4453_v14 = vadd.f32 %v4452_v54, %v12011_v28  ;;  %v4599_v61 = vpop.f32.mrf.mxu3  ;;  %v15402_v54 = vld [vmem:[#allocation157_spill] sm:$0xff] }
 0x4e8   : > { %v4502_v55 = vadd.f32 %v4501_v49, %v4453_v14  ;;  %4748 = vmatmul.bf16.gmra.mxu2 %v15326_v26  ;;  %v15403_v49 = vld [vmem:[#allocation158_spill] sm:$0xff] }
 0x4ea   : > { %v4551_v59 = vadd.f32 %v4550_v62, %v4502_v55  ;;  %4797 = vmatmul.bf16.gmra.mxu3 %v15327_v42 }
 0x4ec   : > { %v12195_v16 = vadd.f32 %v4599_v61, %v4551_v59  ;;  %v4553_v28 = vpop.f32.mrf.mxu2 }
 0x4ed   : > { %v4455_v8 = vpop.f32.mrf.mxu0  ;;  %v4504_v5 = vpop.f32.mrf.mxu1 }
 0x4ee   : > { %v4456_v46 = vadd.f32 %v4455_v8, %v12031_v12  ;;  %v4602_v24 = vpop.f32.mrf.mxu3 }
 0x4f0   : > { %v4505_v60 = vadd.f32 %v4504_v5, %v4456_v46  ;;  %4650 = vmatmul.bf16.gmra.mxu0 %v15251_v35  ;;  %4699 = vmatmul.bf16.gmra.mxu1 %v15252_v45  ;;  %v7256_v5 = vld [vmem:[#allocation2] sm:$0xf]  ;;  %v8578_v46 = vld [vmem:[#allocation2 + $0x4] sm:$0xf] }
 0x4f2   : > { %v4554_v22 = vadd.f32 %v4553_v28, %v4505_v60 }
 0x4f4   : > { %v12202_v50 = vadd.f32 %v4602_v24, %v4554_v22  ;;  %v4555_v26 = vpop.f32.mrf.mxu2 }
 0x4f5   : > { %v4457_v2 = vpop.f32.mrf.mxu0  ;;  %v4506_v36 = vpop.f32.mrf.mxu1 }
 0x4f6   : > { %v4458_v37 = vadd.f32 %v4457_v2, %v12041_v47  ;;  %v4604_v0 = vpop.f32.mrf.mxu3 }
 0x4f8   : > { %v4507_v27 = vadd.f32 %v4506_v36, %v4458_v37  ;;  %4753 = vmatmul.bf16.gmra.mxu2 %v15343_v10 }
 0x4fa   : > { %v4556_v12 = vadd.f32 %v4555_v26, %v4507_v27  ;;  %4802 = vmatmul.bf16.gmra.mxu3 %v15344_v19  ;;  %v15406_v26 = vld [vmem:[#allocation256_spill] sm:$0xff] }
 0x4fc   : > { %v12205_v29 = vadd.f32 %v4604_v0, %v4556_v12  ;;  %v4558_v47 = vpop.f32.mrf.mxu2  ;;  %v15407_v12 = vld [vmem:[#allocation257_spill] sm:$0xff] }
 0x4fd   : > { %v4460_v42 = vpop.f32.mrf.mxu0  ;;  %v4509_v21 = vpop.f32.mrf.mxu1 }
 0x4fe   : > { %v4461_v35 = vadd.f32 %v4460_v42, %v12061_v17  ;;  %v4607_v1 = vpop.f32.mrf.mxu3 }
 0x500   : > { %v4510_v45 = vadd.f32 %v4509_v21, %v4461_v35  ;;  %4655 = vmatmul.bf16.gmra.mxu0 %v15259_v11  ;;  %4704 = vmatmul.bf16.gmra.mxu1 %v15260_v44  ;;  %v15408_v35 = vld [vmem:[#allocation220_spill] sm:$0xff] }
 0x502   : > { %v4559_v6 = vadd.f32 %v4558_v47, %v4510_v45  ;;  %v15409_v45 = vld [vmem:[#allocation221_spill] sm:$0xff] }
 0x504   : > { %v12212_v9 = vadd.f32 %v4607_v1, %v4559_v6  ;;  %v4560_v10 = vpop.f32.mrf.mxu2 }
 0x505   : > { %v4462_v32 = vpop.f32.mrf.mxu0  ;;  %v4511_v57 = vpop.f32.mrf.mxu1 }
 0x506   : > { %v4463_v34 = vadd.f32 %v4462_v32, %v12078_v30  ;;  %v4609_v53 = vpop.f32.mrf.mxu3 }
 0x508   : > { %v4512_v13 = vadd.f32 %v4511_v57, %v4463_v34  ;;  %4758 = vmatmul.bf16.gmra.mxu2 %v15363_v7  ;;  %v8579_v7 = vld [vmem:[#allocation2 + $0x4] sm:$0xf0] }
 0x509   : > { %v12225_v24 = vor.u32 %v8579_v7, %v7256_v5 }
 0x50a   : > { %v4561_v17 = vadd.f32 %v4560_v10, %v4512_v13  ;;  %4807 = vmatmul.bf16.gmra.mxu3 %v15364_v58 }
 0x50b   : > { %15404 = vst [vmem:[#allocation19_spill] sm:$0xff] %v12225_v24  ;;  %v14682_v57 = vshll.u32 %v12225_v24, 16 }
 0x50c   : > { %v12215_v25 = vadd.f32 %v4609_v53, %v4561_v17  ;;  %v4563_v30 = vpop.f32.mrf.mxu2 }
 0x50d   : > { %v4465_v19 = vpop.f32.mrf.mxu0  ;;  %v4514_v23 = vpop.f32.mrf.mxu1 }
 0x50e   : > { %v4466_v11 = vadd.f32 %v4465_v19, %v12093_v3  ;;  %v4612_v14 = vpop.f32.mrf.mxu3  ;;  %v7258_v3 = vld [vmem:[#allocation2 + $0x8] sm:$0xf0] }
 0x50f   : > { %v12227_v2 = vor.u32 %v8578_v46, %v7258_v3 }
 0x510   : > { %v4515_v44 = vadd.f32 %v4514_v23, %v4466_v11  ;;  %4660 = vmatmul.bf16.gmra.mxu0 %v15402_v54  ;;  %4709 = vmatmul.bf16.gmra.mxu1 %v15403_v49  ;;  %v7264_v11 = vld [vmem:[#allocation2 + $0x10] sm:$0xf]  ;;  %v8580_v54 = vld [vmem:[#allocation2 + $0x14] sm:$0xf]  ;;  %v7266_v49 = vld [vmem:[#allocation2 + $0x18] sm:$0xf0] }
 0x511   : > { %15405 = vst [vmem:[#allocation17_spill] sm:$0xff] %v12227_v2  ;;  %v14675_v42 = vshrl.u32 %v12227_v2, 16  ;;  %v14680_v34 = vshll.u32 %v12227_v2, 16  ;;  %v12257_v7 = vor.u32 %v8580_v54, %v7266_v49  ;;  %v15424_v54 = vld [vmem:[#allocation122_spill] sm:$0xff] }
 0x512   : > { %v4564_v55 = vadd.f32 %v4563_v30, %v4515_v44  ;;  %v8581_v44 = vld [vmem:[#allocation2 + $0x14] sm:$0xf0] }
 0x513   : > { %15412 = vst [vmem:[#allocation18_spill] sm:$0xff] %v12257_v7 }
 0x514   : > { %v12222_v62 = vadd.f32 %v4612_v14, %v4564_v55  ;;  %v4565_v58 = vpop.f32.mrf.mxu2 }
 0x515   : > { %v4467_v61 = vpop.f32.mrf.mxu0  ;;  %v4516_v59 = vpop.f32.mrf.mxu1 }
 0x516   : > { %v4468_v8 = vadd.f32 %v4467_v61, %v12104_v48  ;;  %v4614_v28 = vpop.f32.mrf.mxu3  ;;  %v14679_v48 = vshrl.u32 %v12225_v24, 16  ;;  %v12251_v61 = vor.u32 %v8581_v44, %v7264_v11  ;;  %v15423_v44 = vld [vmem:[#allocation120_spill] sm:$0xff] }
 0x518   : > { %v4517_v60 = vadd.f32 %v4516_v59, %v4468_v8  ;;  %4763 = vmatmul.bf16.gmra.mxu2 %v15406_v26  ;;  %v571_v6 = vrot.slane %v14679_v48, 7  ;;  %15410 = vst [vmem:[#allocation20_spill] sm:$0xff] %v12251_v61  ;;  %v14667_v26 = vshrl.u32 %v12257_v7, 16  ;;  %v7306_v48 = vld [vmem:[#allocation2 + $0x68] sm:$0xf0] }
 0x51a   : > { %v4566_v22 = vadd.f32 %v4565_v58, %v4517_v60  ;;  %4812 = vmatmul.bf16.gmra.mxu3 %v15407_v12  ;;  %v574_v19 = vor.u32 %v14682_v57, %v571_v6  ;;  %v15417_v12 = vld [vmem:[#allocation115_spill] sm:$0xff] }
 0x51c   : > { %v12229_v36 = vadd.f32 %v4614_v28, %v4566_v22  ;;  %v4568_v47 = vpop.f32.mrf.mxu2  ;;  %v731_v5 = vsel %vm9724_vm6, 0, %v574_v19 }
 0x51d   : > { %v4470_v37 = vpop.f32.mrf.mxu0  ;;  %v4519_v27 = vpop.f32.mrf.mxu1  ;;  %v12263_v28 = vsel %vm9764_vm9, 0, %v731_v5  ;;  %v15425_v5 = vld [vmem:[#allocation127_spill] sm:$0xff] }
 0x51e   : > { %v4471_v0 = vadd.f32 %v4470_v37, %v12119_v38  ;;  %v4617_v1 = vpop.f32.mrf.mxu3  ;;  %v578_v38 = vrot.slane %v14675_v42, 7  ;;  %15414 = vst [vmem:[#allocation23_spill] sm:$0xff] %v12263_v28  ;;  %v14671_v37 = vshrl.u32 %v12251_v61, 16 }
 0x520   : > { %v4520_v21 = vadd.f32 %v4519_v27, %v4471_v0  ;;  %4665 = vmatmul.bf16.gmra.mxu0 %v15408_v35  ;;  %4714 = vmatmul.bf16.gmra.mxu1 %v15409_v45  ;;  %v581_v23 = vor.u32 %v14680_v34, %v578_v38  ;;  %v15416_v0 = vld [vmem:[#allocation113_spill] sm:$0xff]  ;;  %v592_v38 = vrot.slane %v14667_v26, 7 }
 0x522   : > { %v4569_v32 = vadd.f32 %v4568_v47, %v4520_v21  ;;  %v585_v47 = vrot.slane %v14671_v37, 7  ;;  %v7298_v37 = vld [vmem:[#allocation2 + $0x58] sm:$0xf0] }
 0x524   : > { %v12244_v13 = vadd.f32 %v4617_v1, %v4569_v32  ;;  %v4570_v14 = vpop.f32.mrf.mxu2  ;;  %v15418_v1 = vld [vmem:[#allocation114_spill] sm:$0xff]  ;;  %v14674_v32 = vshll.u32 %v12251_v61, 16 }
 0x525   : > { %v4472_v10 = vpop.f32.mrf.mxu0  ;;  %v4521_v53 = vpop.f32.mrf.mxu1 }
 0x526   : > { %v4473_v17 = vadd.f32 %v4472_v10, %v12123_v56  ;;  %v4619_v55 = vpop.f32.mrf.mxu3  ;;  %v732_v56 = vsel %vm9724_vm6, 0, %v581_v23  ;;  %v14672_v10 = vshll.u32 %v12257_v7, 16 }
 0x527   : > { %v12267_v22 = vsel %vm9764_vm9, 0, %v732_v56  ;;  %v8582_v56 = vld [vmem:[#allocation2 + $0x24] sm:$0xf] }
 0x528   : > { %v4522_v30 = vadd.f32 %v4521_v53, %v4473_v17  ;;  %15415 = vst [vmem:[#allocation21_spill] sm:$0xff] %v12267_v22  ;;  %4924 = vmatmul.bf16.vlgmr.msrb.gmra.mxu2 %v12225_v24  ;;  %v15420_v53 = vld [vmem:[#allocation119_spill] sm:$0xff]  ;;  %v15421_v17 = vld [vmem:[#allocation121_spill] sm:$0xff] }
 0x529   : > { %5308 = vmatpush.bf16.msrb.mxu2 %v15416_v0 }
 0x52a   : > { %v4571_v59 = vadd.f32 %v4570_v14, %v4522_v30  ;;  %4973 = vmatmul.bf16.vlgmr.msrb.gmra.mxu3 %v12227_v2  ;;  %v588_v30 = vor.u32 %v14674_v32, %v585_v47  ;;  %v595_v14 = vor.u32 %v14672_v10, %v592_v38  ;;  %v15432_v38 = vld [vmem:[#allocation135_spill] sm:$0xff] }
 0x52b   : > { %5357 = vmatpush.bf16.msrb.mxu3 %v15417_v12 }
 0x52c   : > { %v12259_v46 = vadd.f32 %v4619_v55, %v4571_v59  ;;  %v4729_v35 = vpop.f32.mrf.mxu2  ;;  %v7272_v55 = vld [vmem:[#allocation2 + $0x20] sm:$0xf]  ;;  %v8583_v59 = vld [vmem:[#allocation2 + $0x24] sm:$0xf0]  ;;  %v733_v47 = vsel %vm9724_vm6, 0, %v588_v30 }
 0x52d   : > { %v4631_v3 = vpop.f32.mrf.mxu0  ;;  %v4680_v60 = vpop.f32.mrf.mxu1  ;;  %5309 = vmatpush.bf16.msrb.mxu2 %v15420_v53 }
 0x52e   : > { %v4632_v27 = vadd.f32 %v4631_v3, %v12136_v18  ;;  %v4778_v45 = vpop.f32.mrf.mxu3  ;;  %v15419_v18 = vld [vmem:[#allocation116_spill] sm:$0xff]  ;;  %v7274_v3 = vld [vmem:[#allocation2 + $0x28] sm:$0xf0] }
 0x52f   : > { %5358 = vmatpush.bf16.msrb.mxu3 %v15421_v17 }
 0x530   : > { %v4681_v21 = vadd.f32 %v4680_v60, %v4632_v27  ;;  %4826 = vmatmul.bf16.vlgmr.msrb.gmra.mxu0 %v12263_v28  ;;  %4875 = vmatmul.bf16.vlgmr.msrb.gmra.mxu1 %v12267_v22  ;;  %v15426_v60 = vld [vmem:[#allocation129_spill] sm:$0xff] }
 0x531   : > { %5210 = vmatpush.bf16.msrb.mxu0 %v15418_v1  ;;  %5259 = vmatpush.bf16.msrb.mxu1 %v15419_v18  ;;  %v734_v1 = vsel %vm9724_vm6, 0, %v595_v14  ;;  %v12307_v18 = vor.u32 %v8582_v56, %v7274_v3 }
 0x532   : > { %v4730_v6 = vadd.f32 %v4729_v35, %v4681_v21  ;;  %5310 = vmatpush.bf16.msrb.mxu2 %v15425_v5  ;;  %v12299_v21 = vor.u32 %v8583_v59, %v7272_v55  ;;  %v15429_v35 = vld [vmem:[#allocation130_spill] sm:$0xff]  ;;  %v15437_v55 = vld [vmem:[#allocation136_spill] sm:$0xff]  ;;  %v15438_v59 = vld [vmem:[#allocation137_spill] sm:$0xff] }
 0x533   : > { %5359 = vmatpush.bf16.msrb.mxu3 %v15426_v60  ;;  %15430 = vst [vmem:[#allocation25_spill] sm:$0xff] %v12307_v18  ;;  %v14661_v14 = vshrl.u32 %v12307_v18, 16  ;;  %v15439_v5 = vld [vmem:[#allocation139_spill] sm:$0xff] }
 0x534   : > { %v12288_v19 = vadd.f32 %v4778_v45, %v4730_v6  ;;  %v4731_v0 = vpop.f32.mrf.mxu2  ;;  %15427 = vst [vmem:[#allocation22_spill] sm:$0xff] %v12299_v21  ;;  %v15431_v6 = vld [vmem:[#allocation133_spill] sm:$0xff] }
 0x535   : > { %v4633_v23 = vpop.f32.mrf.mxu0  ;;  %v4682_v11 = vpop.f32.mrf.mxu1  ;;  %5211 = vmatpush.bf16.msrb.mxu0 %v15423_v44  ;;  %5260 = vmatpush.bf16.msrb.mxu1 %v15424_v54  ;;  %v12319_v44 = vsel %vm9764_vm9, 0, %v734_v1  ;;  %v14663_v54 = vshrl.u32 %v12299_v21, 16  ;;  %v15443_v1 = vld [vmem:[#allocation143_spill] sm:$0xff] }
 0x536   : > { %15422 = vst [vmem:[#allocation24_spill] sm:$0xff] %v12288_v19  ;;  %v4634_v49 = vadd.f32 %v4633_v23, %v12147_v31  ;;  %v4780_v12 = vpop.f32.mrf.mxu3  ;;  %v15428_v31 = vld [vmem:[#allocation128_spill] sm:$0xff]  ;;  %5311 = vmatpush.bf16.msrb.mxu2 %v15431_v6 }
 0x537   : > { %5360 = vmatpush.bf16.msrb.mxu3 %v15432_v38  ;;  %15435 = vst [vmem:[#allocation167_spill] sm:$0xff] %v12319_v44 }
 0x538   : > { %v4683_v27 = vadd.f32 %v4682_v11, %v4634_v49  ;;  %v12315_v11 = vsel %vm9764_vm9, 0, %v733_v47  ;;  %4929 = vmatmul.bf16.gmra.mxu2 %v12251_v61  ;;  %v15436_v49 = vld [vmem:[#allocation134_spill] sm:$0xff]  ;;  %v15442_v47 = vld [vmem:[#allocation141_spill] sm:$0xff] }
 0x539   : > { %5212 = vmatpush.bf16.msrb.mxu0 %v15428_v31  ;;  %5261 = vmatpush.bf16.msrb.mxu1 %v15429_v35  ;;  %15434 = vst [vmem:[#allocation28_spill] sm:$0xff] %v12315_v11  ;;  %v606_v31 = vrot.slane %v14661_v14, 7  ;;  %v14664_v35 = vshll.u32 %v12307_v18, 16  ;;  %v15452_v14 = vld [vmem:[#allocation150_spill] sm:$0xff] }
 0x53a   : > { %v4732_v45 = vadd.f32 %v4731_v0, %v4683_v27  ;;  %4978 = vmatmul.bf16.gmra.mxu3 %v12257_v7  ;;  %5312 = vmatpush.bf16.msrb.mxu2 %v15438_v59  ;;  %v15440_v27 = vld [vmem:[#allocation138_spill] sm:$0xff]  ;;  %v7280_v59 = vld [vmem:[#allocation2 + $0x30] sm:$0xf] }
 0x53b   : > { %5361 = vmatpush.bf16.msrb.mxu3 %v15439_v5  ;;  %v8585_v5 = vld [vmem:[#allocation2 + $0x34] sm:$0xf0] }
 0x53c   : > { %v12311_v53 = vadd.f32 %v4780_v12, %v4732_v45  ;;  %v4734_v3 = vpop.f32.mrf.mxu2  ;;  %v14666_v12 = vshll.u32 %v12299_v21, 16  ;;  %v15441_v45 = vld [vmem:[#allocation140_spill] sm:$0xff] }
 0x53d   : > { %v4636_v17 = vpop.f32.mrf.mxu0  ;;  %v4685_v23 = vpop.f32.mrf.mxu1  ;;  %5213 = vmatpush.bf16.msrb.mxu0 %v15436_v49  ;;  %5262 = vmatpush.bf16.msrb.mxu1 %v15437_v55  ;;  %v609_v55 = vor.u32 %v14664_v35, %v606_v31 }
 0x53e   : > { %15433 = vst [vmem:[#allocation27_spill] sm:$0xff] %v12311_v53  ;;  %v4637_v30 = vadd.f32 %v4636_v17, %v12162_v43  ;;  %v4783_v60 = vpop.f32.mrf.mxu3  ;;  %v599_v43 = vrot.slane %v14663_v54, 7  ;;  %5313 = vmatpush.bf16.msrb.mxu2 %v15442_v47  ;;  %v7290_v54 = vld [vmem:[#allocation2 + $0x48] sm:$0xf0] }
 0x53f   : > { %5362 = vmatpush.bf16.msrb.mxu3 %v15443_v1 }
 0x540   : > { %v4686_v56 = vadd.f32 %v4685_v23, %v4637_v30  ;;  %4831 = vmatmul.bf16.gmra.mxu0 %v12315_v11  ;;  %4880 = vmatmul.bf16.gmra.mxu1 %v12319_v44  ;;  %v15445_v23 = vld [vmem:[#allocation142_spill] sm:$0xff]  ;;  %v602_v30 = vor.u32 %v14666_v12, %v599_v43 }
 0x541   : > { %5214 = vmatpush.bf16.msrb.mxu0 %v15440_v27  ;;  %5263 = vmatpush.bf16.msrb.mxu1 %v15441_v45  ;;  %v7282_v27 = vld [vmem:[#allocation2 + $0x38] sm:$0xf0] }
 0x542   : > { %v4735_v0 = vadd.f32 %v4734_v3, %v4686_v56  ;;  %v15446_v56 = vld [vmem:[#allocation144_spill] sm:$0xff]  ;;  %v8584_v3 = vld [vmem:[#allocation2 + $0x34] sm:$0xf]  ;;  %v735_v31 = vsel %vm9724_vm6, 0, %v602_v30 }
 0x544   : > { %v12342_v6 = vadd.f32 %v4783_v60, %v4735_v0  ;;  %v15447_v60 = vld [vmem:[#allocation147_spill] sm:$0xff]  ;;  %v15448_v0 = vld [vmem:[#allocation149_spill] sm:$0xff]  ;;  %v4736_v47 = vpop.f32.mrf.mxu2 }
 0x545   : > { %v4638_v38 = vpop.f32.mrf.mxu0  ;;  %v4687_v17 = vpop.f32.mrf.mxu1  ;;  %5215 = vmatpush.bf16.msrb.mxu0 %v15445_v23  ;;  %5264 = vmatpush.bf16.msrb.mxu1 %v15446_v56  ;;  %v736_v23 = vsel %vm9724_vm6, 0, %v609_v55  ;;  %v12360_v56 = vor.u32 %v8584_v3, %v7282_v27  ;;  %v15458_v55 = vld [vmem:[#allocation154_spill] sm:$0xff] }
 0x546   : > { %15444 = vst [vmem:[#allocation168_spill] sm:$0xff] %v12342_v6  ;;  %v4639_v49 = vadd.f32 %v4638_v38, %v12173_v39  ;;  %5314 = vmatpush.bf16.msrb.mxu2 %v15447_v60  ;;  %5363 = vmatpush.bf16.msrb.mxu3 %v15448_v0  ;;  %v4785_v1 = vpop.f32.mrf.mxu3  ;;  %v12353_v39 = vor.u32 %v8585_v5, %v7280_v59  ;;  %v15450_v38 = vld [vmem:[#allocation148_spill] sm:$0xff]  ;;  %v15453_v60 = vld [vmem:[#allocation153_spill] sm:$0xff]  ;;  %v12369_v0 = vsel %vm9764_vm9, 0, %v735_v31  ;;  %v12373_v30 = vsel %vm9764_vm9, 0, %v736_v23 }
 0x547   : > { %15451 = vst [vmem:[#allocation29_spill] sm:$0xff] %v12360_v56  ;;  %v14665_v27 = vshrl.u32 %v12360_v56, 16  ;;  %v15551_v6 = vshrl.u32 %v12360_v56, 16 }
 0x548   : > { %v4688_v45 = vadd.f32 %v4687_v17, %v4639_v49  ;;  %15449 = vst [vmem:[#allocation26_spill] sm:$0xff] %v12353_v39  ;;  %v15454_v17 = vld [vmem:[#allocation155_spill] sm:$0xff]  ;;  %4934 = vmatmul.bf16.gmra.mxu2 %v12299_v21  ;;  %v14670_v23 = vshll.u32 %v12353_v39, 16 }
 0x549   : > { %5216 = vmatpush.bf16.msrb.mxu0 %v15450_v38  ;;  %5265 = vmatpush.bf16.msrb.mxu1 %v15452_v14  ;;  %15456 = vst [vmem:[#allocation32_spill] sm:$0xff] %v12369_v0  ;;  %v14662_v14 = vshrl.u32 %v12353_v39, 16 }
 0x54a   : > { %v4737_v43 = vadd.f32 %v4736_v47, %v4688_v45  ;;  %5315 = vmatpush.bf16.msrb.mxu2 %v15453_v60  ;;  %5364 = vmatpush.bf16.msrb.mxu3 %v15454_v17  ;;  %15457 = vst [vmem:[#allocation30_spill] sm:$0xff] %v12373_v30  ;;  %v15459_v45 = vld [vmem:[#allocation156_spill] sm:$0xff]  ;;  %v14668_v60 = vshll.u32 %v12360_v56, 16 }
 0x54b   : > { %4983 = vmatmul.bf16.gmra.mxu3 %v12307_v18 }
 0x54c   : > { %v12365_v49 = vadd.f32 %v4785_v1, %v4737_v43  ;;  %v4739_v1 = vpop.f32.mrf.mxu2  ;;  %v613_v43 = vrot.slane %v14662_v14, 7  ;;  %v8586_v14 = vld [vmem:[#allocation2 + $0x44] sm:$0xf] }
 0x54d   : > { %v4641_v59 = vpop.f32.mrf.mxu0  ;;  %v4690_v5 = vpop.f32.mrf.mxu1  ;;  %5217 = vmatpush.bf16.msrb.mxu0 %v15458_v55  ;;  %5266 = vmatpush.bf16.msrb.mxu1 %v15459_v45 }
 0x54e   : > { %15455 = vst [vmem:[#allocation31_spill] sm:$0xff] %v12365_v49  ;;  %v4642_v3 = vadd.f32 %v4641_v59, %v12182_v40  ;;  %v4788_v38 = vpop.f32.mrf.mxu3  ;;  %v620_v40 = vrot.slane %v14665_v27, 7  ;;  %v15538_v49 = vld [vmem:[#allocation190_spill] sm:$0xff] }
 0x550   : > { %v4691_v47 = vadd.f32 %v4690_v5, %v4642_v3  ;;  %4836 = vmatmul.bf16.gmra.mxu0 %v12369_v0  ;;  %4885 = vmatmul.bf16.gmra.mxu1 %v12373_v30  ;;  %v616_v3 = vor.u32 %v14670_v23, %v613_v43  ;;  %v623_v45 = vor.u32 %v14668_v60, %v620_v40  ;;  %v8588_v23 = vld [vmem:[#allocation2 + $0x54] sm:$0xf] }
 0x551   : > { %v12403_v43 = vor.u32 %v8586_v14, %v7290_v54 }
 0x552   : > { %v4740_v31 = vadd.f32 %v4739_v1, %v4691_v47  ;;  %v7288_v47 = vld [vmem:[#allocation2 + $0x40] sm:$0xf]  ;;  %v8587_v1 = vld [vmem:[#allocation2 + $0x44] sm:$0xf0] }
 0x553   : > { %v12397_v26 = vor.u32 %v8587_v1, %v7288_v47  ;;  %15462 = vst [vmem:[#allocation36_spill] sm:$0xff] %v12403_v43  ;;  %v14673_v54 = vshrl.u32 %v12403_v43, 16 }
 0x554   : > { %v12390_v17 = vadd.f32 %v4788_v38, %v4740_v31  ;;  %v4741_v27 = vpop.f32.mrf.mxu2  ;;  %v737_v31 = vsel %vm9724_vm6, 0, %v616_v3 }
 0x555   : > { %v4643_v59 = vpop.f32.mrf.mxu0  ;;  %v4692_v5 = vpop.f32.mrf.mxu1  ;;  %15461 = vst [vmem:[#allocation35_spill] sm:$0xff] %v12397_v26  ;;  %v14678_v1 = vshll.u32 %v12397_v26, 16 }
 0x556   : > { %15460 = vst [vmem:[#allocation33_spill] sm:$0xff] %v12390_v17  ;;  %v4644_v55 = vadd.f32 %v4643_v59, %v12185_v51  ;;  %v4790_v12 = vpop.f32.mrf.mxu3  ;;  %v738_v51 = vsel %vm9724_vm6, 0, %v623_v45  ;;  %v15535_v17 = vld [vmem:[#allocation188_spill] sm:$0xff] }
 0x558   : > { %v4693_v35 = vadd.f32 %v4692_v5, %v4644_v55  ;;  %v12409_v5 = vsel %vm9764_vm9, 0, %v737_v31  ;;  %v12413_v55 = vsel %vm9764_vm9, 0, %v738_v51  ;;  %4939 = vmatmul.bf16.gmra.mxu2 %v12353_v39 }
 0x559   : > { %15464 = vst [vmem:[#allocation37_spill] sm:$0xff] %v12409_v5 }
 0x55a   : > { %v4742_v38 = vadd.f32 %v4741_v27, %v4693_v35  ;;  %15465 = vst [vmem:[#allocation39_spill] sm:$0xff] %v12413_v55  ;;  %v14669_v35 = vshrl.u32 %v12397_v26, 16 }
 0x55b   : > { %4988 = vmatmul.bf16.gmra.mxu3 %v12360_v56 }
 0x55c   : > { %v12405_v59 = vadd.f32 %v4790_v12, %v4742_v38  ;;  %v4744_v14 = vpop.f32.mrf.mxu2  ;;  %v627_v45 = vrot.slane %v14669_v35, 7  ;;  %v14676_v38 = vshll.u32 %v12403_v43, 16 }
 0x55d   : > { %v4646_v40 = vpop.f32.mrf.mxu0  ;;  %v4695_v60 = vpop.f32.mrf.mxu1 }
 0x55e   : > { %15463 = vst [vmem:[#allocation34_spill] sm:$0xff] %v12405_v59  ;;  %v4647_v27 = vadd.f32 %v4646_v40, %v12192_v52  ;;  %v4793_v3 = vpop.f32.mrf.mxu3  ;;  %v634_v52 = vrot.slane %v14673_v54, 7  ;;  %v15534_v59 = vshrl.u32 %v12307_v18, 16 }
 0x560   : > { %v4696_v12 = vadd.f32 %v4695_v60, %v4647_v27  ;;  %4841 = vmatmul.bf16.gmra.mxu0 %v12409_v5  ;;  %4890 = vmatmul.bf16.gmra.mxu1 %v12413_v55  ;;  %v630_v27 = vor.u32 %v14678_v1, %v627_v45  ;;  %v637_v35 = vor.u32 %v14676_v38, %v634_v52  ;;  %v8590_v1 = vld [vmem:[#allocation2 + $0x64] sm:$0xf] }
 0x561   : > { %v12441_v45 = vor.u32 %v8588_v23, %v7298_v37 }
 0x562   : > { %v4745_v47 = vadd.f32 %v4744_v14, %v4696_v12  ;;  %v7296_v12 = vld [vmem:[#allocation2 + $0x50] sm:$0xf]  ;;  %v8589_v14 = vld [vmem:[#allocation2 + $0x54] sm:$0xf0] }
 0x563   : > { %v12435_v42 = vor.u32 %v8589_v14, %v7296_v12  ;;  %15468 = vst [vmem:[#allocation38_spill] sm:$0xff] %v12441_v45  ;;  %v14681_v37 = vshrl.u32 %v12441_v45, 16 }
 0x564   : > { %v12428_v31 = vadd.f32 %v4793_v3, %v4745_v47  ;;  %v4746_v54 = vpop.f32.mrf.mxu2  ;;  %v739_v47 = vsel %vm9724_vm6, 0, %v630_v27 }
 0x565   : > { %v4648_v60 = vpop.f32.mrf.mxu0  ;;  %v4697_v51 = vpop.f32.mrf.mxu1  ;;  %15467 = vst [vmem:[#allocation226_spill] sm:$0xff] %v12435_v42  ;;  %v14686_v14 = vshll.u32 %v12435_v42, 16 }
 0x566   : > { %15466 = vst [vmem:[#allocation40_spill] sm:$0xff] %v12428_v31  ;;  %v4649_v40 = vadd.f32 %v4648_v60, %v12195_v16  ;;  %v4795_v32 = vpop.f32.mrf.mxu3  ;;  %v740_v16 = vsel %vm9724_vm6, 0, %v637_v35  ;;  %v15531_v31 = vld [vmem:[#allocation186_spill] sm:$0xff] }
 0x568   : > { %v4698_v10 = vadd.f32 %v4697_v51, %v4649_v40  ;;  %v12447_v51 = vsel %vm9764_vm9, 0, %v739_v47  ;;  %v12451_v40 = vsel %vm9764_vm9, 0, %v740_v16  ;;  %4944 = vmatmul.bf16.gmra.mxu2 %v12397_v26 }
 0x569   : > { %15470 = vst [vmem:[#allocation44_spill] sm:$0xff] %v12447_v51 }
 0x56a   : > { %v4747_v3 = vadd.f32 %v4746_v54, %v4698_v10  ;;  %15471 = vst [vmem:[#allocation41_spill] sm:$0xff] %v12451_v40  ;;  %v14677_v10 = vshrl.u32 %v12435_v42, 16 }
 0x56b   : > { %4993 = vmatmul.bf16.gmra.mxu3 %v12403_v43 }
 0x56c   : > { %v12443_v60 = vadd.f32 %v4795_v32, %v4747_v3  ;;  %v4749_v23 = vpop.f32.mrf.mxu2  ;;  %v641_v27 = vrot.slane %v14677_v10, 7  ;;  %v14684_v3 = vshll.u32 %v12441_v45, 16 }
 0x56d   : > { %v4651_v52 = vpop.f32.mrf.mxu0  ;;  %v4700_v38 = vpop.f32.mrf.mxu1 }
 0x56e   : > { %15469 = vst [vmem:[#allocation227_spill] sm:$0xff] %v12443_v60  ;;  %v4652_v35 = vadd.f32 %v4651_v52, %v12202_v50  ;;  %v4798_v54 = vpop.f32.mrf.mxu3  ;;  %v648_v50 = vrot.slane %v14681_v37, 7  ;;  %v15514_v60 = vld [vmem:[#allocation174_spill] sm:$0xff] }
 0x570   : > { %v4701_v32 = vadd.f32 %v4700_v38, %v4652_v35  ;;  %4846 = vmatmul.bf16.gmra.mxu0 %v12447_v51  ;;  %4895 = vmatmul.bf16.gmra.mxu1 %v12451_v40  ;;  %v644_v35 = vor.u32 %v14686_v14, %v641_v27  ;;  %v651_v10 = vor.u32 %v14684_v3, %v648_v50  ;;  %v8592_v14 = vld [vmem:[#allocation2 + $0x74] sm:$0xf] }
 0x571   : > { %v12479_v27 = vor.u32 %v8590_v1, %v7306_v48 }
 0x572   : > { %v4750_v12 = vadd.f32 %v4749_v23, %v4701_v32  ;;  %v7304_v32 = vld [vmem:[#allocation2 + $0x60] sm:$0xf]  ;;  %v8591_v23 = vld [vmem:[#allocation2 + $0x64] sm:$0xf0] }
 0x573   : > { %v12473_v20 = vor.u32 %v8591_v23, %v7304_v32  ;;  %15474 = vst [vmem:[#allocation202_spill] sm:$0xff] %v12479_v27  ;;  %v14689_v48 = vshrl.u32 %v12479_v27, 16 }
 0x574   : > { %v12466_v47 = vadd.f32 %v4798_v54, %v4750_v12  ;;  %v4751_v37 = vpop.f32.mrf.mxu2  ;;  %v741_v12 = vsel %vm9724_vm6, 0, %v644_v35 }
 0x575   : > { %v4653_v38 = vpop.f32.mrf.mxu0  ;;  %v4702_v16 = vpop.f32.mrf.mxu1  ;;  %15473 = vst [vmem:[#allocation201_spill] sm:$0xff] %v12473_v20  ;;  %v14694_v23 = vshll.u32 %v12473_v20, 16 }
 0x576   : > { %15472 = vst [vmem:[#allocation45_spill] sm:$0xff] %v12466_v47  ;;  %v4654_v52 = vadd.f32 %v4653_v38, %v12205_v29  ;;  %v4800_v57 = vpop.f32.mrf.mxu3  ;;  %v742_v29 = vsel %vm9724_vm6, 0, %v651_v10  ;;  %v15512_v47 = vld [vmem:[#allocation173_spill] sm:$0xff] }
 0x578   : > { %v4703_v34 = vadd.f32 %v4702_v16, %v4654_v52  ;;  %v12485_v16 = vsel %vm9764_vm9, 0, %v741_v12  ;;  %v12489_v52 = vsel %vm9764_vm9, 0, %v742_v29  ;;  %4949 = vmatmul.bf16.gmra.mxu2 %v12435_v42 }
 0x579   : > { %15476 = vst [vmem:[#allocation49_spill] sm:$0xff] %v12485_v16 }
 0x57a   : > { %v4752_v54 = vadd.f32 %v4751_v37, %v4703_v34  ;;  %15477 = vst [vmem:[#allocation46_spill] sm:$0xff] %v12489_v52  ;;  %v14685_v34 = vshrl.u32 %v12473_v20, 16 }
 0x57b   : > { %4998 = vmatmul.bf16.gmra.mxu3 %v12441_v45 }
 0x57c   : > { %v12481_v38 = vadd.f32 %v4800_v57, %v4752_v54  ;;  %v4754_v1 = vpop.f32.mrf.mxu2  ;;  %v655_v35 = vrot.slane %v14685_v34, 7  ;;  %v14692_v54 = vshll.u32 %v12479_v27, 16 }
 0x57d   : > { %v4656_v50 = vpop.f32.mrf.mxu0  ;;  %v4705_v3 = vpop.f32.mrf.mxu1 }
 0x57e   : > { %15475 = vst [vmem:[#allocation42_spill] sm:$0xff] %v12481_v38  ;;  %v4657_v10 = vadd.f32 %v4656_v50, %v12212_v9  ;;  %v4803_v37 = vpop.f32.mrf.mxu3  ;;  %v662_v9 = vrot.slane %v14689_v48, 7  ;;  %v15511_v38 = vshrl.u32 %v12257_v7, 16 }
 0x580   : > { %v4706_v57 = vadd.f32 %v4705_v3, %v4657_v10  ;;  %4851 = vmatmul.bf16.gmra.mxu0 %v12485_v16  ;;  %4900 = vmatmul.bf16.gmra.mxu1 %v12489_v52  ;;  %v658_v10 = vor.u32 %v14694_v23, %v655_v35  ;;  %v665_v34 = vor.u32 %v14692_v54, %v662_v9 }
 0x581   : > { %v12517_v35 = vor.u32 %v8592_v14, %v7314_v41 }
 0x582   : > { %v4755_v32 = vadd.f32 %v4754_v1, %v4706_v57  ;;  %v7312_v57 = vld [vmem:[#allocation2 + $0x70] sm:$0xf]  ;;  %v8593_v1 = vld [vmem:[#allocation2 + $0x74] sm:$0xf0] }
 0x583   : > { %v12511_v63 = vor.u32 %v8593_v1, %v7312_v57  ;;  %15480 = vst [vmem:[#allocation51_spill] sm:$0xff] %v12517_v35 }
 0x584   : > { %v12504_v12 = vadd.f32 %v4803_v37, %v4755_v32  ;;  %v4756_v48 = vpop.f32.mrf.mxu2  ;;  %v743_v32 = vsel %vm9724_vm6, 0, %v658_v10 }
 0x585   : > { %v4658_v3 = vpop.f32.mrf.mxu0  ;;  %v4707_v29 = vpop.f32.mrf.mxu1  ;;  %15479 = vst [vmem:[#allocation48_spill] sm:$0xff] %v12511_v63  ;;  %v14698_v1 = vshll.u32 %v12511_v63, 16 }
 0x586   : > { %15478 = vst [vmem:[#allocation50_spill] sm:$0xff] %v12504_v12  ;;  %v4659_v50 = vadd.f32 %v4658_v3, %v12215_v25  ;;  %v4805_v4 = vpop.f32.mrf.mxu3  ;;  %v744_v25 = vsel %vm9724_vm6, 0, %v665_v34 }
 0x588   : > { %v4708_v15 = vadd.f32 %v4707_v29, %v4659_v50  ;;  %v12523_v29 = vsel %vm9764_vm9, 0, %v743_v32  ;;  %v12527_v50 = vsel %vm9764_vm9, 0, %v744_v25  ;;  %4954 = vmatmul.bf16.gmra.mxu2 %v12473_v20 }
 0x589   : > { %15482 = vst [vmem:[#allocation52_spill] sm:$0xff] %v12523_v29 }
 0x58a   : > { %v4757_v37 = vadd.f32 %v4756_v48, %v4708_v15  ;;  %15483 = vst [vmem:[#allocation55_spill] sm:$0xff] %v12527_v50  ;;  %v14693_v15 = vshrl.u32 %v12511_v63, 16 }
 0x58b   : > { %5003 = vmatmul.bf16.gmra.mxu3 %v12479_v27 }
 0x58c   : > { %v12519_v3 = vadd.f32 %v4805_v4, %v4757_v37  ;;  %v14696_v4 = vshrl.u32 %v12517_v35, 16  ;;  %v4759_v14 = vpop.f32.mrf.mxu2  ;;  %v669_v10 = vrot.slane %v14693_v15, 7  ;;  %v14697_v37 = vshll.u32 %v12517_v35, 16 }
 0x58d   : > { %v4661_v9 = vpop.f32.mrf.mxu0  ;;  %v4710_v54 = vpop.f32.mrf.mxu1 }
 0x58e   : > { %15481 = vst [vmem:[#allocation53_spill] sm:$0xff] %v12519_v3  ;;  %v4662_v34 = vadd.f32 %v4661_v9, %v12222_v62  ;;  %v4808_v48 = vpop.f32.mrf.mxu3  ;;  %v676_v62 = vrot.slane %v14696_v4, 7 }
 0x590   : > { %v4711_v41 = vadd.f32 %v4710_v54, %v4662_v34  ;;  %4856 = vmatmul.bf16.gmra.mxu0 %v12523_v29  ;;  %4905 = vmatmul.bf16.gmra.mxu1 %v12527_v50  ;;  %v672_v34 = vor.u32 %v14698_v1, %v669_v10  ;;  %v679_v15 = vor.u32 %v14697_v37, %v676_v62  ;;  %v15492_v37 = vshrl.u32 %v12227_v2, 16 }
 0x592   : > { %v4760_v57 = vadd.f32 %v4759_v14, %v4711_v41  ;;  %v745_v4 = vsel %vm9724_vm6, 0, %v672_v34  ;;  %v15489_v34 = vshll.u32 %v12227_v2, 16 }
 0x593   : > { %v12557_v10 = vsel %vm9764_vm9, 0, %v745_v4  ;;  %v15488_v4 = vshll.u32 %v12225_v24, 16 }
 0x594   : > { %v12542_v32 = vadd.f32 %v4808_v48, %v4760_v57  ;;  %v4761_v14 = vpop.f32.mrf.mxu2  ;;  %v746_v48 = vsel %vm9724_vm6, 0, %v679_v15  ;;  %15486 = vst [vmem:[#allocation59_spill] sm:$0xff] %v12557_v10 }
 0x595   : > { %v4663_v54 = vpop.f32.mrf.mxu0  ;;  %v4712_v25 = vpop.f32.mrf.mxu1  ;;  %v12561_v62 = vsel %vm9764_vm9, 0, %v746_v48 }
 0x596   : > { %15484 = vst [vmem:[#allocation58_spill] sm:$0xff] %v12542_v32  ;;  %v4664_v9 = vadd.f32 %v4663_v54, %v12229_v36  ;;  %v4810_v23 = vpop.f32.mrf.mxu3 }
 0x597   : > { %15487 = vst [vmem:[#allocation62_spill] sm:$0xff] %v12561_v62 }
 0x598   : > { %v4713_v41 = vadd.f32 %v4712_v25, %v4664_v9  ;;  %4959 = vmatmul.bf16.gmra.mxu2 %v12511_v63  ;;  %v787_v9 = vrot.slane %v15488_v4, 1 }
 0x59a   : > { %v4762_v33 = vadd.f32 %v4761_v14, %v4713_v41  ;;  %v789_v41 = vrot.slane %v15489_v34, 1 }
 0x59b   : > { %5008 = vmatmul.bf16.gmra.mxu3 %v12517_v35 }
 0x59c   : > { %v12553_v57 = vadd.f32 %v4810_v23, %v4762_v33  ;;  %v4764_v33 = vpop.f32.mrf.mxu2  ;;  %v790_v1 = vor.u32 %v789_v41, %v15492_v37 }
 0x59d   : > { %v4666_v32 = vpop.f32.mrf.mxu0  ;;  %v4715_v36 = vpop.f32.mrf.mxu1 }
 0x59e   : > { %15485 = vst [vmem:[#allocation60_spill] sm:$0xff] %v12553_v57  ;;  %v4667_v54 = vadd.f32 %v4666_v32, %v12244_v13  ;;  %v4813_v23 = vpop.f32.mrf.mxu3 }
 0x5a0   : > { %v4716_v25 = vadd.f32 %v4715_v36, %v4667_v54  ;;  %4861 = vmatmul.bf16.gmra.mxu0 %v12557_v10  ;;  %4910 = vmatmul.bf16.gmra.mxu1 %v12561_v62  ;;  %v15491_v36 = vshrl.u32 %v12225_v24, 16  ;;  %v15559_v24 = vshrl.u32 %v12403_v43, 16 }
 0x5a2   : > { %v4765_v15 = vadd.f32 %v4764_v33, %v4716_v25  ;;  %v788_v54 = vor.u32 %v787_v9, %v15491_v36  ;;  %v15501_v36 = vld [vmem:[#allocation162_spill] sm:$0xff] }
 0x5a4   : > { %v12572_v14 = vadd.f32 %v4813_v23, %v4765_v15  ;;  %v4766_v25 = vpop.f32.mrf.mxu2  ;;  %v850_v12 = vsel %vm10179_vm0, %v788_v54, 0  ;;  %v851_v23 = vsel %vm10179_vm0, %v790_v1, 0  ;;  %v15502_v54 = vld [vmem:[#allocation164_spill] sm:$0xff] }
 0x5a5   : > { %v4668_v48 = vpop.f32.mrf.mxu0  ;;  %v4717_v13 = vpop.f32.mrf.mxu1  ;;  %v12587_v9 = vsel %vm10185_vm3, 0, %v850_v12  ;;  %v12591_v37 = vsel %vm10185_vm3, 0, %v851_v23 }
 0x5a6   : > { %15490 = vst [vmem:[#allocation65_spill] sm:$0xff] %v12572_v14  ;;  %v4669_v32 = vadd.f32 %v4668_v48, %v12259_v46  ;;  %v4815_v33 = vpop.f32.mrf.mxu3  ;;  %v15507_v14 = vld [vmem:[#allocation170_spill] sm:$0xff] }
 0x5a7   : > { %15496 = vst [vmem:[#allocation66_spill] sm:$0xff] %v12587_v9 }
 0x5a8   : > { %v4718_v57 = vadd.f32 %v4717_v13, %v4669_v32  ;;  %15497 = vst [vmem:[#allocation68_spill] sm:$0xff] %v12591_v37  ;;  %5120 = vmatmul.bf16.vlgmr.msra.gmra.mxu2 %v12315_v11  ;;  %v15499_v13 = vld [vmem:[#allocation161_spill] sm:$0xff]  ;;  %v15567_v11 = vshrl.u32 %v12441_v45, 16 }
 0x5a9   : > { %5504 = vmatpush.bf16.msra.mxu2 %v15499_v13  ;;  %v15505_v13 = vld [vmem:[#allocation169_spill] sm:$0xff] }
 0x5aa   : > { %v4767_v3 = vadd.f32 %v4766_v25, %v4718_v57  ;;  %v15498_v57 = vld [vmem:[#allocation125_spill] sm:$0xff] }
 0x5ab   : > { %5169 = vmatmul.bf16.vlgmr.msra.gmra.mxu3 %v12319_v44 }
 0x5ac   : > { %v12583_v15 = vadd.f32 %v4815_v33, %v4767_v3  ;;  %v15500_v3 = vld [vmem:[#allocation163_spill] sm:$0xff]  ;;  %v4925_v12 = vpop.f32.mrf.mxu2  ;;  %v15503_v33 = vshll.u32 %v12251_v61, 16 }
 0x5ad   : > { %v4827_v34 = vpop.f32.mrf.mxu0  ;;  %v4876_v46 = vpop.f32.mrf.mxu1  ;;  %5553 = vmatpush.bf16.msra.mxu3 %v15500_v3  ;;  %5505 = vmatpush.bf16.msra.mxu2 %v15505_v13  ;;  %v15513_v13 = vld [vmem:[#allocation175_spill] sm:$0xff] }
 0x5ae   : > { %15494 = vst [vmem:[#allocation67_spill] sm:$0xff] %v12583_v15  ;;  %v4828_v41 = vadd.f32 %v4827_v34, %v15498_v57  ;;  %v4974_v32 = vpop.f32.mrf.mxu3  ;;  %v791_v23 = vrot.slane %v15503_v33, 1  ;;  %v15504_v34 = vshll.u32 %v12257_v7, 16 }
 0x5b0   : > { %v4877_v1 = vadd.f32 %v4876_v46, %v4828_v41  ;;  %5022 = vmatmul.bf16.vlgmr.msra.gmra.mxu0 %v12587_v9  ;;  %5071 = vmatmul.bf16.vlgmr.msra.gmra.mxu1 %v12591_v37  ;;  %v793_v57 = vrot.slane %v15504_v34, 1  ;;  %v15506_v46 = vld [vmem:[#allocation171_spill] sm:$0xff] }
 0x5b1   : > { %5406 = vmatpush.bf16.msra.mxu0 %v15501_v36  ;;  %5455 = vmatpush.bf16.msra.mxu1 %v15502_v54  ;;  %v15508_v36 = vld [vmem:[#allocation172_spill] sm:$0xff]  ;;  %v15509_v54 = vld [vmem:[#allocation262_spill] sm:$0xff] }
 0x5b2   : > { %v4926_v25 = vadd.f32 %v4925_v12, %v4877_v1  ;;  %5554 = vmatpush.bf16.msra.mxu3 %v15506_v46  ;;  %v15510_v12 = vshrl.u32 %v12251_v61, 16  ;;  %v794_v34 = vor.u32 %v793_v57, %v15511_v38  ;;  %5506 = vmatpush.bf16.msra.mxu2 %v15512_v47  ;;  %v15517_v38 = vld [vmem:[#allocation179_spill] sm:$0xff] }
 0x5b4   : > { %v12608_v41 = vadd.f32 %v4974_v32, %v4926_v25  ;;  %v792_v33 = vor.u32 %v791_v23, %v15510_v12  ;;  %v4927_v25 = vpop.f32.mrf.mxu2  ;;  %v853_v23 = vsel %vm10179_vm0, %v794_v34, 0  ;;  %v15520_v12 = vld [vmem:[#allocation178_spill] sm:$0xff] }
 0x5b5   : > { %v4829_v3 = vpop.f32.mrf.mxu0  ;;  %v4878_v15 = vpop.f32.mrf.mxu1  ;;  %5407 = vmatpush.bf16.msra.mxu0 %v15507_v14  ;;  %5456 = vmatpush.bf16.msra.mxu1 %v15508_v36  ;;  %v15515_v14 = vld [vmem:[#allocation176_spill] sm:$0xff] }
 0x5b6   : > { %v4830_v1 = vadd.f32 %v4829_v3, %v15509_v54  ;;  %5555 = vmatpush.bf16.msra.mxu3 %v15513_v13  ;;  %v4976_v46 = vpop.f32.mrf.mxu3  ;;  %v852_v3 = vsel %vm10179_vm0, %v792_v33, 0  ;;  %v15516_v54 = vld [vmem:[#allocation177_spill] sm:$0xff]  ;;  %v15521_v33 = vld [vmem:[#allocation131_spill] sm:$0xff]  ;;  %v15522_v13 = vld [vmem:[#allocation180_spill] sm:$0xff] }
 0x5b7   : > { %5507 = vmatpush.bf16.msra.mxu2 %v15516_v54  ;;  %v15526_v54 = vshll.u32 %v12299_v21, 16 }
 0x5b8   : > { %v4879_v32 = vadd.f32 %v4878_v15, %v4830_v1  ;;  %v12635_v1 = vsel %vm10185_vm3, 0, %v853_v23  ;;  %5125 = vmatmul.bf16.gmra.mxu2 %v12369_v0 }
 0x5b9   : > { %5408 = vmatpush.bf16.msra.mxu0 %v15514_v60  ;;  %5457 = vmatpush.bf16.msra.mxu1 %v15515_v14  ;;  %v12631_v60 = vsel %vm10185_vm3, 0, %v852_v3  ;;  %15519 = vst [vmem:[#allocation75_spill] sm:$0xff] %v12635_v1  ;;  %v15525_v3 = vld [vmem:[#allocation182_spill] sm:$0xff] }
 0x5ba   : > { %v4928_v36 = vadd.f32 %v4927_v25, %v4879_v32  ;;  %5556 = vmatpush.bf16.msra.mxu3 %v15517_v38  ;;  %15518 = vst [vmem:[#allocation73_spill] sm:$0xff] %v12631_v60  ;;  %v15523_v32 = vld [vmem:[#allocation181_spill] sm:$0xff]  ;;  %v15524_v25 = vld [vmem:[#allocation183_spill] sm:$0xff]  ;;  %v795_v38 = vrot.slane %v15526_v54, 1 }
 0x5bb   : > { %5174 = vmatmul.bf16.gmra.mxu3 %v12373_v30  ;;  %5508 = vmatpush.bf16.msra.mxu2 %v15523_v32 }
 0x5bc   : > { %v12627_v47 = vadd.f32 %v4976_v46, %v4928_v36  ;;  %v4930_v14 = vpop.f32.mrf.mxu2 }
 0x5bd   : > { %v4832_v15 = vpop.f32.mrf.mxu0  ;;  %v4881_v57 = vpop.f32.mrf.mxu1  ;;  %5409 = vmatpush.bf16.msra.mxu0 %v15520_v12  ;;  %5458 = vmatpush.bf16.msra.mxu1 %v15522_v13  ;;  %v15529_v13 = vld [vmem:[#allocation185_spill] sm:$0xff] }
 0x5be   : > { %v4833_v34 = vadd.f32 %v4832_v15, %v15521_v33  ;;  %5557 = vmatpush.bf16.msra.mxu3 %v15524_v25  ;;  %v4979_v36 = vpop.f32.mrf.mxu3  ;;  %v15527_v15 = vshll.u32 %v12307_v18, 16  ;;  %v15528_v33 = vld [vmem:[#allocation184_spill] sm:$0xff] }
 0x5bf   : > { %5509 = vmatpush.bf16.msra.mxu2 %v15529_v13  ;;  %v15537_v13 = vld [vmem:[#allocation191_spill] sm:$0xff] }
 0x5c0   : > { %v4882_v46 = vadd.f32 %v4881_v57, %v4833_v34  ;;  %5027 = vmatmul.bf16.gmra.mxu0 %v12631_v60  ;;  %5076 = vmatmul.bf16.gmra.mxu1 %v12635_v1  ;;  %v797_v12 = vrot.slane %v15527_v15, 1  ;;  %v15530_v57 = vld [vmem:[#allocation187_spill] sm:$0xff] }
 0x5c1   : > { %5410 = vmatpush.bf16.msra.mxu0 %v15525_v3  ;;  %5459 = vmatpush.bf16.msra.mxu1 %v15528_v33  ;;  %v15532_v3 = vld [vmem:[#allocation264_spill] sm:$0xff]  ;;  %v15536_v33 = vld [vmem:[#allocation189_spill] sm:$0xff] }
 0x5c2   : > { %v4931_v23 = vadd.f32 %v4930_v14, %v4882_v46  ;;  %5558 = vmatpush.bf16.msra.mxu3 %v15530_v57  ;;  %v15533_v14 = vshrl.u32 %v12299_v21, 16  ;;  %v798_v15 = vor.u32 %v797_v12, %v15534_v59  ;;  %v15540_v59 = vld [vmem:[#allocation193_spill] sm:$0xff] }
 0x5c3   : > { %5510 = vmatpush.bf16.msra.mxu2 %v15536_v33 }
 0x5c4   : > { %v12654_v34 = vadd.f32 %v4979_v36, %v4931_v23  ;;  %v796_v54 = vor.u32 %v795_v38, %v15533_v14  ;;  %v4932_v23 = vpop.f32.mrf.mxu2  ;;  %v855_v38 = vsel %vm10179_vm0, %v798_v15, 0  ;;  %v15545_v15 = vld [vmem:[#allocation265_spill] sm:$0xff] }
 0x5c5   : > { %v4834_v32 = vpop.f32.mrf.mxu0  ;;  %v4883_v25 = vpop.f32.mrf.mxu1  ;;  %5411 = vmatpush.bf16.msra.mxu0 %v15531_v31  ;;  %5460 = vmatpush.bf16.msra.mxu1 %v15535_v17  ;;  %v15541_v17 = vld [vmem:[#allocation195_spill] sm:$0xff]  ;;  %v12681_v14 = vsel %vm10185_vm3, 0, %v855_v38 }
 0x5c6   : > { %v4835_v46 = vadd.f32 %v4834_v32, %v15532_v3  ;;  %5559 = vmatpush.bf16.msra.mxu3 %v15537_v13  ;;  %v4981_v57 = vpop.f32.mrf.mxu3  ;;  %v854_v32 = vsel %vm10179_vm0, %v796_v54, 0  ;;  %v15539_v3 = vld [vmem:[#allocation192_spill] sm:$0xff]  ;;  %15543 = vst [vmem:[#allocation76_spill] sm:$0xff] %v12681_v14  ;;  %v15544_v54 = vld [vmem:[#allocation194_spill] sm:$0xff] }
 0x5c7   : > { %5511 = vmatpush.bf16.msra.mxu2 %v15540_v59  ;;  %v15546_v13 = vld [vmem:[#allocation196_spill] sm:$0xff] }
 0x5c8   : > { %v4884_v36 = vadd.f32 %v4883_v25, %v4835_v46  ;;  %5130 = vmatmul.bf16.gmra.mxu2 %v12409_v5 }
 0x5c9   : > { %5412 = vmatpush.bf16.msra.mxu0 %v15538_v49  ;;  %5461 = vmatpush.bf16.msra.mxu1 %v15539_v3  ;;  %v12677_v49 = vsel %vm10185_vm3, 0, %v854_v32  ;;  %v15547_v32 = vshll.u32 %v12353_v39, 16  ;;  %v15548_v3 = vshll.u32 %v12360_v56, 16 }
 0x5ca   : > { %v4933_v31 = vadd.f32 %v4932_v23, %v4884_v36  ;;  %5560 = vmatpush.bf16.msra.mxu3 %v15541_v17  ;;  %15542 = vst [vmem:[#allocation74_spill] sm:$0xff] %v12677_v49 }
 0x5cb   : > { %5179 = vmatmul.bf16.gmra.mxu3 %v12413_v55  ;;  %v799_v38 = vrot.slane %v15547_v32, 1  ;;  %v801_v59 = vrot.slane %v15548_v3, 1 }
 0x5cc   : > { %v12673_v12 = vadd.f32 %v4981_v57, %v4933_v31  ;;  %v4935_v23 = vpop.f32.mrf.mxu2 }
 0x5cd   : > { %v4837_v25 = vpop.f32.mrf.mxu0  ;;  %v4886_v46 = vpop.f32.mrf.mxu1  ;;  %5413 = vmatpush.bf16.msra.mxu0 %v15544_v54  ;;  %5462 = vmatpush.bf16.msra.mxu1 %v15546_v13  ;;  %v802_v53 = vor.u32 %v801_v59, %v15551_v6 }
 0x5ce   : > { %v4838_v33 = vadd.f32 %v4837_v25, %v15545_v15  ;;  %v4984_v57 = vpop.f32.mrf.mxu3  ;;  %v15549_v15 = vld [vmem:[#allocation268_spill] sm:$0xff] }
 0x5d0   : > { %v4887_v36 = vadd.f32 %v4886_v46, %v4838_v33  ;;  %5032 = vmatmul.bf16.gmra.mxu0 %v12677_v49  ;;  %5081 = vmatmul.bf16.gmra.mxu1 %v12681_v14  ;;  %v15550_v46 = vshrl.u32 %v12353_v39, 16 }
 0x5d2   : > { %v4936_v31 = vadd.f32 %v4935_v23, %v4887_v36  ;;  %v800_v33 = vor.u32 %v799_v38, %v15550_v46 }
 0x5d4   : > { %v12694_v17 = vadd.f32 %v4984_v57, %v4936_v31  ;;  %v4937_v36 = vpop.f32.mrf.mxu2  ;;  %v856_v32 = vsel %vm10179_vm0, %v800_v33, 0  ;;  %v857_v57 = vsel %vm10179_vm0, %v802_v53, 0  ;;  %v15556_v33 = vshll.u32 %v12403_v43, 16 }
 0x5d5   : > { %v4839_v25 = vpop.f32.mrf.mxu0  ;;  %v4888_v54 = vpop.f32.mrf.mxu1  ;;  %v12709_v38 = vsel %vm10185_vm3, 0, %v856_v32  ;;  %v12713_v6 = vsel %vm10185_vm3, 0, %v857_v57 }
 0x5d6   : > { %v4840_v13 = vadd.f32 %v4839_v25, %v15549_v15  ;;  %v4986_v23 = vpop.f32.mrf.mxu3  ;;  %15552 = vst [vmem:[#allocation81_spill] sm:$0xff] %v12709_v38 }
 0x5d7   : > { %15553 = vst [vmem:[#allocation83_spill] sm:$0xff] %v12713_v6 }
 0x5d8   : > { %v4889_v19 = vadd.f32 %v4888_v54, %v4840_v13  ;;  %5135 = vmatmul.bf16.gmra.mxu2 %v12447_v51  ;;  %v15555_v13 = vshll.u32 %v12397_v26, 16 }
 0x5da   : > { %v4938_v2 = vadd.f32 %v4937_v36, %v4889_v19  ;;  %v15554_v19 = vld [vmem:[#allocation269_spill] sm:$0xff]  ;;  %v803_v46 = vrot.slane %v15555_v13, 1  ;;  %v805_v36 = vrot.slane %v15556_v33, 1 }
 0x5db   : > { %5184 = vmatmul.bf16.gmra.mxu3 %v12451_v40 }
 0x5dc   : > { %v12705_v31 = vadd.f32 %v4986_v23, %v4938_v2  ;;  %v4940_v2 = vpop.f32.mrf.mxu2  ;;  %v806_v37 = vor.u32 %v805_v36, %v15559_v24 }
 0x5dd   : > { %v4842_v3 = vpop.f32.mrf.mxu0  ;;  %v4891_v25 = vpop.f32.mrf.mxu1 }
 0x5de   : > { %v4843_v59 = vadd.f32 %v4842_v3, %v15554_v19  ;;  %v4989_v53 = vpop.f32.mrf.mxu3  ;;  %v15557_v3 = vld [vmem:[#allocation272_spill] sm:$0xff] }
 0x5e0   : > { %v4892_v54 = vadd.f32 %v4891_v25, %v4843_v59  ;;  %5037 = vmatmul.bf16.gmra.mxu0 %v12709_v38  ;;  %5086 = vmatmul.bf16.gmra.mxu1 %v12713_v6  ;;  %v15558_v25 = vshrl.u32 %v12397_v26, 16 }
 0x5e2   : > { %v4941_v15 = vadd.f32 %v4940_v2, %v4892_v54  ;;  %v804_v59 = vor.u32 %v803_v46, %v15558_v25 }
 0x5e4   : > { %v12724_v23 = vadd.f32 %v4989_v53, %v4941_v15  ;;  %v4942_v54 = vpop.f32.mrf.mxu2  ;;  %v858_v13 = vsel %vm10179_vm0, %v804_v59, 0  ;;  %v859_v53 = vsel %vm10179_vm0, %v806_v37, 0  ;;  %v15564_v59 = vshll.u32 %v12441_v45, 16 }
 0x5e5   : > { %v4844_v32 = vpop.f32.mrf.mxu0  ;;  %v4893_v57 = vpop.f32.mrf.mxu1  ;;  %v12739_v46 = vsel %vm10185_vm3, 0, %v858_v13  ;;  %v12743_v24 = vsel %vm10185_vm3, 0, %v859_v53 }
 0x5e6   : > { %v4845_v19 = vadd.f32 %v4844_v32, %v15557_v3  ;;  %v4991_v2 = vpop.f32.mrf.mxu3  ;;  %15560 = vst [vmem:[#allocation82_spill] sm:$0xff] %v12739_v46 }
 0x5e7   : > { %15561 = vst [vmem:[#allocation84_spill] sm:$0xff] %v12743_v24 }
 0x5e8   : > { %v4894_v9 = vadd.f32 %v4893_v57, %v4845_v19  ;;  %5140 = vmatmul.bf16.gmra.mxu2 %v12485_v16  ;;  %v15563_v19 = vshll.u32 %v12435_v42, 16  ;;  %v15574_v16 = vshrl.u32 %v12473_v20, 16 }
 0x5ea   : > { %v4943_v44 = vadd.f32 %v4942_v54, %v4894_v9  ;;  %v15562_v9 = vld [vmem:[#allocation273_spill] sm:$0xff]  ;;  %v807_v25 = vrot.slane %v15563_v19, 1  ;;  %v809_v54 = vrot.slane %v15564_v59, 1 }
 0x5eb   : > { %5189 = vmatmul.bf16.gmra.mxu3 %v12489_v52 }
 0x5ec   : > { %v12735_v15 = vadd.f32 %v4991_v2, %v4943_v44  ;;  %v4945_v44 = vpop.f32.mrf.mxu2  ;;  %v810_v22 = vor.u32 %v809_v54, %v15567_v11 }
 0x5ed   : > { %v4847_v33 = vpop.f32.mrf.mxu0  ;;  %v4896_v32 = vpop.f32.mrf.mxu1 }
 0x5ee   : > { %v4848_v36 = vadd.f32 %v4847_v33, %v15562_v9  ;;  %v4994_v37 = vpop.f32.mrf.mxu3  ;;  %v15565_v33 = vld [vmem:[#allocation276_spill] sm:$0xff] }
 0x5f0   : > { %v4897_v57 = vadd.f32 %v4896_v32, %v4848_v36  ;;  %5042 = vmatmul.bf16.gmra.mxu0 %v12739_v46  ;;  %5091 = vmatmul.bf16.gmra.mxu1 %v12743_v24  ;;  %v15566_v32 = vshrl.u32 %v12435_v42, 16 }
 0x5f2   : > { %v4946_v3 = vadd.f32 %v4945_v44, %v4897_v57  ;;  %v808_v36 = vor.u32 %v807_v25, %v15566_v32 }
 0x5f4   : > { %v12754_v2 = vadd.f32 %v4994_v37, %v4946_v3  ;;  %v4947_v57 = vpop.f32.mrf.mxu2  ;;  %v860_v19 = vsel %vm10179_vm0, %v808_v36, 0  ;;  %v861_v37 = vsel %vm10179_vm0, %v810_v22, 0  ;;  %v15572_v36 = vshll.u32 %v12479_v27, 16 }
 0x5f5   : > { %v4849_v13 = vpop.f32.mrf.mxu0  ;;  %v4898_v53 = vpop.f32.mrf.mxu1  ;;  %v12769_v25 = vsel %vm10185_vm3, 0, %v860_v19  ;;  %v12773_v11 = vsel %vm10185_vm3, 0, %v861_v37  ;;  %v7320_v19 = vld [vmem:[#allocation2 + $0x80] sm:$0xf]  ;;  %v8595_v37 = vld [vmem:[#allocation2 + $0x84] sm:$0xf0] }
 0x5f6   : > { %v4850_v9 = vadd.f32 %v4849_v13, %v15565_v33  ;;  %v4996_v44 = vpop.f32.mrf.mxu3  ;;  %15568 = vst [vmem:[#allocation89_spill] sm:$0xff] %v12769_v25 }
 0x5f7   : > { %15569 = vst [vmem:[#allocation91_spill] sm:$0xff] %v12773_v11 }
 0x5f8   : > { %v4899_v28 = vadd.f32 %v4898_v53, %v4850_v9  ;;  %5145 = vmatmul.bf16.gmra.mxu2 %v12523_v29  ;;  %v15571_v9 = vshll.u32 %v12473_v20, 16 }
 0x5fa   : > { %v4948_v52 = vadd.f32 %v4947_v57, %v4899_v28  ;;  %v15570_v28 = vld [vmem:[#allocation277_spill] sm:$0xff]  ;;  %v811_v32 = vrot.slane %v15571_v9, 1  ;;  %v813_v57 = vrot.slane %v15572_v36, 1  ;;  %v12791_v9 = vor.u32 %v8595_v37, %v7320_v19 }
 0x5fb   : > { %5194 = vmatmul.bf16.gmra.mxu3 %v12527_v50  ;;  %v15573_v50 = vld [vmem:[#allocation280_spill] sm:$0xff] }
 0x5fc   : > { %v12765_v3 = vadd.f32 %v4996_v44, %v4948_v52  ;;  %v4950_v22 = vpop.f32.mrf.mxu2  ;;  %v812_v40 = vor.u32 %v811_v32, %v15574_v16  ;;  %15576 = vst [vmem:[#allocation90_spill] sm:$0xff] %v12791_v9 }
 0x5fd   : > { %v4852_v59 = vpop.f32.mrf.mxu0  ;;  %v4901_v13 = vpop.f32.mrf.mxu1 }
 0x5fe   : > { %v4853_v54 = vadd.f32 %v4852_v59, %v15570_v28  ;;  %v4999_v52 = vpop.f32.mrf.mxu3  ;;  %v862_v5 = vsel %vm10179_vm0, %v812_v40, 0  ;;  %v15579_v40 = vld [vmem:[#allocation281_spill] sm:$0xff] }
 0x600   : > { %v4902_v53 = vadd.f32 %v4901_v13, %v4853_v54  ;;  %5047 = vmatmul.bf16.gmra.mxu0 %v12769_v25  ;;  %5096 = vmatmul.bf16.gmra.mxu1 %v12773_v11  ;;  %v8594_v13 = vld [vmem:[#allocation2 + $0x84] sm:$0xf]  ;;  %v7322_v54 = vld [vmem:[#allocation2 + $0x88] sm:$0xf0] }
 0x602   : > { %v4951_v33 = vadd.f32 %v4950_v22, %v4902_v53  ;;  %v15575_v53 = vshrl.u32 %v12479_v27, 16 }
 0x604   : > { %v12784_v44 = vadd.f32 %v4999_v52, %v4951_v33  ;;  %v814_v22 = vor.u32 %v813_v57, %v15575_v53  ;;  %v4952_v36 = vpop.f32.mrf.mxu2  ;;  %v12793_v52 = vor.u32 %v8594_v13, %v7322_v54 }
 0x605   : > { %v4854_v59 = vpop.f32.mrf.mxu0  ;;  %v4903_v28 = vpop.f32.mrf.mxu1 }
 0x606   : > { %v4855_v29 = vadd.f32 %v4854_v59, %v15573_v50  ;;  %v5001_v33 = vpop.f32.mrf.mxu3  ;;  %v863_v50 = vsel %vm10179_vm0, %v814_v22, 0  ;;  %v14725_v59 = vshrl.u32 %v12791_v9, 16  ;;  %v14728_v32 = vshrl.u32 %v12793_v52, 16 }
 0x607   : > { %v14737_v53 = vshll.u32 %v12793_v52, 16 }
 0x608   : > { %v4904_v51 = vadd.f32 %v4903_v28, %v4855_v29  ;;  %v12805_v29 = vsel %vm10185_vm3, 0, %v862_v5  ;;  %5150 = vmatmul.bf16.gmra.mxu2 %v12557_v10  ;;  %v14738_v28 = vshll.u32 %v12791_v9, 16  ;;  %v690_v54 = vrot.slane %v14728_v32, 7  ;;  %v15582_v10 = vld [vmem:[#allocation284_spill] sm:$0xff] }
 0x609   : > { %15577 = vst [vmem:[#allocation92_spill] sm:$0xff] %v12805_v29 }
 0x60a   : > { %v4953_v55 = vadd.f32 %v4952_v36, %v4904_v51  ;;  %v12809_v51 = vsel %vm10185_vm3, 0, %v863_v50 }
 0x60b   : > { %15578 = vst [vmem:[#allocation97_spill] sm:$0xff] %v12809_v51  ;;  %5199 = vmatmul.bf16.gmra.mxu3 %v12561_v62 }
 0x60c   : > { %v12800_v16 = vadd.f32 %v5001_v33, %v4953_v55  ;;  %v683_v55 = vrot.slane %v14725_v59, 7  ;;  %v4955_v5 = vpop.f32.mrf.mxu2  ;;  %v15580_v33 = vshll.u32 %v12511_v63, 16  ;;  %v693_v59 = vor.u32 %v14737_v53, %v690_v54 }
 0x60d   : > { %v4857_v57 = vpop.f32.mrf.mxu0  ;;  %v4906_v19 = vpop.f32.mrf.mxu1 }
 0x60e   : > { %v4858_v37 = vadd.f32 %v4857_v57, %v15579_v40  ;;  %v5004_v22 = vpop.f32.mrf.mxu3  ;;  %v815_v50 = vrot.slane %v15580_v33, 1  ;;  %v15581_v57 = vshll.u32 %v12517_v35, 16  ;;  %v15584_v33 = vshrl.u32 %v12517_v35, 16 }
 0x610   : > { %v4907_v13 = vadd.f32 %v4906_v19, %v4858_v37  ;;  %5052 = vmatmul.bf16.gmra.mxu0 %v12805_v29  ;;  %5101 = vmatmul.bf16.gmra.mxu1 %v12809_v51  ;;  %v817_v40 = vrot.slane %v15581_v57, 1  ;;  %v686_v19 = vor.u32 %v14738_v28, %v683_v55 }
 0x612   : > { %v4956_v36 = vadd.f32 %v4955_v5, %v4907_v13  ;;  %v15583_v13 = vshrl.u32 %v12511_v63, 16  ;;  %v818_v0 = vor.u32 %v817_v40, %v15584_v33  ;;  %v747_v57 = vsel %vm9724_vm6, 0, %v686_v19 }
 0x614   : > { %v12828_v37 = vadd.f32 %v5004_v22, %v4956_v36  ;;  %v816_v5 = vor.u32 %v815_v50, %v15583_v13  ;;  %v4957_v55 = vpop.f32.mrf.mxu2  ;;  %v748_v22 = vsel %vm9724_vm6, 0, %v693_v59 }
 0x615   : > { %v4859_v62 = vpop.f32.mrf.mxu0  ;;  %v4908_v32 = vpop.f32.mrf.mxu1  ;;  %v12851_v50 = vsel %vm9764_vm9, 0, %v748_v22 }
 0x616   : > { %v4860_v30 = vadd.f32 %v4859_v62, %v15582_v10  ;;  %v5006_v36 = vpop.f32.mrf.mxu3  ;;  %v864_v53 = vsel %vm10179_vm0, %v816_v5, 0  ;;  %v865_v10 = vsel %vm10179_vm0, %v818_v0, 0  ;;  %v12847_v62 = vsel %vm9764_vm9, 0, %v747_v57  ;;  %15586 = vst [vmem:[#allocation98_spill] sm:$0xff] %v12851_v50  ;;  %v15589_v0 = vld [vmem:[#allocation285_spill] sm:$0xff] }
 0x617   : > { %15585 = vst [vmem:[#allocation99_spill] sm:$0xff] %v12847_v62  ;;  %v12861_v40 = vsel %vm10185_vm3, 0, %v865_v10 }
 0x618   : > { %v4909_v9 = vadd.f32 %v4908_v32, %v4860_v30  ;;  %15588 = vst [vmem:[#allocation105_spill] sm:$0xff] %v12861_v40  ;;  %5155 = vmatmul.bf16.gmra.mxu2 %v12847_v62 }
 0x61a   : > { %v4958_v54 = vadd.f32 %v4957_v55, %v4909_v9  ;;  %v12857_v9 = vsel %vm10185_vm3, 0, %v864_v53 }
 0x61b   : > { %15587 = vst [vmem:[#allocation100_spill] sm:$0xff] %v12857_v9  ;;  %5204 = vmatmul.bf16.gmra.mxu3 %v12851_v50 }
 0x61c   : > { %v12853_v30 = vadd.f32 %v5006_v36, %v4958_v54  ;;  %v4960_v5 = vpop.f32.mrf.mxu2  ;;  %v15590_v36 = vld [vmem:[#allocation288_spill] sm:$0xff] }
 0x61d   : > { %v4862_v32 = vpop.f32.mrf.mxu0  ;;  %v4911_v59 = vpop.f32.mrf.mxu1 }
 0x61e   : > { %v4863_v19 = vadd.f32 %v4862_v32, %v15589_v0  ;;  %v5009_v33 = vpop.f32.mrf.mxu3 }
 0x620   : > { %v4912_v13 = vadd.f32 %v4911_v59, %v4863_v19  ;;  %5057 = vmatmul.bf16.gmra.mxu0 %v12857_v9  ;;  %5106 = vmatmul.bf16.gmra.mxu1 %v12861_v40 }
 0x622   : > { %v4961_v57 = vadd.f32 %v4960_v5, %v4912_v13  ;;  %v15591_v13 = vld [vmem:[#allocation197_spill] sm:$0xff]  ;;  %v15592_v5 = vld [vmem:[#allocation199_spill] sm:$0xff] }
 0x624   : > { %v12868_v53 = vadd.f32 %v5009_v33, %v4961_v57  ;;  %v4962_v28 = vpop.f32.mrf.mxu2  ;;  %v15593_v57 = vld [vmem:[#allocation198_spill] sm:$0xff] }
 0x625   : > { %v4864_v55 = vpop.f32.mrf.mxu0  ;;  %v4913_v22 = vpop.f32.mrf.mxu1 }
 0x626   : > { %v4865_v54 = vadd.f32 %v4864_v55, %v15590_v36  ;;  %v5011_v58 = vpop.f32.mrf.mxu3  ;;  %v15594_v55 = vld [vmem:[#allocation200_spill] sm:$0xff]  ;;  %v15595_v36 = vld [vmem:[#allocation203_spill] sm:$0xff] }
 0x628   : > { %v4914_v10 = vadd.f32 %v4913_v22, %v4865_v54  ;;  %5316 = vmatmul.bf16.vlgmr.msrb.gmra.mxu2 %v12631_v60 }
 0x629   : > { %5700 = vmatpush.bf16.msrb.mxu2 %v15591_v13  ;;  %v15599_v13 = vld [vmem:[#allocation79_spill] sm:$0xff] }
 0x62a   : > { %v4963_v32 = vadd.f32 %v4962_v28, %v4914_v10 }
 0x62b   : > { %5365 = vmatmul.bf16.vlgmr.msrb.gmra.mxu3 %v12635_v1 }
 0x62c   : > { %v12871_v0 = vadd.f32 %v5011_v58, %v4963_v32  ;;  %5749 = vmatpush.bf16.msrb.mxu3 %v15592_v5  ;;  %v5121_v28 = vpop.f32.mrf.mxu2  ;;  %v15600_v5 = vld [vmem:[#allocation207_spill] sm:$0xff] }
 0x62d   : > { %v5023_v59 = vpop.f32.mrf.mxu0  ;;  %v5072_v19 = vpop.f32.mrf.mxu1  ;;  %5701 = vmatpush.bf16.msrb.mxu2 %v15595_v36  ;;  %v15602_v36 = vld [vmem:[#allocation208_spill] sm:$0xff] }
 0x62e   : > { %v5024_v8 = vadd.f32 %v5023_v59, %v12608_v41  ;;  %v5170_v58 = vpop.f32.mrf.mxu3  ;;  %v15596_v41 = vld [vmem:[#allocation205_spill] sm:$0xff]  ;;  %v15598_v59 = vld [vmem:[#allocation206_spill] sm:$0xff] }
 0x630   : > { %v5073_v33 = vadd.f32 %v5072_v19, %v5024_v8  ;;  %5218 = vmatmul.bf16.vlgmr.msrb.gmra.mxu0 %v12251_v61  ;;  %5267 = vmatmul.bf16.vlgmr.msrb.gmra.mxu1 %v12257_v7  ;;  %v15597_v8 = vld [vmem:[#allocation204_spill] sm:$0xff] }
 0x631   : > { %5602 = vmatpush.bf16.msrb.mxu0 %v15593_v57  ;;  %5651 = vmatpush.bf16.msrb.mxu1 %v15594_v55  ;;  %v15601_v55 = vld [vmem:[#allocation80_spill] sm:$0xff] }
 0x632   : > { %v5122_v22 = vadd.f32 %v5121_v28, %v5073_v33  ;;  %5750 = vmatpush.bf16.msrb.mxu3 %v15596_v41  ;;  %5702 = vmatpush.bf16.msrb.mxu2 %v15599_v13  ;;  %v15604_v41 = vld [vmem:[#allocation209_spill] sm:$0xff]  ;;  %v15607_v13 = vld [vmem:[#allocation95_spill] sm:$0xff] }
 0x634   : > { %v12884_v54 = vadd.f32 %v5170_v58, %v5122_v22  ;;  %v5123_v33 = vpop.f32.mrf.mxu2  ;;  %v15603_v22 = vld [vmem:[#allocation87_spill] sm:$0xff] }
 0x635   : > { %v5025_v10 = vpop.f32.mrf.mxu0  ;;  %v5074_v32 = vpop.f32.mrf.mxu1  ;;  %5603 = vmatpush.bf16.msrb.mxu0 %v15597_v8  ;;  %5652 = vmatpush.bf16.msrb.mxu1 %v15598_v59 }
 0x636   : > { %v5026_v19 = vadd.f32 %v5025_v10, %v12627_v47  ;;  %5751 = vmatpush.bf16.msrb.mxu3 %v15600_v5  ;;  %v5172_v28 = vpop.f32.mrf.mxu3  ;;  %5703 = vmatpush.bf16.msrb.mxu2 %v15603_v22  ;;  %v15605_v10 = vld [vmem:[#allocation88_spill] sm:$0xff]  ;;  %v15608_v5 = vld [vmem:[#allocation211_spill] sm:$0xff]  ;;  %v15612_v22 = vld [vmem:[#allocation213_spill] sm:$0xff] }
 0x638   : > { %v5075_v57 = vadd.f32 %v5074_v32, %v5026_v19  ;;  %5321 = vmatmul.bf16.gmra.mxu2 %v12677_v49  ;;  %v15606_v19 = vld [vmem:[#allocation210_spill] sm:$0xff] }
 0x639   : > { %5604 = vmatpush.bf16.msrb.mxu0 %v15601_v55  ;;  %5653 = vmatpush.bf16.msrb.mxu1 %v15602_v36  ;;  %v15609_v55 = vld [vmem:[#allocation96_spill] sm:$0xff] }
 0x63a   : > { %v5124_v58 = vadd.f32 %v5123_v33, %v5075_v57  ;;  %5752 = vmatpush.bf16.msrb.mxu3 %v15604_v41  ;;  %5704 = vmatpush.bf16.msrb.mxu2 %v15607_v13  ;;  %v15615_v13 = vld [vmem:[#allocation111_spill] sm:$0xff] }
 0x63b   : > { %5370 = vmatmul.bf16.gmra.mxu3 %v12681_v14 }
 0x63c   : > { %v12895_v8 = vadd.f32 %v5172_v28, %v5124_v58  ;;  %v5126_v33 = vpop.f32.mrf.mxu2  ;;  %v15610_v58 = vld [vmem:[#allocation212_spill] sm:$0xff] }
 0x63d   : > { %v5028_v59 = vpop.f32.mrf.mxu0  ;;  %v5077_v47 = vpop.f32.mrf.mxu1  ;;  %5605 = vmatpush.bf16.msrb.mxu0 %v15605_v10  ;;  %5654 = vmatpush.bf16.msrb.mxu1 %v15606_v19  ;;  %v15614_v19 = vld [vmem:[#allocation214_spill] sm:$0xff] }
 0x63e   : > { %v5029_v32 = vadd.f32 %v5028_v59, %v12654_v34  ;;  %5753 = vmatpush.bf16.msrb.mxu3 %v15608_v5  ;;  %v5175_v28 = vpop.f32.mrf.mxu3  ;;  %v15611_v34 = vld [vmem:[#allocation103_spill] sm:$0xff] }
 0x63f   : > { %5705 = vmatpush.bf16.msrb.mxu2 %v15611_v34  ;;  %v15616_v5 = vld [vmem:[#allocation215_spill] sm:$0xff] }
 0x640   : > { %v5078_v57 = vadd.f32 %v5077_v47, %v5029_v32  ;;  %5223 = vmatmul.bf16.gmra.mxu0 %v12299_v21  ;;  %5272 = vmatmul.bf16.gmra.mxu1 %v12307_v18  ;;  %v15613_v47 = vld [vmem:[#allocation104_spill] sm:$0xff] }
 0x641   : > { %5606 = vmatpush.bf16.msrb.mxu0 %v15609_v55  ;;  %5655 = vmatpush.bf16.msrb.mxu1 %v15610_v58  ;;  %v15617_v58 = vld [vmem:[#allocation112_spill] sm:$0xff] }
 0x642   : > { %v5127_v36 = vadd.f32 %v5126_v33, %v5078_v57  ;;  %5754 = vmatpush.bf16.msrb.mxu3 %v15612_v22  ;;  %v15620_v22 = vld [vmem:[#allocation218_spill] sm:$0xff] }
 0x643   : > { %5706 = vmatpush.bf16.msrb.mxu2 %v15615_v13 }
 0x644   : > { %v12910_v41 = vadd.f32 %v5175_v28, %v5127_v36  ;;  %v5128_v33 = vpop.f32.mrf.mxu2  ;;  %v15618_v28 = vld [vmem:[#allocation216_spill] sm:$0xff]  ;;  %v15619_v36 = vld [vmem:[#allocation117_spill] sm:$0xff] }
 0x645   : > { %v5030_v59 = vpop.f32.mrf.mxu0  ;;  %v5079_v10 = vpop.f32.mrf.mxu1  ;;  %5607 = vmatpush.bf16.msrb.mxu0 %v15613_v47  ;;  %5656 = vmatpush.bf16.msrb.mxu1 %v15614_v19  ;;  %v15621_v19 = vld [vmem:[#allocation217_spill] sm:$0xff] }
 0x646   : > { %v5031_v32 = vadd.f32 %v5030_v59, %v12673_v12  ;;  %5755 = vmatpush.bf16.msrb.mxu3 %v15616_v5  ;;  %v5177_v55 = vpop.f32.mrf.mxu3 }
 0x647   : > { %5707 = vmatpush.bf16.msrb.mxu2 %v15619_v36 }
 0x648   : > { %v5080_v57 = vadd.f32 %v5079_v10, %v5031_v32  ;;  %5326 = vmatmul.bf16.gmra.mxu2 %v12709_v38  ;;  %v15622_v32 = vld [vmem:[#allocation219_spill] sm:$0xff] }
 0x649   : > { %5608 = vmatpush.bf16.msrb.mxu0 %v15617_v58  ;;  %5657 = vmatpush.bf16.msrb.mxu1 %v15618_v28 }
 0x64a   : > { %v5129_v34 = vadd.f32 %v5128_v33, %v5080_v57  ;;  %5756 = vmatpush.bf16.msrb.mxu3 %v15620_v22 }
 0x64b   : > { %5375 = vmatmul.bf16.gmra.mxu3 %v12713_v6 }
 0x64c   : > { %v12921_v47 = vadd.f32 %v5177_v55, %v5129_v34  ;;  %v5131_v5 = vpop.f32.mrf.mxu2 }
 0x64d   : > { %v5033_v12 = vpop.f32.mrf.mxu0  ;;  %v5082_v59 = vpop.f32.mrf.mxu1  ;;  %5609 = vmatpush.bf16.msrb.mxu0 %v15621_v19  ;;  %5658 = vmatpush.bf16.msrb.mxu1 %v15622_v32 }
 0x64e   : > { %v5034_v10 = vadd.f32 %v5033_v12, %v12694_v17  ;;  %v5180_v57 = vpop.f32.mrf.mxu3 }
 0x650   : > { %v5083_v13 = vadd.f32 %v5082_v59, %v5034_v10  ;;  %5228 = vmatmul.bf16.gmra.mxu0 %v12353_v39  ;;  %5277 = vmatmul.bf16.gmra.mxu1 %v12360_v56 }
 0x652   : > { %v5132_v33 = vadd.f32 %v5131_v5, %v5083_v13 }
 0x654   : > { %v12930_v55 = vadd.f32 %v5180_v57, %v5132_v33  ;;  %v5133_v17 = vpop.f32.mrf.mxu2 }
 0x655   : > { %v5035_v58 = vpop.f32.mrf.mxu0  ;;  %v5084_v34 = vpop.f32.mrf.mxu1 }
 0x656   : > { %v5036_v28 = vadd.f32 %v5035_v58, %v12705_v31  ;;  %v5182_v22 = vpop.f32.mrf.mxu3 }
 0x658   : > { %v5085_v36 = vadd.f32 %v5084_v34, %v5036_v28  ;;  %5331 = vmatmul.bf16.gmra.mxu2 %v12739_v46 }
 0x65a   : > { %v5134_v12 = vadd.f32 %v5133_v17, %v5085_v36 }
 0x65b   : > { %5380 = vmatmul.bf16.gmra.mxu3 %v12743_v24 }
 0x65c   : > { %v12933_v19 = vadd.f32 %v5182_v22, %v5134_v12  ;;  %v5136_v31 = vpop.f32.mrf.mxu2 }
 0x65d   : > { %v5038_v59 = vpop.f32.mrf.mxu0  ;;  %v5087_v10 = vpop.f32.mrf.mxu1 }
 0x65e   : > { %v5039_v32 = vadd.f32 %v5038_v59, %v12724_v23  ;;  %v5185_v5 = vpop.f32.mrf.mxu3 }
 0x660   : > { %v5088_v13 = vadd.f32 %v5087_v10, %v5039_v32  ;;  %5233 = vmatmul.bf16.gmra.mxu0 %v12397_v26  ;;  %5282 = vmatmul.bf16.gmra.mxu1 %v12403_v43 }
 0x662   : > { %v5137_v57 = vadd.f32 %v5136_v31, %v5088_v13 }
 0x664   : > { %v12940_v33 = vadd.f32 %v5185_v5, %v5137_v57  ;;  %v5138_v17 = vpop.f32.mrf.mxu2 }
 0x665   : > { %v5040_v58 = vpop.f32.mrf.mxu0  ;;  %v5089_v34 = vpop.f32.mrf.mxu1 }
 0x666   : > { %v5041_v28 = vadd.f32 %v5040_v58, %v12735_v15  ;;  %v5187_v22 = vpop.f32.mrf.mxu3 }
 0x668   : > { %v5090_v36 = vadd.f32 %v5089_v34, %v5041_v28  ;;  %5336 = vmatmul.bf16.gmra.mxu2 %v12769_v25 }
 0x66a   : > { %v5139_v23 = vadd.f32 %v5138_v17, %v5090_v36 }
 0x66b   : > { %5385 = vmatmul.bf16.gmra.mxu3 %v12773_v11 }
 0x66c   : > { %v12943_v12 = vadd.f32 %v5187_v22, %v5139_v23  ;;  %v5141_v15 = vpop.f32.mrf.mxu2 }
 0x66d   : > { %v5043_v59 = vpop.f32.mrf.mxu0  ;;  %v5092_v10 = vpop.f32.mrf.mxu1 }
 0x66e   : > { %v5044_v32 = vadd.f32 %v5043_v59, %v12754_v2  ;;  %v5190_v31 = vpop.f32.mrf.mxu3 }
 0x670   : > { %v5093_v13 = vadd.f32 %v5092_v10, %v5044_v32  ;;  %5238 = vmatmul.bf16.gmra.mxu0 %v12435_v42  ;;  %5287 = vmatmul.bf16.gmra.mxu1 %v12441_v45 }
 0x672   : > { %v5142_v5 = vadd.f32 %v5141_v15, %v5093_v13 }
 0x674   : > { %v12950_v57 = vadd.f32 %v5190_v31, %v5142_v5  ;;  %v5143_v17 = vpop.f32.mrf.mxu2 }
 0x675   : > { %v5045_v58 = vpop.f32.mrf.mxu0  ;;  %v5094_v34 = vpop.f32.mrf.mxu1 }
 0x676   : > { %v5046_v28 = vadd.f32 %v5045_v58, %v12765_v3  ;;  %v5192_v22 = vpop.f32.mrf.mxu3 }
 0x678   : > { %v5095_v36 = vadd.f32 %v5094_v34, %v5046_v28  ;;  %5341 = vmatmul.bf16.gmra.mxu2 %v12805_v29 }
 0x67a   : > { %v5144_v2 = vadd.f32 %v5143_v17, %v5095_v36 }
 0x67b   : > { %5390 = vmatmul.bf16.gmra.mxu3 %v12809_v51 }
 0x67c   : > { %v12953_v23 = vadd.f32 %v5192_v22, %v5144_v2  ;;  %v5146_v3 = vpop.f32.mrf.mxu2 }
 0x67d   : > { %v5048_v59 = vpop.f32.mrf.mxu0  ;;  %v5097_v10 = vpop.f32.mrf.mxu1 }
 0x67e   : > { %v5049_v32 = vadd.f32 %v5048_v59, %v12784_v44  ;;  %v5195_v15 = vpop.f32.mrf.mxu3 }
 0x680   : > { %v5098_v13 = vadd.f32 %v5097_v10, %v5049_v32  ;;  %5243 = vmatmul.bf16.gmra.mxu0 %v12473_v20  ;;  %5292 = vmatmul.bf16.gmra.mxu1 %v12479_v27 }
 0x682   : > { %v5147_v31 = vadd.f32 %v5146_v3, %v5098_v13  ;;  %v15623_v13 = vld [vmem:[#allocation90_spill] sm:$0xff] }
 0x683   : > { %v15624_v3 = vshll.u32 %v15623_v13, 16 }
 0x684   : > { %v12960_v5 = vadd.f32 %v5195_v15, %v5147_v31  ;;  %v5148_v17 = vpop.f32.mrf.mxu2 }
 0x685   : > { %v5050_v58 = vpop.f32.mrf.mxu0  ;;  %v5099_v34 = vpop.f32.mrf.mxu1  ;;  %v819_v15 = vrot.slane %v15624_v3, 1 }
 0x686   : > { %v5051_v28 = vadd.f32 %v5050_v58, %v12800_v16  ;;  %v5197_v22 = vpop.f32.mrf.mxu3  ;;  %v15625_v58 = vshll.u32 %v12793_v52, 16 }
 0x688   : > { %v5100_v36 = vadd.f32 %v5099_v34, %v5051_v28  ;;  %5346 = vmatmul.bf16.gmra.mxu2 %v12857_v9  ;;  %v821_v34 = vrot.slane %v15625_v58, 1 }
 0x68a   : > { %v5149_v44 = vadd.f32 %v5148_v17, %v5100_v36  ;;  %v15626_v17 = vshrl.u32 %v15623_v13, 16 }
 0x68b   : > { %5395 = vmatmul.bf16.gmra.mxu3 %v12861_v40 }
 0x68c   : > { %v12963_v2 = vadd.f32 %v5197_v22, %v5149_v44  ;;  %v5151_v16 = vpop.f32.mrf.mxu2  ;;  %v820_v22 = vor.u32 %v819_v15, %v15626_v17  ;;  %v15627_v44 = vshrl.u32 %v12793_v52, 16 }
 0x68d   : > { %v5053_v59 = vpop.f32.mrf.mxu0  ;;  %v5102_v10 = vpop.f32.mrf.mxu1 }
 0x68e   : > { %v5054_v32 = vadd.f32 %v5053_v59, %v12828_v37  ;;  %v5200_v28 = vpop.f32.mrf.mxu3  ;;  %v822_v59 = vor.u32 %v821_v34, %v15627_v44  ;;  %v866_v7 = vsel %vm10179_vm0, %v820_v22, 0 }
 0x68f   : > { %v12987_v15 = vsel %vm10185_vm3, 0, %v866_v7 }
 0x690   : > { %v5103_v31 = vadd.f32 %v5102_v10, %v5054_v32  ;;  %5248 = vmatmul.bf16.gmra.mxu0 %v12511_v63  ;;  %5297 = vmatmul.bf16.gmra.mxu1 %v12517_v35  ;;  %15628 = vst [vmem:[#allocation107_spill] sm:$0xff] %v12987_v15 }
 0x692   : > { %v5152_v36 = vadd.f32 %v5151_v16, %v5103_v31  ;;  %v867_v31 = vsel %vm10179_vm0, %v822_v59, 0 }
 0x693   : > { %v12991_v34 = vsel %vm10185_vm3, 0, %v867_v31 }
 0x694   : > { %v12976_v37 = vadd.f32 %v5200_v28, %v5152_v36  ;;  %v5153_v1 = vpop.f32.mrf.mxu2  ;;  %15629 = vst [vmem:[#allocation106_spill] sm:$0xff] %v12991_v34 }
 0x695   : > { %v5055_v3 = vpop.f32.mrf.mxu0  ;;  %v5104_v10 = vpop.f32.mrf.mxu1 }
 0x696   : > { %v5056_v32 = vadd.f32 %v5055_v3, %v12853_v30  ;;  %v5202_v16 = vpop.f32.mrf.mxu3 }
 0x698   : > { %v5105_v61 = vadd.f32 %v5104_v10, %v5056_v32  ;;  %5351 = vmatmul.bf16.gmra.mxu2 %v12987_v15 }
 0x69a   : > { %v5154_v58 = vadd.f32 %v5153_v1, %v5105_v61 }
 0x69b   : > { %5400 = vmatmul.bf16.gmra.mxu3 %v12991_v34 }
 0x69c   : > { %v12993_v28 = vadd.f32 %v5202_v16, %v5154_v58  ;;  %v5156_v61 = vpop.f32.mrf.mxu2 }
 0x69d   : > { %v5058_v30 = vpop.f32.mrf.mxu0  ;;  %v5107_v36 = vpop.f32.mrf.mxu1 }
 0x69e   : > { %v5059_v17 = vadd.f32 %v5058_v30, %v12868_v53  ;;  %v5205_v7 = vpop.f32.mrf.mxu3 }
 0x6a0   : > { %v5108_v22 = vadd.f32 %v5107_v36, %v5059_v17  ;;  %5253 = vmatmul.bf16.gmra.mxu0 %v15623_v13  ;;  %5302 = vmatmul.bf16.gmra.mxu1 %v12793_v52 }
 0x6a2   : > { %v5157_v1 = vadd.f32 %v5156_v61, %v5108_v22  ;;  %v15630_v22 = vld [vmem:[#allocation222_spill] sm:$0xff]  ;;  %v15631_v61 = vld [vmem:[#allocation224_spill] sm:$0xff] }
 0x6a4   : > { %v13000_v44 = vadd.f32 %v5205_v7, %v5157_v1  ;;  %v5158_v31 = vpop.f32.mrf.mxu2  ;;  %v15633_v1 = vld [vmem:[#allocation30_spill] sm:$0xff] }
 0x6a5   : > { %v5060_v59 = vpop.f32.mrf.mxu0  ;;  %v5109_v3 = vpop.f32.mrf.mxu1 }
 0x6a6   : > { %v5061_v10 = vadd.f32 %v5060_v59, %v12871_v0  ;;  %v5207_v16 = vpop.f32.mrf.mxu3  ;;  %v15632_v0 = vld [vmem:[#allocation32_spill] sm:$0xff] }
 0x6a8   : > { %v5110_v32 = vadd.f32 %v5109_v3, %v5061_v10  ;;  %5512 = vmatmul.bf16.vlgmr.msra.gmra.mxu2 %v12299_v21  ;;  %v15634_v10 = vld [vmem:[#allocation223_spill] sm:$0xff]  ;;  %v15645_v21 = vld [vmem:[#allocation234_spill] sm:$0xff] }
 0x6a9   : > { %5896 = vmatpush.bf16.msra.mxu2 %v15630_v22 }
 0x6aa   : > { %v5159_v53 = vadd.f32 %v5158_v31, %v5110_v32  ;;  %v15635_v32 = vld [vmem:[#allocation225_spill] sm:$0xff] }
 0x6ab   : > { %5561 = vmatmul.bf16.vlgmr.msra.gmra.mxu3 %v12307_v18  ;;  %v15640_v18 = vld [vmem:[#allocation63_spill] sm:$0xff] }
 0x6ac   : > { %v13003_v58 = vadd.f32 %v5207_v16, %v5159_v53  ;;  %5945 = vmatpush.bf16.msra.mxu3 %v15631_v61  ;;  %v5317_v59 = vpop.f32.mrf.mxu2  ;;  %v15636_v16 = vld [vmem:[#allocation228_spill] sm:$0xff] }
 0x6ad   : > { %v5219_v30 = vpop.f32.mrf.mxu0  ;;  %v5268_v36 = vpop.f32.mrf.mxu1  ;;  %5897 = vmatpush.bf16.msra.mxu2 %v15636_v16  ;;  %v15642_v16 = vld [vmem:[#allocation64_spill] sm:$0xff] }
 0x6ae   : > { %v5220_v17 = vadd.f32 %v5219_v30, %v12884_v54  ;;  %v5366_v3 = vpop.f32.mrf.mxu3  ;;  %v15637_v54 = vld [vmem:[#allocation230_spill] sm:$0xff] }
 0x6b0   : > { %v5269_v7 = vadd.f32 %v5268_v36, %v5220_v17  ;;  %5414 = vmatmul.bf16.vlgmr.msra.gmra.mxu0 %v15632_v0  ;;  %5463 = vmatmul.bf16.vlgmr.msra.gmra.mxu1 %v15633_v1  ;;  %v15638_v36 = vld [vmem:[#allocation229_spill] sm:$0xff]  ;;  %v15639_v17 = vld [vmem:[#allocation231_spill] sm:$0xff] }
 0x6b1   : > { %5798 = vmatpush.bf16.msra.mxu0 %v15634_v10  ;;  %5847 = vmatpush.bf16.msra.mxu1 %v15635_v32  ;;  %v15641_v10 = vld [vmem:[#allocation232_spill] sm:$0xff] }
 0x6b2   : > { %v5318_v31 = vadd.f32 %v5317_v59, %v5269_v7  ;;  %5946 = vmatpush.bf16.msra.mxu3 %v15637_v54  ;;  %5898 = vmatpush.bf16.msra.mxu2 %v15640_v18  ;;  %v15643_v54 = vld [vmem:[#allocation233_spill] sm:$0xff]  ;;  %v15646_v18 = vld [vmem:[#allocation72_spill] sm:$0xff] }
 0x6b4   : > { %v13016_v53 = vadd.f32 %v5366_v3, %v5318_v31  ;;  %v5319_v7 = vpop.f32.mrf.mxu2  ;;  %v15644_v31 = vld [vmem:[#allocation71_spill] sm:$0xff] }
 0x6b5   : > { %v5221_v30 = vpop.f32.mrf.mxu0  ;;  %v5270_v22 = vpop.f32.mrf.mxu1  ;;  %5799 = vmatpush.bf16.msra.mxu0 %v15638_v36  ;;  %5848 = vmatpush.bf16.msra.mxu1 %v15639_v17 }
 0x6b6   : > { %v5222_v61 = vadd.f32 %v5221_v30, %v12895_v8  ;;  %5947 = vmatpush.bf16.msra.mxu3 %v15641_v10  ;;  %v5368_v59 = vpop.f32.mrf.mxu3  ;;  %5899 = vmatpush.bf16.msra.mxu2 %v15644_v31  ;;  %v15649_v10 = vld [vmem:[#allocation238_spill] sm:$0xff]  ;;  %v15653_v31 = vld [vmem:[#allocation239_spill] sm:$0xff] }
 0x6b8   : > { %v5271_v32 = vadd.f32 %v5270_v22, %v5222_v61  ;;  %5517 = vmatmul.bf16.gmra.mxu2 %v12353_v39  ;;  %v15647_v22 = vld [vmem:[#allocation235_spill] sm:$0xff]  ;;  %v15648_v61 = vld [vmem:[#allocation236_spill] sm:$0xff]  ;;  %v15663_v39 = vld [vmem:[#allocation250_spill] sm:$0xff] }
 0x6b9   : > { %5800 = vmatpush.bf16.msra.mxu0 %v15642_v16  ;;  %5849 = vmatpush.bf16.msra.mxu1 %v15643_v54  ;;  %v15652_v54 = vld [vmem:[#allocation237_spill] sm:$0xff] }
 0x6ba   : > { %v5320_v3 = vadd.f32 %v5319_v7, %v5271_v32  ;;  %5948 = vmatpush.bf16.msra.mxu3 %v15645_v21  ;;  %5900 = vmatpush.bf16.msra.mxu2 %v15648_v61  ;;  %v15650_v21 = vld [vmem:[#allocation37_spill] sm:$0xff]  ;;  %v15651_v7 = vld [vmem:[#allocation39_spill] sm:$0xff] }
 0x6bb   : > { %5566 = vmatmul.bf16.gmra.mxu3 %v12360_v56  ;;  %v15658_v56 = vld [vmem:[#allocation244_spill] sm:$0xff] }
 0x6bc   : > { %v13027_v36 = vadd.f32 %v5368_v59, %v5320_v3  ;;  %v5322_v59 = vpop.f32.mrf.mxu2 }
 0x6bd   : > { %v5224_v17 = vpop.f32.mrf.mxu0  ;;  %v5273_v8 = vpop.f32.mrf.mxu1  ;;  %5801 = vmatpush.bf16.msra.mxu0 %v15646_v18  ;;  %5850 = vmatpush.bf16.msra.mxu1 %v15647_v22 }
 0x6be   : > { %v5225_v30 = vadd.f32 %v5224_v17, %v12910_v41  ;;  %5949 = vmatpush.bf16.msra.mxu3 %v15649_v10  ;;  %v5371_v16 = vpop.f32.mrf.mxu3  ;;  %v15654_v41 = vld [vmem:[#allocation240_spill] sm:$0xff]  ;;  %v15655_v17 = vld [vmem:[#allocation242_spill] sm:$0xff]  ;;  %v15657_v10 = vld [vmem:[#allocation243_spill] sm:$0xff] }
 0x6bf   : > { %5901 = vmatpush.bf16.msra.mxu2 %v15654_v41  ;;  %v15660_v41 = vld [vmem:[#allocation245_spill] sm:$0xff] }
 0x6c0   : > { %v5274_v32 = vadd.f32 %v5273_v8, %v5225_v30  ;;  %5419 = vmatmul.bf16.gmra.mxu0 %v15650_v21  ;;  %5468 = vmatmul.bf16.gmra.mxu1 %v15651_v7  ;;  %v15656_v8 = vld [vmem:[#allocation241_spill] sm:$0xff] }
 0x6c1   : > { %5802 = vmatpush.bf16.msra.mxu0 %v15652_v54  ;;  %5851 = vmatpush.bf16.msra.mxu1 %v15653_v31  ;;  %v15659_v54 = vld [vmem:[#allocation246_spill] sm:$0xff] }
 0x6c2   : > { %v5323_v3 = vadd.f32 %v5322_v59, %v5274_v32  ;;  %5950 = vmatpush.bf16.msra.mxu3 %v15655_v17 }
 0x6c3   : > { %5902 = vmatpush.bf16.msra.mxu2 %v15658_v56  ;;  %v15664_v56 = vld [vmem:[#allocation249_spill] sm:$0xff] }
 0x6c4   : > { %v13042_v18 = vadd.f32 %v5371_v16, %v5323_v3  ;;  %v5324_v59 = vpop.f32.mrf.mxu2  ;;  %v15661_v16 = vld [vmem:[#allocation247_spill] sm:$0xff]  ;;  %v15662_v3 = vld [vmem:[#allocation248_spill] sm:$0xff] }
 0x6c5   : > { %v5226_v22 = vpop.f32.mrf.mxu0  ;;  %v5275_v61 = vpop.f32.mrf.mxu1  ;;  %5803 = vmatpush.bf16.msra.mxu0 %v15656_v8  ;;  %5852 = vmatpush.bf16.msra.mxu1 %v15657_v10 }
 0x6c6   : > { %v5227_v30 = vadd.f32 %v5226_v22, %v12921_v47  ;;  %5951 = vmatpush.bf16.msra.mxu3 %v15659_v54  ;;  %v5373_v31 = vpop.f32.mrf.mxu3  ;;  %v15666_v54 = vld [vmem:[#allocation44_spill] sm:$0xff] }
 0x6c7   : > { %5903 = vmatpush.bf16.msra.mxu2 %v15662_v3 }
 0x6c8   : > { %v5276_v32 = vadd.f32 %v5275_v61, %v5227_v30  ;;  %5522 = vmatmul.bf16.gmra.mxu2 %v12397_v26  ;;  %v15665_v30 = vld [vmem:[#allocation251_spill] sm:$0xff] }
 0x6c9   : > { %5804 = vmatpush.bf16.msra.mxu0 %v15660_v41  ;;  %5853 = vmatpush.bf16.msra.mxu1 %v15661_v16 }
 0x6ca   : > { %v5325_v17 = vadd.f32 %v5324_v59, %v5276_v32  ;;  %5952 = vmatpush.bf16.msra.mxu3 %v15663_v39  ;;  %v15667_v32 = vld [vmem:[#allocation41_spill] sm:$0xff] }
 0x6cb   : > { %5571 = vmatmul.bf16.gmra.mxu3 %v12403_v43 }
 0x6cc   : > { %v13053_v8 = vadd.f32 %v5373_v31, %v5325_v17  ;;  %v5327_v39 = vpop.f32.mrf.mxu2 }
 0x6cd   : > { %v5229_v47 = vpop.f32.mrf.mxu0  ;;  %v5278_v22 = vpop.f32.mrf.mxu1  ;;  %5805 = vmatpush.bf16.msra.mxu0 %v15664_v56  ;;  %5854 = vmatpush.bf16.msra.mxu1 %v15665_v30 }
 0x6ce   : > { %v5230_v61 = vadd.f32 %v5229_v47, %v12930_v55  ;;  %v5376_v59 = vpop.f32.mrf.mxu3 }
 0x6d0   : > { %v5279_v10 = vadd.f32 %v5278_v22, %v5230_v61  ;;  %5424 = vmatmul.bf16.gmra.mxu0 %v15666_v54  ;;  %5473 = vmatmul.bf16.gmra.mxu1 %v15667_v32 }
 0x6d2   : > { %v5328_v31 = vadd.f32 %v5327_v39, %v5279_v10  ;;  %v15668_v39 = vld [vmem:[#allocation49_spill] sm:$0xff] }
 0x6d4   : > { %v13062_v41 = vadd.f32 %v5376_v59, %v5328_v31  ;;  %v5329_v55 = vpop.f32.mrf.mxu2  ;;  %v15669_v59 = vld [vmem:[#allocation46_spill] sm:$0xff] }
 0x6d5   : > { %v5231_v17 = vpop.f32.mrf.mxu0  ;;  %v5280_v16 = vpop.f32.mrf.mxu1 }
 0x6d6   : > { %v5232_v3 = vadd.f32 %v5231_v17, %v12933_v19  ;;  %v5378_v47 = vpop.f32.mrf.mxu3 }
 0x6d8   : > { %v5281_v56 = vadd.f32 %v5280_v16, %v5232_v3  ;;  %5527 = vmatmul.bf16.gmra.mxu2 %v12435_v42 }
 0x6da   : > { %v5330_v43 = vadd.f32 %v5329_v55, %v5281_v56 }
 0x6db   : > { %5576 = vmatmul.bf16.gmra.mxu3 %v12441_v45 }
 0x6dc   : > { %v13065_v26 = vadd.f32 %v5378_v47, %v5330_v43  ;;  %v5332_v19 = vpop.f32.mrf.mxu2 }
 0x6dd   : > { %v5234_v22 = vpop.f32.mrf.mxu0  ;;  %v5283_v61 = vpop.f32.mrf.mxu1 }
 0x6de   : > { %v5235_v30 = vadd.f32 %v5234_v22, %v12940_v33  ;;  %v5381_v31 = vpop.f32.mrf.mxu3 }
 0x6e0   : > { %v5284_v10 = vadd.f32 %v5283_v61, %v5235_v30  ;;  %5429 = vmatmul.bf16.gmra.mxu0 %v15668_v39  ;;  %5478 = vmatmul.bf16.gmra.mxu1 %v15669_v59 }
 0x6e2   : > { %v5333_v17 = vadd.f32 %v5332_v19, %v5284_v10  ;;  %v15670_v19 = vld [vmem:[#allocation52_spill] sm:$0xff] }
 0x6e4   : > { %v13072_v16 = vadd.f32 %v5381_v31, %v5333_v17  ;;  %v5334_v47 = vpop.f32.mrf.mxu2  ;;  %v15671_v31 = vld [vmem:[#allocation55_spill] sm:$0xff] }
 0x6e5   : > { %v5236_v43 = vpop.f32.mrf.mxu0  ;;  %v5285_v3 = vpop.f32.mrf.mxu1 }
 0x6e6   : > { %v5237_v56 = vadd.f32 %v5236_v43, %v12943_v12  ;;  %v5383_v42 = vpop.f32.mrf.mxu3 }
 0x6e8   : > { %v5286_v55 = vadd.f32 %v5285_v3, %v5237_v56  ;;  %5532 = vmatmul.bf16.gmra.mxu2 %v12473_v20 }
 0x6ea   : > { %v5335_v33 = vadd.f32 %v5334_v47, %v5286_v55 }
 0x6eb   : > { %5581 = vmatmul.bf16.gmra.mxu3 %v12479_v27 }
 0x6ec   : > { %v13075_v22 = vadd.f32 %v5383_v42, %v5335_v33  ;;  %v5337_v12 = vpop.f32.mrf.mxu2 }
 0x6ed   : > { %v5239_v61 = vpop.f32.mrf.mxu0  ;;  %v5288_v30 = vpop.f32.mrf.mxu1 }
 0x6ee   : > { %v5240_v45 = vadd.f32 %v5239_v61, %v12950_v57  ;;  %v5386_v17 = vpop.f32.mrf.mxu3 }
 0x6f0   : > { %v5289_v10 = vadd.f32 %v5288_v30, %v5240_v45  ;;  %5434 = vmatmul.bf16.gmra.mxu0 %v15670_v19  ;;  %5483 = vmatmul.bf16.gmra.mxu1 %v15671_v31 }
 0x6f2   : > { %v5338_v43 = vadd.f32 %v5337_v12, %v5289_v10  ;;  %v15672_v12 = vld [vmem:[#allocation59_spill] sm:$0xff] }
 0x6f4   : > { %v13082_v3 = vadd.f32 %v5386_v17, %v5338_v43  ;;  %v5339_v33 = vpop.f32.mrf.mxu2  ;;  %v15673_v17 = vld [vmem:[#allocation62_spill] sm:$0xff] }
 0x6f5   : > { %v5241_v42 = vpop.f32.mrf.mxu0  ;;  %v5290_v56 = vpop.f32.mrf.mxu1 }
 0x6f6   : > { %v5242_v55 = vadd.f32 %v5241_v42, %v12953_v23  ;;  %v5388_v20 = vpop.f32.mrf.mxu3 }
 0x6f8   : > { %v5291_v47 = vadd.f32 %v5290_v56, %v5242_v55  ;;  %5537 = vmatmul.bf16.gmra.mxu2 %v12511_v63  ;;  %v8596_v63 = vld [vmem:[#allocation2 + $0x94] sm:$0xf] }
 0x6fa   : > { %v5340_v57 = vadd.f32 %v5339_v33, %v5291_v47  ;;  %v7328_v33 = vld [vmem:[#allocation2 + $0x90] sm:$0xf] }
 0x6fb   : > { %5586 = vmatmul.bf16.gmra.mxu3 %v12517_v35 }
 0x6fc   : > { %v13085_v61 = vadd.f32 %v5388_v20, %v5340_v57  ;;  %v5342_v23 = vpop.f32.mrf.mxu2  ;;  %v8597_v57 = vld [vmem:[#allocation2 + $0x94] sm:$0xf0] }
 0x6fd   : > { %v5244_v45 = vpop.f32.mrf.mxu0  ;;  %v5293_v30 = vpop.f32.mrf.mxu1 }
 0x6fe   : > { %v5245_v27 = vadd.f32 %v5244_v45, %v12960_v5  ;;  %v5391_v43 = vpop.f32.mrf.mxu3  ;;  %v7330_v5 = vld [vmem:[#allocation2 + $0x98] sm:$0xf0] }
 0x700   : > { %v5294_v10 = vadd.f32 %v5293_v30, %v5245_v27  ;;  %5439 = vmatmul.bf16.gmra.mxu0 %v15672_v12  ;;  %5488 = vmatmul.bf16.gmra.mxu1 %v15673_v17  ;;  %v13095_v30 = vor.u32 %v8597_v57, %v7328_v33  ;;  %v13097_v17 = vor.u32 %v8596_v63, %v7330_v5 }
 0x702   : > { %v5343_v42 = vadd.f32 %v5342_v23, %v5294_v10  ;;  %15674 = vst [vmem:[#allocation108_spill] sm:$0xff] %v13095_v30  ;;  %v14779_v33 = vshll.u32 %v13097_v17, 16 }
 0x703   : > { %15675 = vst [vmem:[#allocation157_spill] sm:$0xff] %v13097_v17 }
 0x704   : > { %v13092_v56 = vadd.f32 %v5391_v43, %v5343_v42  ;;  %v5344_v35 = vpop.f32.mrf.mxu2  ;;  %v14776_v42 = vshrl.u32 %v13097_v17, 16 }
 0x705   : > { %v5246_v20 = vpop.f32.mrf.mxu0  ;;  %v5295_v55 = vpop.f32.mrf.mxu1 }
 0x706   : > { %v5247_v47 = vadd.f32 %v5246_v20, %v12963_v2  ;;  %v5393_v27 = vpop.f32.mrf.mxu3  ;;  %v14773_v2 = vshrl.u32 %v13095_v30, 16 }
 0x708   : > { %v5296_v45 = vadd.f32 %v5295_v55, %v5247_v47  ;;  %5542 = vmatmul.bf16.gmra.mxu2 %v15623_v13  ;;  %v14780_v47 = vshll.u32 %v13095_v30, 16 }
 0x70a   : > { %v5345_v60 = vadd.f32 %v5344_v35, %v5296_v45 }
 0x70b   : > { %5591 = vmatmul.bf16.gmra.mxu3 %v12793_v52 }
 0x70c   : > { %v13099_v12 = vadd.f32 %v5393_v27, %v5345_v60  ;;  %v5347_v63 = vpop.f32.mrf.mxu2  ;;  %v697_v60 = vrot.slane %v14773_v2, 7 }
 0x70d   : > { %v5249_v10 = vpop.f32.mrf.mxu0  ;;  %v5298_v23 = vpop.f32.mrf.mxu1 }
 0x70e   : > { %v5250_v43 = vadd.f32 %v5249_v10, %v12976_v37  ;;  %v5396_v35 = vpop.f32.mrf.mxu3  ;;  %v704_v37 = vrot.slane %v14776_v42, 7  ;;  %v700_v10 = vor.u32 %v14780_v47, %v697_v60 }
 0x710   : > { %v5299_v20 = vadd.f32 %v5298_v23, %v5250_v43  ;;  %5444 = vmatmul.bf16.gmra.mxu0 %v12847_v62  ;;  %5493 = vmatmul.bf16.gmra.mxu1 %v12851_v50  ;;  %v707_v23 = vor.u32 %v14779_v33, %v704_v37  ;;  %v749_v42 = vsel %vm9724_vm6, 0, %v700_v10  ;;  %v15680_v33 = vld [vmem:[#allocation23_spill] sm:$0xff] }
 0x711   : > { %v13129_v60 = vsel %vm9764_vm9, 0, %v749_v42 }
 0x712   : > { %v5348_v55 = vadd.f32 %v5347_v63, %v5299_v20  ;;  %15678 = vst [vmem:[#allocation158_spill] sm:$0xff] %v13129_v60 }
 0x714   : > { %v13114_v57 = vadd.f32 %v5396_v35, %v5348_v55  ;;  %v5349_v20 = vpop.f32.mrf.mxu2  ;;  %v750_v35 = vsel %vm9724_vm6, 0, %v707_v23 }
 0x715   : > { %v5251_v5 = vpop.f32.mrf.mxu0  ;;  %v5300_v45 = vpop.f32.mrf.mxu1  ;;  %v13133_v37 = vsel %vm9764_vm9, 0, %v750_v35 }
 0x716   : > { %v5252_v27 = vadd.f32 %v5251_v5, %v12993_v28  ;;  %v5398_v63 = vpop.f32.mrf.mxu3  ;;  %15679 = vst [vmem:[#allocation256_spill] sm:$0xff] %v13133_v37 }
 0x718   : > { %v5301_v43 = vadd.f32 %v5300_v45, %v5252_v27  ;;  %5547 = vmatmul.bf16.gmra.mxu2 %v13095_v30 }
 0x71a   : > { %v5350_v2 = vadd.f32 %v5349_v20, %v5301_v43 }
 0x71b   : > { %5596 = vmatmul.bf16.gmra.mxu3 %v13097_v17 }
 0x71c   : > { %v13125_v55 = vadd.f32 %v5398_v63, %v5350_v2  ;;  %v5352_v2 = vpop.f32.mrf.mxu2 }
 0x71d   : > { %v5254_v62 = vpop.f32.mrf.mxu0  ;;  %v5303_v28 = vpop.f32.mrf.mxu1 }
 0x71e   : > { %v5255_v45 = vadd.f32 %v5254_v62, %v13000_v44  ;;  %v5401_v27 = vpop.f32.mrf.mxu3 }
 0x720   : > { %v5304_v50 = vadd.f32 %v5303_v28, %v5255_v45  ;;  %5449 = vmatmul.bf16.gmra.mxu0 %v13129_v60  ;;  %5498 = vmatmul.bf16.gmra.mxu1 %v13133_v37  ;;  %v15681_v37 = vld [vmem:[#allocation21_spill] sm:$0xff]  ;;  %v15763_v60 = vld [vmem:[#allocation307_spill] sm:$0xff] }
 0x722   : > { %v5353_v10 = vadd.f32 %v5352_v2, %v5304_v50  ;;  %v15682_v50 = vld [vmem:[#allocation252_spill] sm:$0xff]  ;;  %v15683_v2 = vld [vmem:[#allocation254_spill] sm:$0xff] }
 0x724   : > { %v13140_v42 = vadd.f32 %v5401_v27, %v5353_v10  ;;  %v5354_v35 = vpop.f32.mrf.mxu2 }
 0x725   : > { %v5256_v23 = vpop.f32.mrf.mxu0  ;;  %v5305_v43 = vpop.f32.mrf.mxu1 }
 0x726   : > { %v5257_v20 = vadd.f32 %v5256_v23, %v13003_v58  ;;  %v5403_v5 = vpop.f32.mrf.mxu3  ;;  %v15684_v23 = vld [vmem:[#allocation253_spill] sm:$0xff] }
 0x728   : > { %v5306_v63 = vadd.f32 %v5305_v43, %v5257_v20  ;;  %5708 = vmatmul.bf16.vlgmr.msrb.gmra.mxu2 %v15680_v33  ;;  %v15685_v43 = vld [vmem:[#allocation255_spill] sm:$0xff]  ;;  %v15686_v20 = vld [vmem:[#allocation118_spill] sm:$0xff] }
 0x729   : > { %6092 = vmatpush.bf16.msrb.mxu2 %v15682_v50 }
 0x72a   : > { %v5355_v62 = vadd.f32 %v5354_v35, %v5306_v63 }
 0x72b   : > { %5757 = vmatmul.bf16.vlgmr.msrb.gmra.mxu3 %v15681_v37 }
 0x72c   : > { %v13143_v44 = vadd.f32 %v5403_v5, %v5355_v62  ;;  %6141 = vmatpush.bf16.msrb.mxu3 %v15683_v2  ;;  %v5513_v58 = vpop.f32.mrf.mxu2  ;;  %v15689_v5 = vld [vmem:[#allocation260_spill] sm:$0xff] }
 0x72d   : > { %v5415_v28 = vpop.f32.mrf.mxu0  ;;  %v5464_v45 = vpop.f32.mrf.mxu1  ;;  %6093 = vmatpush.bf16.msrb.mxu2 %v15686_v20 }
 0x72e   : > { %v5416_v47 = vadd.f32 %v5415_v28, %v13016_v53  ;;  %v5562_v10 = vpop.f32.mrf.mxu3  ;;  %v15687_v53 = vld [vmem:[#allocation259_spill] sm:$0xff]  ;;  %v15690_v28 = vld [vmem:[#allocation126_spill] sm:$0xff] }
 0x730   : > { %v5465_v27 = vadd.f32 %v5464_v45, %v5416_v47  ;;  %5610 = vmatmul.bf16.vlgmr.msrb.gmra.mxu0 %v12677_v49  ;;  %5659 = vmatmul.bf16.vlgmr.msrb.gmra.mxu1 %v12681_v14  ;;  %v15688_v47 = vld [vmem:[#allocation258_spill] sm:$0xff]  ;;  %v15691_v45 = vld [vmem:[#allocation47_spill] sm:$0xff] }
 0x731   : > { %5994 = vmatpush.bf16.msrb.mxu0 %v15684_v23  ;;  %6043 = vmatpush.bf16.msrb.mxu1 %v15685_v43  ;;  %v15693_v23 = vld [vmem:[#allocation261_spill] sm:$0xff]  ;;  %v15694_v43 = vld [vmem:[#allocation132_spill] sm:$0xff] }
 0x732   : > { %v5514_v33 = vadd.f32 %v5513_v58, %v5465_v27  ;;  %6142 = vmatpush.bf16.msrb.mxu3 %v15687_v53  ;;  %6094 = vmatpush.bf16.msrb.mxu2 %v15690_v28  ;;  %v15692_v58 = vld [vmem:[#allocation43_spill] sm:$0xff]  ;;  %v15700_v28 = vld [vmem:[#allocation69_spill] sm:$0xff] }
 0x734   : > { %v13156_v37 = vadd.f32 %v5562_v10, %v5514_v33  ;;  %v5515_v2 = vpop.f32.mrf.mxu2  ;;  %v15695_v33 = vld [vmem:[#allocation57_spill] sm:$0xff] }
 0x735   : > { %v5417_v63 = vpop.f32.mrf.mxu0  ;;  %v5466_v35 = vpop.f32.mrf.mxu1  ;;  %5995 = vmatpush.bf16.msrb.mxu0 %v15688_v47  ;;  %6044 = vmatpush.bf16.msrb.mxu1 %v15689_v5  ;;  %v15697_v47 = vld [vmem:[#allocation56_spill] sm:$0xff]  ;;  %v15698_v5 = vld [vmem:[#allocation167_spill] sm:$0xff] }
 0x736   : > { %v5418_v62 = vadd.f32 %v5417_v63, %v13027_v36  ;;  %6143 = vmatpush.bf16.msrb.mxu3 %v15691_v45  ;;  %v5564_v27 = vpop.f32.mrf.mxu3  ;;  %6095 = vmatpush.bf16.msrb.mxu2 %v15694_v43  ;;  %v15696_v63 = vld [vmem:[#allocation28_spill] sm:$0xff]  ;;  %v15701_v45 = vld [vmem:[#allocation266_spill] sm:$0xff] }
 0x737   : > { %v15705_v43 = vld [vmem:[#allocation270_spill] sm:$0xff] }
 0x738   : > { %v5467_v50 = vadd.f32 %v5466_v35, %v5418_v62  ;;  %5713 = vmatmul.bf16.gmra.mxu2 %v15696_v63  ;;  %v15699_v62 = vld [vmem:[#allocation263_spill] sm:$0xff] }
 0x739   : > { %5996 = vmatpush.bf16.msrb.mxu0 %v15692_v58  ;;  %6045 = vmatpush.bf16.msrb.mxu1 %v15693_v23  ;;  %v15702_v58 = vld [vmem:[#allocation70_spill] sm:$0xff] }
 0x73a   : > { %v5516_v10 = vadd.f32 %v5515_v2, %v5467_v50  ;;  %6144 = vmatpush.bf16.msrb.mxu3 %v15695_v33  ;;  %6096 = vmatpush.bf16.msrb.mxu2 %v15700_v28  ;;  %v15708_v28 = vld [vmem:[#allocation85_spill] sm:$0xff] }
 0x73b   : > { %5762 = vmatmul.bf16.gmra.mxu3 %v15698_v5 }
 0x73c   : > { %v13167_v20 = vadd.f32 %v5564_v27, %v5516_v10  ;;  %v5518_v2 = vpop.f32.mrf.mxu2  ;;  %v15703_v10 = vld [vmem:[#allocation267_spill] sm:$0xff] }
 0x73d   : > { %v5420_v53 = vpop.f32.mrf.mxu0  ;;  %v5469_v36 = vpop.f32.mrf.mxu1  ;;  %5997 = vmatpush.bf16.msrb.mxu0 %v15697_v47  ;;  %6046 = vmatpush.bf16.msrb.mxu1 %v15699_v62  ;;  %v15707_v62 = vld [vmem:[#allocation271_spill] sm:$0xff] }
 0x73e   : > { %v5421_v35 = vadd.f32 %v5420_v53, %v13042_v18  ;;  %6145 = vmatpush.bf16.msrb.mxu3 %v15701_v45  ;;  %v5567_v27 = vpop.f32.mrf.mxu3  ;;  %v15704_v18 = vld [vmem:[#allocation77_spill] sm:$0xff]  ;;  %v15709_v45 = vld [vmem:[#allocation274_spill] sm:$0xff] }
 0x73f   : > { %6097 = vmatpush.bf16.msrb.mxu2 %v15704_v18 }
 0x740   : > { %v5470_v50 = vadd.f32 %v5469_v36, %v5421_v35  ;;  %5615 = vmatmul.bf16.gmra.mxu0 %v12709_v38  ;;  %5664 = vmatmul.bf16.gmra.mxu1 %v12713_v6  ;;  %v15706_v36 = vld [vmem:[#allocation78_spill] sm:$0xff] }
 0x741   : > { %5998 = vmatpush.bf16.msrb.mxu0 %v15702_v58  ;;  %6047 = vmatpush.bf16.msrb.mxu1 %v15703_v10  ;;  %v15710_v10 = vld [vmem:[#allocation86_spill] sm:$0xff] }
 0x742   : > { %v5519_v23 = vadd.f32 %v5518_v2, %v5470_v50  ;;  %6146 = vmatpush.bf16.msrb.mxu3 %v15705_v43  ;;  %v15713_v43 = vld [vmem:[#allocation278_spill] sm:$0xff] }
 0x743   : > { %6098 = vmatpush.bf16.msrb.mxu2 %v15708_v28 }
 0x744   : > { %v13182_v33 = vadd.f32 %v5567_v27, %v5519_v23  ;;  %v5520_v2 = vpop.f32.mrf.mxu2  ;;  %v15711_v27 = vld [vmem:[#allocation275_spill] sm:$0xff]  ;;  %v15712_v23 = vld [vmem:[#allocation93_spill] sm:$0xff] }
 0x745   : > { %v5422_v53 = vpop.f32.mrf.mxu0  ;;  %v5471_v47 = vpop.f32.mrf.mxu1  ;;  %5999 = vmatpush.bf16.msrb.mxu0 %v15706_v36  ;;  %6048 = vmatpush.bf16.msrb.mxu1 %v15707_v62  ;;  %v15714_v62 = vld [vmem:[#allocation94_spill] sm:$0xff] }
 0x746   : > { %v5423_v35 = vadd.f32 %v5422_v53, %v13053_v8  ;;  %6147 = vmatpush.bf16.msrb.mxu3 %v15709_v45  ;;  %v5569_v58 = vpop.f32.mrf.mxu3 }
 0x747   : > { %6099 = vmatpush.bf16.msrb.mxu2 %v15712_v23 }
 0x748   : > { %v5472_v50 = vadd.f32 %v5471_v47, %v5423_v35  ;;  %5718 = vmatmul.bf16.gmra.mxu2 %v15632_v0  ;;  %v15715_v35 = vld [vmem:[#allocation279_spill] sm:$0xff] }
 0x749   : > { %6000 = vmatpush.bf16.msrb.mxu0 %v15710_v10  ;;  %6049 = vmatpush.bf16.msrb.mxu1 %v15711_v27 }
 0x74a   : > { %v5521_v18 = vadd.f32 %v5520_v2, %v5472_v50  ;;  %6148 = vmatpush.bf16.msrb.mxu3 %v15713_v43 }
 0x74b   : > { %5767 = vmatmul.bf16.gmra.mxu3 %v15633_v1 }
 0x74c   : > { %v13193_v36 = vadd.f32 %v5569_v58, %v5521_v18  ;;  %v5523_v45 = vpop.f32.mrf.mxu2 }
 0x74d   : > { %v5425_v8 = vpop.f32.mrf.mxu0  ;;  %v5474_v53 = vpop.f32.mrf.mxu1  ;;  %6001 = vmatpush.bf16.msrb.mxu0 %v15714_v62  ;;  %6050 = vmatpush.bf16.msrb.mxu1 %v15715_v35 }
 0x74e   : > { %v5426_v47 = vadd.f32 %v5425_v8, %v13062_v41  ;;  %v5572_v50 = vpop.f32.mrf.mxu3 }
 0x750   : > { %v5475_v28 = vadd.f32 %v5474_v53, %v5426_v47  ;;  %5620 = vmatmul.bf16.gmra.mxu0 %v12739_v46  ;;  %5669 = vmatmul.bf16.gmra.mxu1 %v12743_v24 }
 0x752   : > { %v5524_v2 = vadd.f32 %v5523_v45, %v5475_v28 }
 0x754   : > { %v13202_v58 = vadd.f32 %v5572_v50, %v5524_v2  ;;  %v5525_v41 = vpop.f32.mrf.mxu2 }
 0x755   : > { %v5427_v10 = vpop.f32.mrf.mxu0  ;;  %v5476_v18 = vpop.f32.mrf.mxu1 }
 0x756   : > { %v5428_v27 = vadd.f32 %v5427_v10, %v13065_v26  ;;  %v5574_v43 = vpop.f32.mrf.mxu3 }
 0x758   : > { %v5477_v23 = vadd.f32 %v5476_v18, %v5428_v27  ;;  %5723 = vmatmul.bf16.gmra.mxu2 %v15650_v21 }
 0x75a   : > { %v5526_v8 = vadd.f32 %v5525_v41, %v5477_v23 }
 0x75b   : > { %5772 = vmatmul.bf16.gmra.mxu3 %v15651_v7 }
 0x75c   : > { %v13205_v62 = vadd.f32 %v5574_v43, %v5526_v8  ;;  %v5528_v26 = vpop.f32.mrf.mxu2 }
 0x75d   : > { %v5430_v53 = vpop.f32.mrf.mxu0  ;;  %v5479_v47 = vpop.f32.mrf.mxu1 }
 0x75e   : > { %v5431_v35 = vadd.f32 %v5430_v53, %v13072_v16  ;;  %v5577_v45 = vpop.f32.mrf.mxu3 }
 0x760   : > { %v5480_v28 = vadd.f32 %v5479_v47, %v5431_v35  ;;  %5625 = vmatmul.bf16.gmra.mxu0 %v12769_v25  ;;  %5674 = vmatmul.bf16.gmra.mxu1 %v12773_v11 }
 0x762   : > { %v5529_v50 = vadd.f32 %v5528_v26, %v5480_v28 }
 0x764   : > { %v13212_v2 = vadd.f32 %v5577_v45, %v5529_v50  ;;  %v5530_v41 = vpop.f32.mrf.mxu2 }
 0x765   : > { %v5432_v10 = vpop.f32.mrf.mxu0  ;;  %v5481_v18 = vpop.f32.mrf.mxu1 }
 0x766   : > { %v5433_v27 = vadd.f32 %v5432_v10, %v13075_v22  ;;  %v5579_v43 = vpop.f32.mrf.mxu3 }
 0x768   : > { %v5482_v23 = vadd.f32 %v5481_v18, %v5433_v27  ;;  %5728 = vmatmul.bf16.gmra.mxu2 %v15666_v54 }
 0x76a   : > { %v5531_v16 = vadd.f32 %v5530_v41, %v5482_v23 }
 0x76b   : > { %5777 = vmatmul.bf16.gmra.mxu3 %v15667_v32 }
 0x76c   : > { %v13215_v8 = vadd.f32 %v5579_v43, %v5531_v16  ;;  %v5533_v22 = vpop.f32.mrf.mxu2 }
 0x76d   : > { %v5435_v53 = vpop.f32.mrf.mxu0  ;;  %v5484_v47 = vpop.f32.mrf.mxu1 }
 0x76e   : > { %v5436_v35 = vadd.f32 %v5435_v53, %v13082_v3  ;;  %v5582_v26 = vpop.f32.mrf.mxu3 }
 0x770   : > { %v5485_v28 = vadd.f32 %v5484_v47, %v5436_v35  ;;  %5630 = vmatmul.bf16.gmra.mxu0 %v12805_v29  ;;  %5679 = vmatmul.bf16.gmra.mxu1 %v12809_v51 }
 0x772   : > { %v5534_v45 = vadd.f32 %v5533_v22, %v5485_v28 }
 0x774   : > { %v13222_v50 = vadd.f32 %v5582_v26, %v5534_v45  ;;  %v5535_v41 = vpop.f32.mrf.mxu2 }
 0x775   : > { %v5437_v10 = vpop.f32.mrf.mxu0  ;;  %v5486_v18 = vpop.f32.mrf.mxu1 }
 0x776   : > { %v5438_v27 = vadd.f32 %v5437_v10, %v13085_v61  ;;  %v5584_v43 = vpop.f32.mrf.mxu3 }
 0x778   : > { %v5487_v23 = vadd.f32 %v5486_v18, %v5438_v27  ;;  %5733 = vmatmul.bf16.gmra.mxu2 %v15668_v39 }
 0x77a   : > { %v5536_v3 = vadd.f32 %v5535_v41, %v5487_v23 }
 0x77b   : > { %5782 = vmatmul.bf16.gmra.mxu3 %v15669_v59 }
 0x77c   : > { %v13225_v16 = vadd.f32 %v5584_v43, %v5536_v3  ;;  %v5538_v61 = vpop.f32.mrf.mxu2 }
 0x77d   : > { %v5440_v53 = vpop.f32.mrf.mxu0  ;;  %v5489_v47 = vpop.f32.mrf.mxu1 }
 0x77e   : > { %v5441_v35 = vadd.f32 %v5440_v53, %v13092_v56  ;;  %v5587_v22 = vpop.f32.mrf.mxu3 }
 0x780   : > { %v5490_v28 = vadd.f32 %v5489_v47, %v5441_v35  ;;  %5635 = vmatmul.bf16.gmra.mxu0 %v12857_v9  ;;  %5684 = vmatmul.bf16.gmra.mxu1 %v12861_v40 }
 0x782   : > { %v5539_v26 = vadd.f32 %v5538_v61, %v5490_v28 }
 0x784   : > { %v13232_v45 = vadd.f32 %v5587_v22, %v5539_v26  ;;  %v5540_v41 = vpop.f32.mrf.mxu2  ;;  %v15716_v26 = vshll.u32 %v13095_v30, 16 }
 0x785   : > { %v5442_v10 = vpop.f32.mrf.mxu0  ;;  %v5491_v18 = vpop.f32.mrf.mxu1 }
 0x786   : > { %v5443_v27 = vadd.f32 %v5442_v10, %v13099_v12  ;;  %v5589_v43 = vpop.f32.mrf.mxu3  ;;  %v823_v10 = vrot.slane %v15716_v26, 1 }
 0x788   : > { %v5492_v23 = vadd.f32 %v5491_v18, %v5443_v27  ;;  %5738 = vmatmul.bf16.gmra.mxu2 %v15670_v19  ;;  %v15717_v18 = vshll.u32 %v13097_v17, 16 }
 0x78a   : > { %v5541_v56 = vadd.f32 %v5540_v41, %v5492_v23  ;;  %v825_v27 = vrot.slane %v15717_v18, 1 }
 0x78b   : > { %5787 = vmatmul.bf16.gmra.mxu3 %v15671_v31 }
 0x78c   : > { %v13235_v3 = vadd.f32 %v5589_v43, %v5541_v56  ;;  %v5543_v12 = vpop.f32.mrf.mxu2  ;;  %v15718_v56 = vshrl.u32 %v13095_v30, 16 }
 0x78d   : > { %v5445_v53 = vpop.f32.mrf.mxu0  ;;  %v5494_v47 = vpop.f32.mrf.mxu1 }
 0x78e   : > { %v5446_v35 = vadd.f32 %v5445_v53, %v13114_v57  ;;  %v5592_v61 = vpop.f32.mrf.mxu3  ;;  %v824_v53 = vor.u32 %v823_v10, %v15718_v56 }
 0x790   : > { %v5495_v28 = vadd.f32 %v5494_v47, %v5446_v35  ;;  %5640 = vmatmul.bf16.gmra.mxu0 %v12987_v15  ;;  %5689 = vmatmul.bf16.gmra.mxu1 %v12991_v34  ;;  %v15719_v47 = vshrl.u32 %v13097_v17, 16  ;;  %v868_v26 = vsel %vm10179_vm0, %v824_v53, 0 }
 0x791   : > { %v13261_v10 = vsel %vm10185_vm3, 0, %v868_v26 }
 0x792   : > { %v5544_v22 = vadd.f32 %v5543_v12, %v5495_v28  ;;  %v826_v35 = vor.u32 %v825_v27, %v15719_v47  ;;  %15720 = vst [vmem:[#allocation257_spill] sm:$0xff] %v13261_v10 }
 0x794   : > { %v13246_v23 = vadd.f32 %v5592_v61, %v5544_v22  ;;  %v5545_v28 = vpop.f32.mrf.mxu2  ;;  %v869_v61 = vsel %vm10179_vm0, %v826_v35, 0 }
 0x795   : > { %v5447_v41 = vpop.f32.mrf.mxu0  ;;  %v5496_v57 = vpop.f32.mrf.mxu1  ;;  %v13265_v27 = vsel %vm10185_vm3, 0, %v869_v61 }
 0x796   : > { %v5448_v43 = vadd.f32 %v5447_v41, %v13125_v55  ;;  %v5594_v12 = vpop.f32.mrf.mxu3  ;;  %15721 = vst [vmem:[#allocation220_spill] sm:$0xff] %v13265_v27 }
 0x798   : > { %v5497_v34 = vadd.f32 %v5496_v57, %v5448_v43  ;;  %v15723_v57 = vld [vmem:[#allocation62_spill] sm:$0xff] }
 0x79a   : > { %v5546_v15 = vadd.f32 %v5545_v28, %v5497_v34  ;;  %v15722_v34 = vld [vmem:[#allocation59_spill] sm:$0xff] }
 0x79b   : > { %5743 = vmatmul.bf16.gmra.mxu2 %v15722_v34  ;;  %5792 = vmatmul.bf16.gmra.mxu3 %v15723_v57 }
 0x79c   : > { %v13257_v22 = vadd.f32 %v5594_v12, %v5546_v15  ;;  %v5548_v15 = vpop.f32.mrf.mxu2 }
 0x79d   : > { %v5450_v18 = vpop.f32.mrf.mxu0  ;;  %v5499_v55 = vpop.f32.mrf.mxu1 }
 0x79e   : > { %v5451_v41 = vadd.f32 %v5450_v18, %v13140_v42  ;;  %v5597_v43 = vpop.f32.mrf.mxu3 }
 0x7a0   : > { %v5500_v4 = vadd.f32 %v5499_v55, %v5451_v41  ;;  %5645 = vmatmul.bf16.gmra.mxu0 %v13261_v10  ;;  %5694 = vmatmul.bf16.gmra.mxu1 %v13265_v27  ;;  %v15724_v41 = vld [vmem:[#allocation66_spill] sm:$0xff] }
 0x7a1   : > { %v15760_v10 = vld [vmem:[#allocation302_spill] sm:$0xff] }
 0x7a2   : > { %v5549_v56 = vadd.f32 %v5548_v15, %v5500_v4  ;;  %v15725_v4 = vld [vmem:[#allocation68_spill] sm:$0xff]  ;;  %v15726_v15 = vld [vmem:[#allocation101_spill] sm:$0xff] }
 0x7a4   : > { %v13272_v53 = vadd.f32 %v5597_v43, %v5549_v56  ;;  %v5550_v12 = vpop.f32.mrf.mxu2  ;;  %v13282_v43 = vstv %s6582_s22 }
 0x7a5   : > { %v5452_v47 = vpop.f32.mrf.mxu0  ;;  %v5501_v48 = vpop.f32.mrf.mxu1 }
 0x7a6   : > { %v5453_v35 = vadd.f32 %v5452_v47, %v13143_v44  ;;  %v5599_v42 = vpop.f32.mrf.mxu3  ;;  %v15727_v44 = vld [vmem:[#allocation282_spill] sm:$0xff]  ;;  %v15728_v47 = vld [vmem:[#allocation19_spill] sm:$0xff] }
 0x7a8   : > { %v5502_v28 = vadd.f32 %v5501_v48, %v5453_v35  ;;  %v15729_v48 = vld [vmem:[#allocation17_spill] sm:$0xff] }
 0x7aa   : > { %v5551_v26 = vadd.f32 %v5550_v12, %v5502_v28  ;;  %v15730_v28 = vld [vmem:[#allocation24_spill] sm:$0xff] }
 0x7ab   : > { %5904 = vmatmul.bf16.vlgmr.msra.gmra.mxu2 %v15724_v41  ;;  %5953 = vmatmul.bf16.vlgmr.msra.gmra.mxu3 %v15725_v4  ;;  %v15733_v41 = vld [vmem:[#allocation109_spill] sm:$0xff] }
 0x7ac   : > { %v13276_v61 = vadd.f32 %v5599_v42, %v5551_v26  ;;  %6288 = vmatpush.bf16.msra.mxu2 %v15726_v15  ;;  %6337 = vmatpush.bf16.msra.mxu3 %v15727_v44  ;;  %v5709_v35 = vpop.f32.mrf.mxu2  ;;  %v15731_v26 = vld [vmem:[#allocation102_spill] sm:$0xff] }
 0x7ad   : > { %v5611_v18 = vpop.f32.mrf.mxu0  ;;  %v5660_v55 = vpop.f32.mrf.mxu1  ;;  %v5710_v12 = vadd.f32 %v5709_v35, %v15730_v28  ;;  %v15738_v28 = vld [vmem:[#allocation289_spill] sm:$0xff] }
 0x7ae   : > { %v5612_v17 = vadd.f32 %v5611_v18, %v13156_v37  ;;  %v5758_v42 = vpop.f32.mrf.mxu3  ;;  %v15732_v37 = vld [vmem:[#allocation283_spill] sm:$0xff] }
 0x7af   : > { %v13292_v4 = vadd.f32 %v5758_v42, %v5710_v12  ;;  %v15740_v12 = vld [vmem:[#allocation27_spill] sm:$0xff] }
 0x7b0   : > { %v5661_v56 = vadd.f32 %v5660_v55, %v5612_v17  ;;  %5806 = vmatmul.bf16.vlgmr.msra.gmra.mxu0 %v15728_v47  ;;  %5855 = vmatmul.bf16.vlgmr.msra.gmra.mxu1 %v15729_v48  ;;  %v15734_v17 = vld [vmem:[#allocation286_spill] sm:$0xff]  ;;  %v15737_v48 = vld [vmem:[#allocation287_spill] sm:$0xff] }
 0x7b1   : > { %6190 = vmatpush.bf16.msra.mxu0 %v15731_v26  ;;  %6239 = vmatpush.bf16.msra.mxu1 %v15732_v37  ;;  %v15736_v47 = vld [vmem:[#allocation110_spill] sm:$0xff]  ;;  %v15739_v26 = vld [vmem:[#allocation291_spill] sm:$0xff] }
 0x7b2   : > { %vm6583_vm4 = vcmp.ge.f32.partialorder %v5661_v56, 0.0  ;;  %v6616_v18 = vmul.f32 %v13282_v43, %v5661_v56  ;;  %6289 = vmatpush.bf16.msra.mxu2 %v15733_v41  ;;  %6338 = vmatpush.bf16.msra.mxu3 %v15734_v17  ;;  %v15741_v17 = vld [vmem:[#allocation290_spill] sm:$0xff] }
 0x7b4   : > { %v13295_v55 = vsel %vm6583_vm4, %v5661_v56, %v6616_v18  ;;  %v5711_v41 = vpop.f32.mrf.mxu2  ;;  %v15742_v56 = vld [vmem:[#allocation292_spill] sm:$0xff] }
 0x7b5   : > { %15735 = vst [vmem:[#allocation221_spill] sm:$0xff] %v13295_v55  ;;  %v5613_v15 = vpop.f32.mrf.mxu0  ;;  %v5662_v44 = vpop.f32.mrf.mxu1  ;;  %6191 = vmatpush.bf16.msra.mxu0 %v15736_v47  ;;  %6240 = vmatpush.bf16.msra.mxu1 %v15737_v48  ;;  %v5712_v42 = vadd.f32 %v5711_v41, %v15740_v12  ;;  %v15743_v47 = vld [vmem:[#allocation293_spill] sm:$0xff]  ;;  %v15748_v12 = vld [vmem:[#allocation75_spill] sm:$0xff] }
 0x7b6   : > { %v5614_v35 = vadd.f32 %v5613_v15, %v13167_v20  ;;  %6290 = vmatpush.bf16.msra.mxu2 %v15738_v28  ;;  %6339 = vmatpush.bf16.msra.mxu3 %v15739_v26  ;;  %v5760_v30 = vpop.f32.mrf.mxu3  ;;  %v15744_v20 = vld [vmem:[#allocation295_spill] sm:$0xff]  ;;  %v15746_v28 = vld [vmem:[#allocation73_spill] sm:$0xff]  ;;  %v15747_v26 = vld [vmem:[#allocation294_spill] sm:$0xff] }
 0x7b7   : > { %v13307_v48 = vadd.f32 %v5760_v30, %v5712_v42  ;;  %v15751_v30 = vld [vmem:[#allocation299_spill] sm:$0xff] }
 0x7b8   : > { %v5663_v37 = vadd.f32 %v5662_v44, %v5614_v35 }
 0x7b9   : > { %6192 = vmatpush.bf16.msra.mxu0 %v15741_v17  ;;  %6241 = vmatpush.bf16.msra.mxu1 %v15742_v56  ;;  %v15749_v17 = vld [vmem:[#allocation296_spill] sm:$0xff]  ;;  %v15750_v56 = vld [vmem:[#allocation297_spill] sm:$0xff] }
 0x7ba   : > { %vm6585_vm5 = vcmp.ge.f32.partialorder %v5663_v37, 0.0  ;;  %v6618_v18 = vmul.f32 %v13282_v43, %v5663_v37  ;;  %6291 = vmatpush.bf16.msra.mxu2 %v15743_v47  ;;  %6340 = vmatpush.bf16.msra.mxu3 %v15744_v20  ;;  %v15752_v47 = vld [vmem:[#allocation20_spill] sm:$0xff] }
 0x7bb   : > { %5909 = vmatmul.bf16.gmra.mxu2 %v15746_v28  ;;  %5958 = vmatmul.bf16.gmra.mxu3 %v15748_v12  ;;  %v15754_v20 = vld [vmem:[#allocation168_spill] sm:$0xff] }
 0x7bc   : > { %v13310_v15 = vsel %vm6585_vm5, %v5663_v37, %v6618_v18  ;;  %v15753_v37 = vld [vmem:[#allocation18_spill] sm:$0xff]  ;;  %v5714_v18 = vpop.f32.mrf.mxu2 }
 0x7bd   : > { %15745 = vst [vmem:[#allocation113_spill] sm:$0xff] %v13310_v15  ;;  %v5616_v44 = vpop.f32.mrf.mxu0  ;;  %v5665_v35 = vpop.f32.mrf.mxu1  ;;  %6193 = vmatpush.bf16.msra.mxu0 %v15747_v26  ;;  %6242 = vmatpush.bf16.msra.mxu1 %v15749_v17  ;;  %v5715_v15 = vadd.f32 %v5714_v18, %v15754_v20  ;;  %v15755_v26 = vld [vmem:[#allocation298_spill] sm:$0xff]  ;;  %v15761_v20 = vld [vmem:[#allocation304_spill] sm:$0xff] }
 0x7be   : > { %v5617_v41 = vadd.f32 %v5616_v44, %v13182_v33  ;;  %6292 = vmatpush.bf16.msra.mxu2 %v15750_v56  ;;  %6341 = vmatpush.bf16.msra.mxu3 %v15751_v30  ;;  %v5763_v55 = vpop.f32.mrf.mxu3  ;;  %v15756_v44 = vld [vmem:[#allocation300_spill] sm:$0xff]  ;;  %v15757_v56 = vld [vmem:[#allocation301_spill] sm:$0xff] }
 0x7bf   : > { %v13325_v17 = vadd.f32 %v5763_v55, %v5715_v15 }
 0x7c0   : > { %v5666_v42 = vadd.f32 %v5665_v35, %v5617_v41  ;;  %5811 = vmatmul.bf16.gmra.mxu0 %v15752_v47  ;;  %5860 = vmatmul.bf16.gmra.mxu1 %v15753_v37  ;;  %v15758_v35 = vld [vmem:[#allocation303_spill] sm:$0xff] }
 0x7c1   : > { %6194 = vmatpush.bf16.msra.mxu0 %v15755_v26  ;;  %6243 = vmatpush.bf16.msra.mxu1 %v15756_v44  ;;  %v15762_v26 = vld [vmem:[#allocation305_spill] sm:$0xff]  ;;  %v15764_v44 = vld [vmem:[#allocation31_spill] sm:$0xff] }
 0x7c2   : > { %vm6587_vm6 = vcmp.ge.f32.partialorder %v5666_v42, 0.0  ;;  %v6620_v33 = vmul.f32 %v13282_v43, %v5666_v42  ;;  %6293 = vmatpush.bf16.msra.mxu2 %v15757_v56  ;;  %6342 = vmatpush.bf16.msra.mxu3 %v15758_v35  ;;  %v15765_v35 = vld [vmem:[#allocation306_spill] sm:$0xff] }
 0x7c4   : > { %v13329_v41 = vsel %vm6587_vm6, %v5666_v42, %v6620_v33  ;;  %v5716_v15 = vpop.f32.mrf.mxu2  ;;  %v15766_v33 = vld [vmem:[#allocation308_spill] sm:$0xff] }
 0x7c5   : > { %15759 = vst [vmem:[#allocation115_spill] sm:$0xff] %v13329_v41  ;;  %v5618_v30 = vpop.f32.mrf.mxu0  ;;  %v5667_v27 = vpop.f32.mrf.mxu1  ;;  %6195 = vmatpush.bf16.msra.mxu0 %v15760_v10  ;;  %6244 = vmatpush.bf16.msra.mxu1 %v15761_v20  ;;  %v5717_v56 = vadd.f32 %v5716_v15, %v15764_v44  ;;  %v15771_v15 = vld [vmem:[#allocation312_spill] sm:$0xff]  ;;  %v15772_v44 = vld [vmem:[#allocation22_spill] sm:$0xff] }
 0x7c6   : > { %v5619_v18 = vadd.f32 %v5618_v30, %v13193_v36  ;;  %6294 = vmatpush.bf16.msra.mxu2 %v15762_v26  ;;  %6343 = vmatpush.bf16.msra.mxu3 %v15763_v60  ;;  %v5765_v12 = vpop.f32.mrf.mxu3  ;;  %v15767_v36 = vld [vmem:[#allocation309_spill] sm:$0xff]  ;;  %v15768_v30 = vld [vmem:[#allocation311_spill] sm:$0xff] }
 0x7c7   : > { %v13340_v10 = vadd.f32 %v5765_v12, %v5717_v56  ;;  %v15773_v56 = vld [vmem:[#allocation25_spill] sm:$0xff] }
 0x7c8   : > { %v5668_v55 = vadd.f32 %v5667_v27, %v5619_v18  ;;  %v15770_v18 = vld [vmem:[#allocation310_spill] sm:$0xff] }
 0x7c9   : > { %6196 = vmatpush.bf16.msra.mxu0 %v15765_v35  ;;  %6245 = vmatpush.bf16.msra.mxu1 %v15766_v33 }
 0x7ca   : > { %vm6589_vm7 = vcmp.ge.f32.partialorder %v5668_v55, 0.0  ;;  %v6622_v42 = vmul.f32 %v13282_v43, %v5668_v55  ;;  %6295 = vmatpush.bf16.msra.mxu2 %v15767_v36  ;;  %6344 = vmatpush.bf16.msra.mxu3 %v15768_v30 }
 0x7cb   : > { %5914 = vmatmul.bf16.gmra.mxu2 %v12677_v49  ;;  %5963 = vmatmul.bf16.gmra.mxu3 %v12681_v14 }
 0x7cc   : > { %v13344_v20 = vsel %vm6589_vm7, %v5668_v55, %v6622_v42  ;;  %v5719_v35 = vpop.f32.mrf.mxu2  ;;  %v15774_v55 = vld [vmem:[#allocation33_spill] sm:$0xff] }
 0x7cd   : > { %15769 = vst [vmem:[#allocation114_spill] sm:$0xff] %v13344_v20  ;;  %v5621_v60 = vpop.f32.mrf.mxu0  ;;  %v5670_v27 = vpop.f32.mrf.mxu1  ;;  %6197 = vmatpush.bf16.msra.mxu0 %v15770_v18  ;;  %6246 = vmatpush.bf16.msra.mxu1 %v15771_v15  ;;  %v5720_v42 = vadd.f32 %v5719_v35, %v15774_v55  ;;  %v15776_v20 = vld [vmem:[#allocation34_spill] sm:$0xff] }
 0x7ce   : > { %v5622_v26 = vadd.f32 %v5621_v60, %v13202_v58  ;;  %v5768_v33 = vpop.f32.mrf.mxu3 }
 0x7cf   : > { %v13355_v30 = vadd.f32 %v5768_v33, %v5720_v42 }
 0x7d0   : > { %v5671_v12 = vadd.f32 %v5670_v27, %v5622_v26  ;;  %5816 = vmatmul.bf16.gmra.mxu0 %v15772_v44  ;;  %5865 = vmatmul.bf16.gmra.mxu1 %v15773_v56 }
 0x7d2   : > { %vm6591_vm8 = vcmp.ge.f32.partialorder %v5671_v12, 0.0  ;;  %v6624_v36 = vmul.f32 %v13282_v43, %v5671_v12 }
 0x7d4   : > { %v13357_v18 = vsel %vm6591_vm8, %v5671_v12, %v6624_v36  ;;  %v5721_v26 = vpop.f32.mrf.mxu2  ;;  %v15778_v36 = vld [vmem:[#allocation26_spill] sm:$0xff] }
 0x7d5   : > { %15775 = vst [vmem:[#allocation116_spill] sm:$0xff] %v13357_v18  ;;  %v5623_v58 = vpop.f32.mrf.mxu0  ;;  %v5672_v60 = vpop.f32.mrf.mxu1  ;;  %v5722_v41 = vadd.f32 %v5721_v26, %v15776_v20  ;;  %v15779_v20 = vld [vmem:[#allocation29_spill] sm:$0xff] }
 0x7d6   : > { %v5624_v15 = vadd.f32 %v5623_v58, %v13205_v62  ;;  %v5770_v14 = vpop.f32.mrf.mxu3 }
 0x7d7   : > { %v13362_v55 = vadd.f32 %v5770_v14, %v5722_v41 }
 0x7d8   : > { %v5673_v27 = vadd.f32 %v5672_v60, %v5624_v15  ;;  %v15780_v60 = vld [vmem:[#allocation40_spill] sm:$0xff] }
 0x7da   : > { %vm6593_vm9 = vcmp.ge.f32.partialorder %v5673_v27, 0.0  ;;  %v6626_v35 = vmul.f32 %v13282_v43, %v5673_v27 }
 0x7db   : > { %5919 = vmatmul.bf16.gmra.mxu2 %v12709_v38  ;;  %5968 = vmatmul.bf16.gmra.mxu3 %v12713_v6 }
 0x7dc   : > { %v13364_v49 = vsel %vm6593_vm9, %v5673_v27, %v6626_v35  ;;  %v5724_v58 = vpop.f32.mrf.mxu2 }
 0x7dd   : > { %15777 = vst [vmem:[#allocation119_spill] sm:$0xff] %v13364_v49  ;;  %v5626_v42 = vpop.f32.mrf.mxu0  ;;  %v5675_v33 = vpop.f32.mrf.mxu1  ;;  %v5725_v15 = vadd.f32 %v5724_v58, %v15780_v60  ;;  %v15782_v49 = vld [vmem:[#allocation227_spill] sm:$0xff] }
 0x7de   : > { %v5627_v12 = vadd.f32 %v5626_v42, %v13212_v2  ;;  %v5773_v14 = vpop.f32.mrf.mxu3 }
 0x7df   : > { %v13373_v27 = vadd.f32 %v5773_v14, %v5725_v15 }
 0x7e0   : > { %v5676_v62 = vadd.f32 %v5675_v33, %v5627_v12  ;;  %5821 = vmatmul.bf16.gmra.mxu0 %v15778_v36  ;;  %5870 = vmatmul.bf16.gmra.mxu1 %v15779_v20 }
 0x7e2   : > { %vm6595_vm10 = vcmp.ge.f32.partialorder %v5676_v62, 0.0  ;;  %v6628_v41 = vmul.f32 %v13282_v43, %v5676_v62 }
 0x7e4   : > { %v13375_v26 = vsel %vm6595_vm10, %v5676_v62, %v6628_v41  ;;  %v5726_v12 = vpop.f32.mrf.mxu2  ;;  %v15784_v41 = vld [vmem:[#allocation35_spill] sm:$0xff] }
 0x7e5   : > { %15781 = vst [vmem:[#allocation121_spill] sm:$0xff] %v13375_v26  ;;  %v5628_v35 = vpop.f32.mrf.mxu0  ;;  %v5677_v2 = vpop.f32.mrf.mxu1  ;;  %v5727_v18 = vadd.f32 %v5726_v12, %v15782_v49  ;;  %v15785_v49 = vld [vmem:[#allocation36_spill] sm:$0xff] }
 0x7e6   : > { %v5629_v42 = vadd.f32 %v5628_v35, %v13215_v8  ;;  %v5775_v6 = vpop.f32.mrf.mxu3 }
 0x7e7   : > { %v13380_v60 = vadd.f32 %v5775_v6, %v5727_v18 }
 0x7e8   : > { %v5678_v33 = vadd.f32 %v5677_v2, %v5629_v42  ;;  %v15786_v2 = vld [vmem:[#allocation45_spill] sm:$0xff] }
 0x7ea   : > { %vm6597_vm11 = vcmp.ge.f32.partialorder %v5678_v33, 0.0  ;;  %v6630_v58 = vmul.f32 %v13282_v43, %v5678_v33 }
 0x7eb   : > { %5924 = vmatmul.bf16.gmra.mxu2 %v12739_v46  ;;  %5973 = vmatmul.bf16.gmra.mxu3 %v12743_v24 }
 0x7ec   : > { %v13382_v38 = vsel %vm6597_vm11, %v5678_v33, %v6630_v58  ;;  %v5729_v35 = vpop.f32.mrf.mxu2 }
 0x7ed   : > { %15783 = vst [vmem:[#allocation120_spill] sm:$0xff] %v13382_v38  ;;  %v5631_v15 = vpop.f32.mrf.mxu0  ;;  %v5680_v14 = vpop.f32.mrf.mxu1  ;;  %v5730_v42 = vadd.f32 %v5729_v35, %v15786_v2  ;;  %v15788_v38 = vld [vmem:[#allocation42_spill] sm:$0xff] }
 0x7ee   : > { %v5632_v62 = vadd.f32 %v5631_v15, %v13222_v50  ;;  %v5778_v6 = vpop.f32.mrf.mxu3 }
 0x7ef   : > { %v13391_v33 = vadd.f32 %v5778_v6, %v5730_v42 }
 0x7f0   : > { %v5681_v8 = vadd.f32 %v5680_v14, %v5632_v62  ;;  %5826 = vmatmul.bf16.gmra.mxu0 %v15784_v41  ;;  %5875 = vmatmul.bf16.gmra.mxu1 %v15785_v49 }
 0x7f2   : > { %vm6599_vm12 = vcmp.ge.f32.partialorder %v5681_v8, 0.0  ;;  %v6632_v18 = vmul.f32 %v13282_v43, %v5681_v8 }
 0x7f4   : > { %v13393_v12 = vsel %vm6599_vm12, %v5681_v8, %v6632_v18  ;;  %v5731_v62 = vpop.f32.mrf.mxu2  ;;  %v15790_v18 = vld [vmem:[#allocation226_spill] sm:$0xff] }
 0x7f5   : > { %15787 = vst [vmem:[#allocation122_spill] sm:$0xff] %v13393_v12  ;;  %v5633_v58 = vpop.f32.mrf.mxu0  ;;  %v5682_v50 = vpop.f32.mrf.mxu1  ;;  %v5732_v26 = vadd.f32 %v5731_v62, %v15788_v38  ;;  %v15791_v38 = vld [vmem:[#allocation38_spill] sm:$0xff] }
 0x7f6   : > { %v5634_v15 = vadd.f32 %v5633_v58, %v13225_v16  ;;  %v5780_v24 = vpop.f32.mrf.mxu3 }
 0x7f7   : > { %v13398_v2 = vadd.f32 %v5780_v24, %v5732_v26 }
 0x7f8   : > { %v5683_v14 = vadd.f32 %v5682_v50, %v5634_v15  ;;  %v15792_v50 = vld [vmem:[#allocation50_spill] sm:$0xff] }
 0x7fa   : > { %vm6601_vm13 = vcmp.ge.f32.partialorder %v5683_v14, 0.0  ;;  %v6634_v35 = vmul.f32 %v13282_v43, %v5683_v14 }
 0x7fb   : > { %5929 = vmatmul.bf16.gmra.mxu2 %v12769_v25  ;;  %5978 = vmatmul.bf16.gmra.mxu3 %v12773_v11 }
 0x7fc   : > { %v13400_v46 = vsel %vm6601_vm13, %v5683_v14, %v6634_v35  ;;  %v5734_v58 = vpop.f32.mrf.mxu2 }
 0x7fd   : > { %15789 = vst [vmem:[#allocation127_spill] sm:$0xff] %v13400_v46  ;;  %v5636_v42 = vpop.f32.mrf.mxu0  ;;  %v5685_v6 = vpop.f32.mrf.mxu1  ;;  %v5735_v15 = vadd.f32 %v5734_v58, %v15792_v50  ;;  %v15794_v46 = vld [vmem:[#allocation53_spill] sm:$0xff] }
 0x7fe   : > { %v5637_v8 = vadd.f32 %v5636_v42, %v13232_v45  ;;  %v5783_v24 = vpop.f32.mrf.mxu3 }
 0x7ff   : > { %v13409_v14 = vadd.f32 %v5783_v24, %v5735_v15 }
 0x800   : > { %v5686_v16 = vadd.f32 %v5685_v6, %v5637_v8  ;;  %5831 = vmatmul.bf16.gmra.mxu0 %v15790_v18  ;;  %5880 = vmatmul.bf16.gmra.mxu1 %v15791_v38 }
 0x802   : > { %vm6603_vm14 = vcmp.ge.f32.partialorder %v5686_v16, 0.0  ;;  %v6636_v26 = vmul.f32 %v13282_v43, %v5686_v16 }
 0x804   : > { %v13411_v62 = vsel %vm6603_vm14, %v5686_v16, %v6636_v26  ;;  %v5736_v8 = vpop.f32.mrf.mxu2  ;;  %v15796_v26 = vld [vmem:[#allocation201_spill] sm:$0xff] }
 0x805   : > { %15793 = vst [vmem:[#allocation129_spill] sm:$0xff] %v13411_v62  ;;  %v5638_v35 = vpop.f32.mrf.mxu0  ;;  %v5687_v45 = vpop.f32.mrf.mxu1  ;;  %v5737_v12 = vadd.f32 %v5736_v8, %v15794_v46  ;;  %v15797_v46 = vld [vmem:[#allocation202_spill] sm:$0xff] }
 0x806   : > { %v5639_v42 = vadd.f32 %v5638_v35, %v13235_v3  ;;  %v5785_v11 = vpop.f32.mrf.mxu3 }
 0x807   : > { %v13416_v50 = vadd.f32 %v5785_v11, %v5737_v12 }
 0x808   : > { %v5688_v6 = vadd.f32 %v5687_v45, %v5639_v42  ;;  %v15798_v45 = vld [vmem:[#allocation58_spill] sm:$0xff] }
 0x80a   : > { %vm6605_vm15 = vcmp.ge.f32.partialorder %v5688_v6, 0.0  ;;  %v6638_v58 = vmul.f32 %v13282_v43, %v5688_v6 }
 0x80b   : > { %5934 = vmatmul.bf16.gmra.mxu2 %v12805_v29  ;;  %5983 = vmatmul.bf16.gmra.mxu3 %v12809_v51 }
 0x80c   : > { %v13418_v25 = vsel %vm6605_vm15, %v5688_v6, %v6638_v58  ;;  %v5739_v35 = vpop.f32.mrf.mxu2 }
 0x80d   : > { %15795 = vst [vmem:[#allocation128_spill] sm:$0xff] %v13418_v25  ;;  %v5641_v15 = vpop.f32.mrf.mxu0  ;;  %v5690_v24 = vpop.f32.mrf.mxu1  ;;  %v5740_v42 = vadd.f32 %v5739_v35, %v15798_v45  ;;  %v15800_v25 = vld [vmem:[#allocation60_spill] sm:$0xff] }
 0x80e   : > { %v5642_v16 = vadd.f32 %v5641_v15, %v13246_v23  ;;  %v5788_v11 = vpop.f32.mrf.mxu3 }
 0x80f   : > { %v13427_v6 = vadd.f32 %v5788_v11, %v5740_v42 }
 0x810   : > { %v5691_v3 = vadd.f32 %v5690_v24, %v5642_v16  ;;  %5836 = vmatmul.bf16.gmra.mxu0 %v15796_v26  ;;  %5885 = vmatmul.bf16.gmra.mxu1 %v15797_v46 }
 0x812   : > { %vm6607_vm0 = vcmp.ge.f32.partialorder %v5691_v3, 0.0  ;;  %v6640_v12 = vmul.f32 %v13282_v43, %v5691_v3 }
 0x814   : > { %v13429_v8 = vsel %vm6607_vm0, %v5691_v3, %v6640_v12  ;;  %v5741_v16 = vpop.f32.mrf.mxu2  ;;  %v15802_v12 = vld [vmem:[#allocation48_spill] sm:$0xff] }
 0x815   : > { %15799 = vst [vmem:[#allocation130_spill] sm:$0xff] %v13429_v8  ;;  %v5643_v58 = vpop.f32.mrf.mxu0  ;;  %v5692_v23 = vpop.f32.mrf.mxu1  ;;  %v5742_v62 = vadd.f32 %v5741_v16, %v15800_v25  ;;  %v15803_v25 = vld [vmem:[#allocation51_spill] sm:$0xff] }
 0x816   : > { %v5644_v15 = vadd.f32 %v5643_v58, %v13257_v22  ;;  %v5790_v51 = vpop.f32.mrf.mxu3 }
 0x817   : > { %v13434_v45 = vadd.f32 %v5790_v51, %v5742_v62 }
 0x818   : > { %v5693_v24 = vadd.f32 %v5692_v23, %v5644_v15  ;;  %v15804_v23 = vld [vmem:[#allocation65_spill] sm:$0xff] }
 0x81a   : > { %vm6609_vm1 = vcmp.ge.f32.partialorder %v5693_v24, 0.0  ;;  %v6642_v35 = vmul.f32 %v13282_v43, %v5693_v24 }
 0x81b   : > { %5939 = vmatmul.bf16.gmra.mxu2 %v12857_v9  ;;  %5988 = vmatmul.bf16.gmra.mxu3 %v12861_v40 }
 0x81c   : > { %v13436_v29 = vsel %vm6609_vm1, %v5693_v24, %v6642_v35 }
 0x81d   : > { %15801 = vst [vmem:[#allocation133_spill] sm:$0xff] %v13436_v29  ;;  %v5646_v42 = vpop.f32.mrf.mxu0  ;;  %v5695_v11 = vpop.f32.mrf.mxu1  ;;  %v15806_v29 = vld [vmem:[#allocation67_spill] sm:$0xff] }
 0x81e   : > { %v5647_v3 = vadd.f32 %v5646_v42, %v13272_v53  ;;  %v5744_v58 = vpop.f32.mrf.mxu2  ;;  %v5793_v51 = vpop.f32.mrf.mxu3 }
 0x81f   : > { %v5745_v15 = vadd.f32 %v5744_v58, %v15804_v23 }
 0x820   : > { %v5696_v22 = vadd.f32 %v5695_v11, %v5647_v3  ;;  %5841 = vmatmul.bf16.gmra.mxu0 %v15802_v12  ;;  %5890 = vmatmul.bf16.gmra.mxu1 %v15803_v25 }
 0x821   : > { %v13445_v24 = vadd.f32 %v5793_v51, %v5745_v15 }
 0x822   : > { %vm6611_vm2 = vcmp.ge.f32.partialorder %v5696_v22, 0.0  ;;  %v6644_v62 = vmul.f32 %v13282_v43, %v5696_v22 }
 0x824   : > { %v13447_v16 = vsel %vm6611_vm2, %v5696_v22, %v6644_v62  ;;  %v15809_v62 = vld [vmem:[#allocation315_spill] sm:$0xff] }
 0x825   : > { %15805 = vst [vmem:[#allocation135_spill] sm:$0xff] %v13447_v16  ;;  %v5648_v35 = vpop.f32.mrf.mxu0  ;;  %v5697_v53 = vpop.f32.mrf.mxu1 }
 0x826   : > { %v5649_v42 = vadd.f32 %v5648_v35, %v13276_v61  ;;  %v5746_v3 = vpop.f32.mrf.mxu2  ;;  %v5795_v40 = vpop.f32.mrf.mxu3  ;;  %v15808_v61 = vld [vmem:[#allocation313_spill] sm:$0xff]  ;;  %v15810_v35 = vld [vmem:[#allocation314_spill] sm:$0xff] }
 0x827   : > { %v5747_v8 = vadd.f32 %v5746_v3, %v15806_v29 }
 0x828   : > { %v5698_v11 = vadd.f32 %v5697_v53, %v5649_v42  ;;  %v15811_v53 = vld [vmem:[#allocation316_spill] sm:$0xff]  ;;  %v15812_v42 = vld [vmem:[#allocation165_spill] sm:$0xff] }
 0x829   : > { %v13452_v23 = vadd.f32 %v5795_v40, %v5747_v8 }
 0x82a   : > { %vm6613_vm3 = vcmp.ge.f32.partialorder %v5698_v11, 0.0  ;;  %v6646_v58 = vmul.f32 %v13282_v43, %v5698_v11 }
 0x82b   : > { %6100 = vmatmul.bf16.vlgmr.msrb.gmra.mxu2 %v15752_v47  ;;  %6149 = vmatmul.bf16.vlgmr.msrb.gmra.mxu3 %v15753_v37 }
 0x82c   : > { %v13454_v9 = vsel %vm6613_vm3, %v5698_v11, %v6646_v58  ;;  %6484 = vmatpush.bf16.msrb.mxu2 %v15808_v61  ;;  %6533 = vmatpush.bf16.msrb.mxu3 %v15809_v62  ;;  %v15814_v58 = vld [vmem:[#allocation166_spill] sm:$0xff] }
 0x82d   : > { %15807 = vst [vmem:[#allocation134_spill] sm:$0xff] %v13454_v9  ;;  %v5807_v15 = vpop.f32.mrf.mxu0  ;;  %v5856_v51 = vpop.f32.mrf.mxu1 }
 0x82e   : > { %v5808_v22 = vadd.f32 %v5807_v15, %v13292_v4  ;;  %v5905_v40 = vpop.f32.mrf.mxu2  ;;  %v5954_v8 = vpop.f32.mrf.mxu3  ;;  %v15813_v4 = vld [vmem:[#allocation317_spill] sm:$0xff]  ;;  %v15816_v15 = vld [vmem:[#allocation319_spill] sm:$0xff] }
 0x830   : > { %v5857_v29 = vadd.f32 %v5856_v51, %v5808_v22  ;;  %6002 = vmatmul.bf16.vlgmr.msrb.gmra.mxu0 %v15696_v63  ;;  %6051 = vmatmul.bf16.vlgmr.msrb.gmra.mxu1 %v15698_v5  ;;  %v15815_v63 = vld [vmem:[#allocation318_spill] sm:$0xff]  ;;  %v15817_v51 = vld [vmem:[#allocation321_spill] sm:$0xff] }
 0x831   : > { %6386 = vmatpush.bf16.msrb.mxu0 %v15810_v35  ;;  %6435 = vmatpush.bf16.msrb.mxu1 %v15811_v53  ;;  %v15820_v35 = vld [vmem:[#allocation323_spill] sm:$0xff]  ;;  %v15821_v53 = vld [vmem:[#allocation325_spill] sm:$0xff] }
 0x832   : > { %v5906_v47 = vadd.f32 %v5905_v40, %v5857_v29  ;;  %6485 = vmatpush.bf16.msrb.mxu2 %v15812_v42  ;;  %6534 = vmatpush.bf16.msrb.mxu3 %v15813_v4  ;;  %v15818_v29 = vld [vmem:[#allocation320_spill] sm:$0xff]  ;;  %v15819_v40 = vld [vmem:[#allocation322_spill] sm:$0xff] }
 0x833   : > { %v15822_v4 = vld [vmem:[#allocation324_spill] sm:$0xff] }
 0x834   : > { %v13467_v37 = vadd.f32 %v5954_v8, %v5906_v47 }
 0x835   : > { %v5809_v11 = vpop.f32.mrf.mxu0  ;;  %v5858_v3 = vpop.f32.mrf.mxu1  ;;  %6387 = vmatpush.bf16.msrb.mxu0 %v15814_v58  ;;  %6436 = vmatpush.bf16.msrb.mxu1 %v15815_v63  ;;  %v15824_v58 = vld [vmem:[#allocation327_spill] sm:$0xff]  ;;  %v15825_v63 = vld [vmem:[#allocation329_spill] sm:$0xff] }
 0x836   : > { %v5810_v5 = vadd.f32 %v5809_v11, %v13307_v48  ;;  %6486 = vmatpush.bf16.msrb.mxu2 %v15816_v15  ;;  %6535 = vmatpush.bf16.msrb.mxu3 %v15817_v51  ;;  %v5907_v61 = vpop.f32.mrf.mxu2  ;;  %v5956_v62 = vpop.f32.mrf.mxu3 }
 0x838   : > { %v5859_v22 = vadd.f32 %v5858_v3, %v5810_v5  ;;  %v15823_v3 = vld [vmem:[#allocation326_spill] sm:$0xff] }
 0x839   : > { %6388 = vmatpush.bf16.msrb.mxu0 %v15818_v29  ;;  %6437 = vmatpush.bf16.msrb.mxu1 %v15819_v40  ;;  %v15829_v29 = vld [vmem:[#allocation331_spill] sm:$0xff] }
 0x83a   : > { %v5908_v8 = vadd.f32 %v5907_v61, %v5859_v22  ;;  %6487 = vmatpush.bf16.msrb.mxu2 %v15820_v35  ;;  %6536 = vmatpush.bf16.msrb.mxu3 %v15821_v53  ;;  %v15826_v22 = vld [vmem:[#allocation328_spill] sm:$0xff]  ;;  %v15830_v53 = vld [vmem:[#allocation146_spill] sm:$0xff] }
 0x83b   : > { %6105 = vmatmul.bf16.gmra.mxu2 %v15772_v44  ;;  %6154 = vmatmul.bf16.gmra.mxu3 %v15773_v56 }
 0x83c   : > { %v13478_v47 = vadd.f32 %v5956_v62, %v5908_v8  ;;  %v15827_v62 = vld [vmem:[#allocation330_spill] sm:$0xff] }
 0x83d   : > { %v5812_v42 = vpop.f32.mrf.mxu0  ;;  %v5861_v48 = vpop.f32.mrf.mxu1  ;;  %6389 = vmatpush.bf16.msrb.mxu0 %v15822_v4  ;;  %6438 = vmatpush.bf16.msrb.mxu1 %v15823_v3  ;;  %v15832_v4 = vld [vmem:[#allocation151_spill] sm:$0xff] }
 0x83e   : > { %v5813_v11 = vadd.f32 %v5812_v42, %v13325_v17  ;;  %6488 = vmatpush.bf16.msrb.mxu2 %v15824_v58  ;;  %6537 = vmatpush.bf16.msrb.mxu3 %v15825_v63  ;;  %v5910_v15 = vpop.f32.mrf.mxu2  ;;  %v5959_v51 = vpop.f32.mrf.mxu3  ;;  %v15828_v17 = vld [vmem:[#allocation145_spill] sm:$0xff] }
 0x840   : > { %v5862_v5 = vadd.f32 %v5861_v48, %v5813_v11  ;;  %6007 = vmatmul.bf16.gmra.mxu0 %v15632_v0  ;;  %6056 = vmatmul.bf16.gmra.mxu1 %v15633_v1  ;;  %v15831_v48 = vld [vmem:[#allocation332_spill] sm:$0xff]  ;;  %v15833_v11 = vld [vmem:[#allocation333_spill] sm:$0xff] }
 0x841   : > { %6390 = vmatpush.bf16.msrb.mxu0 %v15826_v22  ;;  %6439 = vmatpush.bf16.msrb.mxu1 %v15827_v62  ;;  %v15836_v22 = vld [vmem:[#allocation159_spill] sm:$0xff] }
 0x842   : > { %v5911_v61 = vadd.f32 %v5910_v15, %v5862_v5  ;;  %6489 = vmatpush.bf16.msrb.mxu2 %v15828_v17  ;;  %6538 = vmatpush.bf16.msrb.mxu3 %v15829_v29  ;;  %v15834_v5 = vld [vmem:[#allocation152_spill] sm:$0xff] }
 0x843   : > { %v15838_v29 = vld [vmem:[#allocation160_spill] sm:$0xff] }
 0x844   : > { %v13493_v40 = vadd.f32 %v5959_v51, %v5911_v61  ;;  %v15835_v51 = vld [vmem:[#allocation334_spill] sm:$0xff]  ;;  %v15837_v61 = vld [vmem:[#allocation335_spill] sm:$0xff] }
 0x845   : > { %v5814_v8 = vpop.f32.mrf.mxu0  ;;  %v5863_v35 = vpop.f32.mrf.mxu1  ;;  %6391 = vmatpush.bf16.msrb.mxu0 %v15830_v53  ;;  %6440 = vmatpush.bf16.msrb.mxu1 %v15831_v48 }
 0x846   : > { %v5815_v42 = vadd.f32 %v5814_v8, %v13340_v10  ;;  %6490 = vmatpush.bf16.msrb.mxu2 %v15832_v4  ;;  %6539 = vmatpush.bf16.msrb.mxu3 %v15833_v11  ;;  %v5912_v58 = vpop.f32.mrf.mxu2  ;;  %v5961_v63 = vpop.f32.mrf.mxu3 }
 0x848   : > { %v5864_v3 = vadd.f32 %v5863_v35, %v5815_v42  ;;  %v15839_v35 = vld [vmem:[#allocation336_spill] sm:$0xff] }
 0x849   : > { %6392 = vmatpush.bf16.msrb.mxu0 %v15834_v5  ;;  %6441 = vmatpush.bf16.msrb.mxu1 %v15835_v51 }
 0x84a   : > { %v5913_v15 = vadd.f32 %v5912_v58, %v5864_v3  ;;  %6491 = vmatpush.bf16.msrb.mxu2 %v15836_v22  ;;  %6540 = vmatpush.bf16.msrb.mxu3 %v15837_v61 }
 0x84b   : > { %6110 = vmatmul.bf16.gmra.mxu2 %v15778_v36  ;;  %6159 = vmatmul.bf16.gmra.mxu3 %v15779_v20 }
 0x84c   : > { %v13504_v62 = vadd.f32 %v5961_v63, %v5913_v15 }
 0x84d   : > { %v5817_v10 = vpop.f32.mrf.mxu0  ;;  %v5866_v17 = vpop.f32.mrf.mxu1  ;;  %6393 = vmatpush.bf16.msrb.mxu0 %v15838_v29  ;;  %6442 = vmatpush.bf16.msrb.mxu1 %v15839_v35 }
 0x84e   : > { %v5818_v8 = vadd.f32 %v5817_v10, %v13355_v30  ;;  %v5915_v42 = vpop.f32.mrf.mxu2  ;;  %v5964_v48 = vpop.f32.mrf.mxu3 }
 0x850   : > { %v5867_v53 = vadd.f32 %v5866_v17, %v5818_v8  ;;  %6012 = vmatmul.bf16.gmra.mxu0 %v15650_v21  ;;  %6061 = vmatmul.bf16.gmra.mxu1 %v15651_v7 }
 0x852   : > { %v5916_v4 = vadd.f32 %v5915_v42, %v5867_v53 }
 0x854   : > { %v13513_v11 = vadd.f32 %v5964_v48, %v5916_v4 }
 0x855   : > { %v5819_v3 = vpop.f32.mrf.mxu0  ;;  %v5868_v58 = vpop.f32.mrf.mxu1 }
 0x856   : > { %v5820_v63 = vadd.f32 %v5819_v3, %v13362_v55  ;;  %v5917_v30 = vpop.f32.mrf.mxu2  ;;  %v5966_v15 = vpop.f32.mrf.mxu3 }
 0x858   : > { %v5869_v5 = vadd.f32 %v5868_v58, %v5820_v63 }
 0x85a   : > { %v5918_v51 = vadd.f32 %v5917_v30, %v5869_v5 }
 0x85b   : > { %6115 = vmatmul.bf16.gmra.mxu2 %v15784_v41  ;;  %6164 = vmatmul.bf16.gmra.mxu3 %v15785_v49 }
 0x85c   : > { %v13516_v22 = vadd.f32 %v5966_v15, %v5918_v51 }
 0x85d   : > { %v5822_v61 = vpop.f32.mrf.mxu0  ;;  %v5871_v10 = vpop.f32.mrf.mxu1 }
 0x85e   : > { %v5823_v17 = vadd.f32 %v5822_v61, %v13373_v27  ;;  %v5920_v55 = vpop.f32.mrf.mxu2  ;;  %v5969_v8 = vpop.f32.mrf.mxu3 }
 0x860   : > { %v5872_v29 = vadd.f32 %v5871_v10, %v5823_v17  ;;  %6017 = vmatmul.bf16.gmra.mxu0 %v15666_v54  ;;  %6066 = vmatmul.bf16.gmra.mxu1 %v15667_v32 }
 0x862   : > { %v5921_v35 = vadd.f32 %v5920_v55, %v5872_v29 }
 0x864   : > { %v13523_v53 = vadd.f32 %v5969_v8, %v5921_v35 }
 0x865   : > { %v5824_v42 = vpop.f32.mrf.mxu0  ;;  %v5873_v48 = vpop.f32.mrf.mxu1 }
 0x866   : > { %v5825_v4 = vadd.f32 %v5824_v42, %v13380_v60  ;;  %v5922_v58 = vpop.f32.mrf.mxu2  ;;  %v5971_v63 = vpop.f32.mrf.mxu3 }
 0x868   : > { %v5874_v3 = vadd.f32 %v5873_v48, %v5825_v4 }
 0x86a   : > { %v5923_v27 = vadd.f32 %v5922_v58, %v5874_v3 }
 0x86b   : > { %6120 = vmatmul.bf16.gmra.mxu2 %v15790_v18  ;;  %6169 = vmatmul.bf16.gmra.mxu3 %v15791_v38 }
 0x86c   : > { %v13526_v5 = vadd.f32 %v5971_v63, %v5923_v27 }
 0x86d   : > { %v5827_v30 = vpop.f32.mrf.mxu0  ;;  %v5876_v15 = vpop.f32.mrf.mxu1 }
 0x86e   : > { %v5828_v51 = vadd.f32 %v5827_v30, %v13391_v33  ;;  %v5925_v60 = vpop.f32.mrf.mxu2  ;;  %v5974_v10 = vpop.f32.mrf.mxu3 }
 0x870   : > { %v5877_v61 = vadd.f32 %v5876_v15, %v5828_v51  ;;  %6022 = vmatmul.bf16.gmra.mxu0 %v15668_v39  ;;  %6071 = vmatmul.bf16.gmra.mxu1 %v15669_v59 }
 0x872   : > { %v5926_v17 = vadd.f32 %v5925_v60, %v5877_v61 }
 0x874   : > { %v13533_v29 = vadd.f32 %v5974_v10, %v5926_v17 }
 0x875   : > { %v5829_v55 = vpop.f32.mrf.mxu0  ;;  %v5878_v8 = vpop.f32.mrf.mxu1 }
 0x876   : > { %v5830_v35 = vadd.f32 %v5829_v55, %v13398_v2  ;;  %v5927_v48 = vpop.f32.mrf.mxu2  ;;  %v5976_v4 = vpop.f32.mrf.mxu3 }
 0x878   : > { %v5879_v42 = vadd.f32 %v5878_v8, %v5830_v35 }
 0x87a   : > { %v5928_v33 = vadd.f32 %v5927_v48, %v5879_v42 }
 0x87b   : > { %6125 = vmatmul.bf16.gmra.mxu2 %v15796_v26  ;;  %6174 = vmatmul.bf16.gmra.mxu3 %v15797_v46 }
 0x87c   : > { %v13536_v3 = vadd.f32 %v5976_v4, %v5928_v33 }
 0x87d   : > { %v5832_v58 = vpop.f32.mrf.mxu0  ;;  %v5881_v63 = vpop.f32.mrf.mxu1 }
 0x87e   : > { %v5833_v27 = vadd.f32 %v5832_v58, %v13409_v14  ;;  %v5930_v2 = vpop.f32.mrf.mxu2  ;;  %v5979_v15 = vpop.f32.mrf.mxu3 }
 0x880   : > { %v5882_v30 = vadd.f32 %v5881_v63, %v5833_v27  ;;  %6027 = vmatmul.bf16.gmra.mxu0 %v15670_v19  ;;  %6076 = vmatmul.bf16.gmra.mxu1 %v15671_v31 }
 0x882   : > { %v5931_v51 = vadd.f32 %v5930_v2, %v5882_v30 }
 0x884   : > { %v13543_v61 = vadd.f32 %v5979_v15, %v5931_v51 }
 0x885   : > { %v5834_v60 = vpop.f32.mrf.mxu0  ;;  %v5883_v10 = vpop.f32.mrf.mxu1 }
 0x886   : > { %v5835_v17 = vadd.f32 %v5834_v60, %v13416_v50  ;;  %v5932_v8 = vpop.f32.mrf.mxu2  ;;  %v5981_v35 = vpop.f32.mrf.mxu3 }
 0x888   : > { %v5884_v55 = vadd.f32 %v5883_v10, %v5835_v17 }
 0x88a   : > { %v5933_v14 = vadd.f32 %v5932_v8, %v5884_v55 }
 0x88b   : > { %6130 = vmatmul.bf16.gmra.mxu2 %v15802_v12  ;;  %6179 = vmatmul.bf16.gmra.mxu3 %v15803_v25 }
 0x88c   : > { %v13546_v42 = vadd.f32 %v5981_v35, %v5933_v14 }
 0x88d   : > { %v5837_v48 = vpop.f32.mrf.mxu0  ;;  %v5886_v4 = vpop.f32.mrf.mxu1 }
 0x88e   : > { %v5838_v33 = vadd.f32 %v5837_v48, %v13427_v6  ;;  %v5935_v50 = vpop.f32.mrf.mxu2  ;;  %v5984_v63 = vpop.f32.mrf.mxu3 }
 0x890   : > { %v5887_v58 = vadd.f32 %v5886_v4, %v5838_v33  ;;  %6032 = vmatmul.bf16.gmra.mxu0 %v15722_v34  ;;  %6081 = vmatmul.bf16.gmra.mxu1 %v15723_v57  ;;  %v15840_v4 = vld [vmem:[#allocation99_spill] sm:$0xff]  ;;  %v15841_v33 = vld [vmem:[#allocation98_spill] sm:$0xff] }
 0x892   : > { %v5936_v27 = vadd.f32 %v5935_v50, %v5887_v58 }
 0x894   : > { %v13553_v30 = vadd.f32 %v5984_v63, %v5936_v27 }
 0x895   : > { %v5839_v2 = vpop.f32.mrf.mxu0  ;;  %v5888_v15 = vpop.f32.mrf.mxu1 }
 0x896   : > { %v5840_v51 = vadd.f32 %v5839_v2, %v13434_v45  ;;  %v5937_v10 = vpop.f32.mrf.mxu2  ;;  %v5986_v17 = vpop.f32.mrf.mxu3 }
 0x898   : > { %v5889_v60 = vadd.f32 %v5888_v15, %v5840_v51 }
 0x89a   : > { %v5938_v6 = vadd.f32 %v5937_v10, %v5889_v60 }
 0x89b   : > { %6135 = vmatmul.bf16.gmra.mxu2 %v15623_v13  ;;  %6184 = vmatmul.bf16.gmra.mxu3 %v12793_v52 }
 0x89c   : > { %v13556_v55 = vadd.f32 %v5986_v17, %v5938_v6 }
 0x89d   : > { %v5842_v8 = vpop.f32.mrf.mxu0  ;;  %v5891_v35 = vpop.f32.mrf.mxu1 }
 0x89e   : > { %v5843_v14 = vadd.f32 %v5842_v8, %v13445_v24  ;;  %v5940_v45 = vpop.f32.mrf.mxu2  ;;  %v5989_v58 = vpop.f32.mrf.mxu3 }
 0x8a0   : > { %v5892_v48 = vadd.f32 %v5891_v35, %v5843_v14  ;;  %6037 = vmatmul.bf16.gmra.mxu0 %v15840_v4  ;;  %6086 = vmatmul.bf16.gmra.mxu1 %v15841_v33 }
 0x8a2   : > { %v5941_v50 = vadd.f32 %v5940_v45, %v5892_v48  ;;  %v15842_v48 = vld [vmem:[#allocation75_spill] sm:$0xff] }
 0x8a4   : > { %v13563_v63 = vadd.f32 %v5989_v58, %v5941_v50 }
 0x8a5   : > { %v5844_v27 = vpop.f32.mrf.mxu0  ;;  %v5893_v2 = vpop.f32.mrf.mxu1 }
 0x8a6   : > { %v5845_v15 = vadd.f32 %v5844_v27, %v13452_v23  ;;  %v5942_v60 = vpop.f32.mrf.mxu2  ;;  %v5991_v10 = vpop.f32.mrf.mxu3 }
 0x8a8   : > { %v5894_v51 = vadd.f32 %v5893_v2, %v5845_v15 }
 0x8aa   : > { %v5943_v24 = vadd.f32 %v5942_v60, %v5894_v51 }
 0x8ab   : > { %6296 = vmatmul.bf16.vlgmr.msra.gmra.mxu2 %v15632_v0  ;;  %6345 = vmatmul.bf16.vlgmr.msra.gmra.mxu3 %v15633_v1 }
 0x8ac   : > { %v13566_v17 = vadd.f32 %v5991_v10, %v5943_v24 }
 0x8ad   : > { %v6003_v6 = vpop.f32.mrf.mxu0  ;;  %v6052_v8 = vpop.f32.mrf.mxu1 }
 0x8ae   : > { %v6004_v35 = vadd.f32 %v6003_v6, %v13467_v37  ;;  %v6101_v23 = vpop.f32.mrf.mxu2  ;;  %v6150_v45 = vpop.f32.mrf.mxu3 }
 0x8b0   : > { %v6053_v14 = vadd.f32 %v6052_v8, %v6004_v35  ;;  %6198 = vmatmul.bf16.vlgmr.msra.gmra.mxu0 %v15746_v28  ;;  %6247 = vmatmul.bf16.vlgmr.msra.gmra.mxu1 %v15842_v48  ;;  %v15843_v8 = vld [vmem:[#allocation74_spill] sm:$0xff]  ;;  %v15844_v35 = vld [vmem:[#allocation76_spill] sm:$0xff] }
 0x8b2   : > { %v6102_v58 = vadd.f32 %v6101_v23, %v6053_v14 }
 0x8b4   : > { %v13573_v50 = vadd.f32 %v6150_v45, %v6102_v58 }
 0x8b5   : > { %v6005_v27 = vpop.f32.mrf.mxu0  ;;  %v6054_v2 = vpop.f32.mrf.mxu1 }
 0x8b6   : > { %v6006_v15 = vadd.f32 %v6005_v27, %v13478_v47  ;;  %v6103_v0 = vpop.f32.mrf.mxu2  ;;  %v6152_v60 = vpop.f32.mrf.mxu3 }
 0x8b8   : > { %v6055_v51 = vadd.f32 %v6054_v2, %v6006_v15 }
 0x8ba   : > { %v6104_v37 = vadd.f32 %v6103_v0, %v6055_v51 }
 0x8bb   : > { %6301 = vmatmul.bf16.gmra.mxu2 %v15650_v21  ;;  %6350 = vmatmul.bf16.gmra.mxu3 %v15651_v7 }
 0x8bc   : > { %v13576_v10 = vadd.f32 %v6152_v60, %v6104_v37 }
 0x8bd   : > { %v6008_v1 = vpop.f32.mrf.mxu0  ;;  %v6057_v24 = vpop.f32.mrf.mxu1 }
 0x8be   : > { %v6009_v28 = vadd.f32 %v6008_v1, %v13493_v40  ;;  %v6106_v47 = vpop.f32.mrf.mxu2  ;;  %v6155_v14 = vpop.f32.mrf.mxu3  ;;  %v15845_v1 = vld [vmem:[#allocation81_spill] sm:$0xff] }
 0x8c0   : > { %v6058_v6 = vadd.f32 %v6057_v24, %v6009_v28  ;;  %6203 = vmatmul.bf16.gmra.mxu0 %v15843_v8  ;;  %6252 = vmatmul.bf16.gmra.mxu1 %v15844_v35  ;;  %v15846_v24 = vld [vmem:[#allocation83_spill] sm:$0xff] }
 0x8c2   : > { %v6107_v48 = vadd.f32 %v6106_v47, %v6058_v6 }
 0x8c4   : > { %v13583_v23 = vadd.f32 %v6155_v14, %v6107_v48 }
 0x8c5   : > { %v6010_v45 = vpop.f32.mrf.mxu0  ;;  %v6059_v58 = vpop.f32.mrf.mxu1 }
 0x8c6   : > { %v6011_v27 = vadd.f32 %v6010_v45, %v13504_v62  ;;  %v6108_v21 = vpop.f32.mrf.mxu2  ;;  %v6157_v15 = vpop.f32.mrf.mxu3 }
 0x8c8   : > { %v6060_v2 = vadd.f32 %v6059_v58, %v6011_v27 }
 0x8ca   : > { %v6109_v40 = vadd.f32 %v6108_v21, %v6060_v2 }
 0x8cb   : > { %6306 = vmatmul.bf16.gmra.mxu2 %v15666_v54  ;;  %6355 = vmatmul.bf16.gmra.mxu3 %v15667_v32 }
 0x8cc   : > { %v13586_v51 = vadd.f32 %v6157_v15, %v6109_v40 }
 0x8cd   : > { %v6013_v7 = vpop.f32.mrf.mxu0  ;;  %v6062_v0 = vpop.f32.mrf.mxu1 }
 0x8ce   : > { %v6014_v60 = vadd.f32 %v6013_v7, %v13513_v11  ;;  %v6111_v62 = vpop.f32.mrf.mxu2  ;;  %v6160_v28 = vpop.f32.mrf.mxu3  ;;  %v15847_v7 = vld [vmem:[#allocation82_spill] sm:$0xff] }
 0x8d0   : > { %v6063_v37 = vadd.f32 %v6062_v0, %v6014_v60  ;;  %6208 = vmatmul.bf16.gmra.mxu0 %v15845_v1  ;;  %6257 = vmatmul.bf16.gmra.mxu1 %v15846_v24  ;;  %v15848_v0 = vld [vmem:[#allocation84_spill] sm:$0xff] }
 0x8d2   : > { %v6112_v6 = vadd.f32 %v6111_v62, %v6063_v37 }
 0x8d4   : > { %v13593_v47 = vadd.f32 %v6160_v28, %v6112_v6 }
 0x8d5   : > { %v6015_v14 = vpop.f32.mrf.mxu0  ;;  %v6064_v48 = vpop.f32.mrf.mxu1 }
 0x8d6   : > { %v6016_v45 = vadd.f32 %v6015_v14, %v13516_v22  ;;  %v6113_v54 = vpop.f32.mrf.mxu2  ;;  %v6162_v27 = vpop.f32.mrf.mxu3 }
 0x8d8   : > { %v6065_v58 = vadd.f32 %v6064_v48, %v6016_v45 }
 0x8da   : > { %v6114_v11 = vadd.f32 %v6113_v54, %v6065_v58 }
 0x8db   : > { %6311 = vmatmul.bf16.gmra.mxu2 %v15668_v39  ;;  %6360 = vmatmul.bf16.gmra.mxu3 %v15669_v59 }
 0x8dc   : > { %v13596_v2 = vadd.f32 %v6162_v27, %v6114_v11 }
 0x8dd   : > { %v6018_v32 = vpop.f32.mrf.mxu0  ;;  %v6067_v21 = vpop.f32.mrf.mxu1 }
 0x8de   : > { %v6019_v15 = vadd.f32 %v6018_v32, %v13523_v53  ;;  %v6116_v22 = vpop.f32.mrf.mxu2  ;;  %v6165_v60 = vpop.f32.mrf.mxu3  ;;  %v15849_v32 = vld [vmem:[#allocation89_spill] sm:$0xff] }
 0x8e0   : > { %v6068_v40 = vadd.f32 %v6067_v21, %v6019_v15  ;;  %6213 = vmatmul.bf16.gmra.mxu0 %v15847_v7  ;;  %6262 = vmatmul.bf16.gmra.mxu1 %v15848_v0  ;;  %v15850_v21 = vld [vmem:[#allocation91_spill] sm:$0xff] }
 0x8e2   : > { %v6117_v37 = vadd.f32 %v6116_v22, %v6068_v40 }
 0x8e4   : > { %v13603_v62 = vadd.f32 %v6165_v60, %v6117_v37 }
 0x8e5   : > { %v6020_v28 = vpop.f32.mrf.mxu0  ;;  %v6069_v6 = vpop.f32.mrf.mxu1 }
 0x8e6   : > { %v6021_v14 = vadd.f32 %v6020_v28, %v13526_v5  ;;  %v6118_v39 = vpop.f32.mrf.mxu2  ;;  %v6167_v45 = vpop.f32.mrf.mxu3 }
 0x8e8   : > { %v6070_v48 = vadd.f32 %v6069_v6, %v6021_v14 }
 0x8ea   : > { %v6119_v53 = vadd.f32 %v6118_v39, %v6070_v48 }
 0x8eb   : > { %6316 = vmatmul.bf16.gmra.mxu2 %v15670_v19  ;;  %6365 = vmatmul.bf16.gmra.mxu3 %v15671_v31 }
 0x8ec   : > { %v13606_v58 = vadd.f32 %v6167_v45, %v6119_v53 }
 0x8ed   : > { %v6023_v59 = vpop.f32.mrf.mxu0  ;;  %v6072_v54 = vpop.f32.mrf.mxu1 }
 0x8ee   : > { %v6024_v27 = vadd.f32 %v6023_v59, %v13533_v29  ;;  %v6121_v5 = vpop.f32.mrf.mxu2  ;;  %v6170_v15 = vpop.f32.mrf.mxu3  ;;  %v15851_v59 = vld [vmem:[#allocation92_spill] sm:$0xff] }
 0x8f0   : > { %v6073_v11 = vadd.f32 %v6072_v54, %v6024_v27  ;;  %6218 = vmatmul.bf16.gmra.mxu0 %v15849_v32  ;;  %6267 = vmatmul.bf16.gmra.mxu1 %v15850_v21  ;;  %v15852_v54 = vld [vmem:[#allocation97_spill] sm:$0xff] }
 0x8f2   : > { %v6122_v40 = vadd.f32 %v6121_v5, %v6073_v11 }
 0x8f4   : > { %v13613_v22 = vadd.f32 %v6170_v15, %v6122_v40 }
 0x8f5   : > { %v6025_v60 = vpop.f32.mrf.mxu0  ;;  %v6074_v37 = vpop.f32.mrf.mxu1 }
 0x8f6   : > { %v6026_v28 = vadd.f32 %v6025_v60, %v13536_v3  ;;  %v6123_v19 = vpop.f32.mrf.mxu2  ;;  %v6172_v14 = vpop.f32.mrf.mxu3 }
 0x8f8   : > { %v6075_v6 = vadd.f32 %v6074_v37, %v6026_v28 }
 0x8fa   : > { %v6124_v29 = vadd.f32 %v6123_v19, %v6075_v6 }
 0x8fb   : > { %6321 = vmatmul.bf16.gmra.mxu2 %v15722_v34  ;;  %6370 = vmatmul.bf16.gmra.mxu3 %v15723_v57 }
 0x8fc   : > { %v13616_v48 = vadd.f32 %v6172_v14, %v6124_v29 }
 0x8fd   : > { %v6028_v31 = vpop.f32.mrf.mxu0  ;;  %v6077_v39 = vpop.f32.mrf.mxu1 }
 0x8fe   : > { %v6029_v45 = vadd.f32 %v6028_v31, %v13543_v61  ;;  %v6126_v3 = vpop.f32.mrf.mxu2  ;;  %v6175_v27 = vpop.f32.mrf.mxu3  ;;  %v15853_v31 = vld [vmem:[#allocation100_spill] sm:$0xff] }
 0x900   : > { %v6078_v53 = vadd.f32 %v6077_v39, %v6029_v45  ;;  %6223 = vmatmul.bf16.gmra.mxu0 %v15851_v59  ;;  %6272 = vmatmul.bf16.gmra.mxu1 %v15852_v54  ;;  %v15854_v39 = vld [vmem:[#allocation105_spill] sm:$0xff] }
 0x902   : > { %v6127_v11 = vadd.f32 %v6126_v3, %v6078_v53 }
 0x904   : > { %v13623_v5 = vadd.f32 %v6175_v27, %v6127_v11 }
 0x905   : > { %v6030_v15 = vpop.f32.mrf.mxu0  ;;  %v6079_v40 = vpop.f32.mrf.mxu1 }
 0x906   : > { %v6031_v60 = vadd.f32 %v6030_v15, %v13546_v42  ;;  %v6128_v34 = vpop.f32.mrf.mxu2  ;;  %v6177_v28 = vpop.f32.mrf.mxu3 }
 0x908   : > { %v6080_v37 = vadd.f32 %v6079_v40, %v6031_v60 }
 0x90a   : > { %v6129_v61 = vadd.f32 %v6128_v34, %v6080_v37 }
 0x90b   : > { %6326 = vmatmul.bf16.gmra.mxu2 %v15840_v4  ;;  %6375 = vmatmul.bf16.gmra.mxu3 %v15841_v33 }
 0x90c   : > { %v13626_v6 = vadd.f32 %v6177_v28, %v6129_v61  ;;  %v15855_v28 = vld [vmem:[#allocation158_spill] sm:$0xff] }
 0x90d   : > { %v6033_v57 = vpop.f32.mrf.mxu0  ;;  %v6082_v19 = vpop.f32.mrf.mxu1 }
 0x90e   : > { %v6034_v14 = vadd.f32 %v6033_v57, %v13553_v30  ;;  %v6131_v42 = vpop.f32.mrf.mxu2  ;;  %v6180_v45 = vpop.f32.mrf.mxu3  ;;  %v15856_v57 = vld [vmem:[#allocation256_spill] sm:$0xff] }
 0x910   : > { %v6083_v29 = vadd.f32 %v6082_v19, %v6034_v14  ;;  %6228 = vmatmul.bf16.gmra.mxu0 %v15853_v31  ;;  %6277 = vmatmul.bf16.gmra.mxu1 %v15854_v39  ;;  %v15857_v14 = vld [vmem:[#allocation107_spill] sm:$0xff] }
 0x912   : > { %v6132_v53 = vadd.f32 %v6131_v42, %v6083_v29  ;;  %v15858_v29 = vld [vmem:[#allocation106_spill] sm:$0xff] }
 0x914   : > { %v13633_v3 = vadd.f32 %v6180_v45, %v6132_v53 }
 0x915   : > { %v6035_v27 = vpop.f32.mrf.mxu0  ;;  %v6084_v11 = vpop.f32.mrf.mxu1 }
 0x916   : > { %v6036_v15 = vadd.f32 %v6035_v27, %v13556_v55  ;;  %v6133_v4 = vpop.f32.mrf.mxu2  ;;  %v6182_v60 = vpop.f32.mrf.mxu3 }
 0x918   : > { %v6085_v40 = vadd.f32 %v6084_v11, %v6036_v15 }
 0x91a   : > { %v6134_v30 = vadd.f32 %v6133_v4, %v6085_v40 }
 0x91b   : > { %6331 = vmatmul.bf16.gmra.mxu2 %v15855_v28  ;;  %6380 = vmatmul.bf16.gmra.mxu3 %v15856_v57 }
 0x91c   : > { %v13636_v37 = vadd.f32 %v6182_v60, %v6134_v30 }
 0x91d   : > { %v6038_v33 = vpop.f32.mrf.mxu0  ;;  %v6087_v34 = vpop.f32.mrf.mxu1 }
 0x91e   : > { %v6039_v61 = vadd.f32 %v6038_v33, %v13563_v63  ;;  %v6136_v55 = vpop.f32.mrf.mxu2  ;;  %v6185_v42 = vpop.f32.mrf.mxu3 }
 0x920   : > { %v6088_v19 = vadd.f32 %v6087_v34, %v6039_v61  ;;  %6233 = vmatmul.bf16.gmra.mxu0 %v15857_v14  ;;  %6282 = vmatmul.bf16.gmra.mxu1 %v15858_v29 }
 0x922   : > { %v6137_v45 = vadd.f32 %v6136_v55, %v6088_v19 }
 0x924   : > { %v13643_v53 = vadd.f32 %v6185_v42, %v6137_v45 }
 0x925   : > { %v6040_v27 = vpop.f32.mrf.mxu0  ;;  %v6089_v11 = vpop.f32.mrf.mxu1 }
 0x926   : > { %v6041_v15 = vadd.f32 %v6040_v27, %v13566_v17  ;;  %v6138_v4 = vpop.f32.mrf.mxu2  ;;  %v6187_v60 = vpop.f32.mrf.mxu3 }
 0x928   : > { %v6090_v40 = vadd.f32 %v6089_v11, %v6041_v15 }
 0x92a   : > { %v6139_v63 = vadd.f32 %v6138_v4, %v6090_v40 }
 0x92b   : > { %6492 = vmatmul.bf16.vlgmr.msrb.gmra.mxu2 %v15843_v8  ;;  %6541 = vmatmul.bf16.vlgmr.msrb.gmra.mxu3 %v15844_v35 }
 0x92c   : > { %v13646_v30 = vadd.f32 %v6187_v60, %v6139_v63 }
 0x92d   : > { %v6199_v33 = vpop.f32.mrf.mxu0  ;;  %v6248_v34 = vpop.f32.mrf.mxu1 }
 0x92e   : > { %v6200_v28 = vadd.f32 %v6199_v33, %v13573_v50  ;;  %v6297_v17 = vpop.f32.mrf.mxu2  ;;  %v6346_v57 = vpop.f32.mrf.mxu3 }
 0x930   : > { %v6249_v61 = vadd.f32 %v6248_v34, %v6200_v28  ;;  %6394 = vmatmul.bf16.vlgmr.msrb.gmra.mxu0 %v15772_v44  ;;  %6443 = vmatmul.bf16.vlgmr.msrb.gmra.mxu1 %v15773_v56 }
 0x932   : > { %v6298_v19 = vadd.f32 %v6297_v17, %v6249_v61 }
 0x934   : > { %v13653_v55 = vadd.f32 %v6346_v57, %v6298_v19 }
 0x935   : > { %v6201_v42 = vpop.f32.mrf.mxu0  ;;  %v6250_v45 = vpop.f32.mrf.mxu1 }
 0x936   : > { %v6202_v27 = vadd.f32 %v6201_v42, %v13576_v10  ;;  %v6299_v8 = vpop.f32.mrf.mxu2  ;;  %v6348_v15 = vpop.f32.mrf.mxu3 }
 0x938   : > { %v6251_v11 = vadd.f32 %v6250_v45, %v6202_v27 }
 0x93a   : > { %v6300_v50 = vadd.f32 %v6299_v8, %v6251_v11 }
 0x93b   : > { %6497 = vmatmul.bf16.gmra.mxu2 %v15845_v1  ;;  %6546 = vmatmul.bf16.gmra.mxu3 %v15846_v24 }
 0x93c   : > { %v13656_v40 = vadd.f32 %v6348_v15, %v6300_v50 }
 0x93d   : > { %v6204_v35 = vpop.f32.mrf.mxu0  ;;  %v6253_v4 = vpop.f32.mrf.mxu1 }
 0x93e   : > { %v6205_v44 = vadd.f32 %v6204_v35, %v13583_v23  ;;  %v6302_v10 = vpop.f32.mrf.mxu2  ;;  %v6351_v60 = vpop.f32.mrf.mxu3 }
 0x940   : > { %v6254_v56 = vadd.f32 %v6253_v4, %v6205_v44  ;;  %6399 = vmatmul.bf16.gmra.mxu0 %v15778_v36  ;;  %6448 = vmatmul.bf16.gmra.mxu1 %v15779_v20 }
 0x942   : > { %v6303_v63 = vadd.f32 %v6302_v10, %v6254_v56 }
 0x944   : > { %v13663_v33 = vadd.f32 %v6351_v60, %v6303_v63 }
 0x945   : > { %v6206_v34 = vpop.f32.mrf.mxu0  ;;  %v6255_v28 = vpop.f32.mrf.mxu1 }
 0x946   : > { %v6207_v61 = vadd.f32 %v6206_v34, %v13586_v51  ;;  %v6304_v1 = vpop.f32.mrf.mxu2  ;;  %v6353_v57 = vpop.f32.mrf.mxu3 }
 0x948   : > { %v6256_v17 = vadd.f32 %v6255_v28, %v6207_v61 }
 0x94a   : > { %v6305_v23 = vadd.f32 %v6304_v1, %v6256_v17 }
 0x94b   : > { %6502 = vmatmul.bf16.gmra.mxu2 %v15847_v7  ;;  %6551 = vmatmul.bf16.gmra.mxu3 %v15848_v0 }
 0x94c   : > { %v13666_v19 = vadd.f32 %v6353_v57, %v6305_v23 }
 0x94d   : > { %v6209_v24 = vpop.f32.mrf.mxu0  ;;  %v6258_v42 = vpop.f32.mrf.mxu1 }
 0x94e   : > { %v6210_v36 = vadd.f32 %v6209_v24, %v13593_v47  ;;  %v6307_v51 = vpop.f32.mrf.mxu2  ;;  %v6356_v45 = vpop.f32.mrf.mxu3 }
 0x950   : > { %v6259_v20 = vadd.f32 %v6258_v42, %v6210_v36  ;;  %6404 = vmatmul.bf16.gmra.mxu0 %v15784_v41  ;;  %6453 = vmatmul.bf16.gmra.mxu1 %v15785_v49 }
 0x952   : > { %v6308_v27 = vadd.f32 %v6307_v51, %v6259_v20 }
 0x954   : > { %v13673_v11 = vadd.f32 %v6356_v45, %v6308_v27 }
 0x955   : > { %v6211_v8 = vpop.f32.mrf.mxu0  ;;  %v6260_v15 = vpop.f32.mrf.mxu1 }
 0x956   : > { %v6212_v50 = vadd.f32 %v6211_v8, %v13596_v2  ;;  %v6309_v7 = vpop.f32.mrf.mxu2  ;;  %v6358_v4 = vpop.f32.mrf.mxu3 }
 0x958   : > { %v6261_v35 = vadd.f32 %v6260_v15, %v6212_v50 }
 0x95a   : > { %v6310_v47 = vadd.f32 %v6309_v7, %v6261_v35 }
 0x95b   : > { %6507 = vmatmul.bf16.gmra.mxu2 %v15849_v32  ;;  %6556 = vmatmul.bf16.gmra.mxu3 %v15850_v21 }
 0x95c   : > { %v13676_v44 = vadd.f32 %v6358_v4, %v6310_v47 }
 0x95d   : > { %v6214_v0 = vpop.f32.mrf.mxu0  ;;  %v6263_v56 = vpop.f32.mrf.mxu1 }
 0x95e   : > { %v6215_v41 = vadd.f32 %v6214_v0, %v13603_v62  ;;  %v6312_v2 = vpop.f32.mrf.mxu2  ;;  %v6361_v10 = vpop.f32.mrf.mxu3 }
 0x960   : > { %v6264_v49 = vadd.f32 %v6263_v56, %v6215_v41  ;;  %6409 = vmatmul.bf16.gmra.mxu0 %v15790_v18  ;;  %6458 = vmatmul.bf16.gmra.mxu1 %v15791_v38 }
 0x962   : > { %v6313_v60 = vadd.f32 %v6312_v2, %v6264_v49 }
 0x964   : > { %v13683_v63 = vadd.f32 %v6361_v10, %v6313_v60 }
 0x965   : > { %v6216_v34 = vpop.f32.mrf.mxu0  ;;  %v6265_v28 = vpop.f32.mrf.mxu1 }
 0x966   : > { %v6217_v61 = vadd.f32 %v6216_v34, %v13606_v58  ;;  %v6314_v32 = vpop.f32.mrf.mxu2  ;;  %v6363_v1 = vpop.f32.mrf.mxu3 }
 0x968   : > { %v6266_v17 = vadd.f32 %v6265_v28, %v6217_v61 }
 0x96a   : > { %v6315_v62 = vadd.f32 %v6314_v32, %v6266_v17 }
 0x96b   : > { %6512 = vmatmul.bf16.gmra.mxu2 %v15851_v59  ;;  %6561 = vmatmul.bf16.gmra.mxu3 %v15852_v54 }
 0x96c   : > { %v13686_v57 = vadd.f32 %v6363_v1, %v6315_v62 }
 0x96d   : > { %v6219_v21 = vpop.f32.mrf.mxu0  ;;  %v6268_v23 = vpop.f32.mrf.mxu1 }
 0x96e   : > { %v6220_v18 = vadd.f32 %v6219_v21, %v13613_v22  ;;  %v6317_v58 = vpop.f32.mrf.mxu2  ;;  %v6366_v24 = vpop.f32.mrf.mxu3 }
 0x970   : > { %v6269_v38 = vadd.f32 %v6268_v23, %v6220_v18  ;;  %6414 = vmatmul.bf16.gmra.mxu0 %v15796_v26  ;;  %6463 = vmatmul.bf16.gmra.mxu1 %v15797_v46  ;;  %v15860_v18 = vld [vmem:[#allocation220_spill] sm:$0xff] }
 0x972   : > { %v6318_v42 = vadd.f32 %v6317_v58, %v6269_v38  ;;  %v15861_v58 = vld [vmem:[#allocation108_spill] sm:$0xff] }
 0x974   : > { %v13693_v36 = vadd.f32 %v6366_v24, %v6318_v42 }
 0x975   : > { %v6221_v20 = vpop.f32.mrf.mxu0  ;;  %v6270_v51 = vpop.f32.mrf.mxu1 }
 0x976   : > { %v6222_v45 = vadd.f32 %v6221_v20, %v13616_v48  ;;  %v6319_v59 = vpop.f32.mrf.mxu2  ;;  %v6368_v8 = vpop.f32.mrf.mxu3 }
 0x978   : > { %v6271_v27 = vadd.f32 %v6270_v51, %v6222_v45 }
 0x97a   : > { %v6320_v22 = vadd.f32 %v6319_v59, %v6271_v27 }
 0x97b   : > { %6517 = vmatmul.bf16.gmra.mxu2 %v15853_v31  ;;  %6566 = vmatmul.bf16.gmra.mxu3 %v15854_v39 }
 0x97c   : > { %v13696_v15 = vadd.f32 %v6368_v8, %v6320_v22 }
 0x97d   : > { %v6224_v54 = vpop.f32.mrf.mxu0  ;;  %v6273_v50 = vpop.f32.mrf.mxu1 }
 0x97e   : > { %v6225_v26 = vadd.f32 %v6224_v54, %v13623_v5  ;;  %v6322_v48 = vpop.f32.mrf.mxu2  ;;  %v6371_v35 = vpop.f32.mrf.mxu3 }
 0x980   : > { %v6274_v46 = vadd.f32 %v6273_v50, %v6225_v26  ;;  %6419 = vmatmul.bf16.gmra.mxu0 %v15802_v12  ;;  %6468 = vmatmul.bf16.gmra.mxu1 %v15803_v25 }
 0x982   : > { %v6323_v7 = vadd.f32 %v6322_v48, %v6274_v46 }
 0x984   : > { %v13703_v4 = vadd.f32 %v6371_v35, %v6323_v7 }
 0x985   : > { %v6226_v47 = vpop.f32.mrf.mxu0  ;;  %v6275_v0 = vpop.f32.mrf.mxu1 }
 0x986   : > { %v6227_v56 = vadd.f32 %v6226_v47, %v13626_v6  ;;  %v6324_v31 = vpop.f32.mrf.mxu2  ;;  %v6373_v49 = vpop.f32.mrf.mxu3 }
 0x988   : > { %v6276_v41 = vadd.f32 %v6275_v0, %v6227_v56 }
 0x98a   : > { %v6325_v5 = vadd.f32 %v6324_v31, %v6276_v41 }
 0x98b   : > { %6522 = vmatmul.bf16.gmra.mxu2 %v15857_v14  ;;  %6571 = vmatmul.bf16.gmra.mxu3 %v15858_v29 }
 0x98c   : > { %v13706_v2 = vadd.f32 %v6373_v49, %v6325_v5 }
 0x98d   : > { %v6229_v39 = vpop.f32.mrf.mxu0  ;;  %v6278_v10 = vpop.f32.mrf.mxu1 }
 0x98e   : > { %v6230_v12 = vadd.f32 %v6229_v39, %v13633_v3  ;;  %v6327_v6 = vpop.f32.mrf.mxu2  ;;  %v6376_v60 = vpop.f32.mrf.mxu3 }
 0x990   : > { %v6279_v25 = vadd.f32 %v6278_v10, %v6230_v12  ;;  %6424 = vmatmul.bf16.gmra.mxu0 %v15623_v13  ;;  %6473 = vmatmul.bf16.gmra.mxu1 %v12793_v52  ;;  %v15859_v52 = vld [vmem:[#allocation257_spill] sm:$0xff] }
 0x992   : > { %v6328_v34 = vadd.f32 %v6327_v6, %v6279_v25 }
 0x994   : > { %v13713_v28 = vadd.f32 %v6376_v60, %v6328_v34 }
 0x995   : > { %v6231_v61 = vpop.f32.mrf.mxu0  ;;  %v6280_v17 = vpop.f32.mrf.mxu1 }
 0x996   : > { %v6232_v32 = vadd.f32 %v6231_v61, %v13636_v37  ;;  %v6329_v14 = vpop.f32.mrf.mxu2  ;;  %v6378_v62 = vpop.f32.mrf.mxu3  ;;  %v15862_v37 = vld [vmem:[#allocation157_spill] sm:$0xff] }
 0x998   : > { %v6281_v1 = vadd.f32 %v6280_v17, %v6232_v32 }
 0x99a   : > { %v6330_v3 = vadd.f32 %v6329_v14, %v6281_v1 }
 0x99b   : > { %6527 = vmatmul.bf16.gmra.mxu2 %v15859_v52  ;;  %6576 = vmatmul.bf16.gmra.mxu3 %v15860_v18 }
 0x99c   : > { %v13716_v21 = vadd.f32 %v6378_v62, %v6330_v3 }
 0x99d   : > { %v6234_v29 = vpop.f32.mrf.mxu0  ;;  %v6283_v13 = vpop.f32.mrf.mxu1 }
 0x99e   : > { %v6235_v23 = vadd.f32 %v6234_v29, %v13643_v53  ;;  %v6332_v24 = vpop.f32.mrf.mxu2  ;;  %v6381_v42 = vpop.f32.mrf.mxu3 }
 0x9a0   : > { %v6284_v38 = vadd.f32 %v6283_v13, %v6235_v23  ;;  %6429 = vmatmul.bf16.gmra.mxu0 %v15861_v58  ;;  %6478 = vmatmul.bf16.gmra.mxu1 %v15862_v37 }
 0x9a2   : > { %v6333_v20 = vadd.f32 %v6332_v24, %v6284_v38 }
 0x9a4   : > { %v13723_v51 = vadd.f32 %v6381_v42, %v6333_v20 }
 0x9a5   : > { %v6236_v45 = vpop.f32.mrf.mxu0  ;;  %v6285_v27 = vpop.f32.mrf.mxu1 }
 0x9a6   : > { %v6237_v59 = vadd.f32 %v6236_v45, %v13646_v30  ;;  %v6334_v8 = vpop.f32.mrf.mxu2  ;;  %v6383_v22 = vpop.f32.mrf.mxu3 }
 0x9a8   : > { %v6286_v53 = vadd.f32 %v6285_v27, %v6237_v59 }
 0x9aa   : > { %v6335_v54 = vadd.f32 %v6334_v8, %v6286_v53 }
 0x9ac   : > { %v13729_v50 = vadd.f32 %v6383_v22, %v6335_v54 }
 0x9ad   : > { %v6395_v26 = vpop.f32.mrf.mxu0  ;;  %v6444_v46 = vpop.f32.mrf.mxu1 }
 0x9ae   : > { %v6396_v30 = vadd.f32 %v6395_v26, %v13653_v55  ;;  %v6493_v35 = vpop.f32.mrf.mxu2  ;;  %v6542_v7 = vpop.f32.mrf.mxu3 }
 0x9b0   : > { %v6445_v48 = vadd.f32 %v6444_v46, %v6396_v30 }
 0x9b2   : > { %v6494_v47 = vadd.f32 %v6493_v35, %v6445_v48 }
 0x9b4   : > { %v6543_v0 = vadd.f32 %v6542_v7, %v6494_v47 }
 0x9b5   : > { %v6397_v56 = vpop.f32.mrf.mxu0  ;;  %v6446_v41 = vpop.f32.mrf.mxu1 }
 0x9b6   : > { %vm6584_vm4 = vcmp.ge.f32.partialorder %v6543_v0, 0.0  ;;  %v6617_v55 = vmul.f32 %v13282_v43, %v6543_v0  ;;  %v6398_v31 = vadd.f32 %v6397_v56, %v13656_v40  ;;  %v6495_v39 = vpop.f32.mrf.mxu2  ;;  %v6544_v10 = vpop.f32.mrf.mxu3 }
 0x9b8   : > { %v13744_v49 = vsel %vm6584_vm4, %v6543_v0, %v6617_v55  ;;  %v6447_v5 = vadd.f32 %v6446_v41, %v6398_v31 }
 0x9ba   : > { %v6496_v12 = vadd.f32 %v6495_v39, %v6447_v5 }
 0x9bc   : > { %v6545_v25 = vadd.f32 %v6544_v10, %v6496_v12 }
 0x9bd   : > { %v6400_v6 = vpop.f32.mrf.mxu0  ;;  %v6449_v60 = vpop.f32.mrf.mxu1 }
 0x9be   : > { %vm6586_vm5 = vcmp.ge.f32.partialorder %v6545_v25, 0.0  ;;  %v6619_v34 = vmul.f32 %v13282_v43, %v6545_v25  ;;  %v6401_v61 = vadd.f32 %v6400_v6, %v13663_v33  ;;  %v6498_v1 = vpop.f32.mrf.mxu2  ;;  %v6547_v14 = vpop.f32.mrf.mxu3 }
 0x9c0   : > { %v13748_v17 = vsel %vm6586_vm5, %v6545_v25, %v6619_v34  ;;  %v6450_v32 = vadd.f32 %v6449_v60, %v6401_v61 }
 0x9c2   : > { %v6499_v40 = vadd.f32 %v6498_v1, %v6450_v32 }
 0x9c4   : > { %v6548_v62 = vadd.f32 %v6547_v14, %v6499_v40 }
 0x9c5   : > { %v6402_v3 = vpop.f32.mrf.mxu0  ;;  %v6451_v29 = vpop.f32.mrf.mxu1 }
 0x9c6   : > { %vm6588_vm6 = vcmp.ge.f32.partialorder %v6548_v62, 0.0  ;;  %v6621_v13 = vmul.f32 %v13282_v43, %v6548_v62  ;;  %v6403_v52 = vadd.f32 %v6402_v3, %v13666_v19  ;;  %v6500_v38 = vpop.f32.mrf.mxu2  ;;  %v6549_v58 = vpop.f32.mrf.mxu3 }
 0x9c8   : > { %v13752_v23 = vsel %vm6588_vm6, %v6548_v62, %v6621_v13  ;;  %v6452_v18 = vadd.f32 %v6451_v29, %v6403_v52 }
 0x9c9   : > { %15864 = vst [vmem:[#allocation136_spill] sm:$0xff] %v13752_v23 }
 0x9ca   : > { %v6501_v33 = vadd.f32 %v6500_v38, %v6452_v18 }
 0x9cc   : > { %v6550_v37 = vadd.f32 %v6549_v58, %v6501_v33 }
 0x9cd   : > { %v6405_v24 = vpop.f32.mrf.mxu0  ;;  %v6454_v42 = vpop.f32.mrf.mxu1 }
 0x9ce   : > { %vm6590_vm7 = vcmp.ge.f32.partialorder %v6550_v37, 0.0  ;;  %v6623_v20 = vmul.f32 %v13282_v43, %v6550_v37  ;;  %v6406_v45 = vadd.f32 %v6405_v24, %v13673_v11  ;;  %v6503_v53 = vpop.f32.mrf.mxu2  ;;  %v6552_v8 = vpop.f32.mrf.mxu3 }
 0x9d0   : > { %v13756_v27 = vsel %vm6590_vm7, %v6550_v37, %v6623_v20  ;;  %v6455_v59 = vadd.f32 %v6454_v42, %v6406_v45 }
 0x9d1   : > { %15865 = vst [vmem:[#allocation137_spill] sm:$0xff] %v13756_v27 }
 0x9d2   : > { %v6504_v19 = vadd.f32 %v6503_v53, %v6455_v59 }
 0x9d4   : > { %v6553_v22 = vadd.f32 %v6552_v8, %v6504_v19 }
 0x9d5   : > { %v6407_v54 = vpop.f32.mrf.mxu0  ;;  %v6456_v26 = vpop.f32.mrf.mxu1 }
 0x9d6   : > { %vm6592_vm8 = vcmp.ge.f32.partialorder %v6553_v22, 0.0  ;;  %v6625_v46 = vmul.f32 %v13282_v43, %v6553_v22  ;;  %v6408_v30 = vadd.f32 %v6407_v54, %v13676_v44  ;;  %v6505_v7 = vpop.f32.mrf.mxu2  ;;  %v6554_v47 = vpop.f32.mrf.mxu3 }
 0x9d8   : > { %v13760_v48 = vsel %vm6592_vm8, %v6553_v22, %v6625_v46  ;;  %v6457_v35 = vadd.f32 %v6456_v26, %v6408_v30 }
 0x9d9   : > { %15866 = vst [vmem:[#allocation139_spill] sm:$0xff] %v13760_v48 }
 0x9da   : > { %v6506_v11 = vadd.f32 %v6505_v7, %v6457_v35 }
 0x9dc   : > { %v6555_v0 = vadd.f32 %v6554_v47, %v6506_v11 }
 0x9dd   : > { %v6410_v56 = vpop.f32.mrf.mxu0  ;;  %v6459_v41 = vpop.f32.mrf.mxu1 }
 0x9de   : > { %vm6594_vm9 = vcmp.ge.f32.partialorder %v6555_v0, 0.0  ;;  %v6627_v55 = vmul.f32 %v13282_v43, %v6555_v0  ;;  %v6411_v31 = vadd.f32 %v6410_v56, %v13683_v63  ;;  %v6508_v10 = vpop.f32.mrf.mxu2  ;;  %v6557_v12 = vpop.f32.mrf.mxu3 }
 0x9e0   : > { %v13764_v5 = vsel %vm6594_vm9, %v6555_v0, %v6627_v55  ;;  %v6460_v39 = vadd.f32 %v6459_v41, %v6411_v31 }
 0x9e1   : > { %15867 = vst [vmem:[#allocation138_spill] sm:$0xff] %v13764_v5 }
 0x9e2   : > { %v6509_v44 = vadd.f32 %v6508_v10, %v6460_v39 }
 0x9e4   : > { %v6558_v25 = vadd.f32 %v6557_v12, %v6509_v44 }
 0x9e5   : > { %v6412_v6 = vpop.f32.mrf.mxu0  ;;  %v6461_v60 = vpop.f32.mrf.mxu1 }
 0x9e6   : > { %vm6596_vm10 = vcmp.ge.f32.partialorder %v6558_v25, 0.0  ;;  %v6629_v34 = vmul.f32 %v13282_v43, %v6558_v25  ;;  %v6413_v61 = vadd.f32 %v6412_v6, %v13686_v57  ;;  %v6510_v14 = vpop.f32.mrf.mxu2  ;;  %v6559_v40 = vpop.f32.mrf.mxu3 }
 0x9e8   : > { %v13768_v32 = vsel %vm6596_vm10, %v6558_v25, %v6629_v34  ;;  %v6462_v1 = vadd.f32 %v6461_v60, %v6413_v61 }
 0x9e9   : > { %15868 = vst [vmem:[#allocation140_spill] sm:$0xff] %v13768_v32 }
 0x9ea   : > { %v6511_v63 = vadd.f32 %v6510_v14, %v6462_v1 }
 0x9ec   : > { %v6560_v62 = vadd.f32 %v6559_v40, %v6511_v63 }
 0x9ed   : > { %v6415_v3 = vpop.f32.mrf.mxu0  ;;  %v6464_v29 = vpop.f32.mrf.mxu1 }
 0x9ee   : > { %vm6598_vm11 = vcmp.ge.f32.partialorder %v6560_v62, 0.0  ;;  %v6631_v13 = vmul.f32 %v13282_v43, %v6560_v62  ;;  %v6416_v52 = vadd.f32 %v6415_v3, %v13693_v36  ;;  %v6513_v58 = vpop.f32.mrf.mxu2  ;;  %v6562_v33 = vpop.f32.mrf.mxu3 }
 0x9f0   : > { %v13772_v18 = vsel %vm6598_vm11, %v6560_v62, %v6631_v13  ;;  %v6465_v38 = vadd.f32 %v6464_v29, %v6416_v52 }
 0x9f1   : > { %15869 = vst [vmem:[#allocation141_spill] sm:$0xff] %v13772_v18 }
 0x9f2   : > { %v6514_v57 = vadd.f32 %v6513_v58, %v6465_v38 }
 0x9f4   : > { %v6563_v37 = vadd.f32 %v6562_v33, %v6514_v57 }
 0x9f5   : > { %v6417_v24 = vpop.f32.mrf.mxu0  ;;  %v6466_v42 = vpop.f32.mrf.mxu1 }
 0x9f6   : > { %vm6600_vm12 = vcmp.ge.f32.partialorder %v6563_v37, 0.0  ;;  %v6633_v20 = vmul.f32 %v13282_v43, %v6563_v37  ;;  %v6418_v45 = vadd.f32 %v6417_v24, %v13696_v15  ;;  %v6515_v8 = vpop.f32.mrf.mxu2  ;;  %v6564_v19 = vpop.f32.mrf.mxu3 }
 0x9f8   : > { %v13776_v59 = vsel %vm6600_vm12, %v6563_v37, %v6633_v20  ;;  %v6467_v53 = vadd.f32 %v6466_v42, %v6418_v45 }
 0x9f9   : > { %15870 = vst [vmem:[#allocation143_spill] sm:$0xff] %v13776_v59 }
 0x9fa   : > { %v6516_v36 = vadd.f32 %v6515_v8, %v6467_v53 }
 0x9fc   : > { %v6565_v22 = vadd.f32 %v6564_v19, %v6516_v36 }
 0x9fd   : > { %v6420_v54 = vpop.f32.mrf.mxu0  ;;  %v6469_v26 = vpop.f32.mrf.mxu1 }
 0x9fe   : > { %vm6602_vm13 = vcmp.ge.f32.partialorder %v6565_v22, 0.0  ;;  %v6635_v46 = vmul.f32 %v13282_v43, %v6565_v22  ;;  %v6421_v30 = vadd.f32 %v6420_v54, %v13703_v4  ;;  %v6518_v47 = vpop.f32.mrf.mxu2  ;;  %v6567_v11 = vpop.f32.mrf.mxu3 }
 0xa00   : > { %v13780_v35 = vsel %vm6602_vm13, %v6565_v22, %v6635_v46  ;;  %v6470_v7 = vadd.f32 %v6469_v26, %v6421_v30 }
 0xa01   : > { %15871 = vst [vmem:[#allocation142_spill] sm:$0xff] %v13780_v35 }
 0xa02   : > { %v6519_v15 = vadd.f32 %v6518_v47, %v6470_v7 }
 0xa04   : > { %v6568_v0 = vadd.f32 %v6567_v11, %v6519_v15 }
 0xa05   : > { %v6422_v56 = vpop.f32.mrf.mxu0  ;;  %v6471_v41 = vpop.f32.mrf.mxu1 }
 0xa06   : > { %vm6604_vm14 = vcmp.ge.f32.partialorder %v6568_v0, 0.0  ;;  %v6637_v55 = vmul.f32 %v13282_v43, %v6568_v0  ;;  %v6423_v31 = vadd.f32 %v6422_v56, %v13706_v2  ;;  %v6520_v12 = vpop.f32.mrf.mxu2  ;;  %v6569_v44 = vpop.f32.mrf.mxu3 }
 0xa08   : > { %v13784_v39 = vsel %vm6604_vm14, %v6568_v0, %v6637_v55  ;;  %v6472_v10 = vadd.f32 %v6471_v41, %v6423_v31 }
 0xa09   : > { %15872 = vst [vmem:[#allocation144_spill] sm:$0xff] %v13784_v39 }
 0xa0a   : > { %v6521_v4 = vadd.f32 %v6520_v12, %v6472_v10 }
 0xa0c   : > { %v6570_v25 = vadd.f32 %v6569_v44, %v6521_v4 }
 0xa0d   : > { %v6425_v6 = vpop.f32.mrf.mxu0  ;;  %v6474_v60 = vpop.f32.mrf.mxu1 }
 0xa0e   : > { %vm6606_vm15 = vcmp.ge.f32.partialorder %v6570_v25, 0.0  ;;  %v6639_v34 = vmul.f32 %v13282_v43, %v6570_v25  ;;  %v6426_v61 = vadd.f32 %v6425_v6, %v13713_v28  ;;  %v6523_v40 = vpop.f32.mrf.mxu2  ;;  %v6572_v63 = vpop.f32.mrf.mxu3 }
 0xa10   : > { %v13788_v1 = vsel %vm6606_vm15, %v6570_v25, %v6639_v34  ;;  %v6475_v14 = vadd.f32 %v6474_v60, %v6426_v61 }
 0xa11   : > { %15873 = vst [vmem:[#allocation147_spill] sm:$0xff] %v13788_v1 }
 0xa12   : > { %v6524_v2 = vadd.f32 %v6523_v40, %v6475_v14 }
 0xa14   : > { %v6573_v62 = vadd.f32 %v6572_v63, %v6524_v2 }
 0xa15   : > { %v6427_v3 = vpop.f32.mrf.mxu0  ;;  %v6476_v29 = vpop.f32.mrf.mxu1 }
 0xa16   : > { %vm6608_vm0 = vcmp.ge.f32.partialorder %v6573_v62, 0.0  ;;  %v6641_v13 = vmul.f32 %v13282_v43, %v6573_v62  ;;  %v6428_v52 = vadd.f32 %v6427_v3, %v13716_v21  ;;  %v6525_v33 = vpop.f32.mrf.mxu2  ;;  %v6574_v57 = vpop.f32.mrf.mxu3 }
 0xa18   : > { %v13792_v38 = vsel %vm6608_vm0, %v6573_v62, %v6641_v13  ;;  %v6477_v58 = vadd.f32 %v6476_v29, %v6428_v52 }
 0xa19   : > { %15874 = vst [vmem:[#allocation149_spill] sm:$0xff] %v13792_v38 }
 0xa1a   : > { %v6526_v28 = vadd.f32 %v6525_v33, %v6477_v58 }
 0xa1c   : > { %v6575_v37 = vadd.f32 %v6574_v57, %v6526_v28 }
 0xa1d   : > { %v6430_v24 = vpop.f32.mrf.mxu0  ;;  %v6479_v42 = vpop.f32.mrf.mxu1 }
 0xa1e   : > { %vm6610_vm1 = vcmp.ge.f32.partialorder %v6575_v37, 0.0  ;;  %v6643_v20 = vmul.f32 %v13282_v43, %v6575_v37  ;;  %v6431_v45 = vadd.f32 %v6430_v24, %v13723_v51  ;;  %v6528_v19 = vpop.f32.mrf.mxu2  ;;  %v6577_v36 = vpop.f32.mrf.mxu3 }
 0xa20   : > { %v13796_v53 = vsel %vm6610_vm1, %v6575_v37, %v6643_v20  ;;  %v6480_v8 = vadd.f32 %v6479_v42, %v6431_v45 }
 0xa21   : > { %15875 = vst [vmem:[#allocation148_spill] sm:$0xff] %v13796_v53 }
 0xa22   : > { %v6529_v21 = vadd.f32 %v6528_v19, %v6480_v8 }
 0xa24   : > { %v6578_v22 = vadd.f32 %v6577_v36, %v6529_v21 }
 0xa25   : > { %v6432_v54 = vpop.f32.mrf.mxu0  ;;  %v6481_v30 = vpop.f32.mrf.mxu1 }
 0xa26   : > { %vm6612_vm2 = vcmp.ge.f32.partialorder %v6578_v22, 0.0  ;;  %v6645_v26 = vmul.f32 %v13282_v43, %v6578_v22  ;;  %v6433_v46 = vadd.f32 %v6432_v54, %v13729_v50  ;;  %v6530_v11 = vpop.f32.mrf.mxu2  ;;  %v6579_v51 = vpop.f32.mrf.mxu3 }
 0xa28   : > { %v13800_v7 = vsel %vm6612_vm2, %v6578_v22, %v6645_v26  ;;  %v6482_v47 = vadd.f32 %v6481_v30, %v6433_v46 }
 0xa29   : > { %15876 = vst [vmem:[#allocation150_spill] sm:$0xff] %v13800_v7 }
 0xa2a   : > { %v6531_v15 = vadd.f32 %v6530_v11, %v6482_v47 }
 0xa2c   : > { %v6580_v0 = vadd.f32 %v6579_v51, %v6531_v15 }
 0xa2d   : > { %6697 = sbr.rel (%p13738_p13) target bundleno = 2644 (0xa54), region = 52 }
 0xa2e   : > { %vm6614_vm3 = vcmp.ge.f32.partialorder %v6580_v0, 0.0  ;;  %v6647_v56 = vmul.f32 %v13282_v43, %v6580_v0 }
 0xa30   : > { %v13803_v41 = vsel %vm6614_vm3, %v6580_v0, %v6647_v56 }
 0xa31   : > { %15877 = vst [vmem:[#allocation153_spill] sm:$0xff] %v13803_v41 }
 0xa32   : > { %v15878_v55 = vld [vmem:[#allocation221_spill] sm:$0xff]  ;;  %v15880_v12 = vld [vmem:[#allocation115_spill] sm:$0xff]  ;;  %v15881_v4 = vld [vmem:[#allocation114_spill] sm:$0xff]  ;;  %v13849_v21 = vpack.c.bf16 %v13800_v7, %v13447_v16  ;;  %v13853_v22 = vpack.c.bf16 %v13803_v41, %v13454_v9 }
 0xa33   : > { %v6698_v31 = vpack.c.bf16 %v13744_v49, %v15878_v55  ;;  %v15879_v50 = vld [vmem:[#allocation113_spill] sm:$0xff]  ;;  %v6700_v44 = vpack.c.bf16 %v13752_v23, %v15880_v12  ;;  %v6701_v25 = vpack.c.bf16 %v13756_v27, %v15881_v4  ;;  %v15882_v43 = vld [vmem:[#allocation116_spill] sm:$0xff]  ;;  %v15883_v60 = vld [vmem:[#allocation119_spill] sm:$0xff] }
 0xa34   : > { %v6699_v10 = vpack.c.bf16 %v13748_v17, %v15879_v50  ;;  %v6702_v6 = vpack.c.bf16 %v13760_v48, %v15882_v43  ;;  %v6703_v34 = vpack.c.bf16 %v13764_v5, %v15883_v60  ;;  %v15884_v61 = vld [vmem:[#allocation121_spill] sm:$0xff]  ;;  %v15885_v40 = vld [vmem:[#allocation120_spill] sm:$0xff]  ;;  %v15886_v2 = vld [vmem:[#allocation122_spill] sm:$0xff]  ;;  %6809 = vst [vmem:[#allocation2 + $0x80] sm:$0xff] %v13849_v21 }
 0xa35   : > { %6795 = vst [vmem:[#allocation2 + $0x10] sm:$0xff] %v6698_v31  ;;  %v6704_v14 = vpack.c.bf16 %v13768_v32, %v15884_v61  ;;  %v6705_v63 = vpack.c.bf16 %v13772_v18, %v15885_v40  ;;  %v13825_v62 = vpack.c.bf16 %v13776_v59, %v15886_v2  ;;  %v15887_v3 = vld [vmem:[#allocation127_spill] sm:$0xff]  ;;  %v6714_v13 = vunpack.c.l.bf16 %v6698_v31  ;;  %v15888_v58 = vld [vmem:[#allocation129_spill] sm:$0xff]  ;;  %v15889_v57 = vld [vmem:[#allocation128_spill] sm:$0xff] }
 0xa36   : > { %6796 = vst [vmem:[#allocation2 + $0x18] sm:$0xff] %v6699_v10  ;;  %v13829_v29 = vpack.c.bf16 %v13780_v35, %v15887_v3  ;;  %v6715_v52 = vunpack.c.h.bf16 %v6698_v31  ;;  %v13833_v33 = vpack.c.bf16 %v13784_v39, %v15888_v58  ;;  %v13837_v28 = vpack.c.bf16 %v13788_v1, %v15889_v57  ;;  %v15890_v42 = vld [vmem:[#allocation130_spill] sm:$0xff]  ;;  %v15891_v45 = vld [vmem:[#allocation133_spill] sm:$0xff] }
 0xa37   : > { %6797 = vst [vmem:[#allocation2 + $0x20] sm:$0xff] %v6700_v44  ;;  %v6716_v37 = vunpack.c.l.bf16 %v6699_v10  ;;  %v6717_v24 = vunpack.c.h.bf16 %v6699_v10  ;;  %v13841_v20 = vpack.c.bf16 %v13792_v38, %v15890_v42  ;;  %v13845_v8 = vpack.c.bf16 %v13796_v53, %v15891_v45 }
 0xa38   : > { %6798 = vst [vmem:[#allocation2 + $0x28] sm:$0xff] %v6701_v25  ;;  %v6718_v19 = vunpack.c.l.bf16 %v6700_v44  ;;  %v6719_v36 = vunpack.c.h.bf16 %v6700_v44  ;;  %v6720_v54 = vunpack.c.l.bf16 %v6701_v25  ;;  %v6721_v26 = vunpack.c.h.bf16 %v6701_v25 }
 0xa39   : > { %6799 = vst [vmem:[#allocation2 + $0x30] sm:$0xff] %v6702_v6  ;;  %v6746_v46 = vsub.f32 %v15878_v55, %v6714_v13  ;;  %v6747_v30 = vsub.f32 %v13744_v49, %v6715_v52  ;;  %v6722_v47 = vunpack.c.l.bf16 %v6702_v6  ;;  %v6723_v11 = vunpack.c.h.bf16 %v6702_v6 }
 0xa3a   : > { %6800 = vst [vmem:[#allocation2 + $0x38] sm:$0xff] %v6703_v34  ;;  %v6748_v15 = vsub.f32 %v15879_v50, %v6716_v37  ;;  %v6749_v51 = vsub.f32 %v13748_v17, %v6717_v24  ;;  %v6724_v0 = vunpack.c.l.bf16 %v6703_v34  ;;  %v6725_v56 = vunpack.c.h.bf16 %v6703_v34 }
 0xa3b   : > { %6801 = vst [vmem:[#allocation2 + $0x40] sm:$0xff] %v6704_v14  ;;  %v6750_v31 = vsub.f32 %v15880_v12, %v6718_v19  ;;  %v6751_v10 = vsub.f32 %v13752_v23, %v6719_v36  ;;  %v6726_v44 = vunpack.c.l.bf16 %v6704_v14  ;;  %v6727_v25 = vunpack.c.h.bf16 %v6704_v14 }
 0xa3c   : > { %6802 = vst [vmem:[#allocation2 + $0x48] sm:$0xff] %v6705_v63  ;;  %v6752_v55 = vsub.f32 %v15881_v4, %v6720_v54  ;;  %v6753_v6 = vsub.f32 %v13756_v27, %v6721_v26  ;;  %v6728_v13 = vunpack.c.l.bf16 %v6705_v63  ;;  %v6729_v50 = vunpack.c.h.bf16 %v6705_v63 }
 0xa3d   : > { %6803 = vst [vmem:[#allocation2 + $0x50] sm:$0xff] %v13825_v62  ;;  %v6754_v34 = vsub.f32 %v15882_v43, %v6722_v47  ;;  %v6755_v52 = vsub.f32 %v13760_v48, %v6723_v11  ;;  %v6756_v12 = vsub.f32 %v15883_v60, %v6724_v0  ;;  %v6757_v37 = vsub.f32 %v13764_v5, %v6725_v56 }
 0xa3e   : > { %6804 = vst [vmem:[#allocation2 + $0x58] sm:$0xff] %v13829_v29  ;;  %v6778_v14 = vpack.c.bf16 %v6747_v30, %v6746_v46  ;;  %v6758_v24 = vsub.f32 %v15884_v61, %v6726_v44  ;;  %v6759_v4 = vsub.f32 %v13768_v32, %v6727_v25  ;;  %v6730_v19 = vunpack.c.l.bf16 %v13825_v62 }
 0xa3f   : > { %6805 = vst [vmem:[#allocation2 + $0x60] sm:$0xff] %v13833_v33  ;;  %v6779_v63 = vpack.c.bf16 %v6749_v51, %v6748_v15  ;;  %v6760_v43 = vsub.f32 %v15885_v40, %v6728_v13  ;;  %v6761_v36 = vsub.f32 %v13772_v18, %v6729_v50  ;;  %v6731_v60 = vunpack.c.h.bf16 %v13825_v62 }
 0xa40   : > { %6806 = vst [vmem:[#allocation2 + $0x68] sm:$0xff] %v13837_v28  ;;  %v6780_v54 = vpack.c.bf16 %v6751_v10, %v6750_v31  ;;  %v6781_v26 = vpack.c.bf16 %v6753_v6, %v6752_v55  ;;  %v6732_v46 = vunpack.c.l.bf16 %v13829_v29  ;;  %v6733_v61 = vunpack.c.h.bf16 %v13829_v29 }
 0xa41   : > { %6807 = vst [vmem:[#allocation2 + $0x70] sm:$0xff] %v13841_v20  ;;  %v6782_v30 = vpack.c.bf16 %v6755_v52, %v6754_v34  ;;  %v6783_v47 = vpack.c.bf16 %v6757_v37, %v6756_v12  ;;  %v6734_v11 = vunpack.c.l.bf16 %v13833_v33  ;;  %v6735_v40 = vunpack.c.h.bf16 %v13833_v33 }
 0xa42   : > { %6808 = vst [vmem:[#allocation2 + $0x78] sm:$0xff] %v13845_v8  ;;  %v6784_v15 = vpack.c.bf16 %v6759_v4, %v6758_v24  ;;  %v6762_v62 = vsub.f32 %v15886_v2, %v6730_v19  ;;  %v6736_v51 = vunpack.c.l.bf16 %v13837_v28  ;;  %v6737_v0 = vunpack.c.h.bf16 %v13837_v28 }
 0xa43   : > { %6810 = vst [vmem:[#allocation2 + $0x88] sm:$0xff] %v13853_v22  ;;  %v6785_v56 = vpack.c.bf16 %v6761_v36, %v6760_v43  ;;  %v6763_v29 = vsub.f32 %v13776_v59, %v6731_v60  ;;  %v6738_v31 = vunpack.c.l.bf16 %v13841_v20  ;;  %v6739_v10 = vunpack.c.h.bf16 %v13841_v20 }
 0xa44   : > { %6812 = vst [vmem:[#allocation3 + $0x10] sm:$0xff] %v6778_v14  ;;  %v6764_v33 = vsub.f32 %v15887_v3, %v6732_v46  ;;  %v6765_v44 = vsub.f32 %v13780_v35, %v6733_v61  ;;  %v6740_v25 = vunpack.c.l.bf16 %v13845_v8  ;;  %v6741_v2 = vunpack.c.h.bf16 %v13845_v8 }
 0xa45   : > { %6813 = vst [vmem:[#allocation3 + $0x18] sm:$0xff] %v6779_v63  ;;  %v6766_v28 = vsub.f32 %v15888_v58, %v6734_v11  ;;  %v6767_v55 = vsub.f32 %v13784_v39, %v6735_v40  ;;  %v6742_v6 = vunpack.c.l.bf16 %v13849_v21  ;;  %v6743_v13 = vunpack.c.h.bf16 %v13849_v21 }
 0xa46   : > { %6814 = vst [vmem:[#allocation3 + $0x20] sm:$0xff] %v6780_v54  ;;  %v6768_v20 = vsub.f32 %v15889_v57, %v6736_v51  ;;  %v6769_v3 = vsub.f32 %v13788_v1, %v6737_v0  ;;  %v6744_v50 = vunpack.c.l.bf16 %v13853_v22  ;;  %v6745_v34 = vunpack.c.h.bf16 %v13853_v22 }
 0xa47   : > { %6815 = vst [vmem:[#allocation3 + $0x28] sm:$0xff] %v6781_v26  ;;  %v6786_v8 = vpack.c.bf16 %v6763_v29, %v6762_v62  ;;  %v6770_v52 = vsub.f32 %v15890_v42, %v6738_v31  ;;  %v6771_v58 = vsub.f32 %v13792_v38, %v6739_v10  ;;  %v6787_v12 = vpack.c.bf16 %v6765_v44, %v6764_v33 }
 0xa48   : > { %6816 = vst [vmem:[#allocation3 + $0x30] sm:$0xff] %v6782_v30  ;;  %v6772_v37 = vsub.f32 %v15891_v45, %v6740_v25  ;;  %v6773_v21 = vsub.f32 %v13796_v53, %v6741_v2  ;;  %v6788_v57 = vpack.c.bf16 %v6767_v55, %v6766_v28  ;;  %v6774_v14 = vsub.f32 %v13447_v16, %v6742_v6 }
 0xa49   : > { %6817 = vst [vmem:[#allocation3 + $0x38] sm:$0xff] %v6783_v47  ;;  %v6775_v24 = vsub.f32 %v13800_v7, %v6743_v13  ;;  %v6789_v22 = vpack.c.bf16 %v6769_v3, %v6768_v20  ;;  %v6776_v4 = vsub.f32 %v13454_v9, %v6744_v50  ;;  %v6777_v42 = vsub.f32 %v13803_v41, %v6745_v34 }
 0xa4a   : > { %6818 = vst [vmem:[#allocation3 + $0x40] sm:$0xff] %v6784_v15  ;;  %v6790_v19 = vpack.c.bf16 %v6771_v58, %v6770_v52  ;;  %v6791_v63 = vpack.c.bf16 %v6773_v21, %v6772_v37 }
 0xa4b   : > { %6819 = vst [vmem:[#allocation3 + $0x48] sm:$0xff] %v6785_v56  ;;  %v6792_v45 = vpack.c.bf16 %v6775_v24, %v6774_v14  ;;  %v6793_v43 = vpack.c.bf16 %v6777_v42, %v6776_v4 }
 0xa4c   : > { %6820 = vst [vmem:[#allocation3 + $0x50] sm:$0xff] %v6786_v8 }
 0xa4d   : > { %6821 = vst [vmem:[#allocation3 + $0x58] sm:$0xff] %v6787_v12 }
 0xa4e   : > { %6822 = vst [vmem:[#allocation3 + $0x60] sm:$0xff] %v6788_v57 }
 0xa4f   : > { %6823 = vst [vmem:[#allocation3 + $0x68] sm:$0xff] %v6789_v22 }
 0xa50   : > { %6824 = vst [vmem:[#allocation3 + $0x70] sm:$0xff] %v6790_v19 }
 0xa51   : > { %6825 = vst [vmem:[#allocation3 + $0x78] sm:$0xff] %v6791_v63 }
 0xa52   : > { %6826 = vst [vmem:[#allocation3 + $0x80] sm:$0xff] %v6792_v45 }
 0xa53   : > { %6827 = vst [vmem:[#allocation3 + $0x88] sm:$0xff] %v6793_v43 }
 0xa54 PF: > { %p6828_p0 = scmp.eq.s32.totalorder %s15943_s21, 1 }
 0xa56   : > { %p6829_p1 = pnand %p6828_p0, %p6680_p9 }
 0xa58   : > { %6832 = sbr.rel (%p6829_p1) target bundleno = 2720 (0xaa0), region = 56 }
 0xa5d   : > { %v6833_v36 = vld [vmem:[#allocation4 + $0xb0] sm:$0xff]  ;;  %v6834_v60 = vld [vmem:[#allocation4] sm:$0xff]  ;;  %v6835_v54 = vld [vmem:[#allocation4 + $0xd8] sm:$0xff] }
 0xa5e   : > { %v15892_v26 = vld [vmem:[#allocation221_spill] sm:$0xff]  ;;  %v13918_v61 = vadd.f32 %v6834_v60, %v13744_v49  ;;  %v6836_v30 = vld [vmem:[#allocation4 + $0x18] sm:$0xff]  ;;  %v6837_v40 = vld [vmem:[#allocation4 + $0x50] sm:$0xff] }
 0xa5f   : > { %v13915_v46 = vadd.f32 %v6833_v36, %v15892_v26  ;;  %v15893_v47 = vld [vmem:[#allocation113_spill] sm:$0xff]  ;;  %v6838_v15 = vld [vmem:[#allocation4 + $0x68] sm:$0xff]  ;;  %v13924_v62 = vadd.f32 %v6836_v30, %v13748_v17  ;;  %v15894_v0 = vld [vmem:[#allocation115_spill] sm:$0xff] }
 0xa60   : > { %v13921_v11 = vadd.f32 %v6835_v54, %v15893_v47  ;;  %v13932_v56 = vadd.f32 %v6837_v40, %v15894_v0  ;;  %v13935_v29 = vadd.f32 %v6838_v15, %v13752_v23  ;;  %v6839_v31 = vld [vmem:[#allocation4 + $0x30] sm:$0xff]  ;;  %v6840_v10 = vld [vmem:[#allocation4 + $0x48] sm:$0xff]  ;;  %7028 = vst [vmem:[#allocation4] sm:$0xff] %v13918_v61  ;;  %v6841_v28 = vld [vmem:[#allocation4 + $0x80] sm:$0xff] }
 0xa61   : > { %v13928_v51 = vpack.c.bf16 %v13918_v61, %v13915_v46  ;;  %7027 = vst [vmem:[#allocation4 + $0xb0] sm:$0xff] %v13915_v46  ;;  %v15895_v44 = vld [vmem:[#allocation114_spill] sm:$0xff]  ;;  %v13948_v2 = vadd.f32 %v6840_v10, %v13756_v27  ;;  %v15896_v13 = vld [vmem:[#allocation116_spill] sm:$0xff]  ;;  %v15897_v52 = vld [vmem:[#allocation119_spill] sm:$0xff] }
 0xa62   : > { %v13940_v33 = vpack.c.bf16 %v13924_v62, %v13921_v11  ;;  %v13945_v25 = vadd.f32 %v6839_v31, %v15895_v44  ;;  %v6842_v55 = vld [vmem:[#allocation4 + $0x88] sm:$0xff]  ;;  %7029 = vst [vmem:[#allocation4 + $0xd8] sm:$0xff] %v13921_v11  ;;  %v13953_v6 = vpack.c.bf16 %v13935_v29, %v13932_v56  ;;  %v13958_v20 = vadd.f32 %v6841_v28, %v15896_v13  ;;  %v6844_v34 = vld [vmem:[#allocation4 + $0xb8] sm:$0xff]  ;;  %v6845_v37 = vld [vmem:[#allocation4 + $0x60] sm:$0xff] }
 0xa63   : > { %6994 = vst [vmem:[#allocation2 + $0x10] sm:$0xff] %v13928_v51  ;;  %v13961_v3 = vadd.f32 %v6842_v55, %v13760_v48  ;;  %v6843_v50 = vld [vmem:[#allocation4 + $0xe8] sm:$0xff]  ;;  %v13974_v12 = vadd.f32 %v6844_v34, %v13764_v5  ;;  %v6846_v21 = vld [vmem:[#allocation4 + $0xf0] sm:$0xff]  ;;  %v15898_v14 = vld [vmem:[#allocation121_spill] sm:$0xff] }
 0xa64   : > { %6995 = vst [vmem:[#allocation2 + $0x18] sm:$0xff] %v13940_v33  ;;  %v13966_v8 = vpack.c.bf16 %v13948_v2, %v13945_v25  ;;  %v13971_v58 = vadd.f32 %v6843_v50, %v15897_v52  ;;  %v13984_v24 = vadd.f32 %v6845_v37, %v15898_v14  ;;  %v13987_v22 = vadd.f32 %v6846_v21, %v13768_v32  ;;  %v6847_v4 = vld [vmem:[#allocation4 + $0x8] sm:$0xff]  ;;  %v6848_v42 = vld [vmem:[#allocation4 + $0x78] sm:$0xff]  ;;  %v6851_v40 = vld [vmem:[#allocation4 + $0x40] sm:$0xff] }
 0xa65   : > { %7030 = vst [vmem:[#allocation4 + $0x18] sm:$0xff] %v13924_v62  ;;  %v13979_v57 = vpack.c.bf16 %v13961_v3, %v13958_v20  ;;  %v15899_v63 = vld [vmem:[#allocation120_spill] sm:$0xff]  ;;  %v14000_v43 = vadd.f32 %v6848_v42, %v13772_v18  ;;  %v15900_v26 = vld [vmem:[#allocation122_spill] sm:$0xff]  ;;  %v15901_v31 = vld [vmem:[#allocation127_spill] sm:$0xff] }
 0xa66   : > { %6996 = vst [vmem:[#allocation2 + $0x20] sm:$0xff] %v13953_v6  ;;  %v13992_v19 = vpack.c.bf16 %v13974_v12, %v13971_v58  ;;  %v13997_v45 = vadd.f32 %v6847_v4, %v15899_v63  ;;  %v6849_v36 = vld [vmem:[#allocation4 + $0x38] sm:$0xff]  ;;  %v14005_v54 = vpack.c.bf16 %v13987_v22, %v13984_v24  ;;  %v6852_v15 = vld [vmem:[#allocation4 + $0xc8] sm:$0xff]  ;;  %v14023_v10 = vadd.f32 %v6851_v40, %v15901_v31  ;;  %v6853_v28 = vld [vmem:[#allocation4 + $0xe0] sm:$0xff] }
 0xa67   : > { %7031 = vst [vmem:[#allocation4 + $0x50] sm:$0xff] %v13932_v56  ;;  %v6850_v60 = vld [vmem:[#allocation4 + $0x58] sm:$0xff]  ;;  %v14010_v30 = vadd.f32 %v6849_v36, %v15900_v26  ;;  %v14026_v44 = vadd.f32 %v6852_v15, %v13780_v35  ;;  %v6854_v55 = vld [vmem:[#allocation4 + $0x90] sm:$0xff]  ;;  %v15902_v50 = vld [vmem:[#allocation129_spill] sm:$0xff]  ;;  %v6922_v18 = vunpack.c.h.bf16 %v13979_v57 }
 0xa68   : > { %7032 = vst [vmem:[#allocation4 + $0x68] sm:$0xff] %v13935_v29  ;;  %v14013_v47 = vadd.f32 %v6850_v60, %v13776_v59  ;;  %v14018_v0 = vpack.c.bf16 %v14000_v43, %v13997_v45  ;;  %v14036_v34 = vadd.f32 %v6853_v28, %v15902_v50  ;;  %v14039_v52 = vadd.f32 %v6854_v55, %v13784_v39  ;;  %v6855_v37 = vld [vmem:[#allocation4 + $0x70] sm:$0xff]  ;;  %v6856_v21 = vld [vmem:[#allocation4 + $0xc0] sm:$0xff]  ;;  %v15903_v4 = vld [vmem:[#allocation128_spill] sm:$0xff] }
 0xa69   : > { %6997 = vst [vmem:[#allocation2 + $0x28] sm:$0xff] %v13966_v8  ;;  %v14044_v14 = vpack.c.bf16 %v14026_v44, %v14023_v10  ;;  %v14049_v42 = vadd.f32 %v6855_v37, %v15903_v4  ;;  %v14052_v63 = vadd.f32 %v6856_v21, %v13788_v1  ;;  %v6857_v36 = vld [vmem:[#allocation4 + $0xa8] sm:$0xff]  ;;  %v6858_v60 = vld [vmem:[#allocation4 + $0xd0] sm:$0xff]  ;;  %v6861_v31 = vld [vmem:[#allocation4 + $0xa0] sm:$0xff]  ;;  %v6923_v32 = vunpack.c.l.bf16 %v13992_v19 }
 0xa6a   : > { %7033 = vst [vmem:[#allocation4 + $0x30] sm:$0xff] %v13945_v25  ;;  %v14031_v13 = vpack.c.bf16 %v14013_v47, %v14010_v30  ;;  %v14057_v26 = vpack.c.bf16 %v14039_v52, %v14036_v34  ;;  %v6859_v40 = vld [vmem:[#allocation4 + $0x10] sm:$0xff]  ;;  %v6860_v15 = vld [vmem:[#allocation4 + $0x28] sm:$0xff]  ;;  %v6862_v28 = vld [vmem:[#allocation4 + $0xf8] sm:$0xff]  ;;  %v14065_v4 = vadd.f32 %v6858_v60, %v13792_v38  ;;  %v6925_v48 = vunpack.c.l.bf16 %v14005_v54 }
 0xa6b   : > { %7034 = vst [vmem:[#allocation4 + $0x48] sm:$0xff] %v13948_v2  ;;  %v6863_v55 = vld [vmem:[#allocation4 + $0x20] sm:$0xff]  ;;  %v6864_v50 = vld [vmem:[#allocation4 + $0x98] sm:$0xff]  ;;  %v15904_v37 = vld [vmem:[#allocation130_spill] sm:$0xff]  ;;  %v14070_v1 = vpack.c.bf16 %v14052_v63, %v14049_v42  ;;  %v14076_v59 = vadd.f32 %v6860_v15, %v13796_v53  ;;  %v14083_v60 = vadd.f32 %v6862_v28, %v13800_v7  ;;  %v6913_v15 = vunpack.c.l.bf16 %v13928_v51 }
 0xa6c   : > { %6998 = vst [vmem:[#allocation2 + $0x30] sm:$0xff] %v13979_v57  ;;  %v14062_v21 = vadd.f32 %v6857_v36, %v15904_v37  ;;  %v15905_v39 = vld [vmem:[#allocation133_spill] sm:$0xff]  ;;  %v14080_v36 = vadd.f32 %v6861_v31, %v13447_v16  ;;  %v14086_v37 = vadd.f32 %v6863_v55, %v13454_v9  ;;  %v14089_v38 = vadd.f32 %v6864_v50, %v13803_v41 }
 0xa6d   : > { %7035 = vst [vmem:[#allocation4 + $0x80] sm:$0xff] %v13958_v20  ;;  %v14073_v35 = vadd.f32 %v6859_v40, %v15905_v39  ;;  %v6914_v31 = vunpack.c.h.bf16 %v13928_v51  ;;  %v6915_v50 = vunpack.c.l.bf16 %v13940_v33  ;;  %v6916_v41 = vunpack.c.h.bf16 %v13940_v33 }
 0xa6e   : > { %7036 = vst [vmem:[#allocation4 + $0x88] sm:$0xff] %v13961_v3  ;;  %v14095_v39 = vpack.c.bf16 %v14065_v4, %v14062_v21  ;;  %v14107_v28 = vpack.c.bf16 %v14083_v60, %v14080_v36  ;;  %v14111_v55 = vpack.c.bf16 %v14089_v38, %v14086_v37  ;;  %v6917_v9 = vunpack.c.l.bf16 %v13953_v6 }
 0xa6f   : > { %6999 = vst [vmem:[#allocation2 + $0x38] sm:$0xff] %v13992_v19  ;;  %v14100_v40 = vpack.c.bf16 %v14076_v59, %v14073_v35  ;;  %v6918_v51 = vunpack.c.h.bf16 %v13953_v6  ;;  %v6919_v7 = vunpack.c.l.bf16 %v13966_v8  ;;  %v6920_v16 = vunpack.c.h.bf16 %v13966_v8 }
 0xa70   : > { %7037 = vst [vmem:[#allocation4 + $0xe8] sm:$0xff] %v13971_v58  ;;  %v6921_v53 = vunpack.c.l.bf16 %v13979_v57  ;;  %v6924_v33 = vunpack.c.h.bf16 %v13992_v19  ;;  %v6945_v5 = vsub.f32 %v13915_v46, %v6913_v15  ;;  %v6946_v6 = vsub.f32 %v13918_v61, %v6914_v31 }
 0xa71   : > { %7038 = vst [vmem:[#allocation4 + $0xb8] sm:$0xff] %v13974_v12  ;;  %v6926_v8 = vunpack.c.h.bf16 %v14005_v54  ;;  %v6947_v27 = vsub.f32 %v13921_v11, %v6915_v50  ;;  %v6948_v57 = vsub.f32 %v13924_v62, %v6916_v41  ;;  %v6927_v23 = vunpack.c.l.bf16 %v14018_v0 }
 0xa72   : > { %7000 = vst [vmem:[#allocation2 + $0x40] sm:$0xff] %v14005_v54  ;;  %v6928_v19 = vunpack.c.h.bf16 %v14018_v0  ;;  %v6949_v46 = vsub.f32 %v13932_v56, %v6917_v9  ;;  %v6950_v61 = vsub.f32 %v13935_v29, %v6918_v51  ;;  %v6951_v15 = vsub.f32 %v13945_v25, %v6919_v7 }
 0xa73   : > { %7039 = vst [vmem:[#allocation4 + $0x60] sm:$0xff] %v13984_v24  ;;  %v6952_v54 = vsub.f32 %v13948_v2, %v6920_v16  ;;  %v6953_v11 = vsub.f32 %v13958_v20, %v6921_v53  ;;  %v6954_v41 = vsub.f32 %v13961_v3, %v6922_v18  ;;  %v6955_v62 = vsub.f32 %v13971_v58, %v6923_v32 }
 0xa74   : > { %7040 = vst [vmem:[#allocation4 + $0xf0] sm:$0xff] %v13987_v22  ;;  %v6977_v31 = vpack.c.bf16 %v6946_v6, %v6945_v5  ;;  %v6957_v9 = vsub.f32 %v13984_v24, %v6925_v48  ;;  %v6958_v56 = vsub.f32 %v13987_v22, %v6926_v8  ;;  %v6929_v7 = vunpack.c.l.bf16 %v14031_v13 }
 0xa75   : > { %7001 = vst [vmem:[#allocation2 + $0x48] sm:$0xff] %v14018_v0  ;;  %v6956_v0 = vsub.f32 %v13974_v12, %v6924_v33  ;;  %v6978_v16 = vpack.c.bf16 %v6948_v57, %v6947_v27  ;;  %v6959_v53 = vsub.f32 %v13997_v45, %v6927_v23  ;;  %v6960_v18 = vsub.f32 %v14000_v43, %v6928_v19 }
 0xa76   : > { %7041 = vst [vmem:[#allocation4 + $0x8] sm:$0xff] %v13997_v45  ;;  %v6930_v32 = vunpack.c.h.bf16 %v14031_v13  ;;  %v6979_v29 = vpack.c.bf16 %v6950_v61, %v6949_v46  ;;  %v6980_v25 = vpack.c.bf16 %v6952_v54, %v6951_v15  ;;  %v6931_v5 = vunpack.c.l.bf16 %v14044_v14 }
 0xa77   : > { %7042 = vst [vmem:[#allocation4 + $0x78] sm:$0xff] %v14000_v43  ;;  %v6932_v48 = vunpack.c.h.bf16 %v14044_v14  ;;  %v6981_v2 = vpack.c.bf16 %v6954_v41, %v6953_v11  ;;  %v6982_v20 = vpack.c.bf16 %v6956_v0, %v6955_v62  ;;  %v6933_v27 = vunpack.c.l.bf16 %v14057_v26 }
 0xa78   : > { %7002 = vst [vmem:[#allocation2 + $0x50] sm:$0xff] %v14031_v13  ;;  %v6934_v23 = vunpack.c.h.bf16 %v14057_v26  ;;  %v6983_v3 = vpack.c.bf16 %v6958_v56, %v6957_v9  ;;  %v6961_v58 = vsub.f32 %v14010_v30, %v6929_v7  ;;  %v6935_v12 = vunpack.c.l.bf16 %v14070_v1 }
 0xa79   : > { %7043 = vst [vmem:[#allocation4 + $0x38] sm:$0xff] %v14010_v30  ;;  %v6936_v24 = vunpack.c.h.bf16 %v14070_v1  ;;  %v6984_v22 = vpack.c.bf16 %v6960_v18, %v6959_v53  ;;  %v6962_v45 = vsub.f32 %v14013_v47, %v6930_v32  ;;  %v6937_v43 = vunpack.c.l.bf16 %v14095_v39 }
 0xa7a   : > { %7044 = vst [vmem:[#allocation4 + $0x58] sm:$0xff] %v14013_v47  ;;  %v6938_v13 = vunpack.c.h.bf16 %v14095_v39  ;;  %v6939_v50 = vunpack.c.l.bf16 %v14100_v40  ;;  %v6940_v30 = vunpack.c.h.bf16 %v14100_v40  ;;  %v6966_v51 = vsub.f32 %v14039_v52, %v6934_v23 }
 0xa7b   : > { %7003 = vst [vmem:[#allocation2 + $0x58] sm:$0xff] %v14044_v14  ;;  %v6963_v14 = vsub.f32 %v14023_v10, %v6931_v5  ;;  %v6941_v47 = vunpack.c.l.bf16 %v14107_v28  ;;  %v6942_v33 = vunpack.c.h.bf16 %v14107_v28  ;;  %v6944_v6 = vunpack.c.h.bf16 %v14111_v55 }
 0xa7c   : > { %7045 = vst [vmem:[#allocation4 + $0x40] sm:$0xff] %v14023_v10  ;;  %v6968_v10 = vsub.f32 %v14052_v63, %v6936_v24  ;;  %v6969_v8 = vsub.f32 %v14062_v21, %v6937_v43  ;;  %v6971_v57 = vsub.f32 %v14073_v35, %v6939_v50 }
 0xa7d   : > { %7046 = vst [vmem:[#allocation4 + $0xc8] sm:$0xff] %v14026_v44  ;;  %v6974_v19 = vsub.f32 %v14083_v60, %v6942_v33 }
 0xa7e   : > { %7004 = vst [vmem:[#allocation2 + $0x60] sm:$0xff] %v14057_v26  ;;  %v6964_v26 = vsub.f32 %v14026_v44, %v6932_v48  ;;  %v6943_v44 = vunpack.c.l.bf16 %v14111_v55 }
 0xa7f   : > { %7047 = vst [vmem:[#allocation4 + $0xe0] sm:$0xff] %v14036_v34 }
 0xa80   : > { %7048 = vst [vmem:[#allocation4 + $0x90] sm:$0xff] %v14039_v52  ;;  %v6986_v52 = vpack.c.bf16 %v6964_v26, %v6963_v14  ;;  %v6975_v46 = vsub.f32 %v14086_v37, %v6943_v44 }
 0xa81   : > { %7005 = vst [vmem:[#allocation2 + $0x68] sm:$0xff] %v14070_v1  ;;  %v6965_v1 = vsub.f32 %v14036_v34, %v6933_v27  ;;  %v6970_v34 = vsub.f32 %v14065_v4, %v6938_v13 }
 0xa82   : > { %7049 = vst [vmem:[#allocation4 + $0x70] sm:$0xff] %v14049_v42 }
 0xa83   : > { %7050 = vst [vmem:[#allocation4 + $0xc0] sm:$0xff] %v14052_v63  ;;  %v6973_v63 = vsub.f32 %v14080_v36, %v6941_v47 }
 0xa84   : > { %7006 = vst [vmem:[#allocation2 + $0x70] sm:$0xff] %v14095_v39  ;;  %v6967_v39 = vsub.f32 %v14049_v42, %v6935_v12  ;;  %v6987_v42 = vpack.c.bf16 %v6966_v51, %v6965_v1 }
 0xa85   : > { %7051 = vst [vmem:[#allocation4 + $0xa8] sm:$0xff] %v14062_v21  ;;  %v6976_v21 = vsub.f32 %v14089_v38, %v6944_v6 }
 0xa86   : > { %7052 = vst [vmem:[#allocation4 + $0xd0] sm:$0xff] %v14065_v4  ;;  %v6989_v4 = vpack.c.bf16 %v6970_v34, %v6969_v8 }
 0xa87   : > { %7007 = vst [vmem:[#allocation2 + $0x78] sm:$0xff] %v14100_v40  ;;  %v6985_v40 = vpack.c.bf16 %v6962_v45, %v6961_v58 }
 0xa88   : > { %7053 = vst [vmem:[#allocation4 + $0x10] sm:$0xff] %v14073_v35  ;;  %v6991_v35 = vpack.c.bf16 %v6974_v19, %v6973_v63 }
 0xa89   : > { %7054 = vst [vmem:[#allocation4 + $0x28] sm:$0xff] %v14076_v59 }
 0xa8a   : > { %7008 = vst [vmem:[#allocation2 + $0x80] sm:$0xff] %v14107_v28  ;;  %v6972_v28 = vsub.f32 %v14076_v59, %v6940_v30  ;;  %v6992_v59 = vpack.c.bf16 %v6976_v21, %v6975_v46 }
 0xa8b   : > { %7055 = vst [vmem:[#allocation4 + $0xa0] sm:$0xff] %v14080_v36 }
 0xa8c   : > { %7056 = vst [vmem:[#allocation4 + $0xf8] sm:$0xff] %v14083_v60  ;;  %v6990_v61 = vpack.c.bf16 %v6972_v28, %v6971_v57 }
 0xa8d   : > { %7009 = vst [vmem:[#allocation2 + $0x88] sm:$0xff] %v14111_v55  ;;  %v6988_v55 = vpack.c.bf16 %v6968_v10, %v6967_v39 }
 0xa8e   : > { %7057 = vst [vmem:[#allocation4 + $0x20] sm:$0xff] %v14086_v37 }
 0xa8f   : > { %7058 = vst [vmem:[#allocation4 + $0x98] sm:$0xff] %v14089_v38 }
 0xa90   : > { %7011 = vst [vmem:[#allocation3 + $0x10] sm:$0xff] %v6977_v31 }
 0xa91   : > { %7012 = vst [vmem:[#allocation3 + $0x18] sm:$0xff] %v6978_v16 }
 0xa92   : > { %7013 = vst [vmem:[#allocation3 + $0x20] sm:$0xff] %v6979_v29 }
 0xa93   : > { %7014 = vst [vmem:[#allocation3 + $0x28] sm:$0xff] %v6980_v25 }
 0xa94   : > { %7015 = vst [vmem:[#allocation3 + $0x30] sm:$0xff] %v6981_v2 }
 0xa95   : > { %7016 = vst [vmem:[#allocation3 + $0x38] sm:$0xff] %v6982_v20 }
 0xa96   : > { %7017 = vst [vmem:[#allocation3 + $0x40] sm:$0xff] %v6983_v3 }
 0xa97   : > { %7018 = vst [vmem:[#allocation3 + $0x48] sm:$0xff] %v6984_v22 }
 0xa98   : > { %7019 = vst [vmem:[#allocation3 + $0x50] sm:$0xff] %v6985_v40 }
 0xa99   : > { %7020 = vst [vmem:[#allocation3 + $0x58] sm:$0xff] %v6986_v52 }
 0xa9a   : > { %7021 = vst [vmem:[#allocation3 + $0x60] sm:$0xff] %v6987_v42 }
 0xa9b   : > { %7022 = vst [vmem:[#allocation3 + $0x68] sm:$0xff] %v6988_v55 }
 0xa9c   : > { %7023 = vst [vmem:[#allocation3 + $0x70] sm:$0xff] %v6989_v4 }
 0xa9d   : > { %7024 = vst [vmem:[#allocation3 + $0x78] sm:$0xff] %v6990_v61 }
 0xa9e   : > { %7025 = vst [vmem:[#allocation3 + $0x80] sm:$0xff] %v6991_v35 }
 0xa9f   : > { %7026 = vst [vmem:[#allocation3 + $0x88] sm:$0xff] %v6992_v59 }
 0xaa0 PF: > { %p8573_p2 = scmp.ne.s32.totalorder %s9185_s16, 8 }
 0xaa2   : > { %7062 = sbr.rel (%p8573_p2) target bundleno = 2762 (0xaca), region = 60 }
 0xaa7   : > { %v7063_v36 = vld [vmem:[#allocation9] sm:$0xff]  ;;  %v7064_v60 = vld [vmem:[#allocation9 + $0x8] sm:$0xff]  ;;  %v7065_v37 = vld [vmem:[#allocation9 + $0x10] sm:$0xff] }
 0xaa8   : > { %v15906_v38 = vld [vmem:[#allocation221_spill] sm:$0xff]  ;;  %v7096_v54 = vadd.f32 %v7064_v60, %v13744_v49  ;;  %v7066_v62 = vld [vmem:[#allocation9 + $0x18] sm:$0xff]  ;;  %v7068_v31 = vld [vmem:[#allocation9 + $0x28] sm:$0xff] }
 0xaa9   : > { %v7095_v15 = vadd.f32 %v7063_v36, %v15906_v38  ;;  %v15907_v11 = vld [vmem:[#allocation113_spill] sm:$0xff]  ;;  %v7098_v9 = vadd.f32 %v7066_v62, %v13748_v17  ;;  %v7069_v56 = vld [vmem:[#allocation9 + $0x30] sm:$0xff]  ;;  %v7070_v53 = vld [vmem:[#allocation9 + $0x38] sm:$0xff] }
 0xaaa   : > { %v7097_v41 = vadd.f32 %v7065_v37, %v15907_v11  ;;  %v7067_v0 = vld [vmem:[#allocation9 + $0x20] sm:$0xff]  ;;  %v15908_v7 = vld [vmem:[#allocation115_spill] sm:$0xff]  ;;  %7128 = vst [vmem:[#allocation12 + $0x8] sm:$0xff] %v7096_v54  ;;  %v15909_v18 = vld [vmem:[#allocation136_spill] sm:$0xff] }
 0xaab   : > { %7127 = vst [vmem:[#allocation12] sm:$0xff] %v7095_v15  ;;  %v7099_v16 = vadd.f32 %v7067_v0, %v15908_v7  ;;  %v7100_v32 = vadd.f32 %v7068_v31, %v15909_v18  ;;  %v7071_v29 = vld [vmem:[#allocation9 + $0x40] sm:$0xff]  ;;  %v15910_v25 = vld [vmem:[#allocation114_spill] sm:$0xff]  ;;  %v7073_v20 = vld [vmem:[#allocation9 + $0x50] sm:$0xff] }
 0xaac   : > { %7129 = vst [vmem:[#allocation12 + $0x10] sm:$0xff] %v7097_v41  ;;  %v7101_v5 = vadd.f32 %v7069_v56, %v15910_v25  ;;  %v7072_v49 = vld [vmem:[#allocation9 + $0x48] sm:$0xff]  ;;  %v15911_v48 = vld [vmem:[#allocation137_spill] sm:$0xff]  ;;  %v15912_v27 = vld [vmem:[#allocation116_spill] sm:$0xff] }
 0xaad   : > { %7130 = vst [vmem:[#allocation12 + $0x18] sm:$0xff] %v7098_v9  ;;  %v7102_v2 = vadd.f32 %v7070_v53, %v15911_v48  ;;  %v7103_v17 = vadd.f32 %v7071_v29, %v15912_v27  ;;  %v7074_v23 = vld [vmem:[#allocation9 + $0x58] sm:$0xff]  ;;  %v15913_v3 = vld [vmem:[#allocation139_spill] sm:$0xff]  ;;  %v7075_v12 = vld [vmem:[#allocation9 + $0x60] sm:$0xff] }
 0xaae   : > { %7131 = vst [vmem:[#allocation12 + $0x20] sm:$0xff] %v7099_v16  ;;  %v7104_v58 = vadd.f32 %v7072_v49, %v15913_v3  ;;  %v15914_v24 = vld [vmem:[#allocation119_spill] sm:$0xff]  ;;  %v7076_v45 = vld [vmem:[#allocation9 + $0x68] sm:$0xff]  ;;  %v15916_v26 = vld [vmem:[#allocation121_spill] sm:$0xff] }
 0xaaf   : > { %7132 = vst [vmem:[#allocation12 + $0x28] sm:$0xff] %v7100_v32  ;;  %v7105_v22 = vadd.f32 %v7073_v20, %v15914_v24  ;;  %v15915_v43 = vld [vmem:[#allocation138_spill] sm:$0xff]  ;;  %v7077_v14 = vld [vmem:[#allocation9 + $0x70] sm:$0xff]  ;;  %v7107_v50 = vadd.f32 %v7075_v12, %v15916_v26  ;;  %v7078_v30 = vld [vmem:[#allocation9 + $0x78] sm:$0xff] }
 0xab0   : > { %7133 = vst [vmem:[#allocation12 + $0x30] sm:$0xff] %v7101_v5  ;;  %v7106_v13 = vadd.f32 %v7074_v23, %v15915_v43  ;;  %v15917_v1 = vld [vmem:[#allocation140_spill] sm:$0xff]  ;;  %v7079_v47 = vld [vmem:[#allocation9 + $0x80] sm:$0xff]  ;;  %v7080_v10 = vld [vmem:[#allocation9 + $0x88] sm:$0xff] }
 0xab1   : > { %7134 = vst [vmem:[#allocation12 + $0x38] sm:$0xff] %v7102_v2  ;;  %v7108_v51 = vadd.f32 %v7076_v45, %v15917_v1  ;;  %v15918_v33 = vld [vmem:[#allocation120_spill] sm:$0xff]  ;;  %v15919_v44 = vld [vmem:[#allocation141_spill] sm:$0xff]  ;;  %v7081_v40 = vld [vmem:[#allocation9 + $0x90] sm:$0xff] }
 0xab2   : > { %7135 = vst [vmem:[#allocation12 + $0x40] sm:$0xff] %v7103_v17  ;;  %v7109_v39 = vadd.f32 %v7077_v14, %v15918_v33  ;;  %v7110_v6 = vadd.f32 %v7078_v30, %v15919_v44  ;;  %v15920_v8 = vld [vmem:[#allocation122_spill] sm:$0xff]  ;;  %v7082_v52 = vld [vmem:[#allocation9 + $0x98] sm:$0xff]  ;;  %v15921_v57 = vld [vmem:[#allocation143_spill] sm:$0xff] }
 0xab3   : > { %7136 = vst [vmem:[#allocation12 + $0x48] sm:$0xff] %v7104_v58  ;;  %v7111_v34 = vadd.f32 %v7079_v47, %v15920_v8  ;;  %v7112_v28 = vadd.f32 %v7080_v10, %v15921_v57  ;;  %v7083_v42 = vld [vmem:[#allocation9 + $0xa0] sm:$0xff]  ;;  %v15922_v63 = vld [vmem:[#allocation127_spill] sm:$0xff]  ;;  %v7084_v55 = vld [vmem:[#allocation9 + $0xa8] sm:$0xff] }
 0xab4   : > { %7137 = vst [vmem:[#allocation12 + $0x50] sm:$0xff] %v7105_v22  ;;  %v7113_v19 = vadd.f32 %v7081_v40, %v15922_v63  ;;  %v15923_v46 = vld [vmem:[#allocation142_spill] sm:$0xff]  ;;  %v7085_v4 = vld [vmem:[#allocation9 + $0xb0] sm:$0xff]  ;;  %v15924_v61 = vld [vmem:[#allocation129_spill] sm:$0xff] }
 0xab5   : > { %7138 = vst [vmem:[#allocation12 + $0x58] sm:$0xff] %v7106_v13  ;;  %v7114_v21 = vadd.f32 %v7082_v52, %v15923_v46  ;;  %v7115_v35 = vadd.f32 %v7083_v42, %v15924_v61  ;;  %v7086_v59 = vld [vmem:[#allocation9 + $0xb8] sm:$0xff]  ;;  %v7087_v37 = vld [vmem:[#allocation9 + $0xc0] sm:$0xff]  ;;  %v7088_v54 = vld [vmem:[#allocation9 + $0xc8] sm:$0xff] }
 0xab6   : > { %7139 = vst [vmem:[#allocation12 + $0x60] sm:$0xff] %v7107_v50  ;;  %v15925_v36 = vld [vmem:[#allocation144_spill] sm:$0xff]  ;;  %v15927_v11 = vld [vmem:[#allocation147_spill] sm:$0xff]  ;;  %v15928_v0 = vld [vmem:[#allocation130_spill] sm:$0xff] }
 0xab7   : > { %7140 = vst [vmem:[#allocation12 + $0x68] sm:$0xff] %v7108_v51  ;;  %v7116_v60 = vadd.f32 %v7084_v55, %v15925_v36  ;;  %v15926_v38 = vld [vmem:[#allocation128_spill] sm:$0xff]  ;;  %v7118_v41 = vadd.f32 %v7086_v59, %v15927_v11  ;;  %v7089_v62 = vld [vmem:[#allocation9 + $0xd0] sm:$0xff]  ;;  %v7119_v31 = vadd.f32 %v7087_v37, %v15928_v0  ;;  %v15929_v56 = vld [vmem:[#allocation149_spill] sm:$0xff] }
 0xab8   : > { %7141 = vst [vmem:[#allocation12 + $0x70] sm:$0xff] %v7109_v39  ;;  %v7117_v15 = vadd.f32 %v7085_v4, %v15926_v38  ;;  %v7090_v9 = vld [vmem:[#allocation9 + $0xd8] sm:$0xff]  ;;  %v7120_v7 = vadd.f32 %v7088_v54, %v15929_v56  ;;  %v7091_v16 = vld [vmem:[#allocation9 + $0xe0] sm:$0xff]  ;;  %v7092_v32 = vld [vmem:[#allocation9 + $0xe8] sm:$0xff] }
 0xab9   : > { %7142 = vst [vmem:[#allocation12 + $0x78] sm:$0xff] %v7110_v6  ;;  %v15930_v53 = vld [vmem:[#allocation133_spill] sm:$0xff]  ;;  %v15931_v29 = vld [vmem:[#allocation148_spill] sm:$0xff]  ;;  %v7093_v5 = vld [vmem:[#allocation9 + $0xf0] sm:$0xff] }
 0xaba   : > { %7143 = vst [vmem:[#allocation12 + $0x80] sm:$0xff] %v7111_v34  ;;  %v7121_v18 = vadd.f32 %v7089_v62, %v15930_v53  ;;  %v7122_v25 = vadd.f32 %v7090_v9, %v15931_v29  ;;  %v15932_v49 = vld [vmem:[#allocation135_spill] sm:$0xff]  ;;  %v7094_v2 = vld [vmem:[#allocation9 + $0xf8] sm:$0xff]  ;;  %v15933_v20 = vld [vmem:[#allocation150_spill] sm:$0xff] }
 0xabb   : > { %7144 = vst [vmem:[#allocation12 + $0x88] sm:$0xff] %v7112_v28  ;;  %v7123_v48 = vadd.f32 %v7091_v16, %v15932_v49  ;;  %v7124_v27 = vadd.f32 %v7092_v32, %v15933_v20  ;;  %v15934_v17 = vld [vmem:[#allocation134_spill] sm:$0xff]  ;;  %v15935_v3 = vld [vmem:[#allocation153_spill] sm:$0xff] }
 0xabc   : > { %7145 = vst [vmem:[#allocation12 + $0x90] sm:$0xff] %v7113_v19  ;;  %v7125_v23 = vadd.f32 %v7093_v5, %v15934_v17  ;;  %v7126_v58 = vadd.f32 %v7094_v2, %v15935_v3 }
 0xabd   : > { %7146 = vst [vmem:[#allocation12 + $0x98] sm:$0xff] %v7114_v21 }
 0xabe   : > { %7147 = vst [vmem:[#allocation12 + $0xa0] sm:$0xff] %v7115_v35 }
 0xabf   : > { %7148 = vst [vmem:[#allocation12 + $0xa8] sm:$0xff] %v7116_v60 }
 0xac0   : > { %7149 = vst [vmem:[#allocation12 + $0xb0] sm:$0xff] %v7117_v15 }
 0xac1   : > { %7150 = vst [vmem:[#allocation12 + $0xb8] sm:$0xff] %v7118_v41 }
 0xac2   : > { %7151 = vst [vmem:[#allocation12 + $0xc0] sm:$0xff] %v7119_v31 }
 0xac3   : > { %7152 = vst [vmem:[#allocation12 + $0xc8] sm:$0xff] %v7120_v7 }
 0xac4   : > { %7153 = vst [vmem:[#allocation12 + $0xd0] sm:$0xff] %v7121_v18 }
 0xac5   : > { %7154 = vst [vmem:[#allocation12 + $0xd8] sm:$0xff] %v7122_v25 }
 0xac6   : > { %7155 = vst [vmem:[#allocation12 + $0xe0] sm:$0xff] %v7123_v48 }
 0xac7   : > { %7156 = vst [vmem:[#allocation12 + $0xe8] sm:$0xff] %v7124_v27 }
 0xac8   : > { %7157 = vst [vmem:[#allocation12 + $0xf0] sm:$0xff] %v7125_v23 }
 0xac9   : > { %7158 = vst [vmem:[#allocation12 + $0xf8] sm:$0xff] %v7126_v58 }
 0xaca PF: > { %p8939_p3 = scmp.eq.s32.totalorder %s9185_s16, 8  ;;  %s9143_s25 = smov [#allocation12]  }
 0xacb   : > { %s7164_s27 = sshll.u32 %s9143_s25, 4  ;;  %s7166_s15 = sshll.u32 %s14239_s3, 4  ;;  %s7165_s27 = int_to_ptr.vmem [resolvable:$true] %s7164_s27  ;;  %s7167_s15 = int_to_ptr.hbm [resolvable:$true] %s7166_s15 }
 0xacc   : > { %s9144_s29 = smov 256   ;;  %s9145_s4 = smov 16  }
 0xacd   : > { %8920 = dma.vmem_to_hbm [thread:$0]  (%p8939_p3), %s7165_s27, 4096, %s7167_s15, [#allocation7], %s9144_s29, %s9144_s29, %s9145_s4  }
 0xace   : > { %9116 = dma.done.wait (%p8939_p3), [#allocation7], 4096  }
 0xacf   : > { %9118 = vsyncadd (%p8939_p3), [#allocation7], 4294963200 }
 0xad0 PF: > { %p16_p4 = scmp.ge.s32.totalorder %s9188_s17, 11   ;;  %s15936_s12 = smov %s9125_s13 }
 0xad1   : > { %s15937_s13 = smov %s9129_s14  ;;  %s15938_s14 = smov %s9198_s20 }
 0xad2   : > { %s15939_s15 = smov %s9188_s17  ;;  %18 = sbr.rel (!%p16_p4) target bundleno = 6 (0x6), region = 103 }
 0xad7   :  { %7183 = vsyncpa [#allocation6], 1 }
 0xad8   :  { %7185 = vsyncpa [#allocation6 + $0x1], 1 }
 0xad9   :  { %7186 = vsyncpa [#allocation11], 1 }
 0xada   :  { %7188 = vsyncpa [#allocation11 + $0x1], 1 }
 0xadb   :  { %7189 = vsyncpa [#allocation7], 1 }
 0xadc   :  { %7191 = vsyncpa [#allocation7 + $0x1], 1 }
 0xadd   :  { %7192 = vsyncpa [#allocation8], 1 }
 0xade   :  { %7194 = vsyncpa [#allocation8 + $0x1], 1 }

</bundles_post_ra>
